<compile_context>
chip_gen: v6e
topology: v6e:2x2x1
jax: 0.10.0
libtpu: 0.0.40
codegen_flags: <defaults>
</compile_context>

<pallas_src>
import numpy as np
import jax
import jax.numpy as jnp
from jax.experimental import pallas as pl
from jax.experimental.pallas import tpu as pltpu


# ---------------------------------------------------------------------------
# Kernel (fused: pool -> conv+BN+ReLU -> fc1+ReLU -> fc2)
# ---------------------------------------------------------------------------
def inception_aux_kernel(x_ref, pmatT_ref, wcT_ref, shift_ref,
                         w1_ref, b1_ref, w2_ref, b2_ref, o_ref):
    B, C, HW = x_ref.shape            # sample block, in-channels, H*W
    P = pmatT_ref.shape[0]            # 16 pooled pixels
    K = wcT_ref.shape[1]              # 128 conv output channels

    # --- adaptive avg pool: contract H*W (last dim of both operands) -------
    pmat_b = jnp.broadcast_to(pmatT_ref[...], (B, P, HW))
    pooled = jnp.einsum("bph,bch->bpc", pmat_b, x_ref[...],
                        preferred_element_type=jnp.float32)      # (B, P, C)

    # --- 1x1 conv (BatchNorm folded) + ReLU, lane-dense over 128 channels --
    feat = jnp.dot(pooled.reshape(B * P, C), wcT_ref[...],
                   preferred_element_type=jnp.float32)           # (B*P, 128)
    feat = jnp.maximum(feat + shift_ref[...], 0.0)
    feat = feat.reshape(B, P, K).astype(jnp.bfloat16)

    # --- fc1 + ReLU: flatten fused as a sum of per-pixel matmuls -----------
    # fc1 weight rows were pre-permuted so row p*128+c matches feat[:, p, c].
    # TODO(synk): Dropout(p=0.7) omitted (eval-mode identity).
    h = jnp.dot(feat[:, 0, :], w1_ref[0:K, :],
                preferred_element_type=jnp.float32)
    for p in range(1, P):             # static unroll: 16 MXU matmuls
        h = h + jnp.dot(feat[:, p, :], w1_ref[p * K:(p + 1) * K, :],
                        preferred_element_type=jnp.float32)
    h = jnp.maximum(h + b1_ref[...], 0.0).astype(jnp.bfloat16)   # (B, 1024)

    # --- fc2: lane-dense output (classes padded to multiple of 128) --------
    o_ref[...] = jnp.dot(h, w2_ref[...],
                         preferred_element_type=jnp.float32) + b2_ref[...]


# ---------------------------------------------------------------------------
# Host-side prep (done ONCE, not per forward)
# ---------------------------------------------------------------------------
def adaptive_avg_pool_matrix_t(H, W, oh=4, ow=4):
    """(oh*ow, H*W) matrix with F.adaptive_avg_pool2d bin semantics."""
    P = np.zeros((oh * ow, H * W), dtype=np.float32)
    for i in range(oh):
        hs, he = (i * H) // oh, -((-(i + 1) * H) // oh)
        for j in range(ow):
            ws, we = (j * W) // ow, -((-(j + 1) * W) // ow)
            cnt = (he - hs) * (we - ws)
            for h in range(hs, he):
                for w in range(ws, we):
                    P[i * ow + j, h * W + w] = 1.0 / cnt
    return jnp.asarray(P)


def prepare_inception_aux_params(params, eps=1e-3):
    """Fold BN into the conv, permute/transpose/cast fc weights (one time)."""
    conv_w = params["conv_w"].reshape(128, -1).astype(jnp.float32)    # (128,C)
    inv_std = 1.0 / jnp.sqrt(params["bn_var"].astype(jnp.float32) + eps)
    scale = params["bn_gamma"] * inv_std                              # (128,)
    shift = params["bn_beta"] - params["bn_mean"] * scale             # (128,)
    wcT = (conv_w * scale[:, None]).T                                 # (C,128)

    # fc1: permute input rows from PyTorch flatten order (c*16 + p) to the
    # kernel's lane-dense order (p*128 + c); transpose; cast to bf16.
    q = jnp.arange(2048)
    perm = (q % 128) * 16 + (q // 128)
    w1 = params["fc1_w"].T[perm, :].astype(jnp.bfloat16)              # (2048,1024)
    b1 = params["fc1_b"].reshape(1, -1).astype(jnp.float32)

    # fc2: transpose, pad classes up to a multiple of 128 (lane-dense output).
    num_classes, hidden = params["fc2_w"].shape
    nc_pad = ((num_classes + 127) // 128) * 128
    w2 = jnp.zeros((hidden, nc_pad), jnp.bfloat16)
    w2 = w2.at[:, :num_classes].set(params["fc2_w"].T.astype(jnp.bfloat16))
    b2 = jnp.zeros((1, nc_pad), jnp.float32)
    b2 = b2.at[:, :num_classes].set(params["fc2_b"].astype(jnp.float32))

    return {"wcT": wcT.astype(jnp.float32),
            "shift": shift.reshape(1, 128).astype(jnp.float32),
            "w1": w1, "b1": b1, "w2": w2, "b2": b2,
            "num_classes": int(num_classes)}


# ---------------------------------------------------------------------------
# Forward
# ---------------------------------------------------------------------------
def inception_aux_forward(x, prep):
    N, C, H, W = x.shape
    HW = H * W
    P, K = 16, 128
    hidden = prep["w1"].shape[1]
    nc_pad = prep["w2"].shape[1]
    num_classes = prep["num_classes"]

    pmatT = adaptive_avg_pool_matrix_t(H, W, 4, 4)        # (16, H*W) host const

    # Fixed 8 samples per grid step: sublane-aligned output blocks, grid
    # shards across TensorCores ("parallel") when N is large; VMEM stays well
    # under the 32 MiB limit even at the real GoogLeNet aux size (C=528).
    B = 8
    G = -(-N // B)
    N_pad = G * B

    x3 = x.reshape(N, C, HW).astype(jnp.float32)
    if N_pad != N:
        x3 = jnp.pad(x3, ((0, N_pad - N), (0, 0), (0, 0)))

    out = pl.pallas_call(
        inception_aux_kernel,
        out_shape=jax.ShapeDtypeStruct((N_pad, nc_pad), jnp.float32),
        grid=(G,),
        in_specs=[
            pl.BlockSpec((B, C, HW), lambda i: (i, 0, 0)),      # x block (per step)
            pl.BlockSpec((P, HW), lambda i: (0, 0)),            # pooling matrix
            pl.BlockSpec((C, K), lambda i: (0, 0)),             # folded conv w
            pl.BlockSpec((1, K), lambda i: (0, 0)),             # folded conv bias
            pl.BlockSpec((P * K, hidden), lambda i: (0, 0)),    # fc1 w (resident)
            pl.BlockSpec((1, hidden), lambda i: (0, 0)),        # fc1 b
            pl.BlockSpec((hidden, nc_pad), lambda i: (0, 0)),   # fc2 w (resident)
            pl.BlockSpec((1, nc_pad), lambda i: (0, 0)),        # fc2 b
        ],
        out_specs=pl.BlockSpec((B, nc_pad), lambda i: (i, 0)),
        compiler_params=pltpu.CompilerParams(
            dimension_semantics=("parallel",),
            vmem_limit_bytes=32 << 20),
    )(x3, pmatT, prep["wcT"], prep["shift"],
      prep["w1"], prep["b1"], prep["w2"], prep["b2"])

    return out[:N, :num_classes]


# ---------------------------------------------------------------------------
# Pure-JAX reference (general adaptive pooling, f32)
# ---------------------------------------------------------------------------
def reference_forward(x, params, eps=1e-3):
    N, C, H, W = x.shape
    oh = ow = 4
    rows = []
    for i in range(oh):
        hs, he = (i * H) // oh, -((-(i + 1) * H) // oh)
        cols = []
        for j in range(ow):
            ws, we = (j * W) // ow, -((-(j + 1) * W) // ow)
            cols.append(x[:, :, hs:he, ws:we].mean(axis=(2, 3)))
        rows.append(jnp.stack(cols, axis=-1))
    pooled = jnp.stack(rows, axis=-2)                             # (N,C,4,4)
    conv = jnp.einsum("kc,ncij->nkij", params["conv_w"].reshape(128, C), pooled)
    inv_std = 1.0 / jnp.sqrt(params["bn_var"] + eps)
    bn = (conv - params["bn_mean"][None, :, None, None]) * \
         (params["bn_gamma"] * inv_std)[None, :, None, None] + \
         params["bn_beta"][None, :, None, None]
    flat = jnp.maximum(bn, 0.0).reshape(N, 2048)
    h = jnp.maximum(flat @ params["fc1_w"].T + params["fc1_b"], 0.0)
    return h @ params["fc2_w"].T + params["fc2_b"]


# ---------------------------------------------------------------------------
if __name__ == "__main__":
    N, C, H, W = 4, 32, 14, 14          # 14x14 = real GoogLeNet aux spatial size
    num_classes = 10

    key = jax.random.PRNGKey(0)
    ks = jax.random.split(key, 10)
    params = {
        "conv_w":   0.05 * jax.random.normal(ks[0], (128, C, 1, 1), jnp.float32),
        "bn_gamma": 1.0 + 0.1 * jax.random.normal(ks[1], (128,), jnp.float32),
        "bn_beta":  0.1 * jax.random.normal(ks[2], (128,), jnp.float32),
        "bn_mean":  0.1 * jax.random.normal(ks[3], (128,), jnp.float32),
        "bn_var":   0.5 + 0.5 * jnp.abs(jax.random.normal(ks[4], (128,), jnp.float32)),
        "fc1_w":    0.02 * jax.random.normal(ks[5], (1024, 2048), jnp.float32),
        "fc1_b":    0.02 * jax.random.normal(ks[6], (1024,), jnp.float32),
        "fc2_w":    0.02 * jax.random.normal(ks[7], (num_classes, 1024), jnp.float32),
        "fc2_b":    0.02 * jax.random.normal(ks[8], (num_classes,), jnp.float32),
    }
    x = jax.random.normal(ks[9], (N, C, H, W), jnp.float32)

    prep = prepare_inception_aux_params(params)         # one-time weight prep
    out = inception_aux_forward(x, prep)
    out = jax.block_until_ready(out)

    ref = reference_forward(x, params)
    assert out.shape == (N, num_classes)
    assert jnp.allclose(out, ref, rtol=2e-2, atol=2e-2), "mismatch vs reference"

    print("KERNEL_OK")
</pallas_src>

<mosaic_0001>
module attributes {stable_mosaic.version = 11 : i64} {
  func.func @inception_aux_kernel(%arg0: i32, %arg1: memref<8x32x196xf32, #tpu.memory_space<vmem>>, %arg2: memref<16x196xf32, #tpu.memory_space<vmem>>, %arg3: memref<32x128xf32, #tpu.memory_space<vmem>>, %arg4: memref<1x128xf32, #tpu.memory_space<vmem>>, %arg5: memref<2048x1024xbf16, #tpu.memory_space<vmem>>, %arg6: memref<1x1024xf32, #tpu.memory_space<vmem>>, %arg7: memref<1024x128xbf16, #tpu.memory_space<vmem>>, %arg8: memref<1x128xf32, #tpu.memory_space<vmem>>, %arg9: memref<8x128xf32, #tpu.memory_space<vmem>>) attributes {dimension_semantics = [#tpu.dimension_semantics<parallel>], iteration_bounds = array<i64: 1>, scalar_prefetch = 0 : i64, scratch_operands = 0 : i64, tpu.core_type = #tpu.core_type<tc>, window_params = [{transform_indices = @transform_0, window_bounds = array<i64: 8, 32, 196>}, {pipeline_mode = #tpu.pipeline_mode<synchronous>, transform_indices = @transform_1, window_bounds = array<i64: 16, 196>}, {pipeline_mode = #tpu.pipeline_mode<synchronous>, transform_indices = @transform_2, window_bounds = array<i64: 32, 128>}, {pipeline_mode = #tpu.pipeline_mode<synchronous>, transform_indices = @transform_3, window_bounds = array<i64: 1, 128>}, {pipeline_mode = #tpu.pipeline_mode<synchronous>, transform_indices = @transform_4, window_bounds = array<i64: 2048, 1024>}, {pipeline_mode = #tpu.pipeline_mode<synchronous>, transform_indices = @transform_5, window_bounds = array<i64: 1, 1024>}, {pipeline_mode = #tpu.pipeline_mode<synchronous>, transform_indices = @transform_6, window_bounds = array<i64: 1024, 128>}, {pipeline_mode = #tpu.pipeline_mode<synchronous>, transform_indices = @transform_7, window_bounds = array<i64: 1, 128>}, {transform_indices = @transform_8, window_bounds = array<i64: 8, 128>}]} {
    %c0 = arith.constant 0 : index
    %c0_0 = arith.constant 0 : index
    %0 = vector.load %arg2[%c0, %c0_0] : memref<16x196xf32, #tpu.memory_space<vmem>>, vector<16x196xf32>
    %1 = vector.shape_cast %0 : vector<16x196xf32> to vector<1x16x196xf32>
    %2 = vector.broadcast %1 : vector<1x16x196xf32> to vector<8x16x196xf32>
    %c0_1 = arith.constant 0 : index
    %c0_2 = arith.constant 0 : index
    %c0_3 = arith.constant 0 : index
    %3 = vector.load %arg1[%c0_1, %c0_2, %c0_3] : memref<8x32x196xf32, #tpu.memory_space<vmem>>, vector<8x32x196xf32>
    "tpu.trace_start"() <{level = 10 : i32, message = "bph,bch->bpc"}> : () -> ()
    %cst = arith.constant dense<0.000000e+00> : vector<8x16x32xf32>
    %4 = tpu.matmul %2, %3, %cst {dimension_numbers = #tpu.dot_dimension_numbers<[2], [2], [1], [1], [0, 0, 0, 1, 1, 1], [0], [0]>} : vector<8x16x196xf32>, vector<8x32x196xf32>, vector<8x16x32xf32> -> vector<8x16x32xf32>
    "tpu.trace_stop"() : () -> ()
    %5 = vector.shape_cast %4 : vector<8x16x32xf32> to vector<128x32xf32>
    %c0_4 = arith.constant 0 : index
    %c0_5 = arith.constant 0 : index
    %6 = vector.load %arg3[%c0_4, %c0_5] : memref<32x128xf32, #tpu.memory_space<vmem>>, vector<32x128xf32>
    %cst_6 = arith.constant dense<0.000000e+00> : vector<128x128xf32>
    %7 = tpu.matmul %5, %6, %cst_6 {dimension_numbers = #tpu.dot_dimension_numbers<[1], [0], [0], [1], [0, 0, 1, 1], [], []>} : vector<128x32xf32>, vector<32x128xf32>, vector<128x128xf32> -> vector<128x128xf32>
    %c0_7 = arith.constant 0 : index
    %c0_8 = arith.constant 0 : index
    %8 = vector.load %arg4[%c0_7, %c0_8] : memref<1x128xf32, #tpu.memory_space<vmem>>, vector<1x128xf32>
    %9 = vector.broadcast %8 : vector<1x128xf32> to vector<128x128xf32>
    %10 = arith.addf %7, %9 : vector<128x128xf32>
    %cst_9 = arith.constant 0.000000e+00 : f32
    %11 = vector.broadcast %cst_9 : f32 to vector<128x128xf32>
    %12 = arith.maximumf %10, %11 : vector<128x128xf32>
    %13 = vector.shape_cast %12 : vector<128x128xf32> to vector<8x16x128xf32>
    %14 = arith.truncf %13 : vector<8x16x128xf32> to vector<8x16x128xbf16>
    %15 = vector.extract_strided_slice %14 {offsets = [0, 0, 0], sizes = [8, 1, 128], strides = [1, 1, 1]} : vector<8x16x128xbf16> to vector<8x1x128xbf16>
    %16 = vector.shape_cast %15 : vector<8x1x128xbf16> to vector<8x128xbf16>
    %c0_10 = arith.constant 0 : index
    %c0_11 = arith.constant 0 : index
    %17 = vector.load %arg5[%c0_10, %c0_11] : memref<2048x1024xbf16, #tpu.memory_space<vmem>>, vector<128x1024xbf16>
    %cst_12 = arith.constant dense<0.000000e+00> : vector<8x1024xf32>
    %18 = tpu.matmul %16, %17, %cst_12 {dimension_numbers = #tpu.dot_dimension_numbers<[1], [0], [0], [1], [0, 0, 1, 1], [], []>} : vector<8x128xbf16>, vector<128x1024xbf16>, vector<8x1024xf32> -> vector<8x1024xf32>
    %19 = vector.extract_strided_slice %14 {offsets = [0, 1, 0], sizes = [8, 1, 128], strides = [1, 1, 1]} : vector<8x16x128xbf16> to vector<8x1x128xbf16>
    %20 = vector.shape_cast %19 : vector<8x1x128xbf16> to vector<8x128xbf16>
    %c128 = arith.constant 128 : index
    %c0_13 = arith.constant 0 : index
    %21 = vector.load %arg5[%c128, %c0_13] : memref<2048x1024xbf16, #tpu.memory_space<vmem>>, vector<128x1024xbf16>
    %cst_14 = arith.constant dense<0.000000e+00> : vector<8x1024xf32>
    %22 = tpu.matmul %20, %21, %cst_14 {dimension_numbers = #tpu.dot_dimension_numbers<[1], [0], [0], [1], [0, 0, 1, 1], [], []>} : vector<8x128xbf16>, vector<128x1024xbf16>, vector<8x1024xf32> -> vector<8x1024xf32>
    %23 = arith.addf %18, %22 : vector<8x1024xf32>
    %24 = vector.extract_strided_slice %14 {offsets = [0, 2, 0], sizes = [8, 1, 128], strides = [1, 1, 1]} : vector<8x16x128xbf16> to vector<8x1x128xbf16>
    %25 = vector.shape_cast %24 : vector<8x1x128xbf16> to vector<8x128xbf16>
    %c256 = arith.constant 256 : index
    %c0_15 = arith.constant 0 : index
    %26 = vector.load %arg5[%c256, %c0_15] : memref<2048x1024xbf16, #tpu.memory_space<vmem>>, vector<128x1024xbf16>
    %cst_16 = arith.constant dense<0.000000e+00> : vector<8x1024xf32>
    %27 = tpu.matmul %25, %26, %cst_16 {dimension_numbers = #tpu.dot_dimension_numbers<[1], [0], [0], [1], [0, 0, 1, 1], [], []>} : vector<8x128xbf16>, vector<128x1024xbf16>, vector<8x1024xf32> -> vector<8x1024xf32>
    %28 = arith.addf %23, %27 : vector<8x1024xf32>
    %29 = vector.extract_strided_slice %14 {offsets = [0, 3, 0], sizes = [8, 1, 128], strides = [1, 1, 1]} : vector<8x16x128xbf16> to vector<8x1x128xbf16>
    %30 = vector.shape_cast %29 : vector<8x1x128xbf16> to vector<8x128xbf16>
    %c384 = arith.constant 384 : index
    %c0_17 = arith.constant 0 : index
    %31 = vector.load %arg5[%c384, %c0_17] : memref<2048x1024xbf16, #tpu.memory_space<vmem>>, vector<128x1024xbf16>
    %cst_18 = arith.constant dense<0.000000e+00> : vector<8x1024xf32>
    %32 = tpu.matmul %30, %31, %cst_18 {dimension_numbers = #tpu.dot_dimension_numbers<[1], [0], [0], [1], [0, 0, 1, 1], [], []>} : vector<8x128xbf16>, vector<128x1024xbf16>, vector<8x1024xf32> -> vector<8x1024xf32>
    %33 = arith.addf %28, %32 : vector<8x1024xf32>
    %34 = vector.extract_strided_slice %14 {offsets = [0, 4, 0], sizes = [8, 1, 128], strides = [1, 1, 1]} : vector<8x16x128xbf16> to vector<8x1x128xbf16>
    %35 = vector.shape_cast %34 : vector<8x1x128xbf16> to vector<8x128xbf16>
    %c512 = arith.constant 512 : index
    %c0_19 = arith.constant 0 : index
    %36 = vector.load %arg5[%c512, %c0_19] : memref<2048x1024xbf16, #tpu.memory_space<vmem>>, vector<128x1024xbf16>
    %cst_20 = arith.constant dense<0.000000e+00> : vector<8x1024xf32>
    %37 = tpu.matmul %35, %36, %cst_20 {dimension_numbers = #tpu.dot_dimension_numbers<[1], [0], [0], [1], [0, 0, 1, 1], [], []>} : vector<8x128xbf16>, vector<128x1024xbf16>, vector<8x1024xf32> -> vector<8x1024xf32>
    %38 = arith.addf %33, %37 : vector<8x1024xf32>
    %39 = vector.extract_strided_slice %14 {offsets = [0, 5, 0], sizes = [8, 1, 128], strides = [1, 1, 1]} : vector<8x16x128xbf16> to vector<8x1x128xbf16>
    %40 = vector.shape_cast %39 : vector<8x1x128xbf16> to vector<8x128xbf16>
    %c640 = arith.constant 640 : index
    %c0_21 = arith.constant 0 : index
    %41 = vector.load %arg5[%c640, %c0_21] : memref<2048x1024xbf16, #tpu.memory_space<vmem>>, vector<128x1024xbf16>
    %cst_22 = arith.constant dense<0.000000e+00> : vector<8x1024xf32>
    %42 = tpu.matmul %40, %41, %cst_22 {dimension_numbers = #tpu.dot_dimension_numbers<[1], [0], [0], [1], [0, 0, 1, 1], [], []>} : vector<8x128xbf16>, vector<128x1024xbf16>, vector<8x1024xf32> -> vector<8x1024xf32>
    %43 = arith.addf %38, %42 : vector<8x1024xf32>
    %44 = vector.extract_strided_slice %14 {offsets = [0, 6, 0], sizes = [8, 1, 128], strides = [1, 1, 1]} : vector<8x16x128xbf16> to vector<8x1x128xbf16>
    %45 = vector.shape_cast %44 : vector<8x1x128xbf16> to vector<8x128xbf16>
    %c768 = arith.constant 768 : index
    %c0_23 = arith.constant 0 : index
    %46 = vector.load %arg5[%c768, %c0_23] : memref<2048x1024xbf16, #tpu.memory_space<vmem>>, vector<128x1024xbf16>
    %cst_24 = arith.constant dense<0.000000e+00> : vector<8x1024xf32>
    %47 = tpu.matmul %45, %46, %cst_24 {dimension_numbers = #tpu.dot_dimension_numbers<[1], [0], [0], [1], [0, 0, 1, 1], [], []>} : vector<8x128xbf16>, vector<128x1024xbf16>, vector<8x1024xf32> -> vector<8x1024xf32>
    %48 = arith.addf %43, %47 : vector<8x1024xf32>
    %49 = vector.extract_strided_slice %14 {offsets = [0, 7, 0], sizes = [8, 1, 128], strides = [1, 1, 1]} : vector<8x16x128xbf16> to vector<8x1x128xbf16>
    %50 = vector.shape_cast %49 : vector<8x1x128xbf16> to vector<8x128xbf16>
    %c896 = arith.constant 896 : index
    %c0_25 = arith.constant 0 : index
    %51 = vector.load %arg5[%c896, %c0_25] : memref<2048x1024xbf16, #tpu.memory_space<vmem>>, vector<128x1024xbf16>
    %cst_26 = arith.constant dense<0.000000e+00> : vector<8x1024xf32>
    %52 = tpu.matmul %50, %51, %cst_26 {dimension_numbers = #tpu.dot_dimension_numbers<[1], [0], [0], [1], [0, 0, 1, 1], [], []>} : vector<8x128xbf16>, vector<128x1024xbf16>, vector<8x1024xf32> -> vector<8x1024xf32>
    %53 = arith.addf %48, %52 : vector<8x1024xf32>
    %54 = vector.extract_strided_slice %14 {offsets = [0, 8, 0], sizes = [8, 1, 128], strides = [1, 1, 1]} : vector<8x16x128xbf16> to vector<8x1x128xbf16>
    %55 = vector.shape_cast %54 : vector<8x1x128xbf16> to vector<8x128xbf16>
    %c1024 = arith.constant 1024 : index
    %c0_27 = arith.constant 0 : index
    %56 = vector.load %arg5[%c1024, %c0_27] : memref<2048x1024xbf16, #tpu.memory_space<vmem>>, vector<128x1024xbf16>
    %cst_28 = arith.constant dense<0.000000e+00> : vector<8x1024xf32>
    %57 = tpu.matmul %55, %56, %cst_28 {dimension_numbers = #tpu.dot_dimension_numbers<[1], [0], [0], [1], [0, 0, 1, 1], [], []>} : vector<8x128xbf16>, vector<128x1024xbf16>, vector<8x1024xf32> -> vector<8x1024xf32>
    %58 = arith.addf %53, %57 : vector<8x1024xf32>
    %59 = vector.extract_strided_slice %14 {offsets = [0, 9, 0], sizes = [8, 1, 128], strides = [1, 1, 1]} : vector<8x16x128xbf16> to vector<8x1x128xbf16>
    %60 = vector.shape_cast %59 : vector<8x1x128xbf16> to vector<8x128xbf16>
    %c1152 = arith.constant 1152 : index
    %c0_29 = arith.constant 0 : index
    %61 = vector.load %arg5[%c1152, %c0_29] : memref<2048x1024xbf16, #tpu.memory_space<vmem>>, vector<128x1024xbf16>
    %cst_30 = arith.constant dense<0.000000e+00> : vector<8x1024xf32>
    %62 = tpu.matmul %60, %61, %cst_30 {dimension_numbers = #tpu.dot_dimension_numbers<[1], [0], [0], [1], [0, 0, 1, 1], [], []>} : vector<8x128xbf16>, vector<128x1024xbf16>, vector<8x1024xf32> -> vector<8x1024xf32>
    %63 = arith.addf %58, %62 : vector<8x1024xf32>
    %64 = vector.extract_strided_slice %14 {offsets = [0, 10, 0], sizes = [8, 1, 128], strides = [1, 1, 1]} : vector<8x16x128xbf16> to vector<8x1x128xbf16>
    %65 = vector.shape_cast %64 : vector<8x1x128xbf16> to vector<8x128xbf16>
    %c1280 = arith.constant 1280 : index
    %c0_31 = arith.constant 0 : index
    %66 = vector.load %arg5[%c1280, %c0_31] : memref<2048x1024xbf16, #tpu.memory_space<vmem>>, vector<128x1024xbf16>
    %cst_32 = arith.constant dense<0.000000e+00> : vector<8x1024xf32>
    %67 = tpu.matmul %65, %66, %cst_32 {dimension_numbers = #tpu.dot_dimension_numbers<[1], [0], [0], [1], [0, 0, 1, 1], [], []>} : vector<8x128xbf16>, vector<128x1024xbf16>, vector<8x1024xf32> -> vector<8x1024xf32>
    %68 = arith.addf %63, %67 : vector<8x1024xf32>
    %69 = vector.extract_strided_slice %14 {offsets = [0, 11, 0], sizes = [8, 1, 128], strides = [1, 1, 1]} : vector<8x16x128xbf16> to vector<8x1x128xbf16>
    %70 = vector.shape_cast %69 : vector<8x1x128xbf16> to vector<8x128xbf16>
    %c1408 = arith.constant 1408 : index
    %c0_33 = arith.constant 0 : index
    %71 = vector.load %arg5[%c1408, %c0_33] : memref<2048x1024xbf16, #tpu.memory_space<vmem>>, vector<128x1024xbf16>
    %cst_34 = arith.constant dense<0.000000e+00> : vector<8x1024xf32>
    %72 = tpu.matmul %70, %71, %cst_34 {dimension_numbers = #tpu.dot_dimension_numbers<[1], [0], [0], [1], [0, 0, 1, 1], [], []>} : vector<8x128xbf16>, vector<128x1024xbf16>, vector<8x1024xf32> -> vector<8x1024xf32>
    %73 = arith.addf %68, %72 : vector<8x1024xf32>
    %74 = vector.extract_strided_slice %14 {offsets = [0, 12, 0], sizes = [8, 1, 128], strides = [1, 1, 1]} : vector<8x16x128xbf16> to vector<8x1x128xbf16>
    %75 = vector.shape_cast %74 : vector<8x1x128xbf16> to vector<8x128xbf16>
    %c1536 = arith.constant 1536 : index
    %c0_35 = arith.constant 0 : index
    %76 = vector.load %arg5[%c1536, %c0_35] : memref<2048x1024xbf16, #tpu.memory_space<vmem>>, vector<128x1024xbf16>
    %cst_36 = arith.constant dense<0.000000e+00> : vector<8x1024xf32>
    %77 = tpu.matmul %75, %76, %cst_36 {dimension_numbers = #tpu.dot_dimension_numbers<[1], [0], [0], [1], [0, 0, 1, 1], [], []>} : vector<8x128xbf16>, vector<128x1024xbf16>, vector<8x1024xf32> -> vector<8x1024xf32>
    %78 = arith.addf %73, %77 : vector<8x1024xf32>
    %79 = vector.extract_strided_slice %14 {offsets = [0, 13, 0], sizes = [8, 1, 128], strides = [1, 1, 1]} : vector<8x16x128xbf16> to vector<8x1x128xbf16>
    %80 = vector.shape_cast %79 : vector<8x1x128xbf16> to vector<8x128xbf16>
    %c1664 = arith.constant 1664 : index
    %c0_37 = arith.constant 0 : index
    %81 = vector.load %arg5[%c1664, %c0_37] : memref<2048x1024xbf16, #tpu.memory_space<vmem>>, vector<128x1024xbf16>
    %cst_38 = arith.constant dense<0.000000e+00> : vector<8x1024xf32>
    %82 = tpu.matmul %80, %81, %cst_38 {dimension_numbers = #tpu.dot_dimension_numbers<[1], [0], [0], [1], [0, 0, 1, 1], [], []>} : vector<8x128xbf16>, vector<128x1024xbf16>, vector<8x1024xf32> -> vector<8x1024xf32>
    %83 = arith.addf %78, %82 : vector<8x1024xf32>
    %84 = vector.extract_strided_slice %14 {offsets = [0, 14, 0], sizes = [8, 1, 128], strides = [1, 1, 1]} : vector<8x16x128xbf16> to vector<8x1x128xbf16>
    %85 = vector.shape_cast %84 : vector<8x1x128xbf16> to vector<8x128xbf16>
    %c1792 = arith.constant 1792 : index
    %c0_39 = arith.constant 0 : index
    %86 = vector.load %arg5[%c1792, %c0_39] : memref<2048x1024xbf16, #tpu.memory_space<vmem>>, vector<128x1024xbf16>
    %cst_40 = arith.constant dense<0.000000e+00> : vector<8x1024xf32>
    %87 = tpu.matmul %85, %86, %cst_40 {dimension_numbers = #tpu.dot_dimension_numbers<[1], [0], [0], [1], [0, 0, 1, 1], [], []>} : vector<8x128xbf16>, vector<128x1024xbf16>, vector<8x1024xf32> -> vector<8x1024xf32>
    %88 = arith.addf %83, %87 : vector<8x1024xf32>
    %89 = vector.extract_strided_slice %14 {offsets = [0, 15, 0], sizes = [8, 1, 128], strides = [1, 1, 1]} : vector<8x16x128xbf16> to vector<8x1x128xbf16>
    %90 = vector.shape_cast %89 : vector<8x1x128xbf16> to vector<8x128xbf16>
    %c1920 = arith.constant 1920 : index
    %c0_41 = arith.constant 0 : index
    %91 = vector.load %arg5[%c1920, %c0_41] : memref<2048x1024xbf16, #tpu.memory_space<vmem>>, vector<128x1024xbf16>
    %cst_42 = arith.constant dense<0.000000e+00> : vector<8x1024xf32>
    %92 = tpu.matmul %90, %91, %cst_42 {dimension_numbers = #tpu.dot_dimension_numbers<[1], [0], [0], [1], [0, 0, 1, 1], [], []>} : vector<8x128xbf16>, vector<128x1024xbf16>, vector<8x1024xf32> -> vector<8x1024xf32>
    %93 = arith.addf %88, %92 : vector<8x1024xf32>
    %c0_43 = arith.constant 0 : index
    %c0_44 = arith.constant 0 : index
    %94 = vector.load %arg6[%c0_43, %c0_44] : memref<1x1024xf32, #tpu.memory_space<vmem>>, vector<1x1024xf32>
    %95 = vector.broadcast %94 : vector<1x1024xf32> to vector<8x1024xf32>
    %96 = arith.addf %93, %95 : vector<8x1024xf32>
    %cst_45 = arith.constant 0.000000e+00 : f32
    %97 = vector.broadcast %cst_45 : f32 to vector<8x1024xf32>
    %98 = arith.maximumf %96, %97 : vector<8x1024xf32>
    %99 = arith.truncf %98 : vector<8x1024xf32> to vector<8x1024xbf16>
    %c0_46 = arith.constant 0 : index
    %c0_47 = arith.constant 0 : index
    %100 = vector.load %arg7[%c0_46, %c0_47] : memref<1024x128xbf16, #tpu.memory_space<vmem>>, vector<1024x128xbf16>
    %cst_48 = arith.constant dense<0.000000e+00> : vector<8x128xf32>
    %101 = tpu.matmul %99, %100, %cst_48 {dimension_numbers = #tpu.dot_dimension_numbers<[1], [0], [0], [1], [0, 0, 1, 1], [], []>} : vector<8x1024xbf16>, vector<1024x128xbf16>, vector<8x128xf32> -> vector<8x128xf32>
    %c0_49 = arith.constant 0 : index
    %c0_50 = arith.constant 0 : index
    %102 = vector.load %arg8[%c0_49, %c0_50] : memref<1x128xf32, #tpu.memory_space<vmem>>, vector<1x128xf32>
    %103 = vector.broadcast %102 : vector<1x128xf32> to vector<8x128xf32>
    %104 = arith.addf %101, %103 : vector<8x128xf32>
    %c0_51 = arith.constant 0 : index
    %c0_52 = arith.constant 0 : index
    %105 = vector.load %arg9[%c0_51, %c0_52] : memref<8x128xf32, #tpu.memory_space<vmem>>, vector<8x128xf32>
    tpu.vector_store %arg9[%c0_51, %c0_52], %104 {strides = array<i32>} : memref<8x128xf32, #tpu.memory_space<vmem>>, vector<8x128xf32>,
    return
  }
  func.func @transform_0(%arg0: i32) -> (i32, i32, i32) {
    %c0_i32 = arith.constant 0 : i32
    %c0_i32_0 = arith.constant 0 : i32
    %c0_i32_1 = arith.constant 0 : i32
    return %arg0, %c0_i32, %c0_i32_0 : i32, i32, i32
  }
  func.func @transform_1(%arg0: i32) -> (i32, i32) {
    %c0_i32 = arith.constant 0 : i32
    %c0_i32_0 = arith.constant 0 : i32
    %c0_i32_1 = arith.constant 0 : i32
    return %c0_i32, %c0_i32_0 : i32, i32
  }
  func.func @transform_2(%arg0: i32) -> (i32, i32) {
    %c0_i32 = arith.constant 0 : i32
    %c0_i32_0 = arith.constant 0 : i32
    %c0_i32_1 = arith.constant 0 : i32
    return %c0_i32, %c0_i32_0 : i32, i32
  }
  func.func @transform_3(%arg0: i32) -> (i32, i32) {
    %c0_i32 = arith.constant 0 : i32
    %c0_i32_0 = arith.constant 0 : i32
    %c0_i32_1 = arith.constant 0 : i32
    return %c0_i32, %c0_i32_0 : i32, i32
  }
  func.func @transform_4(%arg0: i32) -> (i32, i32) {
    %c0_i32 = arith.constant 0 : i32
    %c0_i32_0 = arith.constant 0 : i32
    %c0_i32_1 = arith.constant 0 : i32
    return %c0_i32, %c0_i32_0 : i32, i32
  }
  func.func @transform_5(%arg0: i32) -> (i32, i32) {
    %c0_i32 = arith.constant 0 : i32
    %c0_i32_0 = arith.constant 0 : i32
    %c0_i32_1 = arith.constant 0 : i32
    return %c0_i32, %c0_i32_0 : i32, i32
  }
  func.func @transform_6(%arg0: i32) -> (i32, i32) {
    %c0_i32 = arith.constant 0 : i32
    %c0_i32_0 = arith.constant 0 : i32
    %c0_i32_1 = arith.constant 0 : i32
    return %c0_i32, %c0_i32_0 : i32, i32
  }
  func.func @transform_7(%arg0: i32) -> (i32, i32) {
    %c0_i32 = arith.constant 0 : i32
    %c0_i32_0 = arith.constant 0 : i32
    %c0_i32_1 = arith.constant 0 : i32
    return %c0_i32, %c0_i32_0 : i32, i32
  }
  func.func @transform_8(%arg0: i32) -> (i32, i32) {
    %c0_i32 = arith.constant 0 : i32
    %c0_i32_0 = arith.constant 0 : i32
    return %arg0, %c0_i32 : i32, i32
  }
}

</mosaic_0001>

<bundles_post_ra>
// kernel: tpu_custom_call.1
= control target key start
LH: loop header
LB: loop body
LE: loop exit
PB: predicated region body
PF: predicated region fallthrough
CT: control target
= control target key end

     0   :  { %13 = vsyncpa [#allocation3], 0  ;;  %s13845_s0 = inlined_call_operand.hbm [shape: f32[8,32,196], index: 0, kind: input, shape index: {}]   ;;  %s13846_s1 = inlined_call_operand.hbm [shape: f32[16,196], index: 1, kind: input, shape index: {}]   ;;  %s13847_s2 = inlined_call_operand.hbm [shape: f32[32,128], index: 2, kind: input, shape index: {}]   ;;  %s13848_s3 = inlined_call_operand.hbm [shape: f32[1,128], index: 3, kind: input, shape index: {}]   ;;  %s13849_s4 = inlined_call_operand.hbm [shape: bf16[2048,1024], index: 4, kind: input, shape index: {}]   ;;  %s13850_s5 = inlined_call_operand.hbm [shape: f32[1,1024], index: 5, kind: input, shape index: {}]   ;;  %s13851_s6 = inlined_call_operand.hbm [shape: bf16[1024,128], index: 6, kind: input, shape index: {}]   ;;  %s13852_s7 = inlined_call_operand.hbm [shape: f32[1,128], index: 7, kind: input, shape index: {}]   ;;  %s13853_s8 = inlined_call_operand.hbm [shape: f32[8,128], index: 8, kind: output, shape index: {}]  }
   0x1   :  { %14 = vsyncpa [#allocation6], 0 }
   0x2   :  { %15 = vsyncpa [#allocation9], 0 }
   0x3   :  { %16 = vsyncpa [#allocation12], 0 }
   0x4   :  { %17 = vsyncpa [#allocation15], 0 }
   0x5   :  { %18 = vsyncpa [#allocation4], 0  ;;  %s12634_s27 = smov [#allocation5]   ;;  %s12635_s29 = smov [#allocation8]  }
   0x6   :  { %s36_s28 = sshll.u32 %s12634_s27, 4  ;;  %s61_s30 = sshll.u32 %s12635_s29, 4  ;;  %s37_s28 = int_to_ptr.vmem [resolvable:$true] %s36_s28  ;;  %s62_s30 = int_to_ptr.vmem [resolvable:$true] %s61_s30 }
   0x7   :  { %s12450_s9 = scalar_lea.vmem %s37_s28, 512  ;;  %p12455_p1 = scmp.lt.s32.totalorder %s37_s28, %s37_s28 }
   0x8   :  { %p12451_p0 = scmp.ne.s32.totalorder %s37_s28, %s12450_s9  ;;  %p12456_p2 = scmp.lt.s32.totalorder %s12450_s9, %s12450_s9 }
   0xa   :  { %p12457_p3 = por %p12456_p2, %p12455_p1 }
   0xc   :  { %p12458_p4 = pnand %p12457_p3, %p12451_p0 }
   0xe   :  { %12461 = shalt.err (!%p12458_p4)
}
   0xf   :  { %s12636_s10 = smov 256   ;;  %s12637_s11 = smov 16  }
  0x10   :  { %42 = dma.hbm_to_vmem [thread:$0]  %s13846_s1, 512, %s37_s28, [#allocation6], %s12636_s10, %s12636_s10, %s12637_s11  }
  0x11   :  { %s12470_s14 = scalar_lea.vmem %s62_s30, 16  ;;  %s12474_s15 = scalar_lea.vmem %s62_s30, 32 }
  0x12   :  { %p12471_p5 = scmp.ne.s32.totalorder %s62_s30, %s12470_s14  ;;  %p12475_p6 = scmp.lt.s32.totalorder %s62_s30, %s62_s30 }
  0x13   :  { %p12476_p7 = scmp.lt.s32.totalorder %s12474_s15, %s12470_s14 }
  0x15   :  { %p12477_p8 = por %p12476_p7, %p12475_p6 }
  0x17   :  { %p12478_p9 = pnand %p12477_p8, %p12471_p5 }
  0x19   :  { %12481 = shalt.err (!%p12478_p9)
}
  0x1a   :  { %64 = dma.hbm_to_vmem [thread:$0]  %s13848_s3, 16, %s62_s30, [#allocation9]  }
  0x1b   :  { %s12638_s18 = smov [#allocation11]   ;;  %s12639_s20 = smov [#allocation2]  }
  0x1c   :  { %s83_s19 = sshll.u32 %s12638_s18, 4  ;;  %s24_s21 = sshll.u32 %s12639_s20, 4  ;;  %s84_s19 = int_to_ptr.vmem [resolvable:$true] %s83_s19  ;;  %s25_s21 = int_to_ptr.vmem [resolvable:$true] %s24_s21 }
  0x1d   :  { %s12490_s22 = scalar_lea.vmem %s84_s19, 128  ;;  %p12495_p11 = scmp.lt.s32.totalorder %s84_s19, %s84_s19 }
  0x1e   :  { %p12491_p10 = scmp.ne.s32.totalorder %s84_s19, %s12490_s22  ;;  %p12496_p12 = scmp.lt.s32.totalorder %s12490_s22, %s12490_s22 }
  0x20   :  { %p12497_p13 = por %p12496_p12, %p12495_p11 }
  0x22   :  { %p12498_p0 = pnand %p12497_p13, %p12491_p10 }
  0x24   :  { %12501 = shalt.err (!%p12498_p0)
}
  0x25   :  { %86 = dma.hbm_to_vmem [thread:$0]  %s13850_s5, 128, %s84_s19, [#allocation12]  }
  0x26   :  { %s12510_s24 = scalar_lea.vmem %s25_s21, 8192  ;;  %p12515_p2 = scmp.lt.s32.totalorder %s25_s21, %s25_s21 }
  0x27   :  { %p12511_p1 = scmp.ne.s32.totalorder %s25_s21, %s12510_s24  ;;  %p12516_p3 = scmp.lt.s32.totalorder %s12510_s24, %s12510_s24 }
  0x29   :  { %p12517_p4 = por %p12516_p3, %p12515_p2 }
  0x2b   :  { %p12518_p5 = pnand %p12517_p4, %p12511_p1 }
  0x2d   :  { %12521 = shalt.err (!%p12518_p5)
}
  0x2e   :  { %30 = dma.hbm_to_vmem [thread:$0]  %s13845_s0, 8192, %s25_s21, [#allocation3], %s12636_s10, %s12636_s10, %s12637_s11  }
  0x2f   :  { %s12640_s26 = smov [#allocation7]  }
  0x30   :  { %s48_s27 = sshll.u32 %s12640_s26, 4  ;;  %s49_s27 = int_to_ptr.vmem [resolvable:$true] %s48_s27 }
  0x31   :  { %s12530_s28 = scalar_lea.vmem %s49_s27, 512  ;;  %p12535_p7 = scmp.lt.s32.totalorder %s49_s27, %s49_s27 }
  0x32   :  { %p12531_p6 = scmp.ne.s32.totalorder %s49_s27, %s12530_s28  ;;  %p12536_p8 = scmp.lt.s32.totalorder %s12530_s28, %s12530_s28 }
  0x34   :  { %p12537_p9 = por %p12536_p8, %p12535_p7 }
  0x36   :  { %p12538_p10 = pnand %p12537_p9, %p12531_p6 }
  0x38   :  { %12541 = shalt.err (!%p12538_p10)
}
  0x39   :  { %s12641_s5 = smov 128   ;;  %s12642_s29 = smov 8  }
  0x3a   :  { %54 = dma.hbm_to_vmem [thread:$0]  %s13847_s2, 512, %s49_s27, [#allocation6], %s12641_s5, %s12641_s5, %s12642_s29  }
  0x3b   :  { %s12643_s12 = smov [#allocation10]  }
  0x3c   :  { %s70_s13 = sshll.u32 %s12643_s12, 4  ;;  %s71_s13 = int_to_ptr.vmem [resolvable:$true] %s70_s13 }
  0x3d   :  { %s12550_s0 = scalar_lea.vmem %s71_s13, 131072  ;;  %p12555_p12 = scmp.lt.s32.totalorder %s71_s13, %s71_s13 }
  0x3e   :  { %p12551_p11 = scmp.ne.s32.totalorder %s71_s13, %s12550_s0  ;;  %p12556_p13 = scmp.lt.s32.totalorder %s12550_s0, %s12550_s0 }
  0x40   :  { %p12557_p0 = por %p12556_p13, %p12555_p12 }
  0x42   :  { %p12558_p1 = pnand %p12557_p0, %p12551_p11 }
  0x44   :  { %12561 = shalt.err (!%p12558_p1)
}
  0x45   :  { %s12644_s10 = smov 512   ;;  %s12645_s11 = smov 32  }
  0x46   :  { %76 = dma.hbm_to_vmem [thread:$0]  %s13849_s4, 131072, %s71_s13, [#allocation9], %s12644_s10, %s12644_s10, %s12645_s11  }
  0x47   :  { %s12646_s16 = smov [#allocation13]  }
  0x48   :  { %s92_s17 = sshll.u32 %s12646_s16, 4  ;;  %s93_s17 = int_to_ptr.vmem [resolvable:$true] %s92_s17 }
  0x49   :  { %s12570_s2 = scalar_lea.vmem %s93_s17, 8192  ;;  %p12575_p3 = scmp.lt.s32.totalorder %s93_s17, %s93_s17 }
  0x4a   :  { %p12571_p2 = scmp.ne.s32.totalorder %s93_s17, %s12570_s2  ;;  %p12576_p4 = scmp.lt.s32.totalorder %s12570_s2, %s12570_s2 }
  0x4c   :  { %p12577_p5 = por %p12576_p4, %p12575_p3 }
  0x4e   :  { %p12578_p6 = pnand %p12577_p5, %p12571_p2 }
  0x50   :  { %12581 = shalt.err (!%p12578_p6)
}
  0x51   :  { %s12647_s18 = smov 64   ;;  %s12648_s19 = smov 4  }
  0x52   :  { %98 = dma.hbm_to_vmem [thread:$0]  %s13851_s6, 8192, %s93_s17, [#allocation12], %s12647_s18, %s12647_s18, %s12648_s19  }
  0x53   :  { %s12649_s22 = smov [#allocation14]  }
  0x54   :  { %s105_s1 = sshll.u32 %s12649_s22, 4  ;;  %s106_s1 = int_to_ptr.vmem [resolvable:$true] %s105_s1 }
  0x55   :  { %s12590_s4 = scalar_lea.vmem %s106_s1, 16  ;;  %s12594_s23 = scalar_lea.vmem %s106_s1, 32 }
  0x56   :  { %p12591_p7 = scmp.ne.s32.totalorder %s106_s1, %s12590_s4  ;;  %p12595_p8 = scmp.lt.s32.totalorder %s106_s1, %s106_s1 }
  0x57   :  { %p12596_p9 = scmp.lt.s32.totalorder %s12594_s23, %s12590_s4 }
  0x59   :  { %p12597_p10 = por %p12596_p9, %p12595_p8 }
  0x5b   :  { %p12598_p11 = pnand %p12597_p10, %p12591_p7 }
  0x5d   :  { %12601 = shalt.err (!%p12598_p11)
}
  0x5e   :  { %108 = dma.hbm_to_vmem [thread:$0]  %s13852_s7, 16, %s106_s1, [#allocation15]  }
  0x5f   :  { %12622 = dma.done.wait [#allocation3], 8192  }
  0x60   :  { %12623 = vsyncadd [#allocation3], 4294959104 }
  0x61   :  { %12624 = dma.done.wait [#allocation6], 1024  }
  0x62   :  { %12625 = vsyncadd [#allocation6], 4294966272 }
  0x63   :  { %12626 = dma.done.wait [#allocation9], 131088  }
  0x64   :  { %12627 = vsyncadd [#allocation9], 4294836208 }
  0x65   :  { %12628 = dma.done.wait [#allocation12], 8320  }
  0x66   :  { %12629 = vsyncadd [#allocation12], 4294958976 }
  0x67   :  { %12630 = dma.done.wait [#allocation15], 16  }
  0x68   :  { %12631 = vsyncadd [#allocation15], 4294967280  ;;  %vm202_vm0 = vcmask 556032   ;;  %v145_v0 = vld [vmem:[#allocation2 + $0x38] sm:$0xff]  ;;  %v144_v1 = vld [vmem:[#allocation2 + $0x30] sm:$0xff]  ;;  %vm916_vm1 = vcmask 261120  }
  0x69   :  { %v153_v2 = vld [vmem:[#allocation2 + $0x78] sm:$0xff]  ;;  %11066 = vmatprep.subr.msk.mxu0 %vm202_vm0, %v145_v0  ;;  %v152_v3 = vld [vmem:[#allocation2 + $0x70] sm:$0xff]  ;;  %v143_v4 = vld [vmem:[#allocation2 + $0x28] sm:$0xff]  ;;  %vm1279_vm2 = vcmask 1041409   ;;  %vm1282_vm3 = vcmask 1042434   ;;  %vm1285_vm4 = vcmask 1043459  }
  0x6a   :  { %11072 = vmatprep.subr.msk.mxu1 %vm202_vm0, %v153_v2  ;;  %246 = vmatpush1.xpose.msra.mxu0 %v144_v1  ;;  %v151_v5 = vld [vmem:[#allocation2 + $0x68] sm:$0xff]  ;;  %v142_v6 = vld [vmem:[#allocation2 + $0x20] sm:$0xff]  ;;  %v141_v8 = vld [vmem:[#allocation2 + $0x18] sm:$0xff]  ;;  %vm1288_vm5 = vcmask 1044484   ;;  %vm1291_vm6 = vcmask 1045509   ;;  %vm1294_vm7 = vcmask 1046534  }
  0x6b   :  { %333 = vmatpush1.xpose.msra.mxu1 %v152_v3  ;;  %11067 = vmatprep.subr.msk.mxu0 %vm202_vm0, %v143_v4  ;;  %v150_v7 = vld [vmem:[#allocation2 + $0x60] sm:$0xff]  ;;  %v149_v9 = vld [vmem:[#allocation2 + $0x58] sm:$0xff]  ;;  %v12731_v10 = vld [vmem:[#allocation5 + $0x8] sm:$0xff]  ;;  %vm1297_vm8 = vcmask 1047559   ;;  %s12651_s6 = smov [#allocation16]  }
  0x6c   :  { %11073 = vmatprep.subr.msk.mxu1 %vm202_vm0, %v151_v5  ;;  %v140_v11 = vld [vmem:[#allocation2 + $0x10] sm:$0xff]  ;;  %v139_v13 = vld [vmem:[#allocation2 + $0x8] sm:$0xff]  ;;  %11070 = vmatprep.mubr.msk.f32.mxu0 %vm202_vm0, %v12731_v10  ;;  %v138_v15 = vld [vmem:[#allocation2] sm:$0xff]  ;;  %s11053_s7 = sshll.u32 %s12651_s6, 4  ;;  %s11054_s7 = int_to_ptr.vmem [resolvable:$true] %s11053_s7 }
  0x6d   :  { %v148_v12 = vld [vmem:[#allocation2 + $0x50] sm:$0xff]  ;;  %v147_v14 = vld [vmem:[#allocation2 + $0x48] sm:$0xff]  ;;  %11076 = vmatprep.mubr.msk.f32.mxu1 %vm202_vm0, %v12731_v10  ;;  %v146_v16 = vld [vmem:[#allocation2 + $0x40] sm:$0xff]  ;;  %s12602_s25 = scalar_lea.vmem %s11054_s7, 128  ;;  %p12607_p13 = scmp.lt.s32.totalorder %s11054_s7, %s11054_s7 }
  0x6e   :  { %248 = vmatpush1.xpose.msra.mxu0 %v142_v6  ;;  %v161_v17 = vld [vmem:[#allocation2 + $0xb8] sm:$0xff]  ;;  %v12741_v19 = vld [vmem:[#allocation5] sm:$0xff]  ;;  %v160_v20 = vld [vmem:[#allocation2 + $0xb0] sm:$0xff]  ;;  %p12603_p12 = scmp.ne.s32.totalorder %s11054_s7, %s12602_s25  ;;  %p12608_p0 = scmp.lt.s32.totalorder %s12602_s25, %s12602_s25 }
  0x6f   :  { %335 = vmatpush1.xpose.msra.mxu1 %v150_v7  ;;  %11068 = vmatprep.subr.msk.mxu0 %vm202_vm0, %v141_v8  ;;  %v169_v18 = vld [vmem:[#allocation2 + $0xf8] sm:$0xff]  ;;  %v168_v22 = vld [vmem:[#allocation2 + $0xf0] sm:$0xff]  ;;  %v159_v23 = vld [vmem:[#allocation2 + $0xa8] sm:$0xff] }
  0x70   :  { %11074 = vmatprep.subr.msk.mxu1 %vm202_vm0, %v149_v9  ;;  %v12745_v21 = vld [vmem:[#allocation5 + $0x18] sm:$0xff]  ;;  %v167_v24 = vld [vmem:[#allocation2 + $0xe8] sm:$0xff]  ;;  %v12751_v25 = vld [vmem:[#allocation5 + $0x10] sm:$0xff]  ;;  %p12609_p1 = por %p12608_p0, %p12607_p13 }
  0x71   :  { %v158_v26 = vld [vmem:[#allocation2 + $0xa0] sm:$0xff]  ;;  %v157_v28 = vld [vmem:[#allocation2 + $0x98] sm:$0xff]  ;;  %v156_v30 = vld [vmem:[#allocation2 + $0x90] sm:$0xff] }
  0x72   :  { %250 = vmatpush1.xpose.msra.mxu0 %v140_v11  ;;  %v166_v27 = vld [vmem:[#allocation2 + $0xe0] sm:$0xff]  ;;  %v165_v29 = vld [vmem:[#allocation2 + $0xd8] sm:$0xff]  ;;  %v164_v31 = vld [vmem:[#allocation2 + $0xd0] sm:$0xff]  ;;  %p12610_p2 = pnand %p12609_p1, %p12603_p12 }
  0x73   :  { %337 = vmatpush1.xpose.msra.mxu1 %v148_v12  ;;  %11069 = vmatprep.subr.msk.mxu0 %vm202_vm0, %v139_v13  ;;  %v155_v32 = vld [vmem:[#allocation2 + $0x88] sm:$0xff]  ;;  %v154_v34 = vld [vmem:[#allocation2 + $0x80] sm:$0xff]  ;;  %v177_v36 = vld [vmem:[#allocation2 + $0x138] sm:$0xff] }
  0x74   :  { %11075 = vmatprep.subr.msk.mxu1 %vm202_vm0, %v147_v14  ;;  %v163_v33 = vld [vmem:[#allocation2 + $0xc8] sm:$0xff]  ;;  %v162_v35 = vld [vmem:[#allocation2 + $0xc0] sm:$0xff]  ;;  %v185_v37 = vld [vmem:[#allocation2 + $0x178] sm:$0xff] }
  0x75   :  { %v176_v38 = vld [vmem:[#allocation2 + $0x130] sm:$0xff]  ;;  %v175_v39 = vld [vmem:[#allocation2 + $0x128] sm:$0xff]  ;;  %v174_v42 = vld [vmem:[#allocation2 + $0x120] sm:$0xff] }
  0x76   :  { %252 = vmatpush1.xpose.msra.mxu0 %v138_v15  ;;  %v184_v40 = vld [vmem:[#allocation2 + $0x170] sm:$0xff]  ;;  %v183_v41 = vld [vmem:[#allocation2 + $0x168] sm:$0xff]  ;;  %v173_v43 = vld [vmem:[#allocation2 + $0x118] sm:$0xff] }
  0x77   :  { %339 = vmatpush1.xpose.msra.mxu1 %v146_v16  ;;  %11078 = vmatprep.subr.msk.mxu0 %vm202_vm0, %v161_v17  ;;  %v182_v44 = vld [vmem:[#allocation2 + $0x160] sm:$0xff]  ;;  %v181_v45 = vld [vmem:[#allocation2 + $0x158] sm:$0xff]  ;;  %v172_v46 = vld [vmem:[#allocation2 + $0x110] sm:$0xff] }
  0x78   :  { %11084 = vmatprep.subr.msk.mxu1 %vm202_vm0, %v169_v18  ;;  %v171_v47 = vld [vmem:[#allocation2 + $0x108] sm:$0xff]  ;;  %v180_v48 = vld [vmem:[#allocation2 + $0x150] sm:$0xff]  ;;  %v170_v50 = vld [vmem:[#allocation2 + $0x100] sm:$0xff] }
  0x79   :  { %286 = vmatmul.mubr.f32.vlgmr.msra.gmra.mxu0 %v12741_v19  ;;  %v179_v49 = vld [vmem:[#allocation2 + $0x148] sm:$0xff]  ;;  %v193_v51 = vld [vmem:[#allocation2 + $0x1b8] sm:$0xff]  ;;  %v178_v52 = vld [vmem:[#allocation2 + $0x140] sm:$0xff] }
  0x7a   :  { %373 = vmatmul.mubr.f32.vlgmr.msra.gmra.mxu1 %v12741_v19  ;;  %420 = vmatpush1.xpose.msra.mxu0 %v160_v20  ;;  %v201_v53 = vld [vmem:[#allocation2 + $0x1f8] sm:$0xff]  ;;  %v192_v54 = vld [vmem:[#allocation2 + $0x1b0] sm:$0xff]  ;;  %v191_v55 = vld [vmem:[#allocation2 + $0x1a8] sm:$0xff] }
  0x7b   :  { %11071 = vmatprep.mubr.msk.f32.mxu0 %vm202_vm0, %v12745_v21  ;;  %507 = vmatpush1.xpose.msra.mxu1 %v168_v22  ;;  %v200_v56 = vld [vmem:[#allocation2 + $0x1f0] sm:$0xff]  ;;  %v199_v57 = vld [vmem:[#allocation2 + $0x1e8] sm:$0xff]  ;;  %v190_v58 = vld [vmem:[#allocation2 + $0x1a0] sm:$0xff] }
  0x7c   :  { %11079 = vmatprep.subr.msk.mxu0 %vm202_vm0, %v159_v23  ;;  %11085 = vmatprep.subr.msk.mxu1 %vm202_vm0, %v167_v24  ;;  %v189_v59 = vld [vmem:[#allocation2 + $0x198] sm:$0xff]  ;;  %v198_v60 = vld [vmem:[#allocation2 + $0x1e0] sm:$0xff]  ;;  %v188_v62 = vld [vmem:[#allocation2 + $0x190] sm:$0xff] }
  0x7d   :  { %11077 = vmatprep.mubr.msk.f32.mxu1 %vm202_vm0, %v12745_v21  ;;  %291 = vmatmul.mubr.f32.gmra.mxu0 %v12751_v25  ;;  %v197_v61 = vld [vmem:[#allocation2 + $0x1d8] sm:$0xff]  ;;  %v187_v63 = vld [vmem:[#allocation2 + $0x188] sm:$0xff]  ;;  %v196_v0 = vld [vmem:[#allocation2 + $0x1d0] sm:$0xff] }
  0x7e   :  { %378 = vmatmul.mubr.f32.gmra.mxu1 %v12751_v25  ;;  %422 = vmatpush1.xpose.msra.mxu0 %v158_v26  ;;  %v195_v1 = vld [vmem:[#allocation2 + $0x1c8] sm:$0xff]  ;;  %v186_v2 = vld [vmem:[#allocation2 + $0x180] sm:$0xff]  ;;  %v908_v3 = vld [vmem:[#allocation7 + $0x18] sm:$0xff] }
  0x7f   :  { %11082 = vmatprep.mubr.msk.f32.mxu0 %vm202_vm0, %v12731_v10  ;;  %509 = vmatpush1.xpose.msra.mxu1 %v166_v27  ;;  %v194_v4 = vld [vmem:[#allocation2 + $0x1c0] sm:$0xff]  ;;  %v907_v5 = vld [vmem:[#allocation7 + $0x10] sm:$0xff]  ;;  %v906_v6 = vld [vmem:[#allocation7 + $0x8] sm:$0xff] }
  0x80   :  { %11080 = vmatprep.subr.msk.mxu0 %vm202_vm0, %v157_v28  ;;  %11086 = vmatprep.subr.msk.mxu1 %vm202_vm0, %v165_v29  ;;  %v905_v7 = vld [vmem:[#allocation7] sm:$0xff] }
  0x81   :  { %11088 = vmatprep.mubr.msk.f32.mxu1 %vm202_vm0, %v12731_v10 }
  0x82   :  { %424 = vmatpush1.xpose.msra.mxu0 %v156_v30 }
  0x83   :  { %511 = vmatpush1.xpose.msra.mxu1 %v164_v31  ;;  %11081 = vmatprep.subr.msk.mxu0 %vm202_vm0, %v155_v32 }
  0x84   :  { %11087 = vmatprep.subr.msk.mxu1 %vm202_vm0, %v163_v33 }
  0x86   :  { %426 = vmatpush1.xpose.msra.mxu0 %v154_v34 }
  0x87   :  { %513 = vmatpush1.xpose.msra.mxu1 %v162_v35  ;;  %11090 = vmatprep.subr.msk.mxu0 %vm202_vm0, %v177_v36 }
  0x88   :  { %11096 = vmatprep.subr.msk.mxu1 %vm202_vm0, %v185_v37 }
  0x89   :  { %460 = vmatmul.mubr.f32.vlgmr.msra.gmra.mxu0 %v12741_v19 }
  0x8a   :  { %594 = vmatpush1.xpose.msra.mxu0 %v176_v38  ;;  %11083 = vmatprep.mubr.msk.f32.mxu0 %vm202_vm0, %v12745_v21 }
  0x8b   :  { %547 = vmatmul.mubr.f32.vlgmr.msra.gmra.mxu1 %v12741_v19  ;;  %11091 = vmatprep.subr.msk.mxu0 %vm202_vm0, %v175_v39 }
  0x8c   :  { %681 = vmatpush1.xpose.msra.mxu1 %v184_v40  ;;  %11089 = vmatprep.mubr.msk.f32.mxu1 %vm202_vm0, %v12745_v21  ;;  %v1254_v40 = vld [vmem:[#allocation10 + $0x3c0] sm:$0xff] }
  0x8d   :  { %465 = vmatmul.mubr.f32.gmra.mxu0 %v12751_v25  ;;  %11097 = vmatprep.subr.msk.mxu1 %vm202_vm0, %v183_v41  ;;  %v1258_v41 = vld [vmem:[#allocation10 + $0x3e0] sm:$0xff] }
  0x8e   :  { %596 = vmatpush1.xpose.msra.mxu0 %v174_v42  ;;  %11094 = vmatprep.mubr.msk.f32.mxu0 %vm202_vm0, %v12731_v10  ;;  %v1255_v42 = vld [vmem:[#allocation10 + $0x3c8] sm:$0xff] }
  0x8f   :  { %552 = vmatmul.mubr.f32.gmra.mxu1 %v12751_v25  ;;  %11092 = vmatprep.subr.msk.mxu0 %vm202_vm0, %v173_v43  ;;  %v11188_v43 = vcombine.high %v1254_v40, %v1258_v41 }
  0x90   :  { %683 = vmatpush1.xpose.msra.mxu1 %v182_v44  ;;  %11100 = vmatprep.mubr.msk.f32.mxu1 %vm202_vm0, %v12731_v10  ;;  %v1259_v44 = vld [vmem:[#allocation10 + $0x3e8] sm:$0xff] }
  0x91   :  { %11098 = vmatprep.subr.msk.mxu1 %vm202_vm0, %v181_v45  ;;  %v11187_v45 = vcombine.low %v1254_v40, %v1258_v41 }
  0x92   :  { %598 = vmatpush1.xpose.msra.mxu0 %v172_v46  ;;  %v11189_v46 = vcombine.low %v1255_v42, %v1259_v44 }
  0x93   :  { %11093 = vmatprep.subr.msk.mxu0 %vm202_vm0, %v171_v47  ;;  %v11190_v47 = vcombine.high %v1255_v42, %v1259_v44  ;;  %v12650_v42 = vmov 0   ;;  %v12839_v44 = vld [vmem:[#allocation10 + $0x3d8] sm:$0xff] }
  0x94   :  { %685 = vmatpush1.xpose.msra.mxu1 %v180_v48  ;;  %v1246_v48 = vld [vmem:[#allocation10 + $0x380] sm:$0xff] }
  0x95   :  { %11099 = vmatprep.subr.msk.mxu1 %vm202_vm0, %v179_v49  ;;  %v1250_v49 = vld [vmem:[#allocation10 + $0x3a0] sm:$0xff] }
  0x96   :  { %600 = vmatpush1.xpose.msra.mxu0 %v170_v50  ;;  %v1247_v50 = vld [vmem:[#allocation10 + $0x388] sm:$0xff] }
  0x97   :  { %11102 = vmatprep.subr.msk.mxu0 %vm202_vm0, %v193_v51  ;;  %v11180_v51 = vcombine.high %v1246_v48, %v1250_v49 }
  0x98   :  { %687 = vmatpush1.xpose.msra.mxu1 %v178_v52  ;;  %v1251_v52 = vld [vmem:[#allocation10 + $0x3a8] sm:$0xff] }
  0x99   :  { %634 = vmatmul.mubr.f32.vlgmr.msra.gmra.mxu0 %v12741_v19  ;;  %11108 = vmatprep.subr.msk.mxu1 %vm202_vm0, %v201_v53  ;;  %v11179_v53 = vcombine.low %v1246_v48, %v1250_v49 }
  0x9a   :  { %768 = vmatpush1.xpose.msra.mxu0 %v192_v54  ;;  %11095 = vmatprep.mubr.msk.f32.mxu0 %vm202_vm0, %v12745_v21  ;;  %v11181_v54 = vcombine.low %v1247_v50, %v1251_v52 }
  0x9b   :  { %721 = vmatmul.mubr.f32.vlgmr.msra.gmra.mxu1 %v12741_v19  ;;  %11103 = vmatprep.subr.msk.mxu0 %vm202_vm0, %v191_v55  ;;  %v11182_v55 = vcombine.high %v1247_v50, %v1251_v52  ;;  %v12849_v50 = vld [vmem:[#allocation8] ss:$0 sm:$0xff] }
  0x9c   :  { %855 = vmatpush1.xpose.msra.mxu1 %v200_v56  ;;  %11101 = vmatprep.mubr.msk.f32.mxu1 %vm202_vm0, %v12745_v21  ;;  %v1238_v56 = vld [vmem:[#allocation10 + $0x340] sm:$0xff] }
  0x9d   :  { %639 = vmatmul.mubr.f32.gmra.mxu0 %v12751_v25  ;;  %11109 = vmatprep.subr.msk.mxu1 %vm202_vm0, %v199_v57  ;;  %v1242_v57 = vld [vmem:[#allocation10 + $0x360] sm:$0xff] }
  0x9e   :  { %770 = vmatpush1.xpose.msra.mxu0 %v190_v58  ;;  %11106 = vmatprep.mubr.msk.f32.mxu0 %vm202_vm0, %v12731_v10  ;;  %v1239_v58 = vld [vmem:[#allocation10 + $0x348] sm:$0xff] }
  0x9f   :  { %726 = vmatmul.mubr.f32.gmra.mxu1 %v12751_v25  ;;  %11104 = vmatprep.subr.msk.mxu0 %vm202_vm0, %v189_v59  ;;  %v11172_v59 = vcombine.high %v1238_v56, %v1242_v57 }
  0xa0   :  { %857 = vmatpush1.xpose.msra.mxu1 %v198_v60  ;;  %11112 = vmatprep.mubr.msk.f32.mxu1 %vm202_vm0, %v12731_v10  ;;  %v1243_v60 = vld [vmem:[#allocation10 + $0x368] sm:$0xff] }
  0xa1   :  { %11110 = vmatprep.subr.msk.mxu1 %vm202_vm0, %v197_v61  ;;  %v11171_v61 = vcombine.low %v1238_v56, %v1242_v57 }
  0xa2   :  { %772 = vmatpush1.xpose.msra.mxu0 %v188_v62  ;;  %v11173_v62 = vcombine.low %v1239_v58, %v1243_v60 }
  0xa3   :  { %11105 = vmatprep.subr.msk.mxu0 %vm202_vm0, %v187_v63  ;;  %v11174_v63 = vcombine.high %v1239_v58, %v1243_v60 }
  0xa4   :  { %859 = vmatpush1.xpose.msra.mxu1 %v196_v0  ;;  %v1230_v0 = vld [vmem:[#allocation10 + $0x300] sm:$0xff] }
  0xa5   :  { %11111 = vmatprep.subr.msk.mxu1 %vm202_vm0, %v195_v1  ;;  %v1234_v1 = vld [vmem:[#allocation10 + $0x320] sm:$0xff] }
  0xa6   :  { %774 = vmatpush1.xpose.msra.mxu0 %v186_v2  ;;  %v1231_v2 = vld [vmem:[#allocation10 + $0x308] sm:$0xff] }
  0xa7   :  { %12328 = vmatprep.subr.mxu0 %v908_v3 }
  0xa8   :  { %861 = vmatpush1.xpose.msra.mxu1 %v194_v4  ;;  %v11164_v4 = vcombine.high %v1230_v0, %v1234_v1 }
  0xa9   :  { %808 = vmatmul.mubr.f32.vlgmr.msra.gmra.mxu0 %v12741_v19  ;;  %1621 = vmatprep.subr.bf16.mxu1 %v11188_v43 }
  0xaa   :  { %11107 = vmatprep.mubr.msk.f32.mxu0 %vm202_vm0, %v12745_v21  ;;  %12329 = vmatpush3.msra.mxu0 %v908_v3  ;;  %v11163_v3 = vcombine.low %v1230_v0, %v1234_v1 }
  0xab   :  { %895 = vmatmul.mubr.f32.vlgmr.msra.gmra.mxu1 %v12741_v19  ;;  %12330 = vmatprep.subr.mxu0 %v907_v5 }
  0xac   :  { %11113 = vmatprep.mubr.msk.f32.mxu1 %vm202_vm0, %v12745_v21  ;;  %12331 = vmatpush3.msra.mxu0 %v907_v5  ;;  %v1235_v5 = vld [vmem:[#allocation10 + $0x328] sm:$0xff] }
  0xad   :  { %813 = vmatmul.mubr.f32.gmra.mxu0 %v12751_v25  ;;  %12332 = vmatprep.subr.mxu0 %v906_v6 }
  0xae   :  { %12333 = vmatpush3.msra.mxu0 %v906_v6  ;;  %1622 = vmatpush1.bf16.msra.mxu1 %v11187_v45  ;;  %v11165_v6 = vcombine.low %v1231_v2, %v1235_v5  ;;  %v12841_v45 = vld [vmem:[#allocation10 + $0x3f8] sm:$0xff] }
  0xaf   :  { %900 = vmatmul.mubr.f32.gmra.mxu1 %v12751_v25  ;;  %12334 = vmatprep.subr.mxu0 %v905_v7  ;;  %v11194_v48 = vcombine.high %v12839_v44, %v12841_v45 }
  0xb0   :  { %12335 = vmatpush3.msra.mxu0 %v905_v7  ;;  %1623 = vmatprep.subr.bf16.mxu1 %v11180_v51  ;;  %v11166_v7 = vcombine.high %v1231_v2, %v1235_v5 }
  0xb1   :  { %1662 = vmatprep.subr.bf16.mxu0 %v11190_v47  ;;  %1653 = vmatprep.mubr.bf16.mxu1 %v12650_v42  ;;  %v11193_v47 = vcombine.low %v12839_v44, %v12841_v45 }
  0xb2   :  { %1624 = vmatpush1.bf16.msra.mxu1 %v11179_v53 }
  0xb3   :  { %1625 = vmatprep.subr.bf16.mxu1 %v11172_v59 }
  0xb6   :  { %1626 = vmatpush1.bf16.msra.mxu1 %v11171_v61 }
  0xb7   :  { %1627 = vmatprep.subr.bf16.mxu1 %v11164_v4 }
  0xba   :  { %1628 = vmatpush1.bf16.msra.mxu1 %v11163_v3 }
 0x139   :  { %v287_v8 = vpop.f32.mrf.mxu0 }
 0x13a   :  { %v374_v9 = vpop.f32.mrf.mxu1  ;;  %12336 = vmatprep.mubr.msk.f32.mxu0 %vm916_vm1, %v287_v8  ;;  %v1222_v8 = vld [vmem:[#allocation10 + $0x2c0] sm:$0xff] }
 0x13b   :  { %v289_v10 = vpop.f32.mrf.mxu0 }
 0x13c   :  { %v376_v11 = vpop.f32.mrf.mxu1  ;;  %v1223_v10 = vld [vmem:[#allocation10 + $0x2c8] sm:$0xff] }
 0x13d   :  { %v292_v12 = vpop.f32.mrf.mxu0 }
 0x13e   :  { %v379_v13 = vpop.f32.mrf.mxu1  ;;  %12337 = vmatmul.mubr.msk.f32.vlgmr.msra.gmra.mxu0 %vm916_vm1, %v292_v12  ;;  %v1227_v12 = vld [vmem:[#allocation10 + $0x2e8] sm:$0xff] }
 0x13f   :  { %12339 = vmatprep.mubr.msk.f32.mxu0 %vm916_vm1, %v374_v9  ;;  %v294_v14 = vpop.f32.mrf.mxu0  ;;  %1663 = vmatpush1.bf16.msra.mxu0 %v11189_v46  ;;  %v1226_v9 = vld [vmem:[#allocation10 + $0x2e0] sm:$0xff] }
 0x140   :  { %v381_v15 = vpop.f32.mrf.mxu1  ;;  %1664 = vmatprep.subr.bf16.mxu0 %v11182_v55  ;;  %v11156_v11 = vcombine.high %v1222_v8, %v1226_v9  ;;  %v11157_v14 = vcombine.low %v1223_v10, %v1227_v12 }
 0x141   :  { %v11158_v15 = vcombine.high %v1223_v10, %v1227_v12 }
 0x142   :  { %12340 = vmatmul.mubr.msk.f32.gmra.mxu0 %vm916_vm1, %v379_v13  ;;  %v11155_v13 = vcombine.low %v1222_v8, %v1226_v9  ;;  %1629 = vmatprep.subr.bf16.mxu1 %v11156_v11 }
 0x143   :  { %1665 = vmatpush1.bf16.msra.mxu0 %v11181_v54 }
 0x144   :  { %1666 = vmatprep.subr.bf16.mxu0 %v11174_v63  ;;  %1630 = vmatpush1.bf16.msra.mxu1 %v11155_v13 }
 0x147   :  { %1667 = vmatpush1.bf16.msra.mxu0 %v11173_v62 }
 0x148   :  { %1668 = vmatprep.subr.bf16.mxu0 %v11166_v7 }
 0x149   :  { %v461_v16 = vpop.f32.mrf.mxu0 }
 0x14a   :  { %12342 = vmatprep.mubr.msk.f32.mxu0 %vm916_vm1, %v461_v16  ;;  %v1214_v16 = vld [vmem:[#allocation10 + $0x280] sm:$0xff] }
 0x14b   :  { %v463_v17 = vpop.f32.mrf.mxu0  ;;  %v548_v18 = vpop.f32.mrf.mxu1  ;;  %1669 = vmatpush1.bf16.msra.mxu0 %v11165_v6 }
 0x14c   :  { %1670 = vmatprep.subr.bf16.mxu0 %v11158_v15  ;;  %v1218_v17 = vld [vmem:[#allocation10 + $0x2a0] sm:$0xff] }
 0x14d   :  { %v466_v19 = vpop.f32.mrf.mxu0  ;;  %v550_v20 = vpop.f32.mrf.mxu1 }
 0x14e   :  { %12343 = vmatmul.mubr.msk.f32.gmra.mxu0 %vm916_vm1, %v466_v19  ;;  %v11148_v19 = vcombine.high %v1214_v16, %v1218_v17  ;;  %v1219_v20 = vld [vmem:[#allocation10 + $0x2a8] sm:$0xff] }
 0x14f   :  { %12345 = vmatprep.mubr.msk.f32.mxu0 %vm916_vm1, %v548_v18  ;;  %v553_v21 = vpop.f32.mrf.mxu1  ;;  %v468_v22 = vpop.f32.mrf.mxu0  ;;  %v1215_v18 = vld [vmem:[#allocation10 + $0x288] sm:$0xff]  ;;  %1671 = vmatpush1.bf16.msra.mxu0 %v11157_v14 }
 0x150   :  { %v11149_v22 = vcombine.low %v1215_v18, %v1219_v20  ;;  %1631 = vmatprep.subr.bf16.mxu1 %v11148_v19 }
 0x151   :  { %v555_v23 = vpop.f32.mrf.mxu1 }
 0x152   :  { %12346 = vmatmul.mubr.msk.f32.gmra.mxu0 %vm916_vm1, %v553_v21  ;;  %v11147_v21 = vcombine.low %v1214_v16, %v1218_v17  ;;  %v11150_v23 = vcombine.high %v1215_v18, %v1219_v20 }
 0x154   :  { %1672 = vmatprep.subr.bf16.mxu0 %v11150_v23  ;;  %1632 = vmatpush1.bf16.msra.mxu1 %v11147_v21 }
 0x155   :  { %1673 = vmatpush1.bf16.msra.mxu0 %v11149_v22 }
 0x159   :  { %v635_v24 = vpop.f32.mrf.mxu0 }
 0x15a   :  { %12348 = vmatprep.mubr.msk.f32.mxu0 %vm916_vm1, %v635_v24  ;;  %v1206_v24 = vld [vmem:[#allocation10 + $0x240] sm:$0xff] }
 0x15b   :  { %v637_v25 = vpop.f32.mrf.mxu0  ;;  %v722_v26 = vpop.f32.mrf.mxu1 }
 0x15c   :  { %v1210_v25 = vld [vmem:[#allocation10 + $0x260] sm:$0xff] }
 0x15d   :  { %v640_v27 = vpop.f32.mrf.mxu0  ;;  %v724_v28 = vpop.f32.mrf.mxu1 }
 0x15e   :  { %12349 = vmatmul.mubr.msk.f32.gmra.mxu0 %vm916_vm1, %v640_v27  ;;  %v11140_v27 = vcombine.high %v1206_v24, %v1210_v25  ;;  %v1211_v28 = vld [vmem:[#allocation10 + $0x268] sm:$0xff] }
 0x15f   :  { %12351 = vmatprep.mubr.msk.f32.mxu0 %vm916_vm1, %v722_v26  ;;  %v727_v29 = vpop.f32.mrf.mxu1  ;;  %v642_v30 = vpop.f32.mrf.mxu0  ;;  %v1207_v26 = vld [vmem:[#allocation10 + $0x248] sm:$0xff] }
 0x160   :  { %v11141_v30 = vcombine.low %v1207_v26, %v1211_v28  ;;  %1633 = vmatprep.subr.bf16.mxu1 %v11140_v27 }
 0x161   :  { %v729_v31 = vpop.f32.mrf.mxu1 }
 0x162   :  { %12352 = vmatmul.mubr.msk.f32.gmra.mxu0 %vm916_vm1, %v727_v29  ;;  %v11139_v29 = vcombine.low %v1206_v24, %v1210_v25  ;;  %v11142_v31 = vcombine.high %v1207_v26, %v1211_v28 }
 0x164   :  { %1674 = vmatprep.subr.bf16.mxu0 %v11142_v31  ;;  %1634 = vmatpush1.bf16.msra.mxu1 %v11139_v29 }
 0x165   :  { %1675 = vmatpush1.bf16.msra.mxu0 %v11141_v30 }
 0x169   :  { %v809_v32 = vpop.f32.mrf.mxu0 }
 0x16a   :  { %12354 = vmatprep.mubr.msk.f32.mxu0 %vm916_vm1, %v809_v32  ;;  %v1198_v32 = vld [vmem:[#allocation10 + $0x200] sm:$0xff] }
 0x16b   :  { %v811_v33 = vpop.f32.mrf.mxu0  ;;  %v896_v34 = vpop.f32.mrf.mxu1 }
 0x16c   :  { %v1202_v33 = vld [vmem:[#allocation10 + $0x220] sm:$0xff] }
 0x16d   :  { %v814_v35 = vpop.f32.mrf.mxu0  ;;  %v898_v36 = vpop.f32.mrf.mxu1 }
 0x16e   :  { %12355 = vmatmul.mubr.msk.f32.gmra.mxu0 %vm916_vm1, %v814_v35  ;;  %v11131_v35 = vcombine.low %v1198_v32, %v1202_v33  ;;  %v11132_v36 = vcombine.high %v1198_v32, %v1202_v33 }
 0x16f   :  { %v816_v37 = vpop.f32.mrf.mxu0  ;;  %v901_v38 = vpop.f32.mrf.mxu1  ;;  %12357 = vmatprep.mubr.msk.f32.mxu0 %vm916_vm1, %v896_v34  ;;  %v1199_v34 = vld [vmem:[#allocation10 + $0x208] sm:$0xff] }
 0x170   :  { %v1203_v37 = vld [vmem:[#allocation10 + $0x228] sm:$0xff]  ;;  %1635 = vmatprep.subr.bf16.mxu1 %v11132_v36 }
 0x171   :  { %v903_v39 = vpop.f32.mrf.mxu1  ;;  %v11133_v40 = vcombine.low %v1199_v34, %v1203_v37  ;;  %v11134_v41 = vcombine.high %v1199_v34, %v1203_v37  ;;  %1636 = vmatpush1.bf16.msra.mxu1 %v11131_v35 }
 0x172   :  { %12358 = vmatmul.mubr.msk.f32.gmra.mxu0 %vm916_vm1, %v901_v38  ;;  %v12831_v38 = vld [vmem:[#allocation10 + $0x3d0] sm:$0xff] }
 0x173   :  { %v12833_v39 = vld [vmem:[#allocation10 + $0x3f0] sm:$0xff]  ;;  %1694 = vmatprep.mubr.bf16.mxu0 %v12650_v42  ;;  %1676 = vmatprep.subr.bf16.mxu0 %v11134_v41 }
 0x174   :  { %v11191_v43 = vcombine.low %v12831_v38, %v12833_v39  ;;  %v11192_v46 = vcombine.high %v12831_v38, %v12833_v39  ;;  %1677 = vmatpush1.bf16.msra.mxu0 %v11133_v40 }
 0x175   :  { %1744 = vmatprep.subr.bf16.mxu0 %v11194_v48 }
 0x176   :  { %1703 = vmatprep.subr.bf16.mxu1 %v11192_v46 }
 0x1fe   :  { %v12338_v49 = vpop.f32.mrf.mxu0 }
 0x1ff   :  { %v1037_v51 = vadd.f32 %v12338_v49, %v12849_v50 }
 0x200   :  { %v1031_v52 = vpop.f32.mrf.mxu0 }
 0x201   :  { %v1111_v53 = vmax.f32 %v1037_v51, 0.0  ;;  %v1032_v54 = vadd.f32 %v12849_v50, %v1031_v52 }
 0x202   :  { %v12341_v55 = vpop.f32.mrf.mxu0 }
 0x203   :  { %v1110_v56 = vmax.f32 %v1032_v54, 0.0  ;;  %v1047_v57 = vadd.f32 %v12341_v55, %v12849_v50 }
 0x204   :  { %v1041_v58 = vpop.f32.mrf.mxu0 }
 0x205   :  { %v12854_v59 = vpack.c.bf16 %v1111_v53, %v1110_v56  ;;  %v1113_v60 = vmax.f32 %v1047_v57, 0.0  ;;  %v1042_v61 = vadd.f32 %v12849_v50, %v1041_v58 }
 0x207   :  { %v1112_v62 = vmax.f32 %v1042_v61, 0.0  ;;  %v12858_v63 = vunpack.c.l.b16 %v12854_v59 }
 0x209   :  { %v12860_v0 = vpack.c.bf16 %v1113_v60, %v1112_v62  ;;  %v2349_v2 = vrot.slane %v12858_v63, 2  ;;  %v2921_v3 = vrot.slane %v12858_v63, 3  ;;  %v3493_v4 = vrot.slane %v12858_v63, 4 }
 0x20a   :  { %v4065_v5 = vrot.slane %v12858_v63, 5  ;;  %v4637_v6 = vrot.slane %v12858_v63, 6  ;;  %v5209_v7 = vrot.slane %v12858_v63, 7 }
 0x20b   :  { %v12863_v1 = vunpack.c.l.b16 %v12860_v0 }
 0x20d   :  { %v2350_v9 = vrot.slane %v12863_v1, 1  ;;  %v2922_v10 = vrot.slane %v12863_v1, 2  ;;  %v3494_v11 = vrot.slane %v12863_v1, 3  ;;  %v4066_v12 = vrot.slane %v12863_v1, 4 }
 0x20e   :  { %v12344_v8 = vpop.f32.mrf.mxu0  ;;  %v4638_v14 = vrot.slane %v12863_v1, 5  ;;  %v5210_v15 = vrot.slane %v12863_v1, 6  ;;  %v1785_v32 = vrot.slane %v12863_v1, 7 }
 0x20f   :  { %v1057_v13 = vadd.f32 %v12344_v8, %v12849_v50  ;;  %v2351_v17 = vsel %vm1279_vm2, %v2350_v9, %v2349_v2  ;;  %v2923_v18 = vsel %vm1279_vm2, %v2922_v10, %v2921_v3  ;;  %v3495_v22 = vsel %vm1279_vm2, %v3494_v11, %v3493_v4 }
 0x210   :  { %v1051_v16 = vpop.f32.mrf.mxu0  ;;  %v4067_v23 = vsel %vm1279_vm2, %v4066_v12, %v4065_v5  ;;  %v4639_v24 = vsel %vm1279_vm2, %v4638_v14, %v4637_v6  ;;  %v5211_v25 = vsel %vm1279_vm2, %v5210_v15, %v5209_v7  ;;  %v1786_v37 = vsel %vm1279_vm2, %v1785_v32, %v12858_v63 }
 0x211   :  { %v1115_v19 = vmax.f32 %v1057_v13, 0.0  ;;  %v1052_v20 = vadd.f32 %v12849_v50, %v1051_v16 }
 0x212   :  { %v12347_v21 = vpop.f32.mrf.mxu0 }
 0x213   :  { %v1114_v26 = vmax.f32 %v1052_v20, 0.0  ;;  %v1067_v27 = vadd.f32 %v12347_v21, %v12849_v50 }
 0x214   :  { %v1061_v28 = vpop.f32.mrf.mxu0 }
 0x215   :  { %v12886_v29 = vpack.c.bf16 %v1115_v19, %v1114_v26  ;;  %v1117_v30 = vmax.f32 %v1067_v27, 0.0  ;;  %v1062_v31 = vadd.f32 %v12849_v50, %v1061_v28  ;;  %v12931_v28 = vld [vmem:[#allocation10 + $0x390] sm:$0xff] }
 0x217   :  { %v12891_v33 = vunpack.c.l.b16 %v12886_v29  ;;  %v1116_v34 = vmax.f32 %v1062_v31, 0.0 }
 0x219   :  { %v1129_v35 = vpack.c.bf16 %v1117_v30, %v1116_v34  ;;  %v1787_v36 = vrot.slane %v12891_v33, 6  ;;  %v2352_v40 = vsel %vm1282_vm3, %v12891_v33, %v2351_v17  ;;  %v2924_v41 = vrot.slane %v12891_v33, 1  ;;  %v12933_v30 = vld [vmem:[#allocation10 + $0x3b0] sm:$0xff] }
 0x21a   :  { %v3496_v46 = vrot.slane %v12891_v33, 2  ;;  %v4068_v58 = vrot.slane %v12891_v33, 3  ;;  %v4640_v10 = vrot.slane %v12891_v33, 4  ;;  %v5212_v14 = vrot.slane %v12891_v33, 5 }
 0x21b   :  { %v12900_v48 = vunpack.c.l.b16 %v1129_v35  ;;  %v1788_v49 = vsel %vm1282_vm3, %v1787_v36, %v1786_v37  ;;  %v2925_v51 = vsel %vm1282_vm3, %v2924_v41, %v2923_v18  ;;  %v11183_v37 = vcombine.low %v12931_v28, %v12933_v30 }
 0x21c   :  { %v3497_v52 = vsel %vm1282_vm3, %v3496_v46, %v3495_v22  ;;  %v4069_v5 = vsel %vm1282_vm3, %v4068_v58, %v4067_v23  ;;  %v4641_v17 = vsel %vm1282_vm3, %v4640_v10, %v4639_v24  ;;  %v5213_v22 = vsel %vm1282_vm3, %v5212_v14, %v5211_v25 }
 0x21d   :  { %v1789_v53 = vrot.slane %v12900_v48, 5  ;;  %v2353_v55 = vrot.slane %v12900_v48, 7  ;;  %v2926_v56 = vsel %vm1285_vm4, %v12900_v48, %v2925_v51  ;;  %v3498_v57 = vrot.slane %v12900_v48, 1 }
 0x21e   :  { %v12350_v54 = vpop.f32.mrf.mxu0  ;;  %v4070_v62 = vrot.slane %v12900_v48, 2  ;;  %v4642_v11 = vrot.slane %v12900_v48, 3  ;;  %v5214_v15 = vrot.slane %v12900_v48, 4  ;;  %v12949_v41 = vunpack.c.h.b16 %v12860_v0 }
 0x21f   :  { %v1077_v60 = vadd.f32 %v12350_v54, %v12849_v50  ;;  %v1790_v61 = vsel %vm1285_vm4, %v1789_v53, %v1788_v49  ;;  %v2354_v3 = vsel %vm1285_vm4, %v2353_v55, %v2352_v40  ;;  %v3499_v4 = vsel %vm1285_vm4, %v3498_v57, %v3497_v52 }
 0x220   :  { %v1071_v2 = vpop.f32.mrf.mxu0  ;;  %v4071_v9 = vsel %vm1285_vm4, %v4070_v62, %v4069_v5  ;;  %v4643_v21 = vsel %vm1285_vm4, %v4642_v11, %v4641_v17  ;;  %v5215_v27 = vsel %vm1285_vm4, %v5214_v15, %v5213_v22  ;;  %v12952_v46 = vunpack.c.h.b16 %v12886_v29 }
 0x221   :  { %v1119_v6 = vmax.f32 %v1077_v60, 0.0  ;;  %v1072_v7 = vadd.f32 %v12849_v50, %v1071_v2  ;;  %v12957_v52 = vunpack.c.h.b16 %v12854_v59  ;;  %v12959_v53 = vunpack.c.h.b16 %v1129_v35 }
 0x222   :  { %v12353_v8 = vpop.f32.mrf.mxu0  ;;  %v11184_v54 = vcombine.high %v12931_v28, %v12933_v30  ;;  %v1278_v59 = vrot.slane %v12858_v63, 1  ;;  %v5791_v5 = vrot.slane %v12952_v46, 6  ;;  %v6363_v44 = vrot.slane %v12952_v46, 7 }
 0x223   :  { %v1118_v12 = vmax.f32 %v1072_v7, 0.0  ;;  %v1087_v13 = vadd.f32 %v12353_v8, %v12849_v50  ;;  %v5793_v63 = vrot.slane %v12959_v53, 5 }
 0x224   :  { %v1081_v16 = vpop.f32.mrf.mxu0 }
 0x225   :  { %v1130_v18 = vpack.c.bf16 %v1119_v6, %v1118_v12  ;;  %v1121_v19 = vmax.f32 %v1087_v13, 0.0  ;;  %v1082_v20 = vadd.f32 %v12849_v50, %v1081_v16 }
 0x227   :  { %v12928_v23 = vunpack.c.l.b16 %v1130_v18  ;;  %v1120_v26 = vmax.f32 %v1082_v20, 0.0  ;;  %v12976_v6 = vunpack.c.h.b16 %v1130_v18  ;;  %v1281_v20 = vrot.slane %v12891_v33, 7 }
 0x229   :  { %v12935_v31 = vpack.c.bf16 %v1121_v19, %v1120_v26  ;;  %v1791_v24 = vrot.slane %v12928_v23, 4  ;;  %v2355_v32 = vrot.slane %v12928_v23, 6  ;;  %v2927_v34 = vrot.slane %v12928_v23, 7 }
 0x22a   :  { %v3500_v25 = vsel %vm1288_vm5, %v12928_v23, %v3499_v4  ;;  %v4072_v60 = vrot.slane %v12928_v23, 1  ;;  %v5789_v4 = vrot.slane %v12949_v41, 7  ;;  %v5216_v18 = vrot.slane %v12928_v23, 3 }
 0x22b   :  { %v12943_v36 = vunpack.c.l.b16 %v12935_v31  ;;  %v1792_v40 = vsel %vm1288_vm5, %v1791_v24, %v1790_v61  ;;  %v2356_v49 = vsel %vm1288_vm5, %v2355_v32, %v2354_v3  ;;  %v2928_v51 = vsel %vm1288_vm5, %v2927_v34, %v2926_v56  ;;  %v12999_v34 = vld [vmem:[#allocation10 + $0x398] sm:$0xff] }
 0x22c   :  { %v4644_v61 = vrot.slane %v12928_v23, 2  ;;  %v4073_v12 = vsel %vm1288_vm5, %v4072_v60, %v4071_v9  ;;  %v1284_v32 = vrot.slane %v12900_v48, 6  ;;  %v1287_v33 = vrot.slane %v12928_v23, 5 }
 0x22d   :  { %v1793_v55 = vrot.slane %v12943_v36, 3  ;;  %v2357_v0 = vrot.slane %v12943_v36, 5  ;;  %v2929_v29 = vrot.slane %v12943_v36, 6  ;;  %v3501_v58 = vrot.slane %v12943_v36, 7 }
 0x22e   :  { %v12356_v57 = vpop.f32.mrf.mxu0  ;;  %v4645_v13 = vsel %vm1288_vm5, %v4644_v61, %v4643_v21  ;;  %v4646_v14 = vrot.slane %v12943_v36, 1  ;;  %v12987_v17 = vsel %vm1291_vm6, %v12943_v36, %v4073_v12  ;;  %v5218_v9 = vrot.slane %v12943_v36, 2 }
 0x22f   :  { %v1097_v56 = vadd.f32 %v12356_v57, %v12849_v50  ;;  %v1794_v35 = vsel %vm1291_vm6, %v1793_v55, %v1792_v40  ;;  %v2358_v2 = vsel %vm1291_vm6, %v2357_v0, %v2356_v49  ;;  %v2930_v3 = vsel %vm1291_vm6, %v2929_v29, %v2928_v51 }
 0x230   :  { %v1091_v62 = vpop.f32.mrf.mxu0  ;;  %v3502_v11 = vsel %vm1291_vm6, %v3501_v58, %v3500_v25  ;;  %v12992_v22 = vsel %vm1291_vm6, %v4646_v14, %v4645_v13  ;;  %v5790_v21 = vsel %vm1279_vm2, %v5789_v4, %v12957_v52  ;;  %v13001_v25 = vld [vmem:[#allocation10 + $0x3b8] sm:$0xff]  ;;  %v5217_v49 = vsel %vm1288_vm5, %v5216_v18, %v5215_v27  ;;  %v13025_v4 = vld [vmem:[#allocation10 + $0x370] sm:$0xff] }
 0x231   :  { %v1123_v7 = vmax.f32 %v1097_v56, 0.0  ;;  %v1092_v8 = vadd.f32 %v12849_v50, %v1091_v62  ;;  %v5792_v40 = vsel %vm1282_vm3, %v5791_v5, %v5790_v21  ;;  %v5795_v55 = vrot.slane %v12976_v6, 4  ;;  %v13023_v62 = vld [vmem:[#allocation10 + $0x350] sm:$0xff]  ;;  %v13049_v21 = vld [vmem:[#allocation10 + $0x358] sm:$0xff] }
 0x232   :  { %v12359_v10 = vpop.f32.mrf.mxu0  ;;  %v5794_v51 = vsel %vm1285_vm4, %v5793_v63, %v5792_v40  ;;  %v13011_v48 = vsel %vm1291_vm6, %v5218_v9, %v5217_v49  ;;  %v1280_v29 = vsel %vm1279_vm2, %v12863_v1, %v1278_v59  ;;  %v1290_v58 = vrot.slane %v12943_v36, 4 }
 0x233   :  { %v1122_v15 = vmax.f32 %v1092_v8, 0.0  ;;  %v1107_v16 = vadd.f32 %v12359_v10, %v12849_v50  ;;  %v11185_v23 = vcombine.low %v12999_v34, %v13001_v25  ;;  %v13019_v27 = vsel %vm1288_vm5, %v5795_v55, %v5794_v51 }
 0x234   :  { %v1101_v19 = vpop.f32.mrf.mxu0  ;;  %v1283_v56 = vsel %vm1282_vm3, %v1281_v20, %v1280_v29  ;;  %v11186_v10 = vcombine.high %v12999_v34, %v13001_v25  ;;  %v11175_v14 = vcombine.low %v13023_v62, %v13025_v4  ;;  %v13044_v18 = vunpack.c.h.b16 %v12935_v31 }
 0x235   :  { %v1132_v26 = vpack.c.bf16 %v1123_v7, %v1122_v15  ;;  %v1102_v24 = vadd.f32 %v12849_v50, %v1101_v19  ;;  %v1125_v50 = vmax.f32 %v1107_v16, 0.0  ;;  %v1286_v1 = vsel %vm1285_vm4, %v1284_v32, %v1283_v56 }
 0x236   :  { %v1289_v63 = vsel %vm1288_vm5, %v1287_v33, %v1286_v1  ;;  %v6361_v1 = vrot.slane %v12957_v52, 1  ;;  %v6367_v34 = vrot.slane %v12976_v6, 5 }
 0x237   :  { %v13008_v57 = vunpack.c.l.b16 %v1132_v26  ;;  %v1124_v0 = vmax.f32 %v1102_v24, 0.0  ;;  %v1292_v13 = vsel %vm1291_vm6, %v1290_v58, %v1289_v63  ;;  %v13063_v51 = vunpack.c.h.b16 %v1132_v26  ;;  %v13082_v26 = vld [vmem:[#allocation10 + $0x338] sm:$0xff] }
 0x239   :  { %v1133_v60 = vpack.c.bf16 %v1125_v50, %v1124_v0  ;;  %v1293_v61 = vrot.slane %v13008_v57, 3  ;;  %v1795_v5 = vrot.slane %v13008_v57, 2  ;;  %v2359_v36 = vrot.slane %v13008_v57, 4  ;;  %v13069_v0 = vld [vmem:[#allocation10 + $0x310] sm:$0xff] }
 0x23a   :  { %v2931_v59 = vrot.slane %v13008_v57, 5  ;;  %v3503_v7 = vrot.slane %v13008_v57, 6  ;;  %v4075_v33 = vrot.slane %v13008_v57, 7  ;;  %v11176_v50 = vcombine.high %v13023_v62, %v13025_v4 }
 0x23b   :  { %v13032_v8 = vunpack.c.l.b16 %v1133_v60  ;;  %v1796_v12 = vsel %vm1294_vm7, %v1795_v5, %v1794_v35  ;;  %v2360_v15 = vsel %vm1294_vm7, %v2359_v36, %v2358_v2  ;;  %v1295_v19 = vsel %vm1294_vm7, %v1293_v61, %v1292_v13  ;;  %v13051_v35 = vld [vmem:[#allocation10 + $0x378] sm:$0xff] }
 0x23c   :  { %v2932_v16 = vsel %vm1294_vm7, %v2931_v59, %v2930_v3  ;;  %v3504_v2 = vsel %vm1294_vm7, %v3503_v7, %v3502_v11  ;;  %v13071_v11 = vld [vmem:[#allocation10 + $0x330] sm:$0xff]  ;;  %v13076_v58 = vunpack.c.h.b16 %v1133_v60  ;;  %v11177_v56 = vcombine.low %v13049_v21, %v13051_v35  ;;  %v13080_v61 = vld [vmem:[#allocation10 + $0x318] sm:$0xff] }
 0x23d   :  { %v1296_v20 = vrot.slane %v13032_v8, 2  ;;  %v1797_v9 = vrot.slane %v13032_v8, 1  ;;  %v2361_v24 = vrot.slane %v13032_v8, 3  ;;  %v2933_v32 = vrot.slane %v13032_v8, 4 }
 0x23e   :  { %v3505_v3 = vrot.slane %v13032_v8, 5  ;;  %v4077_v49 = vrot.slane %v13032_v8, 6  ;;  %v5797_v5 = vrot.slane %v13044_v18, 3  ;;  %v4076_v59 = vsel %vm1294_vm7, %v4075_v33, %v12987_v17  ;;  %v13179_v33 = vld [vmem:[#allocation10 + $0x2b8] sm:$0xff] }
 0x23f   :  { %v1298_v31 = vsel %vm1297_vm8, %v1296_v20, %v1295_v19  ;;  %v13059_v40 = vsel %vm1297_vm8, %v1797_v9, %v1796_v12  ;;  %v13074_v29 = vsel %vm1297_vm8, %v2361_v24, %v2360_v15  ;;  %v13089_v36 = vsel %vm1297_vm8, %v2933_v32, %v2932_v16  ;;  %v13124_v15 = vld [vmem:[#allocation10 + $0x2f0] sm:$0xff]  ;;  %v13133_v19 = vld [vmem:[#allocation10 + $0x2d8] sm:$0xff] }
 0x240   :  { %v13065_v55 = vpack.c.b16 %v1298_v31, %v1298_v31  ;;  %v13092_v60 = vsel %vm1297_vm8, %v3505_v3, %v3504_v2  ;;  %v4649_v7 = vrot.slane %v13032_v8, 7  ;;  %v11178_v63 = vcombine.high %v13049_v21, %v13051_v35  ;;  %v13135_v20 = vld [vmem:[#allocation10 + $0x2f8] sm:$0xff]  ;;  %v13175_v3 = vld [vmem:[#allocation10 + $0x2b0] sm:$0xff] }
 0x241   :  { %v11167_v12 = vcombine.low %v13069_v0, %v13071_v11  ;;  %v13108_v13 = vsel %vm1297_vm8, %v4077_v49, %v4076_v59  ;;  %v5220_v17 = vrot.slane %v13008_v57, 1  ;;  %v11168_v38 = vcombine.high %v13069_v0, %v13071_v11  ;;  %v13177_v31 = vld [vmem:[#allocation10 + $0x298] sm:$0xff] }
 0x242   :  { %1654 = vmatmul.mubr.bf16.vlgmr.msra.gmra.mxu1 %v13065_v55  ;;  %1695 = vmatmul.mubr.bf16.vlgmr.msra.gmra.mxu0 %v13065_v55  ;;  %v11169_v39 = vcombine.low %v13080_v61, %v13082_v26  ;;  %v11170_v45 = vcombine.high %v13080_v61, %v13082_v26  ;;  %v6933_v16 = vrot.slane %v12957_v52, 2  ;;  %v5798_v35 = vsel %vm1291_vm6, %v5797_v5, %v13019_v27 }
 0x243   :  { %1704 = vmatpush1.bf16.msra.mxu1 %v11191_v43  ;;  %1745 = vmatpush1.bf16.msra.mxu0 %v11193_v47  ;;  %v5799_v43 = vrot.slane %v13063_v51, 2  ;;  %v13122_v47 = vld [vmem:[#allocation10 + $0x2d0] sm:$0xff]  ;;  %v5221_v21 = vsel %vm1294_vm7, %v5220_v17, %v13011_v48  ;;  %v6365_v24 = vrot.slane %v12959_v53, 6  ;;  %v6934_v27 = vrot.slane %v12949_v41, 1 }
 0x244   :  { %1705 = vmatprep.subr.bf16.mxu1 %v11184_v54  ;;  %1746 = vmatprep.subr.bf16.mxu0 %v11186_v10  ;;  %v4648_v54 = vsel %vm1294_vm7, %v13008_v57, %v12992_v22  ;;  %v5801_v10 = vrot.slane %v13076_v58, 1  ;;  %v6362_v22 = vsel %vm1279_vm2, %v12949_v41, %v6361_v1  ;;  %v13154_v57 = vsel %vm1297_vm8, %v13032_v8, %v5221_v21  ;;  %v13169_v8 = vld [vmem:[#allocation10 + $0x290] sm:$0xff] }
 0x245   :  { %1735 = vmatprep.mubr.bf16.mxu1 %v12650_v42  ;;  %1776 = vmatprep.mubr.bf16.mxu0 %v12650_v42  ;;  %v13138_v9 = vsel %vm1297_vm8, %v4649_v7, %v4648_v54  ;;  %v5800_v48 = vsel %vm1294_vm7, %v5799_v43, %v5798_v35  ;;  %v11159_v28 = vcombine.low %v13122_v47, %v13124_v15  ;;  %v6371_v61 = vrot.slane %v13063_v51, 3  ;;  %v1212_v21 = vld [vmem:[#allocation10 + $0x270] sm:$0xff] }
 0x246   :  { %v11160_v30 = vcombine.high %v13122_v47, %v13124_v15  ;;  %v11161_v25 = vcombine.low %v13133_v19, %v13135_v20  ;;  %v13172_v32 = vsel %vm1297_vm8, %v5801_v10, %v5800_v48  ;;  %v7505_v26 = vrot.slane %v12957_v52, 3  ;;  %v1213_v48 = vld [vmem:[#allocation10 + $0x278] sm:$0xff] }
 0x247   :  { %1706 = vmatpush1.bf16.msra.mxu1 %v11183_v37  ;;  %1747 = vmatpush1.bf16.msra.mxu0 %v11185_v23  ;;  %v6364_v37 = vsel %vm1282_vm3, %v6363_v44, %v6362_v22  ;;  %v11162_v23 = vcombine.high %v13133_v19, %v13135_v20  ;;  %v6373_v5 = vrot.slane %v13076_v58, 2  ;;  %v6935_v1 = vsel %vm1279_vm2, %v6934_v27, %v6933_v16  ;;  %v1208_v20 = vld [vmem:[#allocation10 + $0x250] sm:$0xff] }
 0x248   :  { %1707 = vmatprep.subr.bf16.mxu1 %v11176_v50  ;;  %1748 = vmatprep.subr.bf16.mxu0 %v11178_v63  ;;  %v6366_v2 = vsel %vm1285_vm4, %v6365_v24, %v6364_v37  ;;  %v6369_v50 = vrot.slane %v13044_v18, 4  ;;  %v6937_v59 = vrot.slane %v12959_v53, 7  ;;  %v6939_v7 = vrot.slane %v12976_v6, 6 }
 0x249   :  { %v6368_v49 = vsel %vm1288_vm5, %v6367_v34, %v6366_v2  ;;  %v6936_v17 = vsel %vm1282_vm3, %v12952_v46, %v6935_v1  ;;  %v6941_v43 = vrot.slane %v13044_v18, 5  ;;  %v7506_v62 = vrot.slane %v12949_v41, 2  ;;  %v1205_v1 = vld [vmem:[#allocation10 + $0x238] sm:$0xff] }
 0x24a   :  { %v6370_v63 = vsel %vm1291_vm6, %v6369_v50, %v6368_v49  ;;  %v11152_v4 = vcombine.high %v13169_v8, %v13175_v3  ;;  %v6943_v47 = vrot.slane %v13063_v51, 4  ;;  %v6945_v15 = vrot.slane %v13076_v58, 3 }
 0x24b   :  { %1708 = vmatpush1.bf16.msra.mxu1 %v11175_v14  ;;  %1749 = vmatpush1.bf16.msra.mxu0 %v11177_v56  ;;  %v11154_v14 = vcombine.high %v13177_v31, %v13179_v33  ;;  %v6372_v56 = vsel %vm1294_vm7, %v6371_v61, %v6370_v63  ;;  %v7508_v10 = vrot.slane %v12952_v46, 1  ;;  %v7511_v16 = vrot.slane %v12976_v6, 7 }
 0x24c   :  { %1709 = vmatprep.subr.bf16.mxu1 %v11168_v38  ;;  %1750 = vmatprep.subr.bf16.mxu0 %v11170_v45  ;;  %v6938_v38 = vsel %vm1285_vm4, %v6937_v59, %v6936_v17  ;;  %v13204_v44 = vsel %vm1297_vm8, %v6373_v5, %v6372_v56  ;;  %v8077_v19 = vrot.slane %v12957_v52, 4  ;;  %v7507_v22 = vsel %vm1279_vm2, %v7506_v62, %v7505_v26 }
 0x24d   :  { %v6940_v45 = vsel %vm1288_vm5, %v6939_v7, %v6938_v38  ;;  %v7513_v0 = vrot.slane %v13044_v18, 6  ;;  %v8078_v11 = vrot.slane %v12949_v41, 3  ;;  %v7509_v27 = vsel %vm1282_vm3, %v7508_v10, %v7507_v22 }
 0x24e   :  { %v6942_v54 = vsel %vm1291_vm6, %v6941_v43, %v6940_v45  ;;  %v7510_v37 = vsel %vm1285_vm4, %v12959_v53, %v7509_v27  ;;  %v7515_v34 = vrot.slane %v13063_v51, 5  ;;  %v8082_v49 = vrot.slane %v12959_v53, 1 }
 0x24f   :  { %1710 = vmatpush1.bf16.msra.mxu1 %v11167_v12  ;;  %1751 = vmatpush1.bf16.msra.mxu0 %v11169_v39  ;;  %v6944_v35 = vsel %vm1294_vm7, %v6943_v47, %v6942_v54  ;;  %v11151_v12 = vcombine.low %v13169_v8, %v13175_v3  ;;  %v1209_v39 = vld [vmem:[#allocation10 + $0x258] sm:$0xff]  ;;  %v11144_v8 = vcombine.high %v1208_v20, %v1212_v21  ;;  %v8080_v3 = vrot.slane %v12952_v46, 2  ;;  %v1194_v54 = vld [vmem:[#allocation10 + $0x1e0] sm:$0xff] }
 0x250   :  { %1711 = vmatprep.subr.bf16.mxu1 %v11160_v30  ;;  %1752 = vmatprep.subr.bf16.mxu0 %v11162_v23  ;;  %v13223_v24 = vsel %vm1297_vm8, %v6945_v15, %v6944_v35  ;;  %v11153_v30 = vcombine.low %v13177_v31, %v13179_v33  ;;  %v7517_v23 = vrot.slane %v13076_v58, 4  ;;  %v7512_v2 = vsel %vm1288_vm5, %v7511_v16, %v7510_v37  ;;  %v1200_v31 = vld [vmem:[#allocation10 + $0x210] sm:$0xff]  ;;  %v1190_v15 = vld [vmem:[#allocation10 + $0x1c0] sm:$0xff]  ;;  %v1195_v35 = vld [vmem:[#allocation10 + $0x1e8] sm:$0xff] }
 0x251   :  { %v11146_v50 = vcombine.high %v1209_v39, %v1213_v48  ;;  %v7514_v33 = vsel %vm1291_vm6, %v7513_v0, %v7512_v2  ;;  %v8079_v61 = vsel %vm1279_vm2, %v8078_v11, %v8077_v19  ;;  %v8085_v26 = vrot.slane %v13044_v18, 7 }
 0x252   :  { %v11143_v5 = vcombine.low %v1208_v20, %v1212_v21  ;;  %v7516_v59 = vsel %vm1294_vm7, %v7515_v34, %v7514_v33  ;;  %v8081_v7 = vsel %vm1282_vm3, %v8080_v3, %v8079_v61  ;;  %v8087_v43 = vrot.slane %v13063_v51, 6  ;;  %v1191_v21 = vld [vmem:[#allocation10 + $0x1c8] sm:$0xff] }
 0x253   :  { %1712 = vmatpush1.bf16.msra.mxu1 %v11159_v28  ;;  %1753 = vmatpush1.bf16.msra.mxu0 %v11161_v25  ;;  %v1204_v28 = vld [vmem:[#allocation10 + $0x230] sm:$0xff]  ;;  %v1201_v25 = vld [vmem:[#allocation10 + $0x218] sm:$0xff]  ;;  %v13241_v63 = vsel %vm1297_vm8, %v7517_v23, %v7516_v59  ;;  %v8083_v17 = vsel %vm1285_vm4, %v8082_v49, %v8081_v7  ;;  %v8089_v62 = vrot.slane %v13076_v58, 5  ;;  %v8649_v56 = vrot.slane %v12957_v52, 5  ;;  %v1182_v23 = vld [vmem:[#allocation10 + $0x180] sm:$0xff] }
 0x254   :  { %1713 = vmatprep.subr.bf16.mxu1 %v11152_v4  ;;  %1754 = vmatprep.subr.bf16.mxu0 %v11154_v14  ;;  %v11145_v4 = vcombine.low %v1209_v39, %v1213_v48  ;;  %v8084_v14 = vsel %vm1288_vm5, %v12976_v6, %v8083_v17  ;;  %v8650_v38 = vrot.slane %v12949_v41, 4  ;;  %v11136_v45 = vcombine.high %v1200_v31, %v1204_v28  ;;  %v1183_v33 = vld [vmem:[#allocation10 + $0x188] sm:$0xff] }
 0x255   :  { %v11138_v47 = vcombine.high %v1201_v25, %v1205_v1  ;;  %v8086_v10 = vsel %vm1291_vm6, %v8085_v26, %v8084_v14  ;;  %v8652_v16 = vrot.slane %v12952_v46, 3  ;;  %v11135_v19 = vcombine.low %v1200_v31, %v1204_v28  ;;  %v1187_v61 = vld [vmem:[#allocation10 + $0x1a8] sm:$0xff]  ;;  %v1174_v14 = vld [vmem:[#allocation10 + $0x140] sm:$0xff] }
 0x256   :  { %v11137_v20 = vcombine.low %v1201_v25, %v1205_v1  ;;  %v8088_v22 = vsel %vm1294_vm7, %v8087_v43, %v8086_v10  ;;  %v8651_v11 = vsel %vm1279_vm2, %v8650_v38, %v8649_v56  ;;  %v8656_v39 = vrot.slane %v12976_v6, 1 }
 0x257   :  { %1714 = vmatpush1.bf16.msra.mxu1 %v11151_v12  ;;  %1755 = vmatpush1.bf16.msra.mxu0 %v11153_v30  ;;  %v13254_v0 = vsel %vm1297_vm8, %v8089_v62, %v8088_v22  ;;  %v8654_v12 = vrot.slane %v12959_v53, 2  ;;  %v11252_v48 = vcombine.high %v1190_v15, %v1194_v54  ;;  %v8653_v27 = vsel %vm1282_vm3, %v8652_v16, %v8651_v11 }
 0x258   :  { %1715 = vmatprep.subr.bf16.mxu1 %v11144_v8  ;;  %1756 = vmatprep.subr.bf16.mxu0 %v11146_v50  ;;  %v8659_v30 = vrot.slane %v13063_v51, 7  ;;  %v9221_v37 = vrot.slane %v12957_v52, 6  ;;  %v11254_v34 = vcombine.high %v1191_v21, %v1195_v35  ;;  %v1186_v8 = vld [vmem:[#allocation10 + $0x1a0] sm:$0xff]  ;;  %v8661_v3 = vrot.slane %v13076_v58, 6 }
 0x259   :  { %v8655_v2 = vsel %vm1285_vm4, %v8654_v12, %v8653_v27  ;;  %v9222_v49 = vrot.slane %v12949_v41, 5  ;;  %v11251_v50 = vcombine.low %v1190_v15, %v1194_v54  ;;  %v11253_v31 = vcombine.low %v1191_v21, %v1195_v35  ;;  %v1179_v15 = vld [vmem:[#allocation10 + $0x168] sm:$0xff] }
 0x25a   :  { %v8657_v26 = vsel %vm1288_vm5, %v8656_v39, %v8655_v2  ;;  %v9226_v1 = vrot.slane %v12959_v53, 3  ;;  %v9228_v59 = vrot.slane %v12976_v6, 2  ;;  %v11244_v7 = vcombine.high %v1182_v23, %v1186_v8  ;;  %v1166_v39 = vld [vmem:[#allocation10 + $0x100] sm:$0xff]  ;;  %v1171_v27 = vld [vmem:[#allocation10 + $0x128] sm:$0xff] }
 0x25b   :  { %1716 = vmatpush1.bf16.msra.mxu1 %v11143_v5  ;;  %1757 = vmatpush1.bf16.msra.mxu0 %v11145_v4  ;;  %v9224_v5 = vrot.slane %v12952_v46, 4  ;;  %v8658_v28 = vsel %vm1291_vm6, %v13044_v18, %v8657_v26  ;;  %v9223_v25 = vsel %vm1279_vm2, %v9222_v49, %v9221_v37  ;;  %v9230_v62 = vrot.slane %v13044_v18, 1 }
 0x25c   :  { %1717 = vmatprep.subr.bf16.mxu1 %v11136_v45  ;;  %1758 = vmatprep.subr.bf16.mxu0 %v11138_v47  ;;  %v8660_v17 = vsel %vm1294_vm7, %v8659_v30, %v8658_v28  ;;  %v11246_v4 = vcombine.high %v1183_v33, %v1187_v61  ;;  %v1178_v45 = vld [vmem:[#allocation10 + $0x160] sm:$0xff]  ;;  %v1175_v47 = vld [vmem:[#allocation10 + $0x148] sm:$0xff]  ;;  %v9233_v54 = vrot.slane %v13076_v58, 7  ;;  %v9793_v16 = vrot.slane %v12957_v52, 7 }
 0x25d   :  { %v9225_v43 = vsel %vm1282_vm3, %v9224_v5, %v9223_v25  ;;  %v13276_v56 = vsel %vm1297_vm8, %v8661_v3, %v8660_v17  ;;  %v11245_v21 = vcombine.low %v1183_v33, %v1187_v61  ;;  %v9796_v22 = vrot.slane %v12952_v46, 5  ;;  %v1159_v33 = vld [vmem:[#allocation10 + $0xc8] sm:$0xff]  ;;  %v1154_v17 = vld [vmem:[#allocation10 + $0xa0] sm:$0xff] }
 0x25e   :  { %v9227_v38 = vsel %vm1285_vm4, %v9226_v1, %v9225_v43  ;;  %v11236_v11 = vcombine.high %v1174_v14, %v1178_v45  ;;  %v11238_v12 = vcombine.high %v1175_v47, %v1179_v15  ;;  %v9798_v52 = vrot.slane %v12959_v53, 4  ;;  %v1163_v61 = vld [vmem:[#allocation10 + $0xe8] sm:$0xff] }
 0x25f   :  { %1718 = vmatpush1.bf16.msra.mxu1 %v11135_v19  ;;  %1759 = vmatpush1.bf16.msra.mxu0 %v11137_v20  ;;  %v9229_v10 = vsel %vm1288_vm5, %v9228_v59, %v9227_v38  ;;  %v9794_v19 = vrot.slane %v12949_v41, 6  ;;  %v11243_v20 = vcombine.low %v1182_v23, %v1186_v8  ;;  %v1167_v41 = vld [vmem:[#allocation10 + $0x108] sm:$0xff]  ;;  %v9800_v46 = vrot.slane %v12976_v6, 3  ;;  %v1162_v6 = vld [vmem:[#allocation10 + $0xe0] sm:$0xff] }
 0x260   :  { %2121 = vmatprep.subr.bf16.mxu1 %v11252_v48  ;;  %2162 = vmatprep.subr.bf16.mxu0 %v11254_v34  ;;  %v9231_v35 = vsel %vm1291_vm6, %v9230_v62, %v9229_v10  ;;  %v1170_v48 = vld [vmem:[#allocation10 + $0x120] sm:$0xff]  ;;  %v9802_v34 = vrot.slane %v13044_v18, 2  ;;  %v11235_v23 = vcombine.low %v1174_v14, %v1178_v45  ;;  %v11237_v53 = vcombine.low %v1175_v47, %v1179_v15  ;;  %v1151_v43 = vld [vmem:[#allocation10 + $0x88] sm:$0xff] }
 0x261   :  { %v9795_v37 = vsel %vm1279_vm2, %v9794_v19, %v9793_v16  ;;  %v9804_v2 = vrot.slane %v13063_v51, 1  ;;  %v11228_v3 = vcombine.high %v1166_v39, %v1170_v48  ;;  %v11230_v49 = vcombine.high %v1167_v41, %v1171_v27  ;;  %v1150_v59 = vld [vmem:[#allocation10 + $0x80] sm:$0xff]  ;;  %v1155_v62 = vld [vmem:[#allocation10 + $0xa8] sm:$0xff] }
 0x262   :  { %1736 = vmatmul.mubr.bf16.vlgmr.msra.gmra.mxu1 %v13065_v55  ;;  %1777 = vmatmul.mubr.bf16.vlgmr.msra.gmra.mxu0 %v13065_v55  ;;  %v9232_v55 = vsel %vm1294_vm7, %v13063_v51, %v9231_v35  ;;  %v9797_v8 = vsel %vm1282_vm3, %v9796_v22, %v9795_v37  ;;  %v11227_v5 = vcombine.low %v1166_v39, %v1170_v48  ;;  %v1142_v47 = vld [vmem:[#allocation10 + $0x40] sm:$0xff]  ;;  %v1147_v10 = vld [vmem:[#allocation10 + $0x68] sm:$0xff]  ;;  %v1192_v48 = vld [vmem:[#allocation10 + $0x1d0] sm:$0xff] }
 0x263   :  { %2122 = vmatpush1.bf16.msra.mxu1 %v11251_v50  ;;  %2163 = vmatpush1.bf16.msra.mxu0 %v11253_v31  ;;  %v13293_v30 = vsel %vm1297_vm8, %v9233_v54, %v9232_v55  ;;  %v1158_v50 = vld [vmem:[#allocation10 + $0xc0] sm:$0xff]  ;;  %v9799_v31 = vsel %vm1285_vm4, %v9798_v52, %v9797_v8  ;;  %v11229_v28 = vcombine.low %v1167_v41, %v1171_v27  ;;  %v1143_v54 = vld [vmem:[#allocation10 + $0x48] sm:$0xff]  ;;  %v1196_v41 = vld [vmem:[#allocation10 + $0x1f0] sm:$0xff] }
 0x264   :  { %2123 = vmatprep.subr.bf16.mxu1 %v11244_v7  ;;  %2164 = vmatprep.subr.bf16.mxu0 %v11246_v4  ;;  %v9801_v18 = vsel %vm1288_vm5, %v9800_v46, %v9799_v31  ;;  %v11220_v25 = vcombine.high %v1158_v50, %v1162_v6  ;;  %v11222_v1 = vcombine.high %v1159_v33, %v1163_v61  ;;  %v1146_v15 = vld [vmem:[#allocation10 + $0x60] sm:$0xff]  ;;  %v1135_v22 = vld [vmem:[#allocation10 + $0x8] sm:$0xff]  ;;  %v1193_v27 = vld [vmem:[#allocation10 + $0x1d8] sm:$0xff] }
 0x265   :  { %2153 = vmatprep.mubr.bf16.mxu1 %v12650_v42  ;;  %2194 = vmatprep.mubr.bf16.mxu0 %v12650_v42  ;;  %v9803_v26 = vsel %vm1291_vm6, %v9802_v34, %v9801_v18  ;;  %v11219_v4 = vcombine.low %v1158_v50, %v1162_v6  ;;  %v11221_v14 = vcombine.low %v1159_v33, %v1163_v61  ;;  %v1138_v35 = vld [vmem:[#allocation10 + $0x20] sm:$0xff]  ;;  %v1197_v46 = vld [vmem:[#allocation10 + $0x1f8] sm:$0xff]  ;;  %v1184_v8 = vld [vmem:[#allocation10 + $0x190] sm:$0xff] }
 0x266   :  { %v9805_v51 = vsel %vm1294_vm7, %v9804_v2, %v9803_v26  ;;  %v11212_v38 = vcombine.high %v1150_v59, %v1154_v17  ;;  %v11214_v45 = vcombine.high %v1151_v43, %v1155_v62  ;;  %v11211_v16 = vcombine.low %v1150_v59, %v1154_v17  ;;  %v1188_v2 = vld [vmem:[#allocation10 + $0x1b0] sm:$0xff] }
 0x267   :  { %2124 = vmatpush1.bf16.msra.mxu1 %v11243_v20  ;;  %2165 = vmatpush1.bf16.msra.mxu0 %v11245_v21  ;;  %v13306_v7 = vsel %vm1297_vm8, %v13076_v58, %v9805_v51  ;;  %v11213_v58 = vcombine.low %v1151_v43, %v1155_v62  ;;  %v11204_v19 = vcombine.high %v1142_v47, %v1146_v15  ;;  %v1134_v21 = vld [vmem:[#allocation10] sm:$0xff]  ;;  %v1176_v18 = vld [vmem:[#allocation10 + $0x150] sm:$0xff]  ;;  %v1169_v43 = vld [vmem:[#allocation10 + $0x118] sm:$0xff] }
 0x268   :  { %2125 = vmatprep.subr.bf16.mxu1 %v11236_v11  ;;  %2166 = vmatprep.subr.bf16.mxu0 %v11238_v12  ;;  %v11206_v20 = vcombine.high %v1143_v54, %v1147_v10  ;;  %v1139_v11 = vld [vmem:[#allocation10 + $0x28] sm:$0xff]  ;;  %v11203_v12 = vcombine.low %v1142_v47, %v1146_v15  ;;  %v11205_v39 = vcombine.low %v1143_v54, %v1147_v10  ;;  %v1180_v26 = vld [vmem:[#allocation10 + $0x170] sm:$0xff]  ;;  %v1173_v62 = vld [vmem:[#allocation10 + $0x138] sm:$0xff] }
 0x269   :  { %v11196_v55 = vcombine.high %v1134_v21, %v1138_v35  ;;  %v11198_v52 = vcombine.high %v1135_v22, %v1139_v11  ;;  %v11195_v37 = vcombine.low %v1134_v21, %v1138_v35  ;;  %v11197_v34 = vcombine.low %v1135_v22, %v1139_v11  ;;  %v1168_v59 = vld [vmem:[#allocation10 + $0x110] sm:$0xff]  ;;  %v1161_v54 = vld [vmem:[#allocation10 + $0xd8] sm:$0xff] }
 0x26a   :  { %v11255_v50 = vcombine.low %v1192_v48, %v1196_v41  ;;  %v11257_v31 = vcombine.low %v1193_v27, %v1197_v46  ;;  %v13310_v6 = vpack.c.b16 %v13059_v40, %v13059_v40  ;;  %v11248_v33 = vcombine.high %v1184_v8, %v1188_v2  ;;  %v1172_v17 = vld [vmem:[#allocation10 + $0x130] sm:$0xff]  ;;  %v1165_v10 = vld [vmem:[#allocation10 + $0xf8] sm:$0xff] }
 0x26b   :  { %2126 = vmatpush1.bf16.msra.mxu1 %v11235_v23  ;;  %2167 = vmatpush1.bf16.msra.mxu0 %v11237_v53  ;;  %v11256_v23 = vcombine.high %v1192_v48, %v1196_v41  ;;  %v11258_v53 = vcombine.high %v1193_v27, %v1197_v46  ;;  %v11247_v51 = vcombine.low %v1184_v8, %v1188_v2  ;;  %v1160_v47 = vld [vmem:[#allocation10 + $0xd0] sm:$0xff]  ;;  %v1153_v22 = vld [vmem:[#allocation10 + $0x98] sm:$0xff] }
 0x26c   :  { %2127 = vmatprep.subr.bf16.mxu1 %v11228_v3  ;;  %2168 = vmatprep.subr.bf16.mxu0 %v11230_v49  ;;  %v1185_v3 = vld [vmem:[#allocation10 + $0x198] sm:$0xff]  ;;  %v11240_v40 = vcombine.high %v1176_v18, %v1180_v26  ;;  %v1164_v15 = vld [vmem:[#allocation10 + $0xf0] sm:$0xff] }
 0x26d   :  { %v1189_v49 = vld [vmem:[#allocation10 + $0x1b8] sm:$0xff]  ;;  %v1152_v21 = vld [vmem:[#allocation10 + $0x90] sm:$0xff] }
 0x26e   :  { %v11250_v61 = vcombine.high %v1185_v3, %v1189_v49  ;;  %v1156_v35 = vld [vmem:[#allocation10 + $0xb0] sm:$0xff]  ;;  %v1157_v11 = vld [vmem:[#allocation10 + $0xb8] sm:$0xff] }
 0x26f   :  { %2128 = vmatpush1.bf16.msra.mxu1 %v11227_v5  ;;  %2169 = vmatpush1.bf16.msra.mxu0 %v11229_v28  ;;  %v1177_v5 = vld [vmem:[#allocation10 + $0x158] sm:$0xff]  ;;  %v1144_v48 = vld [vmem:[#allocation10 + $0x50] sm:$0xff] }
 0x270   :  { %2129 = vmatprep.subr.bf16.mxu1 %v11220_v25  ;;  %2170 = vmatprep.subr.bf16.mxu0 %v11222_v1  ;;  %v1181_v28 = vld [vmem:[#allocation10 + $0x178] sm:$0xff]  ;;  %v11249_v25 = vcombine.low %v1185_v3, %v1189_v49  ;;  %v1148_v41 = vld [vmem:[#allocation10 + $0x70] sm:$0xff] }
 0x271   :  { %v11242_v1 = vcombine.high %v1177_v5, %v1181_v28  ;;  %v1145_v27 = vld [vmem:[#allocation10 + $0x58] sm:$0xff]  ;;  %v1136_v8 = vld [vmem:[#allocation10 + $0x10] sm:$0xff] }
 0x272   :  { %v1149_v46 = vld [vmem:[#allocation10 + $0x78] sm:$0xff]  ;;  %v1140_v2 = vld [vmem:[#allocation10 + $0x30] sm:$0xff] }
 0x273   :  { %2130 = vmatpush1.bf16.msra.mxu1 %v11219_v4  ;;  %2171 = vmatpush1.bf16.msra.mxu0 %v11221_v14  ;;  %v11239_v4 = vcombine.low %v1176_v18, %v1180_v26  ;;  %v11241_v14 = vcombine.low %v1177_v5, %v1181_v28  ;;  %v1137_v3 = vld [vmem:[#allocation10 + $0x18] sm:$0xff]  ;;  %v2341_v18 = vld [vmem:[#allocation10 + $0x5c0] sm:$0xff]  ;;  %v2342_v5 = vld [vmem:[#allocation10 + $0x5c8] sm:$0xff] }
 0x274   :  { %2131 = vmatprep.subr.bf16.mxu1 %v11212_v38  ;;  %2172 = vmatprep.subr.bf16.mxu0 %v11214_v45  ;;  %v11232_v38 = vcombine.high %v1168_v59, %v1172_v17  ;;  %v11234_v45 = vcombine.high %v1169_v43, %v1173_v62  ;;  %v1141_v49 = vld [vmem:[#allocation10 + $0x38] sm:$0xff]  ;;  %v2345_v26 = vld [vmem:[#allocation10 + $0x5e0] sm:$0xff]  ;;  %v2346_v28 = vld [vmem:[#allocation10 + $0x5e8] sm:$0xff] }
 0x277   :  { %2132 = vmatpush1.bf16.msra.mxu1 %v11211_v16  ;;  %2173 = vmatpush1.bf16.msra.mxu0 %v11213_v58  ;;  %v11231_v16 = vcombine.low %v1168_v59, %v1172_v17  ;;  %v11233_v58 = vcombine.low %v1169_v43, %v1173_v62  ;;  %v2333_v59 = vld [vmem:[#allocation10 + $0x580] sm:$0xff]  ;;  %v2334_v43 = vld [vmem:[#allocation10 + $0x588] sm:$0xff] }
 0x278   :  { %2133 = vmatprep.subr.bf16.mxu1 %v11204_v19  ;;  %2174 = vmatprep.subr.bf16.mxu0 %v11206_v20  ;;  %v11224_v19 = vcombine.high %v1160_v47, %v1164_v15  ;;  %v11226_v20 = vcombine.high %v1161_v54, %v1165_v10  ;;  %v2337_v17 = vld [vmem:[#allocation10 + $0x5a0] sm:$0xff]  ;;  %v2338_v62 = vld [vmem:[#allocation10 + $0x5a8] sm:$0xff] }
 0x27b   :  { %2134 = vmatpush1.bf16.msra.mxu1 %v11203_v12  ;;  %2175 = vmatpush1.bf16.msra.mxu0 %v11205_v39  ;;  %v11223_v12 = vcombine.low %v1160_v47, %v1164_v15  ;;  %v11225_v39 = vcombine.low %v1161_v54, %v1165_v10  ;;  %v2325_v47 = vld [vmem:[#allocation10 + $0x540] sm:$0xff]  ;;  %v2326_v54 = vld [vmem:[#allocation10 + $0x548] sm:$0xff] }
 0x27c   :  { %2135 = vmatprep.subr.bf16.mxu1 %v11196_v55  ;;  %2176 = vmatprep.subr.bf16.mxu0 %v11198_v52  ;;  %v11216_v55 = vcombine.high %v1152_v21, %v1156_v35  ;;  %v11218_v52 = vcombine.high %v1153_v22, %v1157_v11  ;;  %v2329_v15 = vld [vmem:[#allocation10 + $0x560] sm:$0xff]  ;;  %v2330_v10 = vld [vmem:[#allocation10 + $0x568] sm:$0xff] }
 0x27f   :  { %2136 = vmatpush1.bf16.msra.mxu1 %v11195_v37  ;;  %2177 = vmatpush1.bf16.msra.mxu0 %v11197_v34  ;;  %v11215_v37 = vcombine.low %v1152_v21, %v1156_v35  ;;  %v11217_v34 = vcombine.low %v1153_v22, %v1157_v11  ;;  %v2317_v21 = vld [vmem:[#allocation10 + $0x500] sm:$0xff]  ;;  %v2318_v22 = vld [vmem:[#allocation10 + $0x508] sm:$0xff] }
 0x280   :  { %2203 = vmatprep.subr.bf16.mxu1 %v11256_v23  ;;  %2244 = vmatprep.subr.bf16.mxu0 %v11258_v53  ;;  %v11208_v23 = vcombine.high %v1144_v48, %v1148_v41  ;;  %v11210_v53 = vcombine.high %v1145_v27, %v1149_v46  ;;  %v2321_v35 = vld [vmem:[#allocation10 + $0x520] sm:$0xff]  ;;  %v2322_v11 = vld [vmem:[#allocation10 + $0x528] sm:$0xff] }
 0x282   :  { %2154 = vmatmul.mubr.bf16.vlgmr.msra.gmra.mxu1 %v13310_v6  ;;  %2195 = vmatmul.mubr.bf16.vlgmr.msra.gmra.mxu0 %v13310_v6 }
 0x283   :  { %2204 = vmatpush1.bf16.msra.mxu1 %v11255_v50  ;;  %2245 = vmatpush1.bf16.msra.mxu0 %v11257_v31  ;;  %v11207_v50 = vcombine.low %v1144_v48, %v1148_v41  ;;  %v11209_v31 = vcombine.low %v1145_v27, %v1149_v46  ;;  %v2313_v48 = vld [vmem:[#allocation10 + $0x4e0] sm:$0xff]  ;;  %v2310_v41 = vld [vmem:[#allocation10 + $0x4c8] sm:$0xff]  ;;  %v11291_v46 = vcombine.low %v2317_v21, %v2321_v35 }
 0x284   :  { %2205 = vmatprep.subr.bf16.mxu1 %v11248_v33  ;;  %2246 = vmatprep.subr.bf16.mxu0 %v11250_v61  ;;  %v11200_v33 = vcombine.high %v1136_v8, %v1140_v2  ;;  %v11202_v61 = vcombine.high %v1137_v3, %v1141_v49  ;;  %v2314_v27 = vld [vmem:[#allocation10 + $0x4e8] sm:$0xff] }
 0x285   :  { %2235 = vmatprep.mubr.bf16.mxu1 %v12650_v42  ;;  %2276 = vmatprep.mubr.bf16.mxu0 %v12650_v42 }
 0x287   :  { %2206 = vmatpush1.bf16.msra.mxu1 %v11247_v51  ;;  %2247 = vmatpush1.bf16.msra.mxu0 %v11249_v25  ;;  %v11199_v51 = vcombine.low %v1136_v8, %v1140_v2  ;;  %v11201_v25 = vcombine.low %v1137_v3, %v1141_v49  ;;  %v2305_v8 = vld [vmem:[#allocation10 + $0x4a0] sm:$0xff]  ;;  %v2302_v2 = vld [vmem:[#allocation10 + $0x488] sm:$0xff] }
 0x288   :  { %2207 = vmatprep.subr.bf16.mxu1 %v11240_v40  ;;  %2248 = vmatprep.subr.bf16.mxu0 %v11242_v1  ;;  %v11316_v40 = vcombine.high %v2341_v18, %v2345_v26  ;;  %v11318_v1 = vcombine.high %v2342_v5, %v2346_v28  ;;  %v2306_v3 = vld [vmem:[#allocation10 + $0x4a8] sm:$0xff] }
 0x28b   :  { %2208 = vmatpush1.bf16.msra.mxu1 %v11239_v4  ;;  %2249 = vmatpush1.bf16.msra.mxu0 %v11241_v14  ;;  %v11315_v4 = vcombine.low %v2341_v18, %v2345_v26  ;;  %v11317_v14 = vcombine.low %v2342_v5, %v2346_v28  ;;  %v2297_v18 = vld [vmem:[#allocation10 + $0x460] sm:$0xff]  ;;  %v2294_v26 = vld [vmem:[#allocation10 + $0x448] sm:$0xff] }
 0x28c   :  { %2209 = vmatprep.subr.bf16.mxu1 %v11232_v38  ;;  %2250 = vmatprep.subr.bf16.mxu0 %v11234_v45  ;;  %v11308_v38 = vcombine.high %v2333_v59, %v2337_v17  ;;  %v11310_v45 = vcombine.high %v2334_v43, %v2338_v62  ;;  %v2298_v5 = vld [vmem:[#allocation10 + $0x468] sm:$0xff] }
 0x28f   :  { %2210 = vmatpush1.bf16.msra.mxu1 %v11231_v16  ;;  %2251 = vmatpush1.bf16.msra.mxu0 %v11233_v58  ;;  %v11307_v16 = vcombine.low %v2333_v59, %v2337_v17  ;;  %v11309_v58 = vcombine.low %v2334_v43, %v2338_v62  ;;  %v2289_v59 = vld [vmem:[#allocation10 + $0x420] sm:$0xff]  ;;  %v2286_v17 = vld [vmem:[#allocation10 + $0x408] sm:$0xff] }
 0x290   :  { %2211 = vmatprep.subr.bf16.mxu1 %v11224_v19  ;;  %2252 = vmatprep.subr.bf16.mxu0 %v11226_v20  ;;  %v11300_v19 = vcombine.high %v2325_v47, %v2329_v15  ;;  %v11302_v20 = vcombine.high %v2326_v54, %v2330_v10  ;;  %v2290_v43 = vld [vmem:[#allocation10 + $0x428] sm:$0xff] }
 0x293   :  { %2212 = vmatpush1.bf16.msra.mxu1 %v11223_v12  ;;  %2253 = vmatpush1.bf16.msra.mxu0 %v11225_v39  ;;  %v11299_v12 = vcombine.low %v2325_v47, %v2329_v15  ;;  %v11292_v39 = vcombine.high %v2317_v21, %v2321_v35  ;;  %v2347_v47 = vld [vmem:[#allocation10 + $0x5f0] sm:$0xff]  ;;  %v2344_v15 = vld [vmem:[#allocation10 + $0x5d8] sm:$0xff] }
 0x294   :  { %2213 = vmatprep.subr.bf16.mxu1 %v11216_v55  ;;  %2254 = vmatprep.subr.bf16.mxu0 %v11218_v52  ;;  %v11294_v55 = vcombine.high %v2318_v22, %v2322_v11  ;;  %v2309_v52 = vld [vmem:[#allocation10 + $0x4c0] sm:$0xff]  ;;  %v2339_v21 = vld [vmem:[#allocation10 + $0x5b0] sm:$0xff]  ;;  %v2336_v35 = vld [vmem:[#allocation10 + $0x598] sm:$0xff] }
 0x295   :  { %v11283_v49 = vcombine.low %v2309_v52, %v2313_v48 }
 0x297   :  { %2214 = vmatpush1.bf16.msra.mxu1 %v11215_v37  ;;  %2255 = vmatpush1.bf16.msra.mxu0 %v11217_v34  ;;  %v11293_v37 = vcombine.low %v2318_v22, %v2322_v11  ;;  %v11284_v34 = vcombine.high %v2309_v52, %v2313_v48  ;;  %v2340_v22 = vld [vmem:[#allocation10 + $0x5b8] sm:$0xff]  ;;  %v2327_v52 = vld [vmem:[#allocation10 + $0x550] sm:$0xff] }
 0x298   :  { %2215 = vmatprep.subr.bf16.mxu1 %v11208_v23  ;;  %2256 = vmatprep.subr.bf16.mxu0 %v11210_v53  ;;  %v11286_v23 = vcombine.high %v2310_v41, %v2314_v27  ;;  %v2301_v53 = vld [vmem:[#allocation10 + $0x480] sm:$0xff]  ;;  %v2331_v48 = vld [vmem:[#allocation10 + $0x570] sm:$0xff] }
 0x299   :  { %v11275_v28 = vcombine.low %v2301_v53, %v2305_v8 }
 0x29b   :  { %2216 = vmatpush1.bf16.msra.mxu1 %v11207_v50  ;;  %2257 = vmatpush1.bf16.msra.mxu0 %v11209_v31  ;;  %v11285_v50 = vcombine.low %v2310_v41, %v2314_v27  ;;  %v11276_v31 = vcombine.high %v2301_v53, %v2305_v8  ;;  %v2328_v41 = vld [vmem:[#allocation10 + $0x558] sm:$0xff]  ;;  %v2323_v53 = vld [vmem:[#allocation10 + $0x530] sm:$0xff] }
 0x29c   :  { %2217 = vmatprep.subr.bf16.mxu1 %v11200_v33  ;;  %2258 = vmatprep.subr.bf16.mxu0 %v11202_v61  ;;  %v11278_v33 = vcombine.high %v2302_v2, %v2306_v3  ;;  %v2293_v61 = vld [vmem:[#allocation10 + $0x440] sm:$0xff]  ;;  %v2332_v27 = vld [vmem:[#allocation10 + $0x578] sm:$0xff] }
 0x29d   :  { %v11267_v62 = vcombine.low %v2293_v61, %v2297_v18  ;;  %v2320_v8 = vld [vmem:[#allocation10 + $0x518] sm:$0xff] }
 0x29f   :  { %2218 = vmatpush1.bf16.msra.mxu1 %v11199_v51  ;;  %2259 = vmatpush1.bf16.msra.mxu0 %v11201_v25  ;;  %v11277_v51 = vcombine.low %v2302_v2, %v2306_v3  ;;  %v11268_v25 = vcombine.high %v2293_v61, %v2297_v18  ;;  %v2324_v2 = vld [vmem:[#allocation10 + $0x538] sm:$0xff]  ;;  %v11303_v3 = vcombine.low %v2327_v52, %v2331_v48  ;;  %v2315_v61 = vld [vmem:[#allocation10 + $0x4f0] sm:$0xff] }
 0x2a0   :  { %2685 = vmatprep.subr.bf16.mxu1 %v11316_v40  ;;  %2726 = vmatprep.subr.bf16.mxu0 %v11318_v1  ;;  %v11270_v40 = vcombine.high %v2294_v26, %v2298_v5  ;;  %v2285_v1 = vld [vmem:[#allocation10 + $0x400] sm:$0xff]  ;;  %v2312_v18 = vld [vmem:[#allocation10 + $0x4d8] sm:$0xff] }
 0x2a2   :  { %2236 = vmatmul.mubr.bf16.vlgmr.msra.gmra.mxu1 %v13310_v6  ;;  %2277 = vmatmul.mubr.bf16.vlgmr.msra.gmra.mxu0 %v13310_v6  ;;  %v11301_v6 = vcombine.low %v2326_v54, %v2330_v10  ;;  %v2348_v54 = vld [vmem:[#allocation10 + $0x5f8] sm:$0xff]  ;;  %v11259_v10 = vcombine.low %v2285_v1, %v2289_v59 }
 0x2a3   :  { %2686 = vmatpush1.bf16.msra.mxu1 %v11315_v4  ;;  %2727 = vmatpush1.bf16.msra.mxu0 %v11317_v14  ;;  %v11269_v4 = vcombine.low %v2294_v26, %v2298_v5  ;;  %v11260_v14 = vcombine.high %v2285_v1, %v2289_v59  ;;  %v2316_v26 = vld [vmem:[#allocation10 + $0x4f8] sm:$0xff]  ;;  %v2307_v1 = vld [vmem:[#allocation10 + $0x4b0] sm:$0xff] }
 0x2a4   :  { %2687 = vmatprep.subr.bf16.mxu1 %v11308_v38  ;;  %2728 = vmatprep.subr.bf16.mxu0 %v11310_v45  ;;  %v11262_v38 = vcombine.high %v2286_v17, %v2290_v43  ;;  %v2343_v45 = vld [vmem:[#allocation10 + $0x5d0] sm:$0xff]  ;;  %v2304_v59 = vld [vmem:[#allocation10 + $0x498] sm:$0xff] }
 0x2a5   :  { %2717 = vmatprep.mubr.bf16.mxu1 %v12650_v42  ;;  %2758 = vmatprep.mubr.bf16.mxu0 %v12650_v42  ;;  %v11319_v11 = vcombine.low %v2343_v45, %v2347_v47 }
 0x2a7   :  { %2688 = vmatpush1.bf16.msra.mxu1 %v11307_v16  ;;  %2729 = vmatpush1.bf16.msra.mxu0 %v11309_v58  ;;  %v11261_v16 = vcombine.low %v2286_v17, %v2290_v43  ;;  %v11320_v58 = vcombine.high %v2343_v45, %v2347_v47  ;;  %v2308_v17 = vld [vmem:[#allocation10 + $0x4b8] sm:$0xff]  ;;  %v2299_v45 = vld [vmem:[#allocation10 + $0x470] sm:$0xff] }
 0x2a8   :  { %2689 = vmatprep.subr.bf16.mxu1 %v11300_v19  ;;  %2730 = vmatprep.subr.bf16.mxu0 %v11302_v20  ;;  %v11322_v19 = vcombine.high %v2344_v15, %v2348_v54  ;;  %v2335_v20 = vld [vmem:[#allocation10 + $0x590] sm:$0xff]  ;;  %v2296_v47 = vld [vmem:[#allocation10 + $0x458] sm:$0xff] }
 0x2ab   :  { %2690 = vmatpush1.bf16.msra.mxu1 %v11299_v12  ;;  %2731 = vmatpush1.bf16.msra.mxu0 %v11301_v6  ;;  %v11321_v12 = vcombine.low %v2344_v15, %v2348_v54  ;;  %v13322_v6 = vpack.c.b16 %v13074_v29, %v13074_v29  ;;  %v11304_v29 = vcombine.high %v2327_v52, %v2331_v48  ;;  %v2300_v15 = vld [vmem:[#allocation10 + $0x478] sm:$0xff]  ;;  %v2917_v52 = vld [vmem:[#allocation10 + $0x7e0] sm:$0xff]  ;;  %v2914_v48 = vld [vmem:[#allocation10 + $0x7c8] sm:$0xff] }
 0x2ac   :  { %2691 = vmatprep.subr.bf16.mxu1 %v11292_v39  ;;  %2732 = vmatprep.subr.bf16.mxu0 %v11294_v55  ;;  %v11312_v39 = vcombine.high %v2335_v20, %v2339_v21  ;;  %v11314_v55 = vcombine.high %v2336_v35, %v2340_v22 }
 0x2af   :  { %2692 = vmatpush1.bf16.msra.mxu1 %v11291_v46  ;;  %2733 = vmatpush1.bf16.msra.mxu0 %v11293_v37  ;;  %v11311_v46 = vcombine.low %v2335_v20, %v2339_v21  ;;  %v11313_v37 = vcombine.low %v2336_v35, %v2340_v22  ;;  %v2291_v20 = vld [vmem:[#allocation10 + $0x430] sm:$0xff]  ;;  %v2288_v21 = vld [vmem:[#allocation10 + $0x418] sm:$0xff] }
 0x2b0   :  { %2693 = vmatprep.subr.bf16.mxu1 %v11284_v34  ;;  %2734 = vmatprep.subr.bf16.mxu0 %v11286_v23  ;;  %v11306_v34 = vcombine.high %v2328_v41, %v2332_v27  ;;  %v2319_v23 = vld [vmem:[#allocation10 + $0x510] sm:$0xff]  ;;  %v2292_v35 = vld [vmem:[#allocation10 + $0x438] sm:$0xff] }
 0x2b1   :  { %v11295_v5 = vcombine.low %v2319_v23, %v2323_v53 }
 0x2b3   :  { %2694 = vmatpush1.bf16.msra.mxu1 %v11283_v49  ;;  %2735 = vmatpush1.bf16.msra.mxu0 %v11285_v50  ;;  %v11305_v49 = vcombine.low %v2328_v41, %v2332_v27  ;;  %v11296_v50 = vcombine.high %v2319_v23, %v2323_v53  ;;  %v2918_v41 = vld [vmem:[#allocation10 + $0x7e8] sm:$0xff]  ;;  %v2909_v23 = vld [vmem:[#allocation10 + $0x7a0] sm:$0xff] }
 0x2b4   :  { %2695 = vmatprep.subr.bf16.mxu1 %v11276_v31  ;;  %2736 = vmatprep.subr.bf16.mxu0 %v11278_v33  ;;  %v11298_v31 = vcombine.high %v2320_v8, %v2324_v2  ;;  %v2311_v33 = vld [vmem:[#allocation10 + $0x4d0] sm:$0xff]  ;;  %v2906_v53 = vld [vmem:[#allocation10 + $0x788] sm:$0xff] }
 0x2b5   :  { %v11287_v43 = vcombine.low %v2311_v33, %v2315_v61 }
 0x2b7   :  { %2696 = vmatpush1.bf16.msra.mxu1 %v11275_v28  ;;  %2737 = vmatpush1.bf16.msra.mxu0 %v11277_v51  ;;  %v11297_v28 = vcombine.low %v2320_v8, %v2324_v2  ;;  %v11288_v51 = vcombine.high %v2311_v33, %v2315_v61  ;;  %v2910_v8 = vld [vmem:[#allocation10 + $0x7a8] sm:$0xff]  ;;  %v2901_v33 = vld [vmem:[#allocation10 + $0x760] sm:$0xff] }
 0x2b8   :  { %2697 = vmatprep.subr.bf16.mxu1 %v11268_v25  ;;  %2738 = vmatprep.subr.bf16.mxu0 %v11270_v40  ;;  %v11290_v25 = vcombine.high %v2312_v18, %v2316_v26  ;;  %v2303_v40 = vld [vmem:[#allocation10 + $0x490] sm:$0xff]  ;;  %v2898_v61 = vld [vmem:[#allocation10 + $0x748] sm:$0xff] }
 0x2b9   :  { %v11279_v54 = vcombine.low %v2303_v40, %v2307_v1 }
 0x2bb   :  { %2698 = vmatpush1.bf16.msra.mxu1 %v11267_v62  ;;  %2739 = vmatpush1.bf16.msra.mxu0 %v11269_v4  ;;  %v11289_v62 = vcombine.low %v2312_v18, %v2316_v26  ;;  %v11280_v4 = vcombine.high %v2303_v40, %v2307_v1  ;;  %v2902_v18 = vld [vmem:[#allocation10 + $0x768] sm:$0xff]  ;;  %v2893_v40 = vld [vmem:[#allocation10 + $0x720] sm:$0xff] }
 0x2bc   :  { %2699 = vmatprep.subr.bf16.mxu1 %v11260_v14  ;;  %2740 = vmatprep.subr.bf16.mxu0 %v11262_v38  ;;  %v11282_v14 = vcombine.high %v2304_v59, %v2308_v17  ;;  %v2295_v38 = vld [vmem:[#allocation10 + $0x450] sm:$0xff]  ;;  %v2890_v1 = vld [vmem:[#allocation10 + $0x708] sm:$0xff] }
 0x2bd   :  { %v11271_v22 = vcombine.low %v2295_v38, %v2299_v45 }
 0x2bf   :  { %2700 = vmatpush1.bf16.msra.mxu1 %v11259_v10  ;;  %2741 = vmatpush1.bf16.msra.mxu0 %v11261_v16  ;;  %v11281_v10 = vcombine.low %v2304_v59, %v2308_v17  ;;  %v11272_v16 = vcombine.high %v2295_v38, %v2299_v45  ;;  %v2894_v59 = vld [vmem:[#allocation10 + $0x728] sm:$0xff] }
 0x2c0   :  { %2767 = vmatprep.subr.bf16.mxu1 %v11320_v58  ;;  %2808 = vmatprep.subr.bf16.mxu0 %v11322_v19  ;;  %v11274_v58 = vcombine.high %v2296_v47, %v2300_v15  ;;  %v2287_v19 = vld [vmem:[#allocation10 + $0x410] sm:$0xff]  ;;  %v2882_v38 = vld [vmem:[#allocation10 + $0x6c8] sm:$0xff] }
 0x2c1   :  { %v11263_v27 = vcombine.low %v2287_v19, %v2291_v20  ;;  %v2886_v45 = vld [vmem:[#allocation10 + $0x6e8] sm:$0xff] }
 0x2c2   :  { %2718 = vmatmul.mubr.bf16.vlgmr.msra.gmra.mxu1 %v13322_v6  ;;  %2759 = vmatmul.mubr.bf16.vlgmr.msra.gmra.mxu0 %v13322_v6 }
 0x2c3   :  { %2768 = vmatpush1.bf16.msra.mxu1 %v11319_v11  ;;  %2809 = vmatpush1.bf16.msra.mxu0 %v11321_v12  ;;  %v11273_v11 = vcombine.low %v2296_v47, %v2300_v15  ;;  %v11264_v12 = vcombine.high %v2287_v19, %v2291_v20  ;;  %v11357_v15 = vcombine.low %v2890_v1, %v2894_v59  ;;  %v2874_v19 = vld [vmem:[#allocation10 + $0x688] sm:$0xff] }
 0x2c4   :  { %2769 = vmatprep.subr.bf16.mxu1 %v11312_v39  ;;  %2810 = vmatprep.subr.bf16.mxu0 %v11314_v55  ;;  %v11266_v39 = vcombine.high %v2288_v21, %v2292_v35  ;;  %v2913_v55 = vld [vmem:[#allocation10 + $0x7c0] sm:$0xff]  ;;  %v2878_v20 = vld [vmem:[#allocation10 + $0x6a8] sm:$0xff] }
 0x2c5   :  { %2799 = vmatprep.mubr.bf16.mxu1 %v12650_v42  ;;  %2840 = vmatprep.mubr.bf16.mxu0 %v12650_v42  ;;  %v11379_v2 = vcombine.low %v2913_v55, %v2917_v52 }
 0x2c7   :  { %2770 = vmatpush1.bf16.msra.mxu1 %v11311_v46  ;;  %2811 = vmatpush1.bf16.msra.mxu0 %v11313_v37  ;;  %v11265_v46 = vcombine.low %v2288_v21, %v2292_v35  ;;  %v11380_v37 = vcombine.high %v2913_v55, %v2917_v52  ;;  %v11349_v35 = vcombine.low %v2882_v38, %v2886_v45  ;;  %v2866_v55 = vld [vmem:[#allocation10 + $0x648] sm:$0xff] }
 0x2c8   :  { %2771 = vmatprep.subr.bf16.mxu1 %v11304_v29  ;;  %2812 = vmatprep.subr.bf16.mxu0 %v11306_v34  ;;  %v11382_v29 = vcombine.high %v2914_v48, %v2918_v41  ;;  %v2905_v34 = vld [vmem:[#allocation10 + $0x780] sm:$0xff]  ;;  %v2870_v52 = vld [vmem:[#allocation10 + $0x668] sm:$0xff] }
 0x2c9   :  { %v11371_v26 = vcombine.low %v2905_v34, %v2909_v23 }
 0x2cb   :  { %2772 = vmatpush1.bf16.msra.mxu1 %v11303_v3  ;;  %2813 = vmatpush1.bf16.msra.mxu0 %v11305_v49  ;;  %v11381_v3 = vcombine.low %v2914_v48, %v2918_v41  ;;  %v11372_v49 = vcombine.high %v2905_v34, %v2909_v23  ;;  %v11341_v41 = vcombine.low %v2874_v19, %v2878_v20  ;;  %v2858_v34 = vld [vmem:[#allocation10 + $0x608] sm:$0xff] }
 0x2cc   :  { %2773 = vmatprep.subr.bf16.mxu1 %v11296_v50  ;;  %2814 = vmatprep.subr.bf16.mxu0 %v11298_v31  ;;  %v11374_v50 = vcombine.high %v2906_v53, %v2910_v8  ;;  %v2897_v31 = vld [vmem:[#allocation10 + $0x740] sm:$0xff]  ;;  %v2862_v23 = vld [vmem:[#allocation10 + $0x628] sm:$0xff] }
 0x2cd   :  { %v11363_v17 = vcombine.low %v2897_v31, %v2901_v33 }
 0x2cf   :  { %2774 = vmatpush1.bf16.msra.mxu1 %v11295_v5  ;;  %2815 = vmatpush1.bf16.msra.mxu0 %v11297_v28  ;;  %v11373_v5 = vcombine.low %v2906_v53, %v2910_v8  ;;  %v11364_v28 = vcombine.high %v2897_v31, %v2901_v33  ;;  %v11333_v8 = vcombine.low %v2866_v55, %v2870_v52  ;;  %v2916_v31 = vld [vmem:[#allocation10 + $0x7d8] sm:$0xff] }
 0x2d0   :  { %2775 = vmatprep.subr.bf16.mxu1 %v11288_v51  ;;  %2816 = vmatprep.subr.bf16.mxu0 %v11290_v25  ;;  %v11366_v51 = vcombine.high %v2898_v61, %v2902_v18  ;;  %v2889_v25 = vld [vmem:[#allocation10 + $0x700] sm:$0xff]  ;;  %v2920_v33 = vld [vmem:[#allocation10 + $0x7f8] sm:$0xff] }
 0x2d1   :  { %v11355_v47 = vcombine.low %v2889_v25, %v2893_v40 }
 0x2d3   :  { %2776 = vmatpush1.bf16.msra.mxu1 %v11287_v43  ;;  %2817 = vmatpush1.bf16.msra.mxu0 %v11289_v62  ;;  %v11356_v43 = vcombine.high %v2889_v25, %v2893_v40  ;;  %v11358_v62 = vcombine.high %v2890_v1, %v2894_v59  ;;  %v2908_v25 = vld [vmem:[#allocation10 + $0x798] sm:$0xff]  ;;  %v11385_v59 = vcombine.low %v2916_v31, %v2920_v33 }
 0x2d4   :  { %2777 = vmatprep.subr.bf16.mxu1 %v11280_v4  ;;  %2818 = vmatprep.subr.bf16.mxu0 %v11282_v14  ;;  %v2881_v4 = vld [vmem:[#allocation10 + $0x6c0] sm:$0xff]  ;;  %v2912_v40 = vld [vmem:[#allocation10 + $0x7b8] sm:$0xff] }
 0x2d5   :  { %v2885_v14 = vld [vmem:[#allocation10 + $0x6e0] sm:$0xff] }
 0x2d6   :  { %v11347_v21 = vcombine.low %v2881_v4, %v2885_v14 }
 0x2d7   :  { %2778 = vmatpush1.bf16.msra.mxu1 %v11279_v54  ;;  %2819 = vmatpush1.bf16.msra.mxu0 %v11281_v10  ;;  %v11348_v54 = vcombine.high %v2881_v4, %v2885_v14  ;;  %v11350_v10 = vcombine.high %v2882_v38, %v2886_v45  ;;  %v2903_v4 = vld [vmem:[#allocation10 + $0x770] sm:$0xff]  ;;  %v2900_v14 = vld [vmem:[#allocation10 + $0x758] sm:$0xff] }
 0x2d8   :  { %2779 = vmatprep.subr.bf16.mxu1 %v11272_v16  ;;  %2820 = vmatprep.subr.bf16.mxu0 %v11274_v58  ;;  %v2873_v16 = vld [vmem:[#allocation10 + $0x680] sm:$0xff]  ;;  %v2904_v38 = vld [vmem:[#allocation10 + $0x778] sm:$0xff] }
 0x2d9   :  { %v2877_v58 = vld [vmem:[#allocation10 + $0x6a0] sm:$0xff] }
 0x2da   :  { %v11339_v48 = vcombine.low %v2873_v16, %v2877_v58 }
 0x2db   :  { %2780 = vmatpush1.bf16.msra.mxu1 %v11271_v22  ;;  %2821 = vmatpush1.bf16.msra.mxu0 %v11273_v11  ;;  %v11340_v22 = vcombine.high %v2873_v16, %v2877_v58  ;;  %v11342_v11 = vcombine.high %v2874_v19, %v2878_v20  ;;  %v11370_v58 = vcombine.high %v2900_v14, %v2904_v38  ;;  %v2891_v19 = vld [vmem:[#allocation10 + $0x710] sm:$0xff] }
 0x2dc   :  { %2781 = vmatprep.subr.bf16.mxu1 %v11264_v12  ;;  %2822 = vmatprep.subr.bf16.mxu0 %v11266_v39  ;;  %v2865_v12 = vld [vmem:[#allocation10 + $0x640] sm:$0xff]  ;;  %v2895_v20 = vld [vmem:[#allocation10 + $0x730] sm:$0xff] }
 0x2dd   :  { %v2869_v39 = vld [vmem:[#allocation10 + $0x660] sm:$0xff] }
 0x2de   :  { %v11331_v53 = vcombine.low %v2865_v12, %v2869_v39 }
 0x2df   :  { %2782 = vmatpush1.bf16.msra.mxu1 %v11263_v27  ;;  %2823 = vmatpush1.bf16.msra.mxu0 %v11265_v46  ;;  %v11332_v27 = vcombine.high %v2865_v12, %v2869_v39  ;;  %v11334_v46 = vcombine.high %v2866_v55, %v2870_v52  ;;  %v11369_v39 = vcombine.low %v2900_v14, %v2904_v38 }
 0x2e0   :  { %3257 = vmatprep.subr.bf16.mxu1 %v11380_v37  ;;  %3298 = vmatprep.subr.bf16.mxu0 %v11382_v29  ;;  %v2857_v37 = vld [vmem:[#allocation10 + $0x600] sm:$0xff] }
 0x2e1   :  { %v2861_v29 = vld [vmem:[#allocation10 + $0x620] sm:$0xff] }
 0x2e2   :  { %2800 = vmatmul.mubr.bf16.vlgmr.msra.gmra.mxu1 %v13322_v6  ;;  %2841 = vmatmul.mubr.bf16.vlgmr.msra.gmra.mxu0 %v13322_v6  ;;  %v11365_v6 = vcombine.low %v2898_v61, %v2902_v18  ;;  %v11323_v61 = vcombine.low %v2857_v37, %v2861_v29  ;;  %v11325_v18 = vcombine.low %v2858_v34, %v2862_v23 }
 0x2e3   :  { %3258 = vmatpush1.bf16.msra.mxu1 %v11379_v2  ;;  %3299 = vmatpush1.bf16.msra.mxu0 %v11381_v3  ;;  %v11324_v2 = vcombine.high %v2857_v37, %v2861_v29  ;;  %v11326_v3 = vcombine.high %v2858_v34, %v2862_v23  ;;  %v2884_v37 = vld [vmem:[#allocation10 + $0x6d8] sm:$0xff]  ;;  %v11359_v34 = vcombine.low %v2891_v19, %v2895_v20 }
 0x2e4   :  { %3259 = vmatprep.subr.bf16.mxu1 %v11372_v49  ;;  %3300 = vmatprep.subr.bf16.mxu0 %v11374_v50  ;;  %v2915_v49 = vld [vmem:[#allocation10 + $0x7d0] sm:$0xff]  ;;  %v2888_v29 = vld [vmem:[#allocation10 + $0x6f8] sm:$0xff] }
 0x2e5   :  { %3289 = vmatprep.mubr.bf16.mxu1 %v12650_v42  ;;  %3330 = vmatprep.mubr.bf16.mxu0 %v12650_v42  ;;  %v2919_v50 = vld [vmem:[#allocation10 + $0x7f0] sm:$0xff] }
 0x2e6   :  { %v11383_v1 = vcombine.low %v2915_v49, %v2919_v50 }
 0x2e7   :  { %3260 = vmatpush1.bf16.msra.mxu1 %v11371_v26  ;;  %3301 = vmatpush1.bf16.msra.mxu0 %v11373_v5  ;;  %v11384_v26 = vcombine.high %v2915_v49, %v2919_v50  ;;  %v11386_v5 = vcombine.high %v2916_v31, %v2920_v33  ;;  %v2876_v49 = vld [vmem:[#allocation10 + $0x698] sm:$0xff]  ;;  %v11353_v33 = vcombine.low %v2884_v37, %v2888_v29 }
 0x2e8   :  { %3261 = vmatprep.subr.bf16.mxu1 %v11364_v28  ;;  %3302 = vmatprep.subr.bf16.mxu0 %v11366_v51  ;;  %v2907_v28 = vld [vmem:[#allocation10 + $0x790] sm:$0xff]  ;;  %v2880_v50 = vld [vmem:[#allocation10 + $0x6b8] sm:$0xff] }
 0x2e9   :  { %v2911_v51 = vld [vmem:[#allocation10 + $0x7b0] sm:$0xff] }
 0x2eb   :  { %3262 = vmatpush1.bf16.msra.mxu1 %v11363_v17  ;;  %3303 = vmatpush1.bf16.msra.mxu0 %v11365_v6  ;;  %v13334_v17 = vpack.c.b16 %v13089_v36, %v13089_v36  ;;  %v11376_v6 = vcombine.high %v2907_v28, %v2911_v51  ;;  %v11375_v36 = vcombine.low %v2907_v28, %v2911_v51  ;;  %v2868_v28 = vld [vmem:[#allocation10 + $0x658] sm:$0xff] }
 0x2ec   :  { %3263 = vmatprep.subr.bf16.mxu1 %v11356_v43  ;;  %3304 = vmatprep.subr.bf16.mxu0 %v11358_v62  ;;  %v11378_v43 = vcombine.high %v2908_v25, %v2912_v40  ;;  %v2899_v62 = vld [vmem:[#allocation10 + $0x750] sm:$0xff]  ;;  %v2872_v51 = vld [vmem:[#allocation10 + $0x678] sm:$0xff] }
 0x2ed   :  { %v11368_v16 = vcombine.high %v2899_v62, %v2903_v4  ;;  %v11367_v12 = vcombine.low %v2899_v62, %v2903_v4  ;;  %v2860_v62 = vld [vmem:[#allocation10 + $0x618] sm:$0xff]  ;;  %v11337_v38 = vcombine.low %v2868_v28, %v2872_v51 }
 0x2ee   :  { %v2864_v4 = vld [vmem:[#allocation10 + $0x638] sm:$0xff] }
 0x2ef   :  { %3264 = vmatpush1.bf16.msra.mxu1 %v11355_v47  ;;  %3305 = vmatpush1.bf16.msra.mxu0 %v11357_v15  ;;  %v11377_v15 = vcombine.low %v2908_v25, %v2912_v40  ;;  %v11345_v40 = vcombine.low %v2876_v49, %v2880_v50 }
 0x2f0   :  { %3265 = vmatprep.subr.bf16.mxu1 %v11348_v54  ;;  %3306 = vmatprep.subr.bf16.mxu0 %v11350_v10 }
 0x2f3   :  { %3266 = vmatpush1.bf16.msra.mxu1 %v11347_v21  ;;  %3307 = vmatpush1.bf16.msra.mxu0 %v11349_v35  ;;  %v2892_v21 = vld [vmem:[#allocation10 + $0x718] sm:$0xff] }
 0x2f4   :  { %3267 = vmatprep.subr.bf16.mxu1 %v11340_v22  ;;  %3308 = vmatprep.subr.bf16.mxu0 %v11342_v11  ;;  %v2896_v35 = vld [vmem:[#allocation10 + $0x738] sm:$0xff] }
 0x2f5   :  { %v11361_v23 = vcombine.low %v2892_v21, %v2896_v35 }
 0x2f7   :  { %3268 = vmatpush1.bf16.msra.mxu1 %v11339_v48  ;;  %3309 = vmatpush1.bf16.msra.mxu0 %v11341_v41  ;;  %v11360_v48 = vcombine.high %v2891_v19, %v2895_v20  ;;  %v11362_v41 = vcombine.high %v2892_v21, %v2896_v35  ;;  %v3486_v19 = vld [vmem:[#allocation10 + $0x9c8] sm:$0xff]  ;;  %v11329_v35 = vcombine.low %v2860_v62, %v2864_v4 }
 0x2f8   :  { %3269 = vmatprep.subr.bf16.mxu1 %v11332_v27  ;;  %3310 = vmatprep.subr.bf16.mxu0 %v11334_v46  ;;  %v2883_v27 = vld [vmem:[#allocation10 + $0x6d0] sm:$0xff]  ;;  %v3490_v20 = vld [vmem:[#allocation10 + $0x9e8] sm:$0xff] }
 0x2f9   :  { %v2887_v46 = vld [vmem:[#allocation10 + $0x6f0] sm:$0xff] }
 0x2fa   :  { %v11351_v31 = vcombine.low %v2883_v27, %v2887_v46 }
 0x2fb   :  { %3270 = vmatpush1.bf16.msra.mxu1 %v11331_v53  ;;  %3311 = vmatpush1.bf16.msra.mxu0 %v11333_v8  ;;  %v11352_v53 = vcombine.high %v2883_v27, %v2887_v46  ;;  %v11354_v8 = vcombine.high %v2884_v37, %v2888_v29  ;;  %v3469_v37 = vld [vmem:[#allocation10 + $0x940] sm:$0xff] }
 0x2fc   :  { %3271 = vmatprep.subr.bf16.mxu1 %v11324_v2  ;;  %3312 = vmatprep.subr.bf16.mxu0 %v11326_v3  ;;  %v2875_v2 = vld [vmem:[#allocation10 + $0x690] sm:$0xff]  ;;  %v3473_v29 = vld [vmem:[#allocation10 + $0x960] sm:$0xff] }
 0x2fd   :  { %v2879_v3 = vld [vmem:[#allocation10 + $0x6b0] sm:$0xff] }
 0x2fe   :  { %v11343_v25 = vcombine.low %v2875_v2, %v2879_v3 }
 0x2ff   :  { %3272 = vmatpush1.bf16.msra.mxu1 %v11323_v61  ;;  %3313 = vmatpush1.bf16.msra.mxu0 %v11325_v18  ;;  %v11344_v61 = vcombine.high %v2875_v2, %v2879_v3  ;;  %v11346_v18 = vcombine.high %v2876_v49, %v2880_v50 }
 0x300   :  { %3339 = vmatprep.subr.bf16.mxu1 %v11384_v26  ;;  %3380 = vmatprep.subr.bf16.mxu0 %v11386_v5  ;;  %v2867_v26 = vld [vmem:[#allocation10 + $0x650] sm:$0xff] }
 0x301   :  { %v2871_v5 = vld [vmem:[#allocation10 + $0x670] sm:$0xff] }
 0x302   :  { %3290 = vmatmul.mubr.bf16.vlgmr.msra.gmra.mxu1 %v13334_v17  ;;  %3331 = vmatmul.mubr.bf16.vlgmr.msra.gmra.mxu0 %v13334_v17  ;;  %v13338_v45 = vpop.f32.mrf.mxu1  ;;  %v13340_v47 = vpop.f32.mrf.mxu0  ;;  %v11335_v14 = vcombine.low %v2867_v26, %v2871_v5 }
 0x303   :  { %3340 = vmatpush1.bf16.msra.mxu1 %v11383_v1  ;;  %3381 = vmatpush1.bf16.msra.mxu0 %v11385_v59  ;;  %v11336_v1 = vcombine.high %v2867_v26, %v2871_v5  ;;  %v11338_v59 = vcombine.high %v2868_v28, %v2872_v51  ;;  %v3462_v26 = vld [vmem:[#allocation10 + $0x908] sm:$0xff]  ;;  %v11427_v51 = vcombine.low %v3469_v37, %v3473_v29 }
 0x304   :  { %v13342_v54 = vpop.f32.mrf.mxu1  ;;  %v13344_v10 = vpop.f32.mrf.mxu0  ;;  %3341 = vmatprep.subr.bf16.mxu1 %v11376_v6  ;;  %3382 = vmatprep.subr.bf16.mxu0 %v11378_v43  ;;  %v2859_v6 = vld [vmem:[#allocation10 + $0x610] sm:$0xff]  ;;  %v3466_v5 = vld [vmem:[#allocation10 + $0x928] sm:$0xff] }
 0x305   :  { %3371 = vmatprep.mubr.bf16.mxu1 %v12650_v42  ;;  %3412 = vmatprep.mubr.bf16.mxu0 %v12650_v42  ;;  %v2863_v43 = vld [vmem:[#allocation10 + $0x630] sm:$0xff] }
 0x306   :  { %v1659_v22 = vpop.f32.mrf.mxu1  ;;  %v1700_v11 = vpop.f32.mrf.mxu0  ;;  %v11327_v21 = vcombine.low %v2859_v6, %v2863_v43 }
 0x307   :  { %3342 = vmatpush1.bf16.msra.mxu1 %v11375_v36  ;;  %3383 = vmatpush1.bf16.msra.mxu0 %v11377_v15  ;;  %v11328_v36 = vcombine.high %v2859_v6, %v2863_v43  ;;  %v11330_v15 = vcombine.high %v2860_v62, %v2864_v4  ;;  %v11446_v11 = vcombine.high %v3486_v19, %v3490_v20  ;;  %v3453_v43 = vld [vmem:[#allocation10 + $0x8c0] sm:$0xff]  ;;  %v3454_v4 = vld [vmem:[#allocation10 + $0x8c8] sm:$0xff] }
 0x308   :  { %v1660_v55 = vpop.f32.mrf.mxu1  ;;  %v1701_v52 = vpop.f32.mrf.mxu0  ;;  %3343 = vmatprep.subr.bf16.mxu1 %v11368_v16  ;;  %3384 = vmatprep.subr.bf16.mxu0 %v11370_v58  ;;  %v3485_v16 = vld [vmem:[#allocation10 + $0x9c0] sm:$0xff]  ;;  %v11422_v6 = vcombine.high %v3462_v26, %v3466_v5 }
 0x309   :  { %v3489_v58 = vld [vmem:[#allocation10 + $0x9e0] sm:$0xff]  ;;  %v3478_v55 = vld [vmem:[#allocation10 + $0x988] sm:$0xff] }
 0x30a   :  { %v11444_v22 = vcombine.high %v3485_v16, %v3489_v58  ;;  %v3482_v52 = vld [vmem:[#allocation10 + $0x9a8] sm:$0xff]  ;;  %v3457_v62 = vld [vmem:[#allocation10 + $0x8e0] sm:$0xff] }
 0x30b   :  { %3344 = vmatpush1.bf16.msra.mxu1 %v11367_v12  ;;  %3385 = vmatpush1.bf16.msra.mxu0 %v11369_v39  ;;  %v3477_v12 = vld [vmem:[#allocation10 + $0x980] sm:$0xff]  ;;  %v11438_v46 = vcombine.high %v3478_v55, %v3482_v52  ;;  %v11437_v3 = vcombine.low %v3478_v55, %v3482_v52  ;;  %v3438_v52 = vld [vmem:[#allocation10 + $0x848] sm:$0xff] }
 0x30c   :  { %3345 = vmatprep.subr.bf16.mxu1 %v11360_v48  ;;  %3386 = vmatprep.subr.bf16.mxu0 %v11362_v41  ;;  %v3481_v39 = vld [vmem:[#allocation10 + $0x9a0] sm:$0xff]  ;;  %v11443_v48 = vcombine.low %v3485_v16, %v3489_v58  ;;  %v11445_v41 = vcombine.low %v3486_v19, %v3490_v20  ;;  %v3446_v20 = vld [vmem:[#allocation10 + $0x888] sm:$0xff] }
 0x30d   :  { %v11436_v27 = vcombine.high %v3477_v12, %v3481_v39  ;;  %v11435_v2 = vcombine.low %v3477_v12, %v3481_v39  ;;  %v3445_v58 = vld [vmem:[#allocation10 + $0x880] sm:$0xff] }
 0x30e   :  { %v3449_v19 = vld [vmem:[#allocation10 + $0x8a0] sm:$0xff] }
 0x30f   :  { %3346 = vmatpush1.bf16.msra.mxu1 %v11359_v34  ;;  %3387 = vmatpush1.bf16.msra.mxu0 %v11361_v23  ;;  %v3470_v34 = vld [vmem:[#allocation10 + $0x948] sm:$0xff]  ;;  %v3437_v39 = vld [vmem:[#allocation10 + $0x840] sm:$0xff] }
 0x310   :  { %3347 = vmatprep.subr.bf16.mxu1 %v11352_v53  ;;  %3388 = vmatprep.subr.bf16.mxu0 %v11354_v8  ;;  %v3474_v23 = vld [vmem:[#allocation10 + $0x968] sm:$0xff]  ;;  %v3441_v55 = vld [vmem:[#allocation10 + $0x860] sm:$0xff] }
 0x313   :  { %3348 = vmatpush1.bf16.msra.mxu1 %v11351_v31  ;;  %3389 = vmatpush1.bf16.msra.mxu0 %v11353_v33  ;;  %v11428_v31 = vcombine.high %v3469_v37, %v3473_v29  ;;  %v11430_v33 = vcombine.high %v3470_v34, %v3474_v23  ;;  %v3429_v29 = vld [vmem:[#allocation10 + $0x800] sm:$0xff] }
 0x314   :  { %3349 = vmatprep.subr.bf16.mxu1 %v11344_v61  ;;  %3390 = vmatprep.subr.bf16.mxu0 %v11346_v18  ;;  %v3461_v61 = vld [vmem:[#allocation10 + $0x900] sm:$0xff] }
 0x315   :  { %v3465_v18 = vld [vmem:[#allocation10 + $0x920] sm:$0xff] }
 0x317   :  { %3350 = vmatpush1.bf16.msra.mxu1 %v11343_v25  ;;  %3391 = vmatpush1.bf16.msra.mxu0 %v11345_v40  ;;  %v11429_v25 = vcombine.low %v3470_v34, %v3474_v23  ;;  %v3433_v34 = vld [vmem:[#allocation10 + $0x820] sm:$0xff]  ;;  %v3430_v23 = vld [vmem:[#allocation10 + $0x808] sm:$0xff] }
 0x318   :  { %3351 = vmatprep.subr.bf16.mxu1 %v11336_v1  ;;  %3392 = vmatprep.subr.bf16.mxu0 %v11338_v59  ;;  %v11420_v59 = vcombine.high %v3461_v61, %v3465_v18 }
 0x31b   :  { %3352 = vmatpush1.bf16.msra.mxu1 %v11335_v14  ;;  %3393 = vmatpush1.bf16.msra.mxu0 %v11337_v38  ;;  %v3458_v14 = vld [vmem:[#allocation10 + $0x8e8] sm:$0xff]  ;;  %v11419_v38 = vcombine.low %v3461_v61, %v3465_v18  ;;  %v3487_v18 = vld [vmem:[#allocation10 + $0x9d0] sm:$0xff] }
 0x31c   :  { %3353 = vmatprep.subr.bf16.mxu1 %v11328_v36  ;;  %3394 = vmatprep.subr.bf16.mxu0 %v11330_v15  ;;  %v11421_v36 = vcombine.low %v3462_v26, %v3466_v5  ;;  %v11412_v15 = vcombine.high %v3453_v43, %v3457_v62  ;;  %v11414_v16 = vcombine.high %v3454_v4, %v3458_v14  ;;  %v3491_v26 = vld [vmem:[#allocation10 + $0x9f0] sm:$0xff]  ;;  %v3488_v5 = vld [vmem:[#allocation10 + $0x9d8] sm:$0xff] }
 0x31f   :  { %3354 = vmatpush1.bf16.msra.mxu1 %v11327_v21  ;;  %3395 = vmatpush1.bf16.msra.mxu0 %v11329_v35  ;;  %v3450_v21 = vld [vmem:[#allocation10 + $0x8a8] sm:$0xff]  ;;  %v11411_v35 = vcombine.low %v3453_v43, %v3457_v62  ;;  %v3484_v43 = vld [vmem:[#allocation10 + $0x9b8] sm:$0xff]  ;;  %v11447_v62 = vcombine.low %v3487_v18, %v3491_v26 }
 0x320   :  { %3829 = vmatprep.subr.bf16.mxu1 %v11444_v22  ;;  %3870 = vmatprep.subr.bf16.mxu0 %v11446_v11  ;;  %v11413_v22 = vcombine.low %v3454_v4, %v3458_v14  ;;  %v11404_v11 = vcombine.high %v3445_v58, %v3449_v19  ;;  %v11406_v12 = vcombine.high %v3446_v20, %v3450_v21 }
 0x321   :  { %v13362_v14 = vpack.c.b16 %v13092_v60, %v13092_v60 }
 0x322   :  { %v13348_v53 = vpop.f32.mrf.mxu1  ;;  %v13350_v8 = vpop.f32.mrf.mxu0  ;;  %3372 = vmatmul.mubr.bf16.vlgmr.msra.gmra.mxu1 %v13334_v17  ;;  %3413 = vmatmul.mubr.bf16.vlgmr.msra.gmra.mxu0 %v13334_v17 }
 0x323   :  { %3830 = vmatpush1.bf16.msra.mxu1 %v11443_v48  ;;  %3871 = vmatpush1.bf16.msra.mxu0 %v11445_v41  ;;  %v3442_v48 = vld [vmem:[#allocation10 + $0x868] sm:$0xff]  ;;  %v11403_v41 = vcombine.low %v3445_v58, %v3449_v19  ;;  %v3472_v58 = vld [vmem:[#allocation10 + $0x958] sm:$0xff] }
 0x324   :  { %v13354_v49 = vpop.f32.mrf.mxu1  ;;  %v13356_v50 = vpop.f32.mrf.mxu0  ;;  %3831 = vmatprep.subr.bf16.mxu1 %v11436_v27  ;;  %3872 = vmatprep.subr.bf16.mxu0 %v11438_v46  ;;  %v11405_v27 = vcombine.low %v3446_v20, %v3450_v21  ;;  %v11396_v46 = vcombine.high %v3437_v39, %v3441_v55  ;;  %v11398_v37 = vcombine.high %v3438_v52, %v3442_v48  ;;  %v3476_v19 = vld [vmem:[#allocation10 + $0x978] sm:$0xff] }
 0x325   :  { %3861 = vmatprep.mubr.bf16.mxu1 %v12650_v42  ;;  %3902 = vmatprep.mubr.bf16.mxu0 %v12650_v42 }
 0x326   :  { %v1741_v17 = vpop.f32.mrf.mxu1  ;;  %v1782_v28 = vpop.f32.mrf.mxu0 }
 0x327   :  { %3832 = vmatpush1.bf16.msra.mxu1 %v11435_v2  ;;  %3873 = vmatpush1.bf16.msra.mxu0 %v11437_v3  ;;  %v3434_v2 = vld [vmem:[#allocation10 + $0x828] sm:$0xff]  ;;  %v11395_v3 = vcombine.low %v3437_v39, %v3441_v55  ;;  %v3492_v17 = vld [vmem:[#allocation10 + $0x9f8] sm:$0xff]  ;;  %v11387_v28 = vcombine.low %v3429_v29, %v3433_v34 }
 0x328   :  { %v1742_v40 = vpop.f32.mrf.mxu1  ;;  %v1783_v1 = vpop.f32.mrf.mxu0  ;;  %3833 = vmatprep.subr.bf16.mxu1 %v11428_v31  ;;  %3874 = vmatprep.subr.bf16.mxu0 %v11430_v33  ;;  %v11397_v31 = vcombine.low %v3438_v52, %v3442_v48  ;;  %v11388_v33 = vcombine.high %v3429_v29, %v3433_v34  ;;  %v11390_v61 = vcombine.high %v3430_v23, %v3434_v2  ;;  %v3463_v48 = vld [vmem:[#allocation10 + $0x910] sm:$0xff] }
 0x329   :  { %v11450_v40 = vcombine.high %v3488_v5, %v3492_v17  ;;  %v3479_v1 = vld [vmem:[#allocation10 + $0x990] sm:$0xff]  ;;  %v11449_v4 = vcombine.low %v3488_v5, %v3492_v17  ;;  %v11434_v52 = vcombine.high %v3472_v58, %v3476_v19 }
 0x32b   :  { %3834 = vmatpush1.bf16.msra.mxu1 %v11427_v51  ;;  %3875 = vmatpush1.bf16.msra.mxu0 %v11429_v25  ;;  %v11389_v51 = vcombine.low %v3430_v23, %v3434_v2  ;;  %v11448_v25 = vcombine.high %v3487_v18, %v3491_v26  ;;  %v11433_v23 = vcombine.low %v3472_v58, %v3476_v19  ;;  %v3460_v18 = vld [vmem:[#allocation10 + $0x8f8] sm:$0xff] }
 0x32c   :  { %3835 = vmatprep.subr.bf16.mxu1 %v11420_v59  ;;  %3876 = vmatprep.subr.bf16.mxu0 %v11422_v6  ;;  %v3483_v59 = vld [vmem:[#allocation10 + $0x9b0] sm:$0xff]  ;;  %v3480_v6 = vld [vmem:[#allocation10 + $0x998] sm:$0xff] }
 0x32f   :  { %3836 = vmatpush1.bf16.msra.mxu1 %v11419_v38  ;;  %3877 = vmatpush1.bf16.msra.mxu0 %v11421_v36  ;;  %v11440_v38 = vcombine.high %v3479_v1, %v3483_v59  ;;  %v11442_v36 = vcombine.high %v3480_v6, %v3484_v43 }
 0x330   :  { %3837 = vmatprep.subr.bf16.mxu1 %v11412_v15  ;;  %3878 = vmatprep.subr.bf16.mxu0 %v11414_v16  ;;  %v3471_v15 = vld [vmem:[#allocation10 + $0x950] sm:$0xff] }
 0x331   :  { %v3475_v16 = vld [vmem:[#allocation10 + $0x970] sm:$0xff] }
 0x332   :  { %v11432_v55 = vcombine.high %v3471_v15, %v3475_v16  ;;  %v11431_v34 = vcombine.low %v3471_v15, %v3475_v16  ;;  %v3444_v15 = vld [vmem:[#allocation10 + $0x878] sm:$0xff] }
 0x333   :  { %3838 = vmatpush1.bf16.msra.mxu1 %v11411_v35  ;;  %3879 = vmatpush1.bf16.msra.mxu0 %v11413_v22  ;;  %v11439_v35 = vcombine.low %v3479_v1, %v3483_v59  ;;  %v3452_v1 = vld [vmem:[#allocation10 + $0x8b8] sm:$0xff] }
 0x334   :  { %3839 = vmatprep.subr.bf16.mxu1 %v11404_v11  ;;  %3880 = vmatprep.subr.bf16.mxu0 %v11406_v12  ;;  %v11441_v11 = vcombine.low %v3480_v6, %v3484_v43 }
 0x337   :  { %3840 = vmatpush1.bf16.msra.mxu1 %v11403_v41  ;;  %3881 = vmatpush1.bf16.msra.mxu0 %v11405_v27 }
 0x338   :  { %3841 = vmatprep.subr.bf16.mxu1 %v11396_v46  ;;  %3882 = vmatprep.subr.bf16.mxu0 %v11398_v37  ;;  %v3464_v46 = vld [vmem:[#allocation10 + $0x918] sm:$0xff] }
 0x33b   :  { %3842 = vmatpush1.bf16.msra.mxu1 %v11395_v3  ;;  %3883 = vmatpush1.bf16.msra.mxu0 %v11397_v31  ;;  %v3455_v31 = vld [vmem:[#allocation10 + $0x8d0] sm:$0xff] }
 0x33c   :  { %3843 = vmatprep.subr.bf16.mxu1 %v11388_v33  ;;  %3884 = vmatprep.subr.bf16.mxu0 %v11390_v61  ;;  %v3459_v33 = vld [vmem:[#allocation10 + $0x8f0] sm:$0xff]  ;;  %v3456_v61 = vld [vmem:[#allocation10 + $0x8d8] sm:$0xff] }
 0x33d   :  { %v11416_v17 = vcombine.high %v3455_v31, %v3459_v33  ;;  %v11415_v59 = vcombine.low %v3455_v31, %v3459_v33  ;;  %v11417_v6 = vcombine.low %v3456_v61, %v3460_v18  ;;  %v4054_v31 = vld [vmem:[#allocation10 + $0xba8] sm:$0xff] }
 0x33f   :  { %3844 = vmatpush1.bf16.msra.mxu1 %v11387_v28  ;;  %3885 = vmatpush1.bf16.msra.mxu0 %v11389_v51  ;;  %v11418_v28 = vcombine.high %v3456_v61, %v3460_v18  ;;  %v3447_v51 = vld [vmem:[#allocation10 + $0x890] sm:$0xff] }
 0x340   :  { %3911 = vmatprep.subr.bf16.mxu1 %v11448_v25  ;;  %3952 = vmatprep.subr.bf16.mxu0 %v11450_v40  ;;  %v3451_v25 = vld [vmem:[#allocation10 + $0x8b0] sm:$0xff]  ;;  %v3448_v40 = vld [vmem:[#allocation10 + $0x898] sm:$0xff] }
 0x341   :  { %v11408_v43 = vcombine.high %v3447_v51, %v3451_v25  ;;  %v11407_v16 = vcombine.low %v3447_v51, %v3451_v25  ;;  %v11409_v58 = vcombine.low %v3448_v40, %v3452_v1  ;;  %v4046_v51 = vld [vmem:[#allocation10 + $0xb68] sm:$0xff] }
 0x342   :  { %v2155_v20 = vpop.f32.mrf.mxu1  ;;  %v2196_v21 = vpop.f32.mrf.mxu0  ;;  %3862 = vmatmul.mubr.bf16.vlgmr.msra.gmra.mxu1 %v13362_v14  ;;  %3903 = vmatmul.mubr.bf16.vlgmr.msra.gmra.mxu0 %v13362_v14 }
 0x343   :  { %v13367_v22 = vadd.f32 %v2155_v20, %v13338_v45  ;;  %v13370_v60 = vadd.f32 %v2196_v21, %v13340_v47  ;;  %3912 = vmatpush1.bf16.msra.mxu1 %v11447_v62  ;;  %3953 = vmatpush1.bf16.msra.mxu0 %v11449_v4  ;;  %v3467_v45 = vld [vmem:[#allocation10 + $0x930] sm:$0xff]  ;;  %v3468_v47 = vld [vmem:[#allocation10 + $0x938] sm:$0xff]  ;;  %v11410_v62 = vcombine.high %v3448_v40, %v3452_v1 }
 0x344   :  { %v2157_v12 = vpop.f32.mrf.mxu1  ;;  %v2198_v39 = vpop.f32.mrf.mxu0  ;;  %3913 = vmatprep.subr.bf16.mxu1 %v11440_v38  ;;  %3954 = vmatprep.subr.bf16.mxu0 %v11442_v36  ;;  %v11423_v26 = vcombine.low %v3463_v48, %v3467_v45  ;;  %v11425_v5 = vcombine.low %v3464_v46, %v3468_v47  ;;  %v3439_v4 = vld [vmem:[#allocation10 + $0x850] sm:$0xff]  ;;  %v3440_v36 = vld [vmem:[#allocation10 + $0x858] sm:$0xff] }
 0x345   :  { %v13373_v41 = vadd.f32 %v2157_v12, %v13342_v54  ;;  %v13376_v27 = vadd.f32 %v2198_v39, %v13344_v10  ;;  %3943 = vmatprep.mubr.bf16.mxu1 %v12650_v42  ;;  %3984 = vmatprep.mubr.bf16.mxu0 %v12650_v42  ;;  %v11424_v54 = vcombine.high %v3463_v48, %v3467_v45  ;;  %v3443_v38 = vld [vmem:[#allocation10 + $0x870] sm:$0xff]  ;;  %v3436_v12 = vld [vmem:[#allocation10 + $0x838] sm:$0xff]  ;;  %v4057_v45 = vld [vmem:[#allocation10 + $0xbc0] sm:$0xff] }
 0x346   :  { %v2159_v37 = vpop.f32.mrf.mxu1  ;;  %v2200_v29 = vpop.f32.mrf.mxu0  ;;  %v11426_v10 = vcombine.high %v3464_v46, %v3468_v47  ;;  %v11400_v19 = vcombine.high %v3439_v4, %v3443_v38  ;;  %v11402_v20 = vcombine.high %v3440_v36, %v3444_v15  ;;  %v3431_v21 = vld [vmem:[#allocation10 + $0x810] sm:$0xff]  ;;  %v11399_v39 = vcombine.low %v3439_v4, %v3443_v38  ;;  %v4061_v46 = vld [vmem:[#allocation10 + $0xbe0] sm:$0xff]  ;;  %v4058_v47 = vld [vmem:[#allocation10 + $0xbc8] sm:$0xff] }
 0x347   :  { %3914 = vmatpush1.bf16.msra.mxu1 %v11439_v35  ;;  %3955 = vmatpush1.bf16.msra.mxu0 %v11441_v11  ;;  %v3435_v35 = vld [vmem:[#allocation10 + $0x830] sm:$0xff]  ;;  %v3432_v11 = vld [vmem:[#allocation10 + $0x818] sm:$0xff]  ;;  %v4062_v37 = vld [vmem:[#allocation10 + $0xbe8] sm:$0xff]  ;;  %v11507_v33 = vcombine.low %v4057_v45, %v4061_v46 }
 0x348   :  { %v2160_v2 = vpop.f32.mrf.mxu1  ;;  %v2201_v3 = vpop.f32.mrf.mxu0  ;;  %3915 = vmatprep.subr.bf16.mxu1 %v11432_v55  ;;  %3956 = vmatprep.subr.bf16.mxu0 %v11434_v52  ;;  %v11401_v55 = vcombine.low %v3440_v36, %v3444_v15  ;;  %v11392_v52 = vcombine.high %v3431_v21, %v3435_v35  ;;  %v11394_v48 = vcombine.high %v3432_v11, %v3436_v12  ;;  %v4033_v15 = vld [vmem:[#allocation10 + $0xb00] sm:$0xff] }
 0x349   :  { %v11391_v29 = vcombine.low %v3431_v21, %v3435_v35  ;;  %v11510_v2 = vcombine.high %v4058_v47, %v4062_v37  ;;  %v4049_v3 = vld [vmem:[#allocation10 + $0xb80] sm:$0xff]  ;;  %v11509_v61 = vcombine.low %v4058_v47, %v4062_v37 }
 0x34b   :  { %3916 = vmatpush1.bf16.msra.mxu1 %v11431_v34  ;;  %3957 = vmatpush1.bf16.msra.mxu0 %v11433_v23  ;;  %v11393_v34 = vcombine.low %v3432_v11, %v3436_v12  ;;  %v11508_v23 = vcombine.high %v4057_v45, %v4061_v46 }
 0x34c   :  { %3917 = vmatprep.subr.bf16.mxu1 %v11424_v54  ;;  %3958 = vmatprep.subr.bf16.mxu0 %v11426_v10  ;;  %v4053_v54 = vld [vmem:[#allocation10 + $0xba0] sm:$0xff]  ;;  %v4050_v10 = vld [vmem:[#allocation10 + $0xb88] sm:$0xff] }
 0x34d   :  { %v11500_v18 = vcombine.high %v4049_v3, %v4053_v54  ;;  %v11499_v1 = vcombine.low %v4049_v3, %v4053_v54 }
 0x34f   :  { %3918 = vmatpush1.bf16.msra.mxu1 %v11423_v26  ;;  %3959 = vmatpush1.bf16.msra.mxu0 %v11425_v5  ;;  %v11502_v26 = vcombine.high %v4050_v10, %v4054_v31  ;;  %v4041_v5 = vld [vmem:[#allocation10 + $0xb40] sm:$0xff] }
 0x350   :  { %3919 = vmatprep.subr.bf16.mxu1 %v11416_v17  ;;  %3960 = vmatprep.subr.bf16.mxu0 %v11418_v28  ;;  %v4045_v17 = vld [vmem:[#allocation10 + $0xb60] sm:$0xff]  ;;  %v4042_v28 = vld [vmem:[#allocation10 + $0xb48] sm:$0xff] }
 0x351   :  { %v11492_v38 = vcombine.high %v4041_v5, %v4045_v17  ;;  %v11494_v36 = vcombine.high %v4042_v28, %v4046_v51  ;;  %v11491_v21 = vcombine.low %v4041_v5, %v4045_v17  ;;  %v11493_v35 = vcombine.low %v4042_v28, %v4046_v51 }
 0x353   :  { %3920 = vmatpush1.bf16.msra.mxu1 %v11415_v59  ;;  %3961 = vmatpush1.bf16.msra.mxu0 %v11417_v6 }
 0x354   :  { %3921 = vmatprep.subr.bf16.mxu1 %v11408_v43  ;;  %3962 = vmatprep.subr.bf16.mxu0 %v11410_v62  ;;  %v11501_v43 = vcombine.low %v4050_v10, %v4054_v31 }
 0x357   :  { %3922 = vmatpush1.bf16.msra.mxu1 %v11407_v16  ;;  %3963 = vmatpush1.bf16.msra.mxu0 %v11409_v58  ;;  %v4034_v58 = vld [vmem:[#allocation10 + $0xb08] sm:$0xff] }
 0x358   :  { %3923 = vmatprep.subr.bf16.mxu1 %v11400_v19  ;;  %3964 = vmatprep.subr.bf16.mxu0 %v11402_v20 }
 0x35b   :  { %3924 = vmatpush1.bf16.msra.mxu1 %v11399_v39  ;;  %3965 = vmatpush1.bf16.msra.mxu0 %v11401_v55  ;;  %v4025_v39 = vld [vmem:[#allocation10 + $0xac0] sm:$0xff] }
 0x35c   :  { %3925 = vmatprep.subr.bf16.mxu1 %v11392_v52  ;;  %3966 = vmatprep.subr.bf16.mxu0 %v11394_v48  ;;  %v4029_v55 = vld [vmem:[#allocation10 + $0xae0] sm:$0xff]  ;;  %v4026_v52 = vld [vmem:[#allocation10 + $0xac8] sm:$0xff] }
 0x35d   :  { %v4030_v48 = vld [vmem:[#allocation10 + $0xae8] sm:$0xff]  ;;  %v11476_v47 = vcombine.high %v4025_v39, %v4029_v55  ;;  %v11475_v3 = vcombine.low %v4025_v39, %v4029_v55 }
 0x35e   :  { %v11478_v37 = vcombine.high %v4026_v52, %v4030_v48  ;;  %v11477_v54 = vcombine.low %v4026_v52, %v4030_v48  ;;  %v13398_v52 = vpack.c.b16 %v13108_v13, %v13108_v13 }
 0x35f   :  { %3926 = vmatpush1.bf16.msra.mxu1 %v11391_v29  ;;  %3967 = vmatpush1.bf16.msra.mxu0 %v11393_v34  ;;  %v4017_v29 = vld [vmem:[#allocation10 + $0xa80] sm:$0xff] }
 0x360   :  { %4401 = vmatprep.subr.bf16.mxu1 %v11508_v23  ;;  %4442 = vmatprep.subr.bf16.mxu0 %v11510_v2  ;;  %v4021_v34 = vld [vmem:[#allocation10 + $0xaa0] sm:$0xff]  ;;  %v4018_v23 = vld [vmem:[#allocation10 + $0xa88] sm:$0xff] }
 0x361   :  { %v4022_v2 = vld [vmem:[#allocation10 + $0xaa8] sm:$0xff]  ;;  %v11468_v10 = vcombine.high %v4017_v29, %v4021_v34  ;;  %v11467_v5 = vcombine.low %v4017_v29, %v4021_v34  ;;  %v4048_v29 = vld [vmem:[#allocation10 + $0xb78] sm:$0xff] }
 0x362   :  { %v2237_v25 = vpop.f32.mrf.mxu1  ;;  %v2278_v40 = vpop.f32.mrf.mxu0  ;;  %3944 = vmatmul.mubr.bf16.vlgmr.msra.gmra.mxu1 %v13362_v14  ;;  %3985 = vmatmul.mubr.bf16.vlgmr.msra.gmra.mxu0 %v13362_v14  ;;  %v11470_v31 = vcombine.high %v4018_v23, %v4022_v2  ;;  %v11469_v17 = vcombine.low %v4018_v23, %v4022_v2 }
 0x363   :  { %v13383_v59 = vadd.f32 %v2237_v25, %v13348_v53  ;;  %v13386_v6 = vadd.f32 %v2278_v40, %v13350_v8  ;;  %4402 = vmatpush1.bf16.msra.mxu1 %v11507_v33  ;;  %4443 = vmatpush1.bf16.msra.mxu0 %v11509_v61  ;;  %v4037_v53 = vld [vmem:[#allocation10 + $0xb20] sm:$0xff]  ;;  %v4038_v8 = vld [vmem:[#allocation10 + $0xb28] sm:$0xff] }
 0x364   :  { %v2239_v62 = vpop.f32.mrf.mxu1  ;;  %v2280_v4 = vpop.f32.mrf.mxu0  ;;  %4403 = vmatprep.subr.bf16.mxu1 %v11500_v18  ;;  %4444 = vmatprep.subr.bf16.mxu0 %v11502_v26  ;;  %v11483_v45 = vcombine.low %v4033_v15, %v4037_v53  ;;  %v11485_v46 = vcombine.low %v4034_v58, %v4038_v8  ;;  %v4009_v33 = vld [vmem:[#allocation10 + $0xa40] sm:$0xff]  ;;  %v4010_v18 = vld [vmem:[#allocation10 + $0xa48] sm:$0xff] }
 0x365   :  { %v13389_v16 = vadd.f32 %v2239_v62, %v13354_v49  ;;  %v13392_v14 = vadd.f32 %v2280_v4, %v13356_v50  ;;  %4433 = vmatprep.mubr.bf16.mxu1 %v12650_v42  ;;  %4474 = vmatprep.mubr.bf16.mxu0 %v12650_v42  ;;  %v11484_v49 = vcombine.high %v4033_v15, %v4037_v53  ;;  %v4013_v61 = vld [vmem:[#allocation10 + $0xa60] sm:$0xff]  ;;  %v4014_v26 = vld [vmem:[#allocation10 + $0xa68] sm:$0xff]  ;;  %v4059_v15 = vld [vmem:[#allocation10 + $0xbd0] sm:$0xff] }
 0x366   :  { %v2241_v19 = vpop.f32.mrf.mxu1  ;;  %v2282_v20 = vpop.f32.mrf.mxu0  ;;  %v11486_v50 = vcombine.high %v4034_v58, %v4038_v8  ;;  %v11460_v28 = vcombine.high %v4009_v33, %v4013_v61  ;;  %v11462_v51 = vcombine.high %v4010_v18, %v4014_v26  ;;  %v4001_v25 = vld [vmem:[#allocation10 + $0xa00] sm:$0xff]  ;;  %v11459_v62 = vcombine.low %v4009_v33, %v4013_v61  ;;  %v4063_v53 = vld [vmem:[#allocation10 + $0xbf0] sm:$0xff]  ;;  %v4060_v58 = vld [vmem:[#allocation10 + $0xbd8] sm:$0xff] }
 0x367   :  { %4404 = vmatpush1.bf16.msra.mxu1 %v11499_v1  ;;  %4445 = vmatpush1.bf16.msra.mxu0 %v11501_v43  ;;  %v4005_v40 = vld [vmem:[#allocation10 + $0xa20] sm:$0xff]  ;;  %v4002_v1 = vld [vmem:[#allocation10 + $0xa08] sm:$0xff]  ;;  %v11461_v4 = vcombine.low %v4010_v18, %v4014_v26  ;;  %v4064_v8 = vld [vmem:[#allocation10 + $0xbf8] sm:$0xff]  ;;  %v11511_v39 = vcombine.low %v4059_v15, %v4063_v53 }
 0x368   :  { %v2242_v11 = vpop.f32.mrf.mxu1  ;;  %v2283_v12 = vpop.f32.mrf.mxu0  ;;  %4405 = vmatprep.subr.bf16.mxu1 %v11492_v38  ;;  %4446 = vmatprep.subr.bf16.mxu0 %v11494_v36  ;;  %v4006_v43 = vld [vmem:[#allocation10 + $0xa28] sm:$0xff]  ;;  %v11452_v38 = vcombine.high %v4001_v25, %v4005_v40  ;;  %v11451_v19 = vcombine.low %v4001_v25, %v4005_v40  ;;  %v11513_v55 = vcombine.low %v4060_v58, %v4064_v8  ;;  %v4035_v18 = vld [vmem:[#allocation10 + $0xb10] sm:$0xff] }
 0x369   :  { %v11454_v36 = vcombine.high %v4002_v1, %v4006_v43  ;;  %v11453_v20 = vcombine.low %v4002_v1, %v4006_v43  ;;  %v4051_v11 = vld [vmem:[#allocation10 + $0xb90] sm:$0xff] }
 0x36a   :  { %v4055_v12 = vld [vmem:[#allocation10 + $0xbb0] sm:$0xff] }
 0x36b   :  { %4406 = vmatpush1.bf16.msra.mxu1 %v11491_v21  ;;  %4447 = vmatpush1.bf16.msra.mxu0 %v11493_v35  ;;  %v11512_v21 = vcombine.high %v4059_v15, %v4063_v53  ;;  %v11514_v35 = vcombine.high %v4060_v58, %v4064_v8  ;;  %v11504_v48 = vcombine.high %v4051_v11, %v4055_v12 }
 0x36c   :  { %4407 = vmatprep.subr.bf16.mxu1 %v11484_v49  ;;  %4448 = vmatprep.subr.bf16.mxu0 %v11486_v50  ;;  %v4052_v49 = vld [vmem:[#allocation10 + $0xb98] sm:$0xff]  ;;  %v11503_v2 = vcombine.low %v4051_v11, %v4055_v12 }
 0x36d   :  { %v4056_v50 = vld [vmem:[#allocation10 + $0xbb8] sm:$0xff] }
 0x36f   :  { %4408 = vmatpush1.bf16.msra.mxu1 %v11483_v45  ;;  %4449 = vmatpush1.bf16.msra.mxu0 %v11485_v46  ;;  %v11506_v45 = vcombine.high %v4052_v49, %v4056_v50  ;;  %v4043_v46 = vld [vmem:[#allocation10 + $0xb50] sm:$0xff] }
 0x370   :  { %4409 = vmatprep.subr.bf16.mxu1 %v11476_v47  ;;  %4450 = vmatprep.subr.bf16.mxu0 %v11478_v37  ;;  %v4047_v47 = vld [vmem:[#allocation10 + $0xb70] sm:$0xff]  ;;  %v4044_v37 = vld [vmem:[#allocation10 + $0xb58] sm:$0xff] }
 0x371   :  { %v11496_v33 = vcombine.high %v4043_v46, %v4047_v47  ;;  %v11498_v61 = vcombine.high %v4044_v37, %v4048_v29  ;;  %v11495_v25 = vcombine.low %v4043_v46, %v4047_v47  ;;  %v11497_v40 = vcombine.low %v4044_v37, %v4048_v29 }
 0x373   :  { %4410 = vmatpush1.bf16.msra.mxu1 %v11475_v3  ;;  %4451 = vmatpush1.bf16.msra.mxu0 %v11477_v54  ;;  %v11505_v54 = vcombine.low %v4052_v49, %v4056_v50 }
 0x374   :  { %4411 = vmatprep.subr.bf16.mxu1 %v11468_v10  ;;  %4452 = vmatprep.subr.bf16.mxu0 %v11470_v31 }
 0x377   :  { %4412 = vmatpush1.bf16.msra.mxu1 %v11467_v5  ;;  %4453 = vmatpush1.bf16.msra.mxu0 %v11469_v17  ;;  %v4036_v17 = vld [vmem:[#allocation10 + $0xb18] sm:$0xff] }
 0x378   :  { %4413 = vmatprep.subr.bf16.mxu1 %v11460_v28  ;;  %4454 = vmatprep.subr.bf16.mxu0 %v11462_v51 }
 0x37b   :  { %4414 = vmatpush1.bf16.msra.mxu1 %v11459_v62  ;;  %4455 = vmatpush1.bf16.msra.mxu0 %v11461_v4  ;;  %v4027_v62 = vld [vmem:[#allocation10 + $0xad0] sm:$0xff] }
 0x37c   :  { %4415 = vmatprep.subr.bf16.mxu1 %v11452_v38  ;;  %4456 = vmatprep.subr.bf16.mxu0 %v11454_v36  ;;  %v4031_v4 = vld [vmem:[#allocation10 + $0xaf0] sm:$0xff]  ;;  %v4028_v38 = vld [vmem:[#allocation10 + $0xad8] sm:$0xff] }
 0x37d   :  { %v4032_v36 = vld [vmem:[#allocation10 + $0xaf8] sm:$0xff]  ;;  %v11480_v58 = vcombine.high %v4027_v62, %v4031_v4  ;;  %v11479_v11 = vcombine.low %v4027_v62, %v4031_v4 }
 0x37e   :  { %v11482_v8 = vcombine.high %v4028_v38, %v4032_v36  ;;  %v11481_v12 = vcombine.low %v4028_v38, %v4032_v36 }
 0x37f   :  { %4416 = vmatpush1.bf16.msra.mxu1 %v11451_v19  ;;  %4457 = vmatpush1.bf16.msra.mxu0 %v11453_v20  ;;  %v4019_v19 = vld [vmem:[#allocation10 + $0xa90] sm:$0xff] }
 0x380   :  { %4483 = vmatprep.subr.bf16.mxu1 %v11512_v21  ;;  %4524 = vmatprep.subr.bf16.mxu0 %v11514_v35  ;;  %v4023_v20 = vld [vmem:[#allocation10 + $0xab0] sm:$0xff]  ;;  %v4020_v21 = vld [vmem:[#allocation10 + $0xa98] sm:$0xff] }
 0x381   :  { %v4024_v35 = vld [vmem:[#allocation10 + $0xab8] sm:$0xff]  ;;  %v11472_v49 = vcombine.high %v4019_v19, %v4023_v20  ;;  %v11471_v46 = vcombine.low %v4019_v19, %v4023_v20 }
 0x382   :  { %v2719_v34 = vpop.f32.mrf.mxu1  ;;  %v2760_v23 = vpop.f32.mrf.mxu0  ;;  %4434 = vmatmul.mubr.bf16.vlgmr.msra.gmra.mxu1 %v13398_v52  ;;  %4475 = vmatmul.mubr.bf16.vlgmr.msra.gmra.mxu0 %v13398_v52  ;;  %v11474_v50 = vcombine.high %v4020_v21, %v4024_v35  ;;  %v11473_v47 = vcombine.low %v4020_v21, %v4024_v35 }
 0x383   :  { %v13403_v3 = vadd.f32 %v2719_v34, %v13367_v22  ;;  %v13406_v13 = vadd.f32 %v2760_v23, %v13370_v60  ;;  %4484 = vmatpush1.bf16.msra.mxu1 %v11511_v39  ;;  %4525 = vmatpush1.bf16.msra.mxu0 %v11513_v55  ;;  %v4039_v22 = vld [vmem:[#allocation10 + $0xb30] sm:$0xff]  ;;  %v4040_v60 = vld [vmem:[#allocation10 + $0xb38] sm:$0xff] }
 0x384   :  { %v2721_v10 = vpop.f32.mrf.mxu1  ;;  %v2762_v31 = vpop.f32.mrf.mxu0  ;;  %4485 = vmatprep.subr.bf16.mxu1 %v11504_v48  ;;  %4526 = vmatprep.subr.bf16.mxu0 %v11506_v45  ;;  %v11487_v15 = vcombine.low %v4035_v18, %v4039_v22  ;;  %v11489_v53 = vcombine.low %v4036_v17, %v4040_v60  ;;  %v4011_v39 = vld [vmem:[#allocation10 + $0xa50] sm:$0xff]  ;;  %v4012_v48 = vld [vmem:[#allocation10 + $0xa58] sm:$0xff] }
 0x385   :  { %v13409_v26 = vadd.f32 %v2721_v10, %v13373_v41  ;;  %v13412_v5 = vadd.f32 %v2762_v31, %v13376_v27  ;;  %4515 = vmatprep.mubr.bf16.mxu1 %v12650_v42  ;;  %4556 = vmatprep.mubr.bf16.mxu0 %v12650_v42  ;;  %v11488_v41 = vcombine.high %v4035_v18, %v4039_v22  ;;  %v4015_v55 = vld [vmem:[#allocation10 + $0xa70] sm:$0xff]  ;;  %v4016_v45 = vld [vmem:[#allocation10 + $0xa78] sm:$0xff]  ;;  %v4629_v18 = vld [vmem:[#allocation10 + $0xdc0] sm:$0xff] }
 0x386   :  { %v2723_v28 = vpop.f32.mrf.mxu1  ;;  %v2764_v51 = vpop.f32.mrf.mxu0  ;;  %v11490_v27 = vcombine.high %v4036_v17, %v4040_v60  ;;  %v11464_v37 = vcombine.high %v4011_v39, %v4015_v55  ;;  %v11466_v29 = vcombine.high %v4012_v48, %v4016_v45  ;;  %v4003_v34 = vld [vmem:[#allocation10 + $0xa10] sm:$0xff]  ;;  %v11463_v10 = vcombine.low %v4011_v39, %v4015_v55  ;;  %v4633_v22 = vld [vmem:[#allocation10 + $0xde0] sm:$0xff]  ;;  %v4630_v17 = vld [vmem:[#allocation10 + $0xdc8] sm:$0xff] }
 0x387   :  { %4486 = vmatpush1.bf16.msra.mxu1 %v11503_v2  ;;  %4527 = vmatpush1.bf16.msra.mxu0 %v11505_v54  ;;  %v4007_v23 = vld [vmem:[#allocation10 + $0xa30] sm:$0xff]  ;;  %v4004_v2 = vld [vmem:[#allocation10 + $0xa18] sm:$0xff]  ;;  %v11465_v31 = vcombine.low %v4012_v48, %v4016_v45  ;;  %v4634_v60 = vld [vmem:[#allocation10 + $0xde8] sm:$0xff]  ;;  %v11571_v62 = vcombine.low %v4629_v18, %v4633_v22 }
 0x388   :  { %v2724_v1 = vpop.f32.mrf.mxu1  ;;  %v2765_v43 = vpop.f32.mrf.mxu0  ;;  %4487 = vmatprep.subr.bf16.mxu1 %v11496_v33  ;;  %4528 = vmatprep.subr.bf16.mxu0 %v11498_v61  ;;  %v4008_v54 = vld [vmem:[#allocation10 + $0xa38] sm:$0xff]  ;;  %v11456_v33 = vcombine.high %v4003_v34, %v4007_v23  ;;  %v11455_v28 = vcombine.low %v4003_v34, %v4007_v23  ;;  %v11573_v4 = vcombine.low %v4630_v17, %v4634_v60  ;;  %v4605_v48 = vld [vmem:[#allocation10 + $0xd00] sm:$0xff] }
 0x389   :  { %v11458_v61 = vcombine.high %v4004_v2, %v4008_v54  ;;  %v11457_v51 = vcombine.low %v4004_v2, %v4008_v54  ;;  %v4621_v1 = vld [vmem:[#allocation10 + $0xd80] sm:$0xff] }
 0x38a   :  { %v4625_v43 = vld [vmem:[#allocation10 + $0xda0] sm:$0xff] }
 0x38b   :  { %4488 = vmatpush1.bf16.msra.mxu1 %v11495_v25  ;;  %4529 = vmatpush1.bf16.msra.mxu0 %v11497_v40  ;;  %v11572_v25 = vcombine.high %v4629_v18, %v4633_v22  ;;  %v11574_v40 = vcombine.high %v4630_v17, %v4634_v60  ;;  %v11564_v38 = vcombine.high %v4621_v1, %v4625_v43  ;;  %v4597_v54 = vld [vmem:[#allocation10 + $0xcc0] sm:$0xff] }
 0x38c   :  { %4489 = vmatprep.subr.bf16.mxu1 %v11488_v41  ;;  %4530 = vmatprep.subr.bf16.mxu0 %v11490_v27  ;;  %v4622_v41 = vld [vmem:[#allocation10 + $0xd88] sm:$0xff]  ;;  %v11563_v21 = vcombine.low %v4621_v1, %v4625_v43  ;;  %v4589_v60 = vld [vmem:[#allocation10 + $0xc80] sm:$0xff] }
 0x38d   :  { %v4626_v27 = vld [vmem:[#allocation10 + $0xda8] sm:$0xff] }
 0x38e   :  { %v11566_v36 = vcombine.high %v4622_v41, %v4626_v27 }
 0x38f   :  { %4490 = vmatpush1.bf16.msra.mxu1 %v11487_v15  ;;  %4531 = vmatpush1.bf16.msra.mxu0 %v11489_v53  ;;  %v4613_v15 = vld [vmem:[#allocation10 + $0xd40] sm:$0xff] }
 0x390   :  { %4491 = vmatprep.subr.bf16.mxu1 %v11480_v58  ;;  %4532 = vmatprep.subr.bf16.mxu0 %v11482_v8  ;;  %v4617_v53 = vld [vmem:[#allocation10 + $0xd60] sm:$0xff]  ;;  %v4614_v58 = vld [vmem:[#allocation10 + $0xd48] sm:$0xff] }
 0x391   :  { %v4618_v8 = vld [vmem:[#allocation10 + $0xd68] sm:$0xff]  ;;  %v11556_v39 = vcombine.high %v4613_v15, %v4617_v53 }
 0x392   :  { %v11558_v55 = vcombine.high %v4614_v58, %v4618_v8  ;;  %v11557_v34 = vcombine.low %v4614_v58, %v4618_v8  ;;  %v4573_v8 = vld [vmem:[#allocation10 + $0xc00] sm:$0xff] }
 0x393   :  { %4492 = vmatpush1.bf16.msra.mxu1 %v11479_v11  ;;  %4533 = vmatpush1.bf16.msra.mxu0 %v11481_v12  ;;  %v11565_v12 = vcombine.low %v4622_v41, %v4626_v27  ;;  %v4581_v27 = vld [vmem:[#allocation10 + $0xc40] sm:$0xff] }
 0x394   :  { %4493 = vmatprep.subr.bf16.mxu1 %v11472_v49  ;;  %4534 = vmatprep.subr.bf16.mxu0 %v11474_v50 }
 0x397   :  { %4494 = vmatpush1.bf16.msra.mxu1 %v11471_v46  ;;  %4535 = vmatpush1.bf16.msra.mxu0 %v11473_v47  ;;  %v4606_v46 = vld [vmem:[#allocation10 + $0xd08] sm:$0xff] }
 0x398   :  { %4495 = vmatprep.subr.bf16.mxu1 %v11464_v37  ;;  %4536 = vmatprep.subr.bf16.mxu0 %v11466_v29  ;;  %v11555_v29 = vcombine.low %v4613_v15, %v4617_v53 }
 0x39b   :  { %4496 = vmatpush1.bf16.msra.mxu1 %v11463_v10  ;;  %4537 = vmatpush1.bf16.msra.mxu0 %v11465_v31  ;;  %v4601_v10 = vld [vmem:[#allocation10 + $0xce0] sm:$0xff]  ;;  %v4598_v31 = vld [vmem:[#allocation10 + $0xcc8] sm:$0xff] }
 0x39c   :  { %4497 = vmatprep.subr.bf16.mxu1 %v11456_v33  ;;  %4538 = vmatprep.subr.bf16.mxu0 %v11458_v61  ;;  %v4602_v33 = vld [vmem:[#allocation10 + $0xce8] sm:$0xff]  ;;  %v11540_v22 = vcombine.high %v4597_v54, %v4601_v10 }
 0x39d   :  { %v11542_v17 = vcombine.high %v4598_v31, %v4602_v33  ;;  %v11541_v1 = vcombine.low %v4598_v31, %v4602_v33 }
 0x39f   :  { %4498 = vmatpush1.bf16.msra.mxu1 %v11455_v28  ;;  %4539 = vmatpush1.bf16.msra.mxu0 %v11457_v51  ;;  %v4593_v28 = vld [vmem:[#allocation10 + $0xca0] sm:$0xff]  ;;  %v4590_v51 = vld [vmem:[#allocation10 + $0xc88] sm:$0xff] }
 0x3a0   :  { %4973 = vmatprep.subr.bf16.mxu1 %v11572_v25  ;;  %5014 = vmatprep.subr.bf16.mxu0 %v11574_v40  ;;  %v4594_v25 = vld [vmem:[#allocation10 + $0xca8] sm:$0xff]  ;;  %v11539_v40 = vcombine.low %v4597_v54, %v4601_v10  ;;  %v11532_v43 = vcombine.high %v4589_v60, %v4593_v28  ;;  %v13434_v10 = vpack.c.b16 %v13138_v9, %v13138_v9 }
 0x3a1   :  { %v11534_v41 = vcombine.high %v4590_v51, %v4594_v25  ;;  %v11533_v15 = vcombine.low %v4590_v51, %v4594_v25 }
 0x3a2   :  { %v2801_v19 = vpop.f32.mrf.mxu1  ;;  %v2842_v20 = vpop.f32.mrf.mxu0  ;;  %4516 = vmatmul.mubr.bf16.vlgmr.msra.gmra.mxu1 %v13398_v52  ;;  %4557 = vmatmul.mubr.bf16.vlgmr.msra.gmra.mxu0 %v13398_v52 }
 0x3a3   :  { %v13419_v35 = vadd.f32 %v2801_v19, %v13383_v59  ;;  %v13422_v11 = vadd.f32 %v2842_v20, %v13386_v6  ;;  %4974 = vmatpush1.bf16.msra.mxu1 %v11571_v62  ;;  %5015 = vmatpush1.bf16.msra.mxu0 %v11573_v4  ;;  %v4609_v59 = vld [vmem:[#allocation10 + $0xd20] sm:$0xff]  ;;  %v4610_v6 = vld [vmem:[#allocation10 + $0xd28] sm:$0xff] }
 0x3a4   :  { %v2803_v49 = vpop.f32.mrf.mxu1  ;;  %v2844_v50 = vpop.f32.mrf.mxu0  ;;  %4975 = vmatprep.subr.bf16.mxu1 %v11564_v38  ;;  %5016 = vmatprep.subr.bf16.mxu0 %v11566_v36  ;;  %v11547_v61 = vcombine.low %v4605_v48, %v4609_v59  ;;  %v11549_v18 = vcombine.low %v4606_v46, %v4610_v6  ;;  %v4585_v62 = vld [vmem:[#allocation10 + $0xc60] sm:$0xff]  ;;  %v4582_v4 = vld [vmem:[#allocation10 + $0xc48] sm:$0xff]  ;;  %v11531_v36 = vcombine.low %v4589_v60, %v4593_v28 }
 0x3a5   :  { %v13425_v45 = vadd.f32 %v2803_v49, %v13389_v16  ;;  %v13428_v52 = vadd.f32 %v2844_v50, %v13392_v14  ;;  %5005 = vmatprep.mubr.bf16.mxu1 %v12650_v42  ;;  %5046 = vmatprep.mubr.bf16.mxu0 %v12650_v42  ;;  %v11548_v16 = vcombine.high %v4605_v48, %v4609_v59  ;;  %v4586_v38 = vld [vmem:[#allocation10 + $0xc68] sm:$0xff]  ;;  %v4577_v19 = vld [vmem:[#allocation10 + $0xc20] sm:$0xff]  ;;  %v4635_v48 = vld [vmem:[#allocation10 + $0xdf0] sm:$0xff] }
 0x3a6   :  { %v2805_v47 = vpop.f32.mrf.mxu1  ;;  %v2846_v37 = vpop.f32.mrf.mxu0  ;;  %v11550_v14 = vcombine.high %v4606_v46, %v4610_v6  ;;  %v11524_v53 = vcombine.high %v4581_v27, %v4585_v62  ;;  %v11526_v58 = vcombine.high %v4582_v4, %v4586_v38  ;;  %v4574_v20 = vld [vmem:[#allocation10 + $0xc08] sm:$0xff]  ;;  %v11525_v49 = vcombine.low %v4582_v4, %v4586_v38  ;;  %v4632_v59 = vld [vmem:[#allocation10 + $0xdd8] sm:$0xff] }
 0x3a7   :  { %4976 = vmatpush1.bf16.msra.mxu1 %v11563_v21  ;;  %5017 = vmatpush1.bf16.msra.mxu0 %v11565_v12  ;;  %v4578_v21 = vld [vmem:[#allocation10 + $0xc28] sm:$0xff]  ;;  %v11523_v12 = vcombine.low %v4581_v27, %v4585_v62  ;;  %v11516_v50 = vcombine.high %v4573_v8, %v4577_v19  ;;  %v4636_v46 = vld [vmem:[#allocation10 + $0xdf8] sm:$0xff]  ;;  %v11515_v6 = vcombine.low %v4573_v8, %v4577_v19  ;;  %v4607_v62 = vld [vmem:[#allocation10 + $0xd10] sm:$0xff] }
 0x3a8   :  { %v2806_v23 = vpop.f32.mrf.mxu1  ;;  %v2847_v2 = vpop.f32.mrf.mxu0  ;;  %4977 = vmatprep.subr.bf16.mxu1 %v11556_v39  ;;  %5018 = vmatprep.subr.bf16.mxu0 %v11558_v55  ;;  %v11518_v39 = vcombine.high %v4574_v20, %v4578_v21  ;;  %v4631_v55 = vld [vmem:[#allocation10 + $0xdd0] sm:$0xff]  ;;  %v11517_v47 = vcombine.low %v4574_v20, %v4578_v21  ;;  %v11577_v54 = vcombine.low %v4632_v59, %v4636_v46 }
 0x3a9   :  { %v11576_v37 = vcombine.high %v4631_v55, %v4635_v48  ;;  %v4627_v23 = vld [vmem:[#allocation10 + $0xdb0] sm:$0xff]  ;;  %v4624_v2 = vld [vmem:[#allocation10 + $0xd98] sm:$0xff] }
 0x3aa   :  { %v4599_v21 = vld [vmem:[#allocation10 + $0xcd0] sm:$0xff] }
 0x3ab   :  { %4978 = vmatpush1.bf16.msra.mxu1 %v11555_v29  ;;  %5019 = vmatpush1.bf16.msra.mxu0 %v11557_v34  ;;  %v11578_v29 = vcombine.high %v4632_v59, %v4636_v46  ;;  %v4623_v34 = vld [vmem:[#allocation10 + $0xd90] sm:$0xff] }
 0x3ac   :  { %4979 = vmatprep.subr.bf16.mxu1 %v11548_v16  ;;  %5020 = vmatprep.subr.bf16.mxu0 %v11550_v14  ;;  %v4628_v16 = vld [vmem:[#allocation10 + $0xdb8] sm:$0xff]  ;;  %v11575_v14 = vcombine.low %v4631_v55, %v4635_v48  ;;  %v11568_v31 = vcombine.high %v4623_v34, %v4627_v23  ;;  %v11567_v51 = vcombine.low %v4623_v34, %v4627_v23  ;;  %v4591_v46 = vld [vmem:[#allocation10 + $0xc90] sm:$0xff] }
 0x3ad   :  { %v11570_v33 = vcombine.high %v4624_v2, %v4628_v16 }
 0x3af   :  { %4980 = vmatpush1.bf16.msra.mxu1 %v11547_v61  ;;  %5021 = vmatpush1.bf16.msra.mxu0 %v11549_v18  ;;  %v4615_v61 = vld [vmem:[#allocation10 + $0xd50] sm:$0xff] }
 0x3b0   :  { %4981 = vmatprep.subr.bf16.mxu1 %v11540_v22  ;;  %5022 = vmatprep.subr.bf16.mxu0 %v11542_v17  ;;  %v4619_v18 = vld [vmem:[#allocation10 + $0xd70] sm:$0xff]  ;;  %v4616_v22 = vld [vmem:[#allocation10 + $0xd58] sm:$0xff] }
 0x3b1   :  { %v4620_v17 = vld [vmem:[#allocation10 + $0xd78] sm:$0xff] }
 0x3b2   :  { %v11562_v27 = vcombine.high %v4616_v22, %v4620_v17  ;;  %v11561_v8 = vcombine.low %v4616_v22, %v4620_v17  ;;  %v4575_v17 = vld [vmem:[#allocation10 + $0xc10] sm:$0xff] }
 0x3b3   :  { %4982 = vmatpush1.bf16.msra.mxu1 %v11539_v40  ;;  %5023 = vmatpush1.bf16.msra.mxu0 %v11541_v1  ;;  %v11569_v40 = vcombine.low %v4624_v2, %v4628_v16  ;;  %v4583_v16 = vld [vmem:[#allocation10 + $0xc50] sm:$0xff] }
 0x3b4   :  { %4983 = vmatprep.subr.bf16.mxu1 %v11532_v43  ;;  %5024 = vmatprep.subr.bf16.mxu0 %v11534_v41  ;;  %v11560_v41 = vcombine.high %v4615_v61, %v4619_v18 }
 0x3b7   :  { %4984 = vmatpush1.bf16.msra.mxu1 %v11531_v36  ;;  %5025 = vmatpush1.bf16.msra.mxu0 %v11533_v15  ;;  %v4608_v36 = vld [vmem:[#allocation10 + $0xd18] sm:$0xff] }
 0x3b8   :  { %4985 = vmatprep.subr.bf16.mxu1 %v11524_v53  ;;  %5026 = vmatprep.subr.bf16.mxu0 %v11526_v58  ;;  %v11559_v58 = vcombine.low %v4615_v61, %v4619_v18 }
 0x3bb   :  { %4986 = vmatpush1.bf16.msra.mxu1 %v11523_v12  ;;  %5027 = vmatpush1.bf16.msra.mxu0 %v11525_v49  ;;  %v4603_v12 = vld [vmem:[#allocation10 + $0xcf0] sm:$0xff]  ;;  %v4600_v49 = vld [vmem:[#allocation10 + $0xcd8] sm:$0xff] }
 0x3bc   :  { %4987 = vmatprep.subr.bf16.mxu1 %v11516_v50  ;;  %5028 = vmatprep.subr.bf16.mxu0 %v11518_v39  ;;  %v4604_v50 = vld [vmem:[#allocation10 + $0xcf8] sm:$0xff]  ;;  %v11544_v48 = vcombine.high %v4599_v21, %v4603_v12 }
 0x3bd   :  { %v11546_v59 = vcombine.high %v4600_v49, %v4604_v50  ;;  %v11545_v34 = vcombine.low %v4600_v49, %v4604_v50  ;;  %v5185_v50 = vld [vmem:[#allocation10 + $0xf40] sm:$0xff] }
 0x3bf   :  { %4988 = vmatpush1.bf16.msra.mxu1 %v11515_v6  ;;  %5029 = vmatpush1.bf16.msra.mxu0 %v11517_v47  ;;  %v4595_v6 = vld [vmem:[#allocation10 + $0xcb0] sm:$0xff]  ;;  %v4592_v47 = vld [vmem:[#allocation10 + $0xc98] sm:$0xff] }
 0x3c0   :  { %5055 = vmatprep.subr.bf16.mxu1 %v11576_v37  ;;  %5096 = vmatprep.subr.bf16.mxu0 %v11578_v29  ;;  %v4596_v37 = vld [vmem:[#allocation10 + $0xcb8] sm:$0xff]  ;;  %v11543_v29 = vcombine.low %v4599_v21, %v4603_v12  ;;  %v11536_v23 = vcombine.high %v4591_v46, %v4595_v6 }
 0x3c1   :  { %v11538_v2 = vcombine.high %v4592_v47, %v4596_v37  ;;  %v11537_v61 = vcombine.low %v4592_v47, %v4596_v37 }
 0x3c2   :  { %v3291_v60 = vpop.f32.mrf.mxu1  ;;  %v3332_v28 = vpop.f32.mrf.mxu0  ;;  %5006 = vmatmul.mubr.bf16.vlgmr.msra.gmra.mxu1 %v13434_v10  ;;  %5047 = vmatmul.mubr.bf16.vlgmr.msra.gmra.mxu0 %v13434_v10 }
 0x3c3   :  { %v13439_v25 = vadd.f32 %v3291_v60, %v13403_v3  ;;  %v13442_v9 = vadd.f32 %v3332_v28, %v13406_v13  ;;  %5056 = vmatpush1.bf16.msra.mxu1 %v11575_v14  ;;  %5097 = vmatpush1.bf16.msra.mxu0 %v11577_v54  ;;  %v4611_v3 = vld [vmem:[#allocation10 + $0xd30] sm:$0xff]  ;;  %v4612_v13 = vld [vmem:[#allocation10 + $0xd38] sm:$0xff] }
 0x3c4   :  { %v3293_v1 = vpop.f32.mrf.mxu1  ;;  %v3334_v43 = vpop.f32.mrf.mxu0  ;;  %5057 = vmatprep.subr.bf16.mxu1 %v11568_v31  ;;  %5098 = vmatprep.subr.bf16.mxu0 %v11570_v33  ;;  %v11551_v39 = vcombine.low %v4607_v62, %v4611_v3  ;;  %v11553_v55 = vcombine.low %v4608_v36, %v4612_v13  ;;  %v4587_v14 = vld [vmem:[#allocation10 + $0xc70] sm:$0xff]  ;;  %v4584_v54 = vld [vmem:[#allocation10 + $0xc58] sm:$0xff]  ;;  %v11535_v33 = vcombine.low %v4591_v46, %v4595_v6 }
 0x3c5   :  { %v13445_v4 = vadd.f32 %v3293_v1, %v13409_v26  ;;  %v13448_v38 = vadd.f32 %v3334_v43, %v13412_v5  ;;  %5087 = vmatprep.mubr.bf16.mxu1 %v12650_v42  ;;  %5128 = vmatprep.mubr.bf16.mxu0 %v12650_v42  ;;  %v11552_v26 = vcombine.high %v4607_v62, %v4611_v3  ;;  %v4588_v31 = vld [vmem:[#allocation10 + $0xc78] sm:$0xff]  ;;  %v4579_v60 = vld [vmem:[#allocation10 + $0xc30] sm:$0xff]  ;;  %v5205_v62 = vld [vmem:[#allocation10 + $0xfe0] sm:$0xff] }
 0x3c6   :  { %v3295_v15 = vpop.f32.mrf.mxu1  ;;  %v3336_v53 = vpop.f32.mrf.mxu0  ;;  %v11554_v5 = vcombine.high %v4608_v36, %v4612_v13  ;;  %v11528_v18 = vcombine.high %v4583_v16, %v4587_v14  ;;  %v11530_v22 = vcombine.high %v4584_v54, %v4588_v31  ;;  %v4576_v28 = vld [vmem:[#allocation10 + $0xc18] sm:$0xff]  ;;  %v11529_v1 = vcombine.low %v4584_v54, %v4588_v31  ;;  %v5202_v3 = vld [vmem:[#allocation10 + $0xfc8] sm:$0xff] }
 0x3c7   :  { %5058 = vmatpush1.bf16.msra.mxu1 %v11567_v51  ;;  %5099 = vmatpush1.bf16.msra.mxu0 %v11569_v40  ;;  %v4580_v51 = vld [vmem:[#allocation10 + $0xc38] sm:$0xff]  ;;  %v11527_v40 = vcombine.low %v4583_v16, %v4587_v14  ;;  %v11520_v43 = vcombine.high %v4575_v17, %v4579_v60  ;;  %v5206_v36 = vld [vmem:[#allocation10 + $0xfe8] sm:$0xff]  ;;  %v11519_v13 = vcombine.low %v4575_v17, %v4579_v60  ;;  %v5177_v14 = vld [vmem:[#allocation10 + $0xf00] sm:$0xff] }
 0x3c8   :  { %v3296_v19 = vpop.f32.mrf.mxu1  ;;  %v3337_v20 = vpop.f32.mrf.mxu0  ;;  %5059 = vmatprep.subr.bf16.mxu1 %v11560_v41  ;;  %5100 = vmatprep.subr.bf16.mxu0 %v11562_v27  ;;  %v11522_v41 = vcombine.high %v4576_v28, %v4580_v51  ;;  %v5201_v27 = vld [vmem:[#allocation10 + $0xfc0] sm:$0xff]  ;;  %v11521_v15 = vcombine.low %v4576_v28, %v4580_v51  ;;  %v11637_v21 = vcombine.low %v5202_v3, %v5206_v36  ;;  %v5178_v31 = vld [vmem:[#allocation10 + $0xf08] sm:$0xff] }
 0x3c9   :  { %v11636_v53 = vcombine.high %v5201_v27, %v5205_v62  ;;  %v5197_v19 = vld [vmem:[#allocation10 + $0xfa0] sm:$0xff]  ;;  %v5194_v20 = vld [vmem:[#allocation10 + $0xf88] sm:$0xff] }
 0x3ca   :  { %v5169_v28 = vld [vmem:[#allocation10 + $0xec0] sm:$0xff] }
 0x3cb   :  { %5060 = vmatpush1.bf16.msra.mxu1 %v11559_v58  ;;  %5101 = vmatpush1.bf16.msra.mxu0 %v11561_v8  ;;  %v11638_v58 = vcombine.high %v5202_v3, %v5206_v36  ;;  %v5193_v8 = vld [vmem:[#allocation10 + $0xf80] sm:$0xff] }
 0x3cc   :  { %5061 = vmatprep.subr.bf16.mxu1 %v11552_v26  ;;  %5102 = vmatprep.subr.bf16.mxu0 %v11554_v5  ;;  %v5198_v26 = vld [vmem:[#allocation10 + $0xfa8] sm:$0xff]  ;;  %v11635_v5 = vcombine.low %v5201_v27, %v5205_v62  ;;  %v11628_v12 = vcombine.high %v5193_v8, %v5197_v19  ;;  %v11627_v6 = vcombine.low %v5193_v8, %v5197_v19  ;;  %v5173_v51 = vld [vmem:[#allocation10 + $0xee0] sm:$0xff] }
 0x3cd   :  { %v11630_v49 = vcombine.high %v5194_v20, %v5198_v26  ;;  %v11604_v27 = vcombine.high %v5169_v28, %v5173_v51  ;;  %v5161_v3 = vld [vmem:[#allocation10 + $0xe80] sm:$0xff] }
 0x3ce   :  { %v5165_v36 = vld [vmem:[#allocation10 + $0xea0] sm:$0xff] }
 0x3cf   :  { %5062 = vmatpush1.bf16.msra.mxu1 %v11551_v39  ;;  %5103 = vmatpush1.bf16.msra.mxu0 %v11553_v55  ;;  %v5189_v39 = vld [vmem:[#allocation10 + $0xf60] sm:$0xff]  ;;  %v5186_v55 = vld [vmem:[#allocation10 + $0xf48] sm:$0xff]  ;;  %v11596_v8 = vcombine.high %v5161_v3, %v5165_v36 }
 0x3d0   :  { %5063 = vmatprep.subr.bf16.mxu1 %v11544_v48  ;;  %5104 = vmatprep.subr.bf16.mxu0 %v11546_v59  ;;  %v5190_v48 = vld [vmem:[#allocation10 + $0xf68] sm:$0xff] }
 0x3d1   :  { %v11622_v16 = vcombine.high %v5186_v55, %v5190_v48 }
 0x3d3   :  { %5064 = vmatpush1.bf16.msra.mxu1 %v11543_v29  ;;  %5105 = vmatpush1.bf16.msra.mxu0 %v11545_v34  ;;  %v11629_v29 = vcombine.low %v5194_v20, %v5198_v26  ;;  %v5153_v20 = vld [vmem:[#allocation10 + $0xe40] sm:$0xff] }
 0x3d4   :  { %5065 = vmatprep.subr.bf16.mxu1 %v11536_v23  ;;  %5106 = vmatprep.subr.bf16.mxu0 %v11538_v2  ;;  %v11620_v2 = vcombine.high %v5185_v50, %v5189_v39  ;;  %v5157_v26 = vld [vmem:[#allocation10 + $0xe60] sm:$0xff] }
 0x3d7   :  { %5066 = vmatpush1.bf16.msra.mxu1 %v11535_v33  ;;  %5107 = vmatpush1.bf16.msra.mxu0 %v11537_v61 }
 0x3d8   :  { %5067 = vmatprep.subr.bf16.mxu1 %v11528_v18  ;;  %5108 = vmatprep.subr.bf16.mxu0 %v11530_v22  ;;  %v11619_v18 = vcombine.low %v5185_v50, %v5189_v39  ;;  %v11621_v22 = vcombine.low %v5186_v55, %v5190_v48  ;;  %v11588_v50 = vcombine.high %v5153_v20, %v5157_v26  ;;  %v5145_v55 = vld [vmem:[#allocation10 + $0xe00] sm:$0xff] }
 0x3d9   :  { %v5149_v48 = vld [vmem:[#allocation10 + $0xe20] sm:$0xff] }
 0x3db   :  { %5068 = vmatpush1.bf16.msra.mxu1 %v11527_v40  ;;  %5109 = vmatpush1.bf16.msra.mxu0 %v11529_v1  ;;  %v5170_v40 = vld [vmem:[#allocation10 + $0xec8] sm:$0xff] }
 0x3dc   :  { %5069 = vmatprep.subr.bf16.mxu1 %v11520_v43  ;;  %5110 = vmatprep.subr.bf16.mxu0 %v11522_v41  ;;  %v5174_v1 = vld [vmem:[#allocation10 + $0xee8] sm:$0xff] }
 0x3dd   :  { %v11606_v62 = vcombine.high %v5170_v40, %v5174_v1 }
 0x3df   :  { %5070 = vmatpush1.bf16.msra.mxu1 %v11519_v13  ;;  %5111 = vmatpush1.bf16.msra.mxu0 %v11521_v15  ;;  %v5162_v13 = vld [vmem:[#allocation10 + $0xe88] sm:$0xff] }
 0x3e0   :  { %5545 = vmatprep.subr.bf16.mxu1 %v11636_v53  ;;  %5586 = vmatprep.subr.bf16.mxu0 %v11638_v58  ;;  %v5166_v15 = vld [vmem:[#allocation10 + $0xea8] sm:$0xff]  ;;  %v11603_v53 = vcombine.low %v5169_v28, %v5173_v51  ;;  %v11605_v58 = vcombine.low %v5170_v40, %v5174_v1  ;;  %v13470_v28 = vpack.c.b16 %v13154_v57, %v13154_v57  ;;  %v5187_v1 = vld [vmem:[#allocation10 + $0xf50] sm:$0xff] }
 0x3e1   :  { %v11598_v19 = vcombine.high %v5162_v13, %v5166_v15 }
 0x3e2   :  { %v3373_v59 = vpop.f32.mrf.mxu1  ;;  %v3414_v46 = vpop.f32.mrf.mxu0  ;;  %5088 = vmatmul.mubr.bf16.vlgmr.msra.gmra.mxu1 %v13434_v10  ;;  %5129 = vmatmul.mubr.bf16.vlgmr.msra.gmra.mxu0 %v13434_v10 }
 0x3e3   :  { %v13455_v47 = vadd.f32 %v3373_v59, %v13419_v35  ;;  %v13458_v37 = vadd.f32 %v3414_v46, %v13422_v11  ;;  %5546 = vmatpush1.bf16.msra.mxu1 %v11635_v5  ;;  %5587 = vmatpush1.bf16.msra.mxu0 %v11637_v21  ;;  %v5181_v35 = vld [vmem:[#allocation10 + $0xf20] sm:$0xff]  ;;  %v5182_v11 = vld [vmem:[#allocation10 + $0xf28] sm:$0xff] }
 0x3e4   :  { %v3375_v34 = vpop.f32.mrf.mxu1  ;;  %v3416_v23 = vpop.f32.mrf.mxu0  ;;  %5547 = vmatprep.subr.bf16.mxu1 %v11628_v12  ;;  %5588 = vmatprep.subr.bf16.mxu0 %v11630_v49  ;;  %v11611_v43 = vcombine.low %v5177_v14, %v5181_v35  ;;  %v11613_v41 = vcombine.low %v5178_v31, %v5182_v11  ;;  %v5154_v5 = vld [vmem:[#allocation10 + $0xe48] sm:$0xff]  ;;  %v11595_v12 = vcombine.low %v5161_v3, %v5165_v36 }
 0x3e5   :  { %v13461_v54 = vadd.f32 %v3375_v34, %v13425_v45  ;;  %v13464_v10 = vadd.f32 %v3416_v23, %v13428_v52  ;;  %5577 = vmatprep.mubr.bf16.mxu1 %v12650_v42  ;;  %5618 = vmatprep.mubr.bf16.mxu0 %v12650_v42  ;;  %v11612_v45 = vcombine.high %v5177_v14, %v5181_v35  ;;  %v5158_v21 = vld [vmem:[#allocation10 + $0xe68] sm:$0xff]  ;;  %v5204_v14 = vld [vmem:[#allocation10 + $0xfd8] sm:$0xff] }
 0x3e6   :  { %v3377_v33 = vpop.f32.mrf.mxu1  ;;  %v3418_v61 = vpop.f32.mrf.mxu0  ;;  %v11614_v52 = vcombine.high %v5178_v31, %v5182_v11  ;;  %v11597_v49 = vcombine.low %v5162_v13, %v5166_v15  ;;  %v11590_v39 = vcombine.high %v5154_v5, %v5158_v21  ;;  %v5146_v59 = vld [vmem:[#allocation10 + $0xe08] sm:$0xff]  ;;  %v11580_v34 = vcombine.high %v5145_v55, %v5149_v48  ;;  %v5208_v35 = vld [vmem:[#allocation10 + $0xff8] sm:$0xff] }
 0x3e7   :  { %5548 = vmatpush1.bf16.msra.mxu1 %v11627_v6  ;;  %5589 = vmatpush1.bf16.msra.mxu0 %v11629_v29  ;;  %v5150_v46 = vld [vmem:[#allocation10 + $0xe28] sm:$0xff]  ;;  %v11587_v6 = vcombine.low %v5153_v20, %v5157_v26  ;;  %v11589_v29 = vcombine.low %v5154_v5, %v5158_v21  ;;  %v11579_v31 = vcombine.low %v5145_v55, %v5149_v48  ;;  %v5179_v20 = vld [vmem:[#allocation10 + $0xf10] sm:$0xff]  ;;  %v5180_v21 = vld [vmem:[#allocation10 + $0xf18] sm:$0xff] }
 0x3e8   :  { %v3378_v17 = vpop.f32.mrf.mxu1  ;;  %v3419_v60 = vpop.f32.mrf.mxu0  ;;  %5549 = vmatprep.subr.bf16.mxu1 %v11620_v2  ;;  %5590 = vmatprep.subr.bf16.mxu0 %v11622_v16  ;;  %v11582_v23 = vcombine.high %v5146_v59, %v5150_v46  ;;  %v5203_v2 = vld [vmem:[#allocation10 + $0xfd0] sm:$0xff]  ;;  %v11581_v11 = vcombine.low %v5146_v59, %v5150_v46  ;;  %v11642_v61 = vcombine.high %v5204_v14, %v5208_v35 }
 0x3e9   :  { %v5207_v16 = vld [vmem:[#allocation10 + $0xff0] sm:$0xff]  ;;  %v5196_v17 = vld [vmem:[#allocation10 + $0xf98] sm:$0xff] }
 0x3ea   :  { %v11640_v33 = vcombine.high %v5203_v2, %v5207_v16  ;;  %v5200_v60 = vld [vmem:[#allocation10 + $0xfb8] sm:$0xff]  ;;  %v5171_v59 = vld [vmem:[#allocation10 + $0xed0] sm:$0xff] }
 0x3eb   :  { %5550 = vmatpush1.bf16.msra.mxu1 %v11619_v18  ;;  %5591 = vmatpush1.bf16.msra.mxu0 %v11621_v22  ;;  %v5195_v18 = vld [vmem:[#allocation10 + $0xf90] sm:$0xff]  ;;  %v11634_v40 = vcombine.high %v5196_v17, %v5200_v60  ;;  %v11633_v15 = vcombine.low %v5196_v17, %v5200_v60 }
 0x3ec   :  { %5551 = vmatprep.subr.bf16.mxu1 %v11612_v45  ;;  %5592 = vmatprep.subr.bf16.mxu0 %v11614_v52  ;;  %v5199_v22 = vld [vmem:[#allocation10 + $0xfb0] sm:$0xff]  ;;  %v11639_v45 = vcombine.low %v5203_v2, %v5207_v16  ;;  %v11641_v52 = vcombine.low %v5204_v14, %v5208_v35 }
 0x3ed   :  { %v11632_v51 = vcombine.high %v5195_v18, %v5199_v22  ;;  %v11631_v36 = vcombine.low %v5195_v18, %v5199_v22  ;;  %v5175_v46 = vld [vmem:[#allocation10 + $0xef0] sm:$0xff] }
 0x3ee   :  { %v11608_v2 = vcombine.high %v5171_v59, %v5175_v46  ;;  %v5163_v14 = vld [vmem:[#allocation10 + $0xe90] sm:$0xff] }
 0x3ef   :  { %5552 = vmatpush1.bf16.msra.mxu1 %v11611_v43  ;;  %5593 = vmatpush1.bf16.msra.mxu0 %v11613_v41  ;;  %v5191_v43 = vld [vmem:[#allocation10 + $0xf70] sm:$0xff]  ;;  %v5188_v41 = vld [vmem:[#allocation10 + $0xf58] sm:$0xff] }
 0x3f0   :  { %5553 = vmatprep.subr.bf16.mxu1 %v11604_v27  ;;  %5594 = vmatprep.subr.bf16.mxu0 %v11606_v62  ;;  %v5192_v27 = vld [vmem:[#allocation10 + $0xf78] sm:$0xff]  ;;  %v5167_v35 = vld [vmem:[#allocation10 + $0xeb0] sm:$0xff] }
 0x3f1   :  { %v11600_v18 = vcombine.high %v5163_v14, %v5167_v35  ;;  %v5155_v17 = vld [vmem:[#allocation10 + $0xe50] sm:$0xff] }
 0x3f2   :  { %v5159_v60 = vld [vmem:[#allocation10 + $0xe70] sm:$0xff] }
 0x3f3   :  { %5554 = vmatpush1.bf16.msra.mxu1 %v11603_v53  ;;  %5595 = vmatpush1.bf16.msra.mxu0 %v11605_v58 }
 0x3f4   :  { %5555 = vmatprep.subr.bf16.mxu1 %v11596_v8  ;;  %5596 = vmatprep.subr.bf16.mxu0 %v11598_v19  ;;  %v11624_v8 = vcombine.high %v5187_v1, %v5191_v43  ;;  %v11626_v19 = vcombine.high %v5188_v41, %v5192_v27 }
 0x3f7   :  { %5556 = vmatpush1.bf16.msra.mxu1 %v11595_v12  ;;  %5597 = vmatpush1.bf16.msra.mxu0 %v11597_v49 }
 0x3f8   :  { %5557 = vmatprep.subr.bf16.mxu1 %v11588_v50  ;;  %5598 = vmatprep.subr.bf16.mxu0 %v11590_v39  ;;  %v11623_v50 = vcombine.low %v5187_v1, %v5191_v43  ;;  %v11625_v39 = vcombine.low %v5188_v41, %v5192_v27  ;;  %v11592_v1 = vcombine.high %v5155_v17, %v5159_v60  ;;  %v5147_v41 = vld [vmem:[#allocation10 + $0xe10] sm:$0xff] }
 0x3f9   :  { %v5151_v27 = vld [vmem:[#allocation10 + $0xe30] sm:$0xff] }
 0x3fb   :  { %5558 = vmatpush1.bf16.msra.mxu1 %v11587_v6  ;;  %5599 = vmatpush1.bf16.msra.mxu0 %v11589_v29  ;;  %v5172_v6 = vld [vmem:[#allocation10 + $0xed8] sm:$0xff] }
 0x3fc   :  { %5559 = vmatprep.subr.bf16.mxu1 %v11580_v34  ;;  %5600 = vmatprep.subr.bf16.mxu0 %v11582_v23  ;;  %v5176_v29 = vld [vmem:[#allocation10 + $0xef8] sm:$0xff] }
 0x3fd   :  { %v11610_v16 = vcombine.high %v5172_v6, %v5176_v29 }
 0x3ff   :  { %5560 = vmatpush1.bf16.msra.mxu1 %v11579_v31  ;;  %5601 = vmatpush1.bf16.msra.mxu0 %v11581_v11  ;;  %v5164_v31 = vld [vmem:[#allocation10 + $0xe98] sm:$0xff] }
 0x400   :  { %5627 = vmatprep.subr.bf16.mxu1 %v11640_v33  ;;  %5668 = vmatprep.subr.bf16.mxu0 %v11642_v61  ;;  %v5168_v11 = vld [vmem:[#allocation10 + $0xeb8] sm:$0xff]  ;;  %v11607_v33 = vcombine.low %v5171_v59, %v5175_v46  ;;  %v11609_v61 = vcombine.low %v5172_v6, %v5176_v29  ;;  %v5757_v6 = vld [vmem:[#allocation10 + $0x1140] sm:$0xff] }
 0x401   :  { %v11602_v22 = vcombine.high %v5164_v31, %v5168_v11  ;;  %v5761_v29 = vld [vmem:[#allocation10 + $0x1160] sm:$0xff] }
 0x402   :  { %v3863_v62 = vpop.f32.mrf.mxu1  ;;  %v3904_v3 = vpop.f32.mrf.mxu0  ;;  %5578 = vmatmul.mubr.bf16.vlgmr.msra.gmra.mxu1 %v13470_v28  ;;  %5619 = vmatmul.mubr.bf16.vlgmr.msra.gmra.mxu0 %v13470_v28 }
 0x403   :  { %v13475_v13 = vadd.f32 %v3863_v62, %v13439_v25  ;;  %v13478_v57 = vadd.f32 %v3904_v3, %v13442_v9  ;;  %5628 = vmatpush1.bf16.msra.mxu1 %v11639_v45  ;;  %5669 = vmatpush1.bf16.msra.mxu0 %v11641_v52  ;;  %v5183_v25 = vld [vmem:[#allocation10 + $0xf30] sm:$0xff]  ;;  %v5184_v9 = vld [vmem:[#allocation10 + $0xf38] sm:$0xff] }
 0x404   :  { %v3865_v53 = vpop.f32.mrf.mxu1  ;;  %v3906_v58 = vpop.f32.mrf.mxu0  ;;  %5629 = vmatprep.subr.bf16.mxu1 %v11632_v51  ;;  %5670 = vmatprep.subr.bf16.mxu0 %v11634_v40  ;;  %v11615_v34 = vcombine.low %v5179_v20, %v5183_v25  ;;  %v11617_v23 = vcombine.low %v5180_v21, %v5184_v9  ;;  %v5156_v45 = vld [vmem:[#allocation10 + $0xe58] sm:$0xff]  ;;  %v11599_v51 = vcombine.low %v5163_v14, %v5167_v35 }
 0x405   :  { %v13481_v26 = vadd.f32 %v3865_v53, %v13445_v4  ;;  %v13484_v5 = vadd.f32 %v3906_v58, %v13448_v38  ;;  %5659 = vmatprep.mubr.bf16.mxu1 %v12650_v42  ;;  %5700 = vmatprep.mubr.bf16.mxu0 %v12650_v42  ;;  %v11616_v4 = vcombine.high %v5179_v20, %v5183_v25  ;;  %v5160_v52 = vld [vmem:[#allocation10 + $0xe78] sm:$0xff]  ;;  %v5774_v20 = vld [vmem:[#allocation10 + $0x11c8] sm:$0xff] }
 0x406   :  { %v3867_v12 = vpop.f32.mrf.mxu1  ;;  %v3908_v49 = vpop.f32.mrf.mxu0  ;;  %v11618_v38 = vcombine.high %v5180_v21, %v5184_v9  ;;  %v11601_v40 = vcombine.low %v5164_v31, %v5168_v11  ;;  %v11594_v43 = vcombine.high %v5156_v45, %v5160_v52  ;;  %v5148_v62 = vld [vmem:[#allocation10 + $0xe18] sm:$0xff]  ;;  %v11584_v53 = vcombine.high %v5147_v41, %v5151_v27  ;;  %v5778_v25 = vld [vmem:[#allocation10 + $0x11e8] sm:$0xff] }
 0x407   :  { %5630 = vmatpush1.bf16.msra.mxu1 %v11631_v36  ;;  %5671 = vmatpush1.bf16.msra.mxu0 %v11633_v15  ;;  %v5152_v3 = vld [vmem:[#allocation10 + $0xe38] sm:$0xff]  ;;  %v11591_v36 = vcombine.low %v5155_v17, %v5159_v60  ;;  %v11593_v15 = vcombine.low %v5156_v45, %v5160_v52  ;;  %v11583_v21 = vcombine.low %v5147_v41, %v5151_v27  ;;  %v5749_v17 = vld [vmem:[#allocation10 + $0x1100] sm:$0xff]  ;;  %v5750_v45 = vld [vmem:[#allocation10 + $0x1108] sm:$0xff] }
 0x408   :  { %v3868_v55 = vpop.f32.mrf.mxu1  ;;  %v3909_v48 = vpop.f32.mrf.mxu0  ;;  %5631 = vmatprep.subr.bf16.mxu1 %v11624_v8  ;;  %5672 = vmatprep.subr.bf16.mxu0 %v11626_v19  ;;  %v11586_v58 = vcombine.high %v5148_v62, %v5152_v3  ;;  %v5773_v8 = vld [vmem:[#allocation10 + $0x11c0] sm:$0xff]  ;;  %v11585_v9 = vcombine.low %v5148_v62, %v5152_v3  ;;  %v11702_v49 = vcombine.high %v5774_v20, %v5778_v25  ;;  %v5742_v3 = vld [vmem:[#allocation10 + $0x10c8] sm:$0xff] }
 0x409   :  { %v5777_v19 = vld [vmem:[#allocation10 + $0x11e0] sm:$0xff]  ;;  %v5766_v55 = vld [vmem:[#allocation10 + $0x1188] sm:$0xff] }
 0x40a   :  { %v11700_v12 = vcombine.high %v5773_v8, %v5777_v19  ;;  %v5770_v48 = vld [vmem:[#allocation10 + $0x11a8] sm:$0xff]  ;;  %v5741_v27 = vld [vmem:[#allocation10 + $0x10c0] sm:$0xff] }
 0x40b   :  { %5632 = vmatpush1.bf16.msra.mxu1 %v11623_v50  ;;  %5673 = vmatpush1.bf16.msra.mxu0 %v11625_v39  ;;  %v5765_v50 = vld [vmem:[#allocation10 + $0x1180] sm:$0xff]  ;;  %v11694_v46 = vcombine.high %v5766_v55, %v5770_v48  ;;  %v11693_v11 = vcombine.low %v5766_v55, %v5770_v48  ;;  %v5726_v48 = vld [vmem:[#allocation10 + $0x1048] sm:$0xff] }
 0x40c   :  { %5633 = vmatprep.subr.bf16.mxu1 %v11616_v4  ;;  %5674 = vmatprep.subr.bf16.mxu0 %v11618_v38  ;;  %v5769_v39 = vld [vmem:[#allocation10 + $0x11a0] sm:$0xff]  ;;  %v11699_v4 = vcombine.low %v5773_v8, %v5777_v19  ;;  %v11701_v38 = vcombine.low %v5774_v20, %v5778_v25  ;;  %v5734_v25 = vld [vmem:[#allocation10 + $0x1088] sm:$0xff] }
 0x40d   :  { %v11692_v59 = vcombine.high %v5765_v50, %v5769_v39  ;;  %v11691_v14 = vcombine.low %v5765_v50, %v5769_v39  ;;  %v5745_v62 = vld [vmem:[#allocation10 + $0x10e0] sm:$0xff] }
 0x40e   :  { %v5733_v19 = vld [vmem:[#allocation10 + $0x1080] sm:$0xff] }
 0x40f   :  { %5634 = vmatpush1.bf16.msra.mxu1 %v11615_v34  ;;  %5675 = vmatpush1.bf16.msra.mxu0 %v11617_v23  ;;  %v5758_v34 = vld [vmem:[#allocation10 + $0x1148] sm:$0xff]  ;;  %v5737_v20 = vld [vmem:[#allocation10 + $0x10a0] sm:$0xff] }
 0x410   :  { %5635 = vmatprep.subr.bf16.mxu1 %v11608_v2  ;;  %5676 = vmatprep.subr.bf16.mxu0 %v11610_v16  ;;  %v5762_v23 = vld [vmem:[#allocation10 + $0x1168] sm:$0xff]  ;;  %v5725_v39 = vld [vmem:[#allocation10 + $0x1040] sm:$0xff] }
 0x411   :  { %v5729_v55 = vld [vmem:[#allocation10 + $0x1060] sm:$0xff] }
 0x413   :  { %5636 = vmatpush1.bf16.msra.mxu1 %v11607_v33  ;;  %5677 = vmatpush1.bf16.msra.mxu0 %v11609_v61 }
 0x414   :  { %5637 = vmatprep.subr.bf16.mxu1 %v11600_v18  ;;  %5678 = vmatprep.subr.bf16.mxu0 %v11602_v22  ;;  %v11684_v18 = vcombine.high %v5757_v6, %v5761_v29  ;;  %v11686_v22 = vcombine.high %v5758_v34, %v5762_v23 }
 0x417   :  { %5638 = vmatpush1.bf16.msra.mxu1 %v11599_v51  ;;  %5679 = vmatpush1.bf16.msra.mxu0 %v11601_v40  ;;  %v11683_v40 = vcombine.low %v5757_v6, %v5761_v29  ;;  %v5717_v29 = vld [vmem:[#allocation10 + $0x1000] sm:$0xff] }
 0x418   :  { %5639 = vmatprep.subr.bf16.mxu1 %v11592_v1  ;;  %5680 = vmatprep.subr.bf16.mxu0 %v11594_v43  ;;  %v11685_v1 = vcombine.low %v5758_v34, %v5762_v23  ;;  %v5721_v34 = vld [vmem:[#allocation10 + $0x1020] sm:$0xff]  ;;  %v5718_v23 = vld [vmem:[#allocation10 + $0x1008] sm:$0xff] }
 0x41b   :  { %5640 = vmatpush1.bf16.msra.mxu1 %v11591_v36  ;;  %5681 = vmatpush1.bf16.msra.mxu0 %v11593_v15  ;;  %v5746_v36 = vld [vmem:[#allocation10 + $0x10e8] sm:$0xff] }
 0x41c   :  { %5641 = vmatprep.subr.bf16.mxu1 %v11584_v53  ;;  %5682 = vmatprep.subr.bf16.mxu0 %v11586_v58  ;;  %v11668_v58 = vcombine.high %v5741_v27, %v5745_v62  ;;  %v11670_v8 = vcombine.high %v5742_v3, %v5746_v36 }
 0x41f   :  { %5642 = vmatpush1.bf16.msra.mxu1 %v11583_v21  ;;  %5683 = vmatpush1.bf16.msra.mxu0 %v11585_v9  ;;  %v5738_v21 = vld [vmem:[#allocation10 + $0x10a8] sm:$0xff]  ;;  %v11667_v9 = vcombine.low %v5741_v27, %v5745_v62 }
 0x420   :  { %6125 = vmatprep.subr.bf16.mxu1 %v11700_v12  ;;  %6166 = vmatprep.subr.bf16.mxu0 %v11702_v49  ;;  %v11669_v12 = vcombine.low %v5742_v3, %v5746_v36  ;;  %v11660_v49 = vcombine.high %v5733_v19, %v5737_v20  ;;  %v11662_v50 = vcombine.high %v5734_v25, %v5738_v21  ;;  %v5759_v3 = vld [vmem:[#allocation10 + $0x1150] sm:$0xff] }
 0x421   :  { %v5763_v36 = vld [vmem:[#allocation10 + $0x1170] sm:$0xff] }
 0x422   :  { %v3945_v2 = vpop.f32.mrf.mxu1  ;;  %v3986_v16 = vpop.f32.mrf.mxu0  ;;  %5660 = vmatmul.mubr.bf16.vlgmr.msra.gmra.mxu1 %v13470_v28  ;;  %5701 = vmatmul.mubr.bf16.vlgmr.msra.gmra.mxu0 %v13470_v28 }
 0x423   :  { %v13491_v35 = vadd.f32 %v3945_v2, %v13455_v47  ;;  %v13494_v31 = vadd.f32 %v3986_v16, %v13458_v37  ;;  %6126 = vmatpush1.bf16.msra.mxu1 %v11699_v4  ;;  %6167 = vmatpush1.bf16.msra.mxu0 %v11701_v38  ;;  %v5753_v47 = vld [vmem:[#allocation10 + $0x1120] sm:$0xff]  ;;  %v5754_v37 = vld [vmem:[#allocation10 + $0x1128] sm:$0xff]  ;;  %v11659_v38 = vcombine.low %v5733_v19, %v5737_v20 }
 0x424   :  { %v3947_v33 = vpop.f32.mrf.mxu1  ;;  %v3988_v61 = vpop.f32.mrf.mxu0  ;;  %6127 = vmatprep.subr.bf16.mxu1 %v11692_v59  ;;  %6168 = vmatprep.subr.bf16.mxu0 %v11694_v46  ;;  %v11675_v15 = vcombine.low %v5749_v17, %v5753_v47  ;;  %v11677_v53 = vcombine.low %v5750_v45, %v5754_v37  ;;  %v5730_v4 = vld [vmem:[#allocation10 + $0x1068] sm:$0xff]  ;;  %v11661_v59 = vcombine.low %v5734_v25, %v5738_v21 }
 0x425   :  { %v13497_v60 = vadd.f32 %v3947_v33, %v13461_v54  ;;  %v13500_v28 = vadd.f32 %v3988_v61, %v13464_v10  ;;  %6157 = vmatprep.mubr.bf16.mxu1 %v12650_v42  ;;  %6198 = vmatprep.mubr.bf16.mxu0 %v12650_v42  ;;  %v11676_v54 = vcombine.high %v5749_v17, %v5753_v47  ;;  %v5722_v2 = vld [vmem:[#allocation10 + $0x1028] sm:$0xff]  ;;  %v5775_v61 = vld [vmem:[#allocation10 + $0x11d0] sm:$0xff]  ;;  %v5780_v17 = vld [vmem:[#allocation10 + $0x11f8] sm:$0xff] }
 0x426   :  { %v3949_v52 = vpop.f32.mrf.mxu1  ;;  %v3990_v51 = vpop.f32.mrf.mxu0  ;;  %v11678_v10 = vcombine.high %v5750_v45, %v5754_v37  ;;  %v11652_v46 = vcombine.high %v5725_v39, %v5729_v55  ;;  %v11654_v6 = vcombine.high %v5726_v48, %v5730_v4  ;;  %v11651_v16 = vcombine.low %v5725_v39, %v5729_v55 }
 0x427   :  { %6128 = vmatpush1.bf16.msra.mxu1 %v11691_v14  ;;  %6169 = vmatpush1.bf16.msra.mxu0 %v11693_v11  ;;  %v11653_v14 = vcombine.low %v5726_v48, %v5730_v4  ;;  %v11644_v11 = vcombine.high %v5717_v29, %v5721_v34  ;;  %v11646_v33 = vcombine.high %v5718_v23, %v5722_v2  ;;  %v5767_v51 = vld [vmem:[#allocation10 + $0x1190] sm:$0xff]  ;;  %v5752_v48 = vld [vmem:[#allocation10 + $0x1118] sm:$0xff] }
 0x428   :  { %v3950_v43 = vpop.f32.mrf.mxu1  ;;  %v3991_v41 = vpop.f32.mrf.mxu0  ;;  %6129 = vmatprep.subr.bf16.mxu1 %v11684_v18  ;;  %6170 = vmatprep.subr.bf16.mxu0 %v11686_v22  ;;  %v5779_v18 = vld [vmem:[#allocation10 + $0x11f0] sm:$0xff]  ;;  %v5776_v22 = vld [vmem:[#allocation10 + $0x11d8] sm:$0xff]  ;;  %v11643_v47 = vcombine.low %v5717_v29, %v5721_v34  ;;  %v11645_v45 = vcombine.low %v5718_v23, %v5722_v2 }
 0x429   :  { %v11704_v37 = vcombine.high %v5775_v61, %v5779_v18  ;;  %v11706_v52 = vcombine.high %v5776_v22, %v5780_v17  ;;  %v5772_v43 = vld [vmem:[#allocation10 + $0x11b8] sm:$0xff]  ;;  %v11703_v41 = vcombine.low %v5775_v61, %v5779_v18  ;;  %v5743_v34 = vld [vmem:[#allocation10 + $0x10d0] sm:$0xff] }
 0x42a   :  { %v5747_v23 = vld [vmem:[#allocation10 + $0x10f0] sm:$0xff]  ;;  %v5744_v2 = vld [vmem:[#allocation10 + $0x10d8] sm:$0xff] }
 0x42b   :  { %6130 = vmatpush1.bf16.msra.mxu1 %v11683_v40  ;;  %6171 = vmatpush1.bf16.msra.mxu0 %v11685_v1  ;;  %v5771_v40 = vld [vmem:[#allocation10 + $0x11b0] sm:$0xff]  ;;  %v5768_v1 = vld [vmem:[#allocation10 + $0x1198] sm:$0xff] }
 0x42c   :  { %6131 = vmatprep.subr.bf16.mxu1 %v11676_v54  ;;  %6172 = vmatprep.subr.bf16.mxu0 %v11678_v10  ;;  %v11705_v54 = vcombine.low %v5776_v22, %v5780_v17  ;;  %v13506_v10 = vpack.c.b16 %v13172_v32, %v13172_v32  ;;  %v11696_v27 = vcombine.high %v5767_v51, %v5771_v40  ;;  %v5735_v18 = vld [vmem:[#allocation10 + $0x1090] sm:$0xff]  ;;  %v5736_v17 = vld [vmem:[#allocation10 + $0x1098] sm:$0xff] }
 0x42d   :  { %v11698_v62 = vcombine.high %v5768_v1, %v5772_v43  ;;  %v11695_v19 = vcombine.low %v5767_v51, %v5771_v40  ;;  %v11697_v25 = vcombine.low %v5768_v1, %v5772_v43  ;;  %v5739_v22 = vld [vmem:[#allocation10 + $0x10b0] sm:$0xff]  ;;  %v5728_v43 = vld [vmem:[#allocation10 + $0x1058] sm:$0xff] }
 0x42e   :  { %v5727_v40 = vld [vmem:[#allocation10 + $0x1050] sm:$0xff] }
 0x42f   :  { %6132 = vmatpush1.bf16.msra.mxu1 %v11675_v15  ;;  %6173 = vmatpush1.bf16.msra.mxu0 %v11677_v53  ;;  %v5760_v15 = vld [vmem:[#allocation10 + $0x1158] sm:$0xff]  ;;  %v5731_v1 = vld [vmem:[#allocation10 + $0x1070] sm:$0xff] }
 0x430   :  { %6133 = vmatprep.subr.bf16.mxu1 %v11668_v58  ;;  %6174 = vmatprep.subr.bf16.mxu0 %v11670_v8  ;;  %v5764_v53 = vld [vmem:[#allocation10 + $0x1178] sm:$0xff] }
 0x433   :  { %6134 = vmatpush1.bf16.msra.mxu1 %v11667_v9  ;;  %6175 = vmatpush1.bf16.msra.mxu0 %v11669_v12  ;;  %v11688_v12 = vcombine.high %v5759_v3, %v5763_v36 }
 0x434   :  { %6135 = vmatprep.subr.bf16.mxu1 %v11660_v49  ;;  %6176 = vmatprep.subr.bf16.mxu0 %v11662_v50  ;;  %v11690_v49 = vcombine.high %v5760_v15, %v5764_v53  ;;  %v5751_v50 = vld [vmem:[#allocation10 + $0x1110] sm:$0xff] }
 0x437   :  { %6136 = vmatpush1.bf16.msra.mxu1 %v11659_v38  ;;  %6177 = vmatpush1.bf16.msra.mxu0 %v11661_v59  ;;  %v11687_v59 = vcombine.low %v5759_v3, %v5763_v36  ;;  %v5719_v36 = vld [vmem:[#allocation10 + $0x1010] sm:$0xff] }
 0x438   :  { %6137 = vmatprep.subr.bf16.mxu1 %v11652_v46  ;;  %6178 = vmatprep.subr.bf16.mxu0 %v11654_v6  ;;  %v11689_v46 = vcombine.low %v5760_v15, %v5764_v53  ;;  %v5723_v15 = vld [vmem:[#allocation10 + $0x1030] sm:$0xff]  ;;  %v5720_v53 = vld [vmem:[#allocation10 + $0x1018] sm:$0xff] }
 0x43b   :  { %6138 = vmatpush1.bf16.msra.mxu1 %v11651_v16  ;;  %6179 = vmatpush1.bf16.msra.mxu0 %v11653_v14  ;;  %v5748_v16 = vld [vmem:[#allocation10 + $0x10f8] sm:$0xff] }
 0x43c   :  { %6139 = vmatprep.subr.bf16.mxu1 %v11644_v11  ;;  %6180 = vmatprep.subr.bf16.mxu0 %v11646_v33  ;;  %v11672_v33 = vcombine.high %v5743_v34, %v5747_v23  ;;  %v11674_v61 = vcombine.high %v5744_v2, %v5748_v16 }
 0x43f   :  { %6140 = vmatpush1.bf16.msra.mxu1 %v11643_v47  ;;  %6181 = vmatpush1.bf16.msra.mxu0 %v11645_v45  ;;  %v5740_v47 = vld [vmem:[#allocation10 + $0x10b8] sm:$0xff]  ;;  %v11671_v45 = vcombine.low %v5743_v34, %v5747_v23  ;;  %v6337_v23 = vld [vmem:[#allocation10 + $0x1340] sm:$0xff] }
 0x440   :  { %6207 = vmatprep.subr.bf16.mxu1 %v11704_v37  ;;  %6248 = vmatprep.subr.bf16.mxu0 %v11706_v52  ;;  %v11673_v37 = vcombine.low %v5744_v2, %v5748_v16  ;;  %v11664_v52 = vcombine.high %v5735_v18, %v5739_v22  ;;  %v11666_v51 = vcombine.high %v5736_v17, %v5740_v47  ;;  %v6341_v2 = vld [vmem:[#allocation10 + $0x1360] sm:$0xff]  ;;  %v6338_v16 = vld [vmem:[#allocation10 + $0x1348] sm:$0xff] }
 0x442   :  { %v4435_v58 = vpop.f32.mrf.mxu1  ;;  %v4476_v8 = vpop.f32.mrf.mxu0  ;;  %6158 = vmatmul.mubr.bf16.vlgmr.msra.gmra.mxu1 %v13506_v10  ;;  %6199 = vmatmul.mubr.bf16.vlgmr.msra.gmra.mxu0 %v13506_v10 }
 0x443   :  { %v13511_v20 = vadd.f32 %v4435_v58, %v13475_v13  ;;  %v13514_v32 = vadd.f32 %v4476_v8, %v13478_v57  ;;  %6208 = vmatpush1.bf16.msra.mxu1 %v11703_v41  ;;  %6249 = vmatpush1.bf16.msra.mxu0 %v11705_v54  ;;  %v5755_v13 = vld [vmem:[#allocation10 + $0x1130] sm:$0xff]  ;;  %v5756_v57 = vld [vmem:[#allocation10 + $0x1138] sm:$0xff]  ;;  %v11663_v54 = vcombine.low %v5735_v18, %v5739_v22 }
 0x444   :  { %v4437_v21 = vpop.f32.mrf.mxu1  ;;  %v4478_v9 = vpop.f32.mrf.mxu0  ;;  %6209 = vmatprep.subr.bf16.mxu1 %v11696_v27  ;;  %6250 = vmatprep.subr.bf16.mxu0 %v11698_v62  ;;  %v11679_v14 = vcombine.low %v5751_v50, %v5755_v13  ;;  %v11681_v11 = vcombine.low %v5752_v48, %v5756_v57  ;;  %v5732_v41 = vld [vmem:[#allocation10 + $0x1078] sm:$0xff]  ;;  %v11665_v27 = vcombine.low %v5736_v17, %v5740_v47 }
 0x445   :  { %v13517_v39 = vadd.f32 %v4437_v21, %v13481_v26  ;;  %v13520_v55 = vadd.f32 %v4478_v9, %v13484_v5  ;;  %6239 = vmatprep.mubr.bf16.mxu1 %v12650_v42  ;;  %6280 = vmatprep.mubr.bf16.mxu0 %v12650_v42  ;;  %v11680_v26 = vcombine.high %v5751_v50, %v5755_v13  ;;  %v5724_v58 = vld [vmem:[#allocation10 + $0x1038] sm:$0xff]  ;;  %v6353_v9 = vld [vmem:[#allocation10 + $0x13c0] sm:$0xff]  ;;  %v6358_v50 = vld [vmem:[#allocation10 + $0x13e8] sm:$0xff] }
 0x446   :  { %v4439_v4 = vpop.f32.mrf.mxu1  ;;  %v4480_v38 = vpop.f32.mrf.mxu0  ;;  %v11682_v5 = vcombine.high %v5752_v48, %v5756_v57  ;;  %v11656_v62 = vcombine.high %v5727_v40, %v5731_v1  ;;  %v11658_v3 = vcombine.high %v5728_v43, %v5732_v41  ;;  %v11655_v8 = vcombine.low %v5727_v40, %v5731_v1  ;;  %v6330_v1 = vld [vmem:[#allocation10 + $0x1308] sm:$0xff] }
 0x447   :  { %6210 = vmatpush1.bf16.msra.mxu1 %v11695_v19  ;;  %6251 = vmatpush1.bf16.msra.mxu0 %v11697_v25  ;;  %v11657_v19 = vcombine.low %v5728_v43, %v5732_v41  ;;  %v11648_v25 = vcombine.high %v5719_v36, %v5723_v15  ;;  %v11650_v21 = vcombine.high %v5720_v53, %v5724_v58  ;;  %v6345_v38 = vld [vmem:[#allocation10 + $0x1380] sm:$0xff] }
 0x448   :  { %v4440_v6 = vpop.f32.mrf.mxu1  ;;  %v4481_v29 = vpop.f32.mrf.mxu0  ;;  %6211 = vmatprep.subr.bf16.mxu1 %v11688_v12  ;;  %6252 = vmatprep.subr.bf16.mxu0 %v11690_v49  ;;  %v6357_v12 = vld [vmem:[#allocation10 + $0x13e0] sm:$0xff]  ;;  %v6354_v49 = vld [vmem:[#allocation10 + $0x13c8] sm:$0xff]  ;;  %v11647_v13 = vcombine.low %v5719_v36, %v5723_v15  ;;  %v11649_v48 = vcombine.low %v5720_v53, %v5724_v58 }
 0x449   :  { %v11764_v57 = vcombine.high %v6353_v9, %v6357_v12  ;;  %v11766_v4 = vcombine.high %v6354_v49, %v6358_v50  ;;  %v6350_v6 = vld [vmem:[#allocation10 + $0x13a8] sm:$0xff]  ;;  %v11763_v29 = vcombine.low %v6353_v9, %v6357_v12  ;;  %v6321_v36 = vld [vmem:[#allocation10 + $0x12c0] sm:$0xff] }
 0x44a   :  { %v6325_v15 = vld [vmem:[#allocation10 + $0x12e0] sm:$0xff]  ;;  %v6322_v53 = vld [vmem:[#allocation10 + $0x12c8] sm:$0xff] }
 0x44b   :  { %6212 = vmatpush1.bf16.msra.mxu1 %v11687_v59  ;;  %6253 = vmatpush1.bf16.msra.mxu0 %v11689_v46  ;;  %v6349_v59 = vld [vmem:[#allocation10 + $0x13a0] sm:$0xff]  ;;  %v6346_v46 = vld [vmem:[#allocation10 + $0x1388] sm:$0xff] }
 0x44c   :  { %6213 = vmatprep.subr.bf16.mxu1 %v11680_v26  ;;  %6254 = vmatprep.subr.bf16.mxu0 %v11682_v5  ;;  %v11765_v26 = vcombine.low %v6354_v49, %v6358_v50  ;;  %v11756_v5 = vcombine.high %v6345_v38, %v6349_v59  ;;  %v11758_v34 = vcombine.high %v6346_v46, %v6350_v6  ;;  %v6326_v58 = vld [vmem:[#allocation10 + $0x12e8] sm:$0xff]  ;;  %v6313_v9 = vld [vmem:[#allocation10 + $0x1280] sm:$0xff] }
 0x44d   :  { %v11757_v17 = vcombine.low %v6346_v46, %v6350_v6  ;;  %v6317_v12 = vld [vmem:[#allocation10 + $0x12a0] sm:$0xff]  ;;  %v6314_v49 = vld [vmem:[#allocation10 + $0x1288] sm:$0xff] }
 0x44e   :  { %v6318_v50 = vld [vmem:[#allocation10 + $0x12a8] sm:$0xff] }
 0x44f   :  { %6214 = vmatpush1.bf16.msra.mxu1 %v11679_v14  ;;  %6255 = vmatpush1.bf16.msra.mxu0 %v11681_v11  ;;  %v6342_v14 = vld [vmem:[#allocation10 + $0x1368] sm:$0xff] }
 0x450   :  { %6215 = vmatprep.subr.bf16.mxu1 %v11672_v33  ;;  %6256 = vmatprep.subr.bf16.mxu0 %v11674_v61  ;;  %v11755_v61 = vcombine.low %v6345_v38, %v6349_v59  ;;  %v6305_v38 = vld [vmem:[#allocation10 + $0x1240] sm:$0xff]  ;;  %v6306_v46 = vld [vmem:[#allocation10 + $0x1248] sm:$0xff] }
 0x451   :  { %v6309_v59 = vld [vmem:[#allocation10 + $0x1260] sm:$0xff]  ;;  %v6310_v6 = vld [vmem:[#allocation10 + $0x1268] sm:$0xff] }
 0x453   :  { %6216 = vmatpush1.bf16.msra.mxu1 %v11671_v45  ;;  %6257 = vmatpush1.bf16.msra.mxu0 %v11673_v37  ;;  %v11748_v37 = vcombine.high %v6337_v23, %v6341_v2 }
 0x454   :  { %6217 = vmatprep.subr.bf16.mxu1 %v11664_v52  ;;  %6258 = vmatprep.subr.bf16.mxu0 %v11666_v51  ;;  %v11750_v52 = vcombine.high %v6338_v16, %v6342_v14  ;;  %v6329_v51 = vld [vmem:[#allocation10 + $0x1300] sm:$0xff] }
 0x457   :  { %6218 = vmatpush1.bf16.msra.mxu1 %v11663_v54  ;;  %6259 = vmatpush1.bf16.msra.mxu0 %v11665_v27  ;;  %v11747_v54 = vcombine.low %v6337_v23, %v6341_v2  ;;  %v11749_v27 = vcombine.low %v6338_v16, %v6342_v14  ;;  %v6297_v23 = vld [vmem:[#allocation10 + $0x1200] sm:$0xff]  ;;  %v6298_v16 = vld [vmem:[#allocation10 + $0x1208] sm:$0xff] }
 0x458   :  { %6219 = vmatprep.subr.bf16.mxu1 %v11656_v62  ;;  %6260 = vmatprep.subr.bf16.mxu0 %v11658_v3  ;;  %v6301_v2 = vld [vmem:[#allocation10 + $0x1220] sm:$0xff]  ;;  %v6302_v14 = vld [vmem:[#allocation10 + $0x1228] sm:$0xff] }
 0x45b   :  { %6220 = vmatpush1.bf16.msra.mxu1 %v11655_v8  ;;  %6261 = vmatpush1.bf16.msra.mxu0 %v11657_v19 }
 0x45c   :  { %6221 = vmatprep.subr.bf16.mxu1 %v11648_v25  ;;  %6262 = vmatprep.subr.bf16.mxu0 %v11650_v21  ;;  %v11732_v25 = vcombine.high %v6321_v36, %v6325_v15  ;;  %v11734_v21 = vcombine.high %v6322_v53, %v6326_v58 }
 0x45f   :  { %6222 = vmatpush1.bf16.msra.mxu1 %v11647_v13  ;;  %6263 = vmatpush1.bf16.msra.mxu0 %v11649_v48  ;;  %v11731_v13 = vcombine.low %v6321_v36, %v6325_v15  ;;  %v11733_v48 = vcombine.low %v6322_v53, %v6326_v58  ;;  %v6339_v15 = vld [vmem:[#allocation10 + $0x1350] sm:$0xff]  ;;  %v6340_v58 = vld [vmem:[#allocation10 + $0x1358] sm:$0xff] }
 0x460   :  { %6697 = vmatprep.subr.bf16.mxu1 %v11764_v57  ;;  %6738 = vmatprep.subr.bf16.mxu0 %v11766_v4  ;;  %v11724_v57 = vcombine.high %v6313_v9, %v6317_v12  ;;  %v11726_v4 = vcombine.high %v6314_v49, %v6318_v50  ;;  %v6343_v53 = vld [vmem:[#allocation10 + $0x1370] sm:$0xff] }
 0x462   :  { %v4517_v11 = vpop.f32.mrf.mxu1  ;;  %v4558_v33 = vpop.f32.mrf.mxu0  ;;  %6240 = vmatmul.mubr.bf16.vlgmr.msra.gmra.mxu1 %v13506_v10  ;;  %6281 = vmatmul.mubr.bf16.vlgmr.msra.gmra.mxu0 %v13506_v10 }
 0x463   :  { %v13527_v18 = vadd.f32 %v4517_v11, %v13491_v35  ;;  %v13530_v22 = vadd.f32 %v4558_v33, %v13494_v31  ;;  %6698 = vmatpush1.bf16.msra.mxu1 %v11763_v29  ;;  %6739 = vmatpush1.bf16.msra.mxu0 %v11765_v26  ;;  %v6333_v35 = vld [vmem:[#allocation10 + $0x1320] sm:$0xff]  ;;  %v6334_v31 = vld [vmem:[#allocation10 + $0x1328] sm:$0xff]  ;;  %v11723_v29 = vcombine.low %v6313_v9, %v6317_v12 }
 0x464   :  { %v4519_v47 = vpop.f32.mrf.mxu1  ;;  %v4560_v45 = vpop.f32.mrf.mxu0  ;;  %6699 = vmatprep.subr.bf16.mxu1 %v11756_v5  ;;  %6740 = vmatprep.subr.bf16.mxu0 %v11758_v34  ;;  %v11739_v8 = vcombine.low %v6329_v51, %v6333_v35  ;;  %v11741_v19 = vcombine.low %v6330_v1, %v6334_v31  ;;  %v11725_v26 = vcombine.low %v6314_v49, %v6318_v50 }
 0x465   :  { %v13533_v40 = vadd.f32 %v4519_v47, %v13497_v60  ;;  %v13536_v10 = vadd.f32 %v4560_v45, %v13500_v28  ;;  %6729 = vmatprep.mubr.bf16.mxu1 %v12650_v42  ;;  %6770 = vmatprep.mubr.bf16.mxu0 %v12650_v42  ;;  %v11740_v60 = vcombine.high %v6329_v51, %v6333_v35  ;;  %v6355_v47 = vld [vmem:[#allocation10 + $0x13d0] sm:$0xff] }
 0x466   :  { %v4521_v43 = vpop.f32.mrf.mxu1  ;;  %v4562_v41 = vpop.f32.mrf.mxu0  ;;  %v11742_v28 = vcombine.high %v6330_v1, %v6334_v31  ;;  %v11716_v5 = vcombine.high %v6305_v38, %v6309_v59  ;;  %v11718_v34 = vcombine.high %v6306_v46, %v6310_v6  ;;  %v11715_v11 = vcombine.low %v6305_v38, %v6309_v59  ;;  %v6359_v45 = vld [vmem:[#allocation10 + $0x13f0] sm:$0xff]  ;;  %v6332_v59 = vld [vmem:[#allocation10 + $0x1318] sm:$0xff] }
 0x467   :  { %6700 = vmatpush1.bf16.msra.mxu1 %v11755_v61  ;;  %6741 = vmatpush1.bf16.msra.mxu0 %v11757_v17  ;;  %v11717_v33 = vcombine.low %v6306_v46, %v6310_v6  ;;  %v11708_v61 = vcombine.high %v6297_v23, %v6301_v2  ;;  %v11710_v17 = vcombine.high %v6298_v16, %v6302_v14  ;;  %v6347_v43 = vld [vmem:[#allocation10 + $0x1390] sm:$0xff] }
 0x468   :  { %v4522_v62 = vpop.f32.mrf.mxu1  ;;  %v4563_v3 = vpop.f32.mrf.mxu0  ;;  %6701 = vmatprep.subr.bf16.mxu1 %v11748_v37  ;;  %6742 = vmatprep.subr.bf16.mxu0 %v11750_v52  ;;  %v6356_v37 = vld [vmem:[#allocation10 + $0x13d8] sm:$0xff]  ;;  %v11707_v51 = vcombine.low %v6297_v23, %v6301_v2  ;;  %v11709_v35 = vcombine.low %v6298_v16, %v6302_v14  ;;  %v11768_v1 = vcombine.high %v6355_v47, %v6359_v45  ;;  %v6351_v41 = vld [vmem:[#allocation10 + $0x13b0] sm:$0xff] }
 0x469   :  { %v6360_v52 = vld [vmem:[#allocation10 + $0x13f8] sm:$0xff]  ;;  %v11767_v62 = vcombine.low %v6355_v47, %v6359_v45  ;;  %v6323_v23 = vld [vmem:[#allocation10 + $0x12d0] sm:$0xff] }
 0x46a   :  { %v11770_v31 = vcombine.high %v6356_v37, %v6360_v52  ;;  %v11769_v3 = vcombine.low %v6356_v37, %v6360_v52  ;;  %v6327_v2 = vld [vmem:[#allocation10 + $0x12f0] sm:$0xff]  ;;  %v6324_v16 = vld [vmem:[#allocation10 + $0x12d8] sm:$0xff] }
 0x46b   :  { %6702 = vmatpush1.bf16.msra.mxu1 %v11747_v54  ;;  %6743 = vmatpush1.bf16.msra.mxu0 %v11749_v27  ;;  %v6348_v54 = vld [vmem:[#allocation10 + $0x1398] sm:$0xff]  ;;  %v6315_v47 = vld [vmem:[#allocation10 + $0x1290] sm:$0xff] }
 0x46c   :  { %6703 = vmatprep.subr.bf16.mxu1 %v11740_v60  ;;  %6744 = vmatprep.subr.bf16.mxu0 %v11742_v28  ;;  %v6352_v27 = vld [vmem:[#allocation10 + $0x13b8] sm:$0xff]  ;;  %v13542_v60 = vpack.c.b16 %v13204_v44, %v13204_v44  ;;  %v11760_v28 = vcombine.high %v6347_v43, %v6351_v41  ;;  %v6319_v45 = vld [vmem:[#allocation10 + $0x12b0] sm:$0xff] }
 0x46d   :  { %v11762_v36 = vcombine.high %v6348_v54, %v6352_v27  ;;  %v11761_v12 = vcombine.low %v6348_v54, %v6352_v27  ;;  %v6328_v14 = vld [vmem:[#allocation10 + $0x12f8] sm:$0xff] }
 0x46e   :  { %v6316_v37 = vld [vmem:[#allocation10 + $0x1298] sm:$0xff] }
 0x46f   :  { %6704 = vmatpush1.bf16.msra.mxu1 %v11739_v8  ;;  %6745 = vmatpush1.bf16.msra.mxu0 %v11741_v19  ;;  %v6344_v8 = vld [vmem:[#allocation10 + $0x1378] sm:$0xff] }
 0x470   :  { %6705 = vmatprep.subr.bf16.mxu1 %v11732_v25  ;;  %6746 = vmatprep.subr.bf16.mxu0 %v11734_v21  ;;  %v11759_v21 = vcombine.low %v6347_v43, %v6351_v41  ;;  %v6320_v52 = vld [vmem:[#allocation10 + $0x12b8] sm:$0xff]  ;;  %v6307_v43 = vld [vmem:[#allocation10 + $0x1250] sm:$0xff] }
 0x471   :  { %v6311_v41 = vld [vmem:[#allocation10 + $0x1270] sm:$0xff]  ;;  %v6308_v54 = vld [vmem:[#allocation10 + $0x1258] sm:$0xff] }
 0x472   :  { %v6312_v27 = vld [vmem:[#allocation10 + $0x1278] sm:$0xff] }
 0x473   :  { %6706 = vmatpush1.bf16.msra.mxu1 %v11731_v13  ;;  %6747 = vmatpush1.bf16.msra.mxu0 %v11733_v48  ;;  %v11752_v13 = vcombine.high %v6339_v15, %v6343_v53  ;;  %v11754_v48 = vcombine.high %v6340_v58, %v6344_v8 }
 0x474   :  { %6707 = vmatprep.subr.bf16.mxu1 %v11724_v57  ;;  %6748 = vmatprep.subr.bf16.mxu0 %v11726_v4  ;;  %v6331_v57 = vld [vmem:[#allocation10 + $0x1310] sm:$0xff] }
 0x477   :  { %6708 = vmatpush1.bf16.msra.mxu1 %v11723_v29  ;;  %6749 = vmatpush1.bf16.msra.mxu0 %v11725_v26  ;;  %v11751_v29 = vcombine.low %v6339_v15, %v6343_v53  ;;  %v11753_v26 = vcombine.low %v6340_v58, %v6344_v8  ;;  %v6299_v15 = vld [vmem:[#allocation10 + $0x1210] sm:$0xff]  ;;  %v6300_v58 = vld [vmem:[#allocation10 + $0x1218] sm:$0xff] }
 0x478   :  { %6709 = vmatprep.subr.bf16.mxu1 %v11716_v5  ;;  %6750 = vmatprep.subr.bf16.mxu0 %v11718_v34  ;;  %v6303_v53 = vld [vmem:[#allocation10 + $0x1230] sm:$0xff]  ;;  %v6304_v8 = vld [vmem:[#allocation10 + $0x1238] sm:$0xff] }
 0x47b   :  { %6710 = vmatpush1.bf16.msra.mxu1 %v11715_v11  ;;  %6751 = vmatpush1.bf16.msra.mxu0 %v11717_v33 }
 0x47c   :  { %6711 = vmatprep.subr.bf16.mxu1 %v11708_v61  ;;  %6752 = vmatprep.subr.bf16.mxu0 %v11710_v17  ;;  %v11736_v61 = vcombine.high %v6323_v23, %v6327_v2  ;;  %v11738_v17 = vcombine.high %v6324_v16, %v6328_v14 }
 0x47f   :  { %6712 = vmatpush1.bf16.msra.mxu1 %v11707_v51  ;;  %6753 = vmatpush1.bf16.msra.mxu0 %v11709_v35  ;;  %v11735_v51 = vcombine.low %v6323_v23, %v6327_v2  ;;  %v11737_v35 = vcombine.low %v6324_v16, %v6328_v14  ;;  %v6909_v23 = vld [vmem:[#allocation10 + $0x1540] sm:$0xff]  ;;  %v6910_v16 = vld [vmem:[#allocation10 + $0x1548] sm:$0xff] }
 0x480   :  { %6779 = vmatprep.subr.bf16.mxu1 %v11768_v1  ;;  %6820 = vmatprep.subr.bf16.mxu0 %v11770_v31  ;;  %v11728_v1 = vcombine.high %v6315_v47, %v6319_v45  ;;  %v11730_v31 = vcombine.high %v6316_v37, %v6320_v52  ;;  %v6913_v2 = vld [vmem:[#allocation10 + $0x1560] sm:$0xff]  ;;  %v6914_v14 = vld [vmem:[#allocation10 + $0x1568] sm:$0xff] }
 0x482   :  { %v5007_v19 = vpop.f32.mrf.mxu1  ;;  %v5048_v25 = vpop.f32.mrf.mxu0  ;;  %6730 = vmatmul.mubr.bf16.vlgmr.msra.gmra.mxu1 %v13542_v60  ;;  %6771 = vmatmul.mubr.bf16.vlgmr.msra.gmra.mxu0 %v13542_v60 }
 0x483   :  { %v13547_v9 = vadd.f32 %v5007_v19, %v13511_v20  ;;  %v13550_v44 = vadd.f32 %v5048_v25, %v13514_v32  ;;  %6780 = vmatpush1.bf16.msra.mxu1 %v11767_v62  ;;  %6821 = vmatpush1.bf16.msra.mxu0 %v11769_v3  ;;  %v6335_v20 = vld [vmem:[#allocation10 + $0x1330] sm:$0xff]  ;;  %v6336_v32 = vld [vmem:[#allocation10 + $0x1338] sm:$0xff]  ;;  %v11727_v62 = vcombine.low %v6315_v47, %v6319_v45 }
 0x484   :  { %v5009_v49 = vpop.f32.mrf.mxu1  ;;  %v5050_v50 = vpop.f32.mrf.mxu0  ;;  %6781 = vmatprep.subr.bf16.mxu1 %v11760_v28  ;;  %6822 = vmatprep.subr.bf16.mxu0 %v11762_v36  ;;  %v11743_v11 = vcombine.low %v6331_v57, %v6335_v20  ;;  %v11745_v33 = vcombine.low %v6332_v59, %v6336_v32  ;;  %v11729_v3 = vcombine.low %v6316_v37, %v6320_v52 }
 0x485   :  { %v13553_v4 = vadd.f32 %v5009_v49, %v13517_v39  ;;  %v13556_v38 = vadd.f32 %v5050_v50, %v13520_v55  ;;  %6811 = vmatprep.mubr.bf16.mxu1 %v12650_v42  ;;  %6852 = vmatprep.mubr.bf16.mxu0 %v12650_v42  ;;  %v11744_v39 = vcombine.high %v6331_v57, %v6335_v20  ;;  %v6925_v49 = vld [vmem:[#allocation10 + $0x15c0] sm:$0xff] }
 0x486   :  { %v5011_v46 = vpop.f32.mrf.mxu1  ;;  %v5052_v6 = vpop.f32.mrf.mxu0  ;;  %v11746_v55 = vcombine.high %v6332_v59, %v6336_v32  ;;  %v11720_v28 = vcombine.high %v6307_v43, %v6311_v41  ;;  %v11722_v36 = vcombine.high %v6308_v54, %v6312_v27  ;;  %v11719_v19 = vcombine.low %v6307_v43, %v6311_v41  ;;  %v6929_v50 = vld [vmem:[#allocation10 + $0x15e0] sm:$0xff]  ;;  %v6902_v43 = vld [vmem:[#allocation10 + $0x1508] sm:$0xff] }
 0x487   :  { %6782 = vmatpush1.bf16.msra.mxu1 %v11759_v21  ;;  %6823 = vmatpush1.bf16.msra.mxu0 %v11761_v12  ;;  %v11721_v25 = vcombine.low %v6308_v54, %v6312_v27  ;;  %v11712_v21 = vcombine.high %v6299_v15, %v6303_v53  ;;  %v11714_v12 = vcombine.high %v6300_v58, %v6304_v8  ;;  %v6917_v46 = vld [vmem:[#allocation10 + $0x1580] sm:$0xff] }
 0x488   :  { %v5012_v5 = vpop.f32.mrf.mxu1  ;;  %v5053_v34 = vpop.f32.mrf.mxu0  ;;  %6783 = vmatprep.subr.bf16.mxu1 %v11752_v13  ;;  %6824 = vmatprep.subr.bf16.mxu0 %v11754_v48  ;;  %v6926_v13 = vld [vmem:[#allocation10 + $0x15c8] sm:$0xff]  ;;  %v11711_v57 = vcombine.low %v6299_v15, %v6303_v53  ;;  %v11713_v20 = vcombine.low %v6300_v58, %v6304_v8  ;;  %v11828_v59 = vcombine.high %v6925_v49, %v6929_v50  ;;  %v6921_v6 = vld [vmem:[#allocation10 + $0x15a0] sm:$0xff] }
 0x489   :  { %v6930_v48 = vld [vmem:[#allocation10 + $0x15e8] sm:$0xff]  ;;  %v11827_v5 = vcombine.low %v6925_v49, %v6929_v50  ;;  %v11811_v27 = vcombine.low %v6909_v23, %v6913_v2  ;;  %v6897_v15 = vld [vmem:[#allocation10 + $0x14e0] sm:$0xff] }
 0x48a   :  { %v11830_v32 = vcombine.high %v6926_v13, %v6930_v48  ;;  %v11829_v34 = vcombine.low %v6926_v13, %v6930_v48  ;;  %v6894_v53 = vld [vmem:[#allocation10 + $0x14c8] sm:$0xff]  ;;  %v6889_v49 = vld [vmem:[#allocation10 + $0x14a0] sm:$0xff] }
 0x48b   :  { %6784 = vmatpush1.bf16.msra.mxu1 %v11751_v29  ;;  %6825 = vmatpush1.bf16.msra.mxu0 %v11753_v26  ;;  %v6918_v29 = vld [vmem:[#allocation10 + $0x1588] sm:$0xff] }
 0x48c   :  { %6785 = vmatprep.subr.bf16.mxu1 %v11744_v39  ;;  %6826 = vmatprep.subr.bf16.mxu0 %v11746_v55  ;;  %v6922_v26 = vld [vmem:[#allocation10 + $0x15a8] sm:$0xff]  ;;  %v11820_v39 = vcombine.high %v6917_v46, %v6921_v6 }
 0x48d   :  { %v11822_v55 = vcombine.high %v6918_v29, %v6922_v26  ;;  %v11821_v45 = vcombine.low %v6918_v29, %v6922_v26  ;;  %v6898_v58 = vld [vmem:[#allocation10 + $0x14e8] sm:$0xff] }
 0x48e   :  { %v6886_v50 = vld [vmem:[#allocation10 + $0x1488] sm:$0xff] }
 0x48f   :  { %6786 = vmatpush1.bf16.msra.mxu1 %v11743_v11  ;;  %6827 = vmatpush1.bf16.msra.mxu0 %v11745_v33  ;;  %v6890_v13 = vld [vmem:[#allocation10 + $0x14a8] sm:$0xff] }
 0x490   :  { %6787 = vmatprep.subr.bf16.mxu1 %v11736_v61  ;;  %6828 = vmatprep.subr.bf16.mxu0 %v11738_v17  ;;  %v11819_v61 = vcombine.low %v6917_v46, %v6921_v6  ;;  %v6881_v46 = vld [vmem:[#allocation10 + $0x1460] sm:$0xff]  ;;  %v6878_v6 = vld [vmem:[#allocation10 + $0x1448] sm:$0xff] }
 0x491   :  { %v6882_v29 = vld [vmem:[#allocation10 + $0x1468] sm:$0xff] }
 0x493   :  { %6788 = vmatpush1.bf16.msra.mxu1 %v11735_v51  ;;  %6829 = vmatpush1.bf16.msra.mxu0 %v11737_v35  ;;  %v11812_v51 = vcombine.high %v6909_v23, %v6913_v2  ;;  %v11814_v35 = vcombine.high %v6910_v16, %v6914_v14  ;;  %v6873_v23 = vld [vmem:[#allocation10 + $0x1420] sm:$0xff]  ;;  %v6870_v2 = vld [vmem:[#allocation10 + $0x1408] sm:$0xff] }
 0x494   :  { %6789 = vmatprep.subr.bf16.mxu1 %v11728_v1  ;;  %6830 = vmatprep.subr.bf16.mxu0 %v11730_v31  ;;  %v6901_v1 = vld [vmem:[#allocation10 + $0x1500] sm:$0xff] }
 0x497   :  { %6790 = vmatpush1.bf16.msra.mxu1 %v11727_v62  ;;  %6831 = vmatpush1.bf16.msra.mxu0 %v11729_v3  ;;  %v11813_v62 = vcombine.low %v6910_v16, %v6914_v14  ;;  %v6874_v16 = vld [vmem:[#allocation10 + $0x1428] sm:$0xff] }
 0x498   :  { %6791 = vmatprep.subr.bf16.mxu1 %v11720_v28  ;;  %6832 = vmatprep.subr.bf16.mxu0 %v11722_v36  ;;  %v6893_v36 = vld [vmem:[#allocation10 + $0x14c0] sm:$0xff] }
 0x499   :  { %v11795_v48 = vcombine.low %v6893_v36, %v6897_v15 }
 0x49b   :  { %6792 = vmatpush1.bf16.msra.mxu1 %v11719_v19  ;;  %6833 = vmatpush1.bf16.msra.mxu0 %v11721_v25  ;;  %v11796_v25 = vcombine.high %v6893_v36, %v6897_v15  ;;  %v6911_v36 = vld [vmem:[#allocation10 + $0x1550] sm:$0xff] }
 0x49c   :  { %6793 = vmatprep.subr.bf16.mxu1 %v11712_v21  ;;  %6834 = vmatprep.subr.bf16.mxu0 %v11714_v12  ;;  %v11798_v21 = vcombine.high %v6894_v53, %v6898_v58  ;;  %v6885_v12 = vld [vmem:[#allocation10 + $0x1480] sm:$0xff]  ;;  %v6915_v15 = vld [vmem:[#allocation10 + $0x1570] sm:$0xff] }
 0x49d   :  { %v11787_v26 = vcombine.low %v6885_v12, %v6889_v49 }
 0x49f   :  { %6794 = vmatpush1.bf16.msra.mxu1 %v11711_v57  ;;  %6835 = vmatpush1.bf16.msra.mxu0 %v11713_v20  ;;  %v11797_v57 = vcombine.low %v6894_v53, %v6898_v58  ;;  %v11788_v20 = vcombine.high %v6885_v12, %v6889_v49  ;;  %v6912_v53 = vld [vmem:[#allocation10 + $0x1558] sm:$0xff] }
 0x4a0   :  { %7269 = vmatprep.subr.bf16.mxu1 %v11828_v59  ;;  %7310 = vmatprep.subr.bf16.mxu0 %v11830_v32  ;;  %v11790_v59 = vcombine.high %v6886_v50, %v6890_v13  ;;  %v6877_v32 = vld [vmem:[#allocation10 + $0x1440] sm:$0xff]  ;;  %v6916_v58 = vld [vmem:[#allocation10 + $0x1578] sm:$0xff] }
 0x4a1   :  { %v11779_v14 = vcombine.low %v6877_v32, %v6881_v46 }
 0x4a2   :  { %v5089_v11 = vpop.f32.mrf.mxu1  ;;  %v5130_v33 = vpop.f32.mrf.mxu0  ;;  %6812 = vmatmul.mubr.bf16.vlgmr.msra.gmra.mxu1 %v13542_v60  ;;  %6853 = vmatmul.mubr.bf16.vlgmr.msra.gmra.mxu0 %v13542_v60 }
 0x4a3   :  { %v13563_v17 = vadd.f32 %v5089_v11, %v13527_v18  ;;  %v13566_v47 = vadd.f32 %v5130_v33, %v13530_v22  ;;  %7270 = vmatpush1.bf16.msra.mxu1 %v11827_v5  ;;  %7311 = vmatpush1.bf16.msra.mxu0 %v11829_v34  ;;  %v6905_v18 = vld [vmem:[#allocation10 + $0x1520] sm:$0xff]  ;;  %v6906_v22 = vld [vmem:[#allocation10 + $0x1528] sm:$0xff]  ;;  %v11789_v5 = vcombine.low %v6886_v50, %v6890_v13 }
 0x4a4   :  { %v5091_v37 = vpop.f32.mrf.mxu1  ;;  %v5132_v52 = vpop.f32.mrf.mxu0  ;;  %7271 = vmatprep.subr.bf16.mxu1 %v11820_v39  ;;  %7312 = vmatprep.subr.bf16.mxu0 %v11822_v55  ;;  %v11803_v8 = vcombine.low %v6901_v1, %v6905_v18  ;;  %v11805_v19 = vcombine.low %v6902_v43, %v6906_v22  ;;  %v11780_v34 = vcombine.high %v6877_v32, %v6881_v46  ;;  %v6869_v55 = vld [vmem:[#allocation10 + $0x1400] sm:$0xff]  ;;  %v6904_v32 = vld [vmem:[#allocation10 + $0x1518] sm:$0xff] }
 0x4a5   :  { %v13569_v31 = vadd.f32 %v5091_v37, %v13533_v40  ;;  %v13572_v60 = vadd.f32 %v5132_v52, %v13536_v10  ;;  %7301 = vmatprep.mubr.bf16.mxu1 %v12650_v42  ;;  %7342 = vmatprep.mubr.bf16.mxu0 %v12650_v42  ;;  %v11804_v40 = vcombine.high %v6901_v1, %v6905_v18  ;;  %v6931_v37 = vld [vmem:[#allocation10 + $0x15f0] sm:$0xff]  ;;  %v6928_v52 = vld [vmem:[#allocation10 + $0x15d8] sm:$0xff] }
 0x4a6   :  { %v5093_v41 = vpop.f32.mrf.mxu1  ;;  %v5134_v54 = vpop.f32.mrf.mxu0  ;;  %v11806_v10 = vcombine.high %v6902_v43, %v6906_v22  ;;  %v11782_v39 = vcombine.high %v6878_v6, %v6882_v29  ;;  %v11781_v11 = vcombine.low %v6878_v6, %v6882_v29  ;;  %v11772_v33 = vcombine.high %v6869_v55, %v6873_v23  ;;  %v6919_v22 = vld [vmem:[#allocation10 + $0x1590] sm:$0xff] }
 0x4a7   :  { %7272 = vmatpush1.bf16.msra.mxu1 %v11819_v61  ;;  %7313 = vmatpush1.bf16.msra.mxu0 %v11821_v45  ;;  %v11774_v61 = vcombine.high %v6870_v2, %v6874_v16  ;;  %v6927_v45 = vld [vmem:[#allocation10 + $0x15d0] sm:$0xff]  ;;  %v11773_v1 = vcombine.low %v6870_v2, %v6874_v16  ;;  %v6920_v54 = vld [vmem:[#allocation10 + $0x1598] sm:$0xff]  ;;  %v11816_v13 = vcombine.high %v6911_v36, %v6915_v15 }
 0x4a8   :  { %v5094_v3 = vpop.f32.mrf.mxu1  ;;  %v5135_v28 = vpop.f32.mrf.mxu0  ;;  %7273 = vmatprep.subr.bf16.mxu1 %v11812_v51  ;;  %7314 = vmatprep.subr.bf16.mxu0 %v11814_v35  ;;  %v6932_v51 = vld [vmem:[#allocation10 + $0x15f8] sm:$0xff]  ;;  %v11771_v35 = vcombine.low %v6869_v55, %v6873_v23  ;;  %v11832_v18 = vcombine.high %v6927_v45, %v6931_v37  ;;  %v6923_v41 = vld [vmem:[#allocation10 + $0x15b0] sm:$0xff]  ;;  %v11815_v29 = vcombine.low %v6911_v36, %v6915_v15 }
 0x4a9   :  { %v11834_v43 = vcombine.high %v6928_v52, %v6932_v51  ;;  %v11833_v3 = vcombine.low %v6928_v52, %v6932_v51  ;;  %v13578_v28 = vpack.c.b16 %v13223_v24, %v13223_v24  ;;  %v6899_v55 = vld [vmem:[#allocation10 + $0x14f0] sm:$0xff]  ;;  %v6896_v23 = vld [vmem:[#allocation10 + $0x14d8] sm:$0xff] }
 0x4aa   :  { %v6900_v2 = vld [vmem:[#allocation10 + $0x14f8] sm:$0xff]  ;;  %v6875_v36 = vld [vmem:[#allocation10 + $0x1430] sm:$0xff] }
 0x4ab   :  { %7274 = vmatpush1.bf16.msra.mxu1 %v11811_v27  ;;  %7315 = vmatpush1.bf16.msra.mxu0 %v11813_v62  ;;  %v6924_v27 = vld [vmem:[#allocation10 + $0x15b8] sm:$0xff]  ;;  %v11831_v62 = vcombine.low %v6927_v45, %v6931_v37  ;;  %v6891_v45 = vld [vmem:[#allocation10 + $0x14b0] sm:$0xff] }
 0x4ac   :  { %7275 = vmatprep.subr.bf16.mxu1 %v11804_v40  ;;  %7316 = vmatprep.subr.bf16.mxu0 %v11806_v10  ;;  %v11824_v40 = vcombine.high %v6919_v22, %v6923_v41  ;;  %v11826_v10 = vcombine.high %v6920_v54, %v6924_v27  ;;  %v11825_v12 = vcombine.low %v6920_v54, %v6924_v27  ;;  %v6888_v37 = vld [vmem:[#allocation10 + $0x1498] sm:$0xff] }
 0x4ad   :  { %v6892_v52 = vld [vmem:[#allocation10 + $0x14b8] sm:$0xff] }
 0x4ae   :  { %v6884_v54 = vld [vmem:[#allocation10 + $0x1478] sm:$0xff] }
 0x4af   :  { %7276 = vmatpush1.bf16.msra.mxu1 %v11803_v8  ;;  %7317 = vmatpush1.bf16.msra.mxu0 %v11805_v19  ;;  %v6872_v15 = vld [vmem:[#allocation10 + $0x1418] sm:$0xff] }
 0x4b0   :  { %7277 = vmatprep.subr.bf16.mxu1 %v11796_v25  ;;  %7318 = vmatprep.subr.bf16.mxu0 %v11798_v21  ;;  %v11823_v25 = vcombine.low %v6919_v22, %v6923_v41  ;;  %v6883_v22 = vld [vmem:[#allocation10 + $0x1470] sm:$0xff]  ;;  %v6880_v41 = vld [vmem:[#allocation10 + $0x1458] sm:$0xff] }
 0x4b3   :  { %7278 = vmatpush1.bf16.msra.mxu1 %v11795_v48  ;;  %7319 = vmatpush1.bf16.msra.mxu0 %v11797_v57  ;;  %v11818_v48 = vcombine.high %v6912_v53, %v6916_v58  ;;  %v6903_v57 = vld [vmem:[#allocation10 + $0x1510] sm:$0xff] }
 0x4b4   :  { %7279 = vmatprep.subr.bf16.mxu1 %v11788_v20  ;;  %7320 = vmatprep.subr.bf16.mxu0 %v11790_v59 }
 0x4b7   :  { %7280 = vmatpush1.bf16.msra.mxu1 %v11787_v26  ;;  %7321 = vmatpush1.bf16.msra.mxu0 %v11789_v5  ;;  %v11817_v26 = vcombine.low %v6912_v53, %v6916_v58  ;;  %v6876_v53 = vld [vmem:[#allocation10 + $0x1438] sm:$0xff] }
 0x4b8   :  { %7281 = vmatprep.subr.bf16.mxu1 %v11780_v34  ;;  %7322 = vmatprep.subr.bf16.mxu0 %v11782_v39  ;;  %v6895_v39 = vld [vmem:[#allocation10 + $0x14d0] sm:$0xff] }
 0x4b9   :  { %v11799_v51 = vcombine.low %v6895_v39, %v6899_v55 }
 0x4bb   :  { %7282 = vmatpush1.bf16.msra.mxu1 %v11779_v14  ;;  %7323 = vmatpush1.bf16.msra.mxu0 %v11781_v11  ;;  %v11800_v11 = vcombine.high %v6895_v39, %v6899_v55  ;;  %v7485_v39 = vld [vmem:[#allocation10 + $0x1760] sm:$0xff]  ;;  %v7482_v55 = vld [vmem:[#allocation10 + $0x1748] sm:$0xff] }
 0x4bc   :  { %7283 = vmatprep.subr.bf16.mxu1 %v11772_v33  ;;  %7324 = vmatprep.subr.bf16.mxu0 %v11774_v61  ;;  %v11802_v33 = vcombine.high %v6896_v23, %v6900_v2  ;;  %v6887_v61 = vld [vmem:[#allocation10 + $0x1490] sm:$0xff] }
 0x4bd   :  { %v11791_v27 = vcombine.low %v6887_v61, %v6891_v45 }
 0x4bf   :  { %7284 = vmatpush1.bf16.msra.mxu1 %v11771_v35  ;;  %7325 = vmatpush1.bf16.msra.mxu0 %v11773_v1  ;;  %v11801_v35 = vcombine.low %v6896_v23, %v6900_v2  ;;  %v11792_v1 = vcombine.high %v6887_v61, %v6891_v45  ;;  %v7486_v23 = vld [vmem:[#allocation10 + $0x1768] sm:$0xff] }
 0x4c0   :  { %7351 = vmatprep.subr.bf16.mxu1 %v11832_v18  ;;  %7392 = vmatprep.subr.bf16.mxu0 %v11834_v43  ;;  %v11794_v18 = vcombine.high %v6888_v37, %v6892_v52  ;;  %v6879_v43 = vld [vmem:[#allocation10 + $0x1450] sm:$0xff] }
 0x4c1   :  { %v11783_v58 = vcombine.low %v6879_v43, %v6883_v22 }
 0x4c2   :  { %v5579_v8 = vpop.f32.mrf.mxu1  ;;  %v5620_v19 = vpop.f32.mrf.mxu0  ;;  %7302 = vmatmul.mubr.bf16.vlgmr.msra.gmra.mxu1 %v13578_v28  ;;  %7343 = vmatmul.mubr.bf16.vlgmr.msra.gmra.mxu0 %v13578_v28 }
 0x4c3   :  { %v13583_v21 = vadd.f32 %v5579_v8, %v13547_v9  ;;  %v13586_v24 = vadd.f32 %v5620_v19, %v13550_v44  ;;  %7352 = vmatpush1.bf16.msra.mxu1 %v11831_v62  ;;  %7393 = vmatpush1.bf16.msra.mxu0 %v11833_v3  ;;  %v6907_v9 = vld [vmem:[#allocation10 + $0x1530] sm:$0xff]  ;;  %v6908_v44 = vld [vmem:[#allocation10 + $0x1538] sm:$0xff]  ;;  %v11793_v62 = vcombine.low %v6888_v37, %v6892_v52 }
 0x4c4   :  { %v5581_v49 = vpop.f32.mrf.mxu1  ;;  %v5622_v50 = vpop.f32.mrf.mxu0  ;;  %7353 = vmatprep.subr.bf16.mxu1 %v11824_v40  ;;  %7394 = vmatprep.subr.bf16.mxu0 %v11826_v10  ;;  %v11807_v16 = vcombine.low %v6903_v57, %v6907_v9  ;;  %v11809_v14 = vcombine.low %v6904_v32, %v6908_v44  ;;  %v11784_v3 = vcombine.high %v6879_v43, %v6883_v22  ;;  %v6871_v10 = vld [vmem:[#allocation10 + $0x1410] sm:$0xff] }
 0x4c5   :  { %v13589_v20 = vadd.f32 %v5581_v49, %v13553_v4  ;;  %v13592_v59 = vadd.f32 %v5622_v50, %v13556_v38  ;;  %7383 = vmatprep.mubr.bf16.mxu1 %v12650_v42  ;;  %7424 = vmatprep.mubr.bf16.mxu0 %v12650_v42  ;;  %v11808_v4 = vcombine.high %v6903_v57, %v6907_v9  ;;  %v7501_v49 = vld [vmem:[#allocation10 + $0x17e0] sm:$0xff]  ;;  %v7498_v50 = vld [vmem:[#allocation10 + $0x17c8] sm:$0xff] }
 0x4c6   :  { %v5583_v46 = vpop.f32.mrf.mxu1  ;;  %v5624_v6 = vpop.f32.mrf.mxu0  ;;  %v11810_v38 = vcombine.high %v6904_v32, %v6908_v44  ;;  %v11786_v40 = vcombine.high %v6880_v41, %v6884_v54  ;;  %v11785_v8 = vcombine.low %v6880_v41, %v6884_v54  ;;  %v11776_v19 = vcombine.high %v6871_v10, %v6875_v36  ;;  %v7489_v44 = vld [vmem:[#allocation10 + $0x1780] sm:$0xff] }
 0x4c7   :  { %7354 = vmatpush1.bf16.msra.mxu1 %v11823_v25  ;;  %7395 = vmatpush1.bf16.msra.mxu0 %v11825_v12  ;;  %v11778_v25 = vcombine.high %v6872_v15, %v6876_v53  ;;  %v7497_v12 = vld [vmem:[#allocation10 + $0x17c0] sm:$0xff]  ;;  %v11777_v57 = vcombine.low %v6872_v15, %v6876_v53  ;;  %v7490_v6 = vld [vmem:[#allocation10 + $0x1788] sm:$0xff]  ;;  %v11877_v54 = vcombine.low %v7482_v55, %v7486_v23 }
 0x4c8   :  { %v5584_v5 = vpop.f32.mrf.mxu1  ;;  %v5625_v34 = vpop.f32.mrf.mxu0  ;;  %7355 = vmatprep.subr.bf16.mxu1 %v11816_v13  ;;  %7396 = vmatprep.subr.bf16.mxu0 %v11818_v48  ;;  %v7502_v13 = vld [vmem:[#allocation10 + $0x17e8] sm:$0xff]  ;;  %v11775_v48 = vcombine.low %v6871_v10, %v6875_v36  ;;  %v11892_v9 = vcombine.high %v7497_v12, %v7501_v49  ;;  %v7493_v46 = vld [vmem:[#allocation10 + $0x17a0] sm:$0xff] }
 0x4c9   :  { %v11894_v32 = vcombine.high %v7498_v50, %v7502_v13  ;;  %v11893_v5 = vcombine.low %v7498_v50, %v7502_v13  ;;  %v11884_v34 = vcombine.high %v7489_v44, %v7493_v46  ;;  %v7466_v10 = vld [vmem:[#allocation10 + $0x16c8] sm:$0xff] }
 0x4ca   :  { %v7470_v36 = vld [vmem:[#allocation10 + $0x16e8] sm:$0xff] }
 0x4cb   :  { %7356 = vmatpush1.bf16.msra.mxu1 %v11815_v29  ;;  %7397 = vmatpush1.bf16.msra.mxu0 %v11817_v26  ;;  %v7494_v29 = vld [vmem:[#allocation10 + $0x17a8] sm:$0xff]  ;;  %v11891_v26 = vcombine.low %v7497_v12, %v7501_v49  ;;  %v11861_v13 = vcombine.low %v7466_v10, %v7470_v36 }
 0x4cc   :  { %7357 = vmatprep.subr.bf16.mxu1 %v11808_v4  ;;  %7398 = vmatprep.subr.bf16.mxu0 %v11810_v38  ;;  %v11886_v4 = vcombine.high %v7490_v6, %v7494_v29  ;;  %v7481_v38 = vld [vmem:[#allocation10 + $0x1740] sm:$0xff]  ;;  %v11885_v61 = vcombine.low %v7490_v6, %v7494_v29  ;;  %v7458_v12 = vld [vmem:[#allocation10 + $0x1688] sm:$0xff] }
 0x4cd   :  { %v11876_v52 = vcombine.high %v7481_v38, %v7485_v39  ;;  %v11875_v41 = vcombine.low %v7481_v38, %v7485_v39  ;;  %v7462_v49 = vld [vmem:[#allocation10 + $0x16a8] sm:$0xff] }
 0x4ce   :  { %v11853_v29 = vcombine.low %v7458_v12, %v7462_v49  ;;  %v7442_v38 = vld [vmem:[#allocation10 + $0x1608] sm:$0xff] }
 0x4cf   :  { %7358 = vmatpush1.bf16.msra.mxu1 %v11807_v16  ;;  %7399 = vmatpush1.bf16.msra.mxu0 %v11809_v14  ;;  %v11883_v14 = vcombine.low %v7489_v44, %v7493_v46  ;;  %v7450_v44 = vld [vmem:[#allocation10 + $0x1648] sm:$0xff] }
 0x4d0   :  { %7359 = vmatprep.subr.bf16.mxu1 %v11800_v11  ;;  %7400 = vmatprep.subr.bf16.mxu0 %v11802_v33  ;;  %v7454_v46 = vld [vmem:[#allocation10 + $0x1668] sm:$0xff] }
 0x4d1   :  { %v7446_v39 = vld [vmem:[#allocation10 + $0x1628] sm:$0xff] }
 0x4d3   :  { %7360 = vmatpush1.bf16.msra.mxu1 %v11799_v51  ;;  %7401 = vmatpush1.bf16.msra.mxu0 %v11801_v35  ;;  %v11878_v51 = vcombine.high %v7482_v55, %v7486_v23  ;;  %v7473_v35 = vld [vmem:[#allocation10 + $0x1700] sm:$0xff]  ;;  %v11845_v23 = vcombine.low %v7450_v44, %v7454_v46 }
 0x4d4   :  { %7361 = vmatprep.subr.bf16.mxu1 %v11792_v1  ;;  %7402 = vmatprep.subr.bf16.mxu0 %v11794_v18  ;;  %v7474_v18 = vld [vmem:[#allocation10 + $0x1708] sm:$0xff] }
 0x4d7   :  { %7362 = vmatpush1.bf16.msra.mxu1 %v11791_v27  ;;  %7403 = vmatpush1.bf16.msra.mxu0 %v11793_v62 }
 0x4d8   :  { %7363 = vmatprep.subr.bf16.mxu1 %v11784_v3  ;;  %7404 = vmatprep.subr.bf16.mxu0 %v11786_v40  ;;  %v7465_v3 = vld [vmem:[#allocation10 + $0x16c0] sm:$0xff] }
 0x4d9   :  { %v7469_v40 = vld [vmem:[#allocation10 + $0x16e0] sm:$0xff] }
 0x4da   :  { %v11859_v50 = vcombine.low %v7465_v3, %v7469_v40 }
 0x4db   :  { %7364 = vmatpush1.bf16.msra.mxu1 %v11783_v58  ;;  %7405 = vmatpush1.bf16.msra.mxu0 %v11785_v8  ;;  %v11860_v58 = vcombine.high %v7465_v3, %v7469_v40  ;;  %v11862_v8 = vcombine.high %v7466_v10, %v7470_v36  ;;  %v7487_v3 = vld [vmem:[#allocation10 + $0x1770] sm:$0xff]  ;;  %v7484_v40 = vld [vmem:[#allocation10 + $0x1758] sm:$0xff] }
 0x4dc   :  { %7365 = vmatprep.subr.bf16.mxu1 %v11776_v19  ;;  %7406 = vmatprep.subr.bf16.mxu0 %v11778_v25  ;;  %v7457_v19 = vld [vmem:[#allocation10 + $0x1680] sm:$0xff]  ;;  %v7488_v10 = vld [vmem:[#allocation10 + $0x1778] sm:$0xff] }
 0x4dd   :  { %v7461_v25 = vld [vmem:[#allocation10 + $0x16a0] sm:$0xff] }
 0x4de   :  { %v11851_v6 = vcombine.low %v7457_v19, %v7461_v25 }
 0x4df   :  { %7366 = vmatpush1.bf16.msra.mxu1 %v11775_v48  ;;  %7407 = vmatpush1.bf16.msra.mxu0 %v11777_v57  ;;  %v11852_v48 = vcombine.high %v7457_v19, %v7461_v25  ;;  %v11854_v57 = vcombine.high %v7458_v12, %v7462_v49  ;;  %v11882_v49 = vcombine.high %v7484_v40, %v7488_v10 }
 0x4e0   :  { %7841 = vmatprep.subr.bf16.mxu1 %v11892_v9  ;;  %7882 = vmatprep.subr.bf16.mxu0 %v11894_v32  ;;  %v7449_v9 = vld [vmem:[#allocation10 + $0x1640] sm:$0xff] }
 0x4e1   :  { %v7453_v32 = vld [vmem:[#allocation10 + $0x1660] sm:$0xff] }
 0x4e2   :  { %v5661_v2 = vpop.f32.mrf.mxu1  ;;  %v5702_v16 = vpop.f32.mrf.mxu0  ;;  %7384 = vmatmul.mubr.bf16.vlgmr.msra.gmra.mxu1 %v13578_v28  ;;  %7425 = vmatmul.mubr.bf16.vlgmr.msra.gmra.mxu0 %v13578_v28  ;;  %v11843_v55 = vcombine.low %v7449_v9, %v7453_v32 }
 0x4e3   :  { %v13599_v11 = vadd.f32 %v5661_v2, %v13563_v17  ;;  %v13602_v33 = vadd.f32 %v5702_v16, %v13566_v47  ;;  %7842 = vmatpush1.bf16.msra.mxu1 %v11891_v26  ;;  %7883 = vmatpush1.bf16.msra.mxu0 %v11893_v5  ;;  %v7477_v17 = vld [vmem:[#allocation10 + $0x1720] sm:$0xff]  ;;  %v7478_v47 = vld [vmem:[#allocation10 + $0x1728] sm:$0xff]  ;;  %v11844_v26 = vcombine.high %v7449_v9, %v7453_v32 }
 0x4e4   :  { %v5663_v45 = vpop.f32.mrf.mxu1  ;;  %v5704_v37 = vpop.f32.mrf.mxu0  ;;  %7843 = vmatprep.subr.bf16.mxu1 %v11884_v34  ;;  %7884 = vmatprep.subr.bf16.mxu0 %v11886_v4  ;;  %v11867_v15 = vcombine.low %v7473_v35, %v7477_v17  ;;  %v11869_v53 = vcombine.low %v7474_v18, %v7478_v47  ;;  %v11846_v5 = vcombine.high %v7450_v44, %v7454_v46  ;;  %v7441_v34 = vld [vmem:[#allocation10 + $0x1600] sm:$0xff] }
 0x4e5   :  { %v13605_v1 = vadd.f32 %v5663_v45, %v13569_v31  ;;  %v13608_v28 = vadd.f32 %v5704_v37, %v13572_v60  ;;  %7873 = vmatprep.mubr.bf16.mxu1 %v12650_v42  ;;  %7914 = vmatprep.mubr.bf16.mxu0 %v12650_v42  ;;  %v11868_v31 = vcombine.high %v7473_v35, %v7477_v17  ;;  %v7445_v4 = vld [vmem:[#allocation10 + $0x1620] sm:$0xff]  ;;  %v7500_v45 = vld [vmem:[#allocation10 + $0x17d8] sm:$0xff] }
 0x4e6   :  { %v5665_v43 = vpop.f32.mrf.mxu1  ;;  %v5706_v22 = vpop.f32.mrf.mxu0  ;;  %v11870_v60 = vcombine.high %v7474_v18, %v7478_v47  ;;  %v11836_v2 = vcombine.high %v7441_v34, %v7445_v4  ;;  %v11838_v16 = vcombine.high %v7442_v38, %v7446_v39  ;;  %v7504_v37 = vld [vmem:[#allocation10 + $0x17f8] sm:$0xff]  ;;  %v7491_v18 = vld [vmem:[#allocation10 + $0x1790] sm:$0xff]  ;;  %v11881_v46 = vcombine.low %v7484_v40, %v7488_v10 }
 0x4e7   :  { %7844 = vmatpush1.bf16.msra.mxu1 %v11883_v14  ;;  %7885 = vmatpush1.bf16.msra.mxu0 %v11885_v61  ;;  %v7499_v14 = vld [vmem:[#allocation10 + $0x17d0] sm:$0xff]  ;;  %v11898_v17 = vcombine.high %v7500_v45, %v7504_v37  ;;  %v7492_v43 = vld [vmem:[#allocation10 + $0x1798] sm:$0xff] }
 0x4e8   :  { %v5666_v27 = vpop.f32.mrf.mxu1  ;;  %v5707_v62 = vpop.f32.mrf.mxu0  ;;  %7845 = vmatprep.subr.bf16.mxu1 %v11876_v52  ;;  %7886 = vmatprep.subr.bf16.mxu0 %v11878_v51  ;;  %v7503_v61 = vld [vmem:[#allocation10 + $0x17f0] sm:$0xff]  ;;  %v11835_v52 = vcombine.low %v7441_v34, %v7445_v4  ;;  %v11837_v51 = vcombine.low %v7442_v38, %v7446_v39  ;;  %v7496_v22 = vld [vmem:[#allocation10 + $0x17b8] sm:$0xff] }
 0x4e9   :  { %v11896_v35 = vcombine.high %v7499_v14, %v7503_v61  ;;  %v7495_v47 = vld [vmem:[#allocation10 + $0x17b0] sm:$0xff]  ;;  %v13614_v27 = vpack.c.b16 %v13241_v63, %v13241_v63  ;;  %v7468_v34 = vld [vmem:[#allocation10 + $0x16d8] sm:$0xff] }
 0x4ea   :  { %v11888_v62 = vcombine.high %v7491_v18, %v7495_v47  ;;  %v7472_v4 = vld [vmem:[#allocation10 + $0x16f8] sm:$0xff] }
 0x4eb   :  { %7846 = vmatpush1.bf16.msra.mxu1 %v11875_v41  ;;  %7887 = vmatpush1.bf16.msra.mxu0 %v11877_v54  ;;  %v11895_v41 = vcombine.low %v7499_v14, %v7503_v61  ;;  %v11897_v54 = vcombine.low %v7500_v45, %v7504_v37  ;;  %v7460_v14 = vld [vmem:[#allocation10 + $0x1698] sm:$0xff]  ;;  %v11865_v37 = vcombine.low %v7468_v34, %v7472_v4 }
 0x4ec   :  { %7847 = vmatprep.subr.bf16.mxu1 %v11868_v31  ;;  %7888 = vmatprep.subr.bf16.mxu0 %v11870_v60  ;;  %v11890_v31 = vcombine.high %v7492_v43, %v7496_v22  ;;  %v7483_v60 = vld [vmem:[#allocation10 + $0x1750] sm:$0xff]  ;;  %v7464_v61 = vld [vmem:[#allocation10 + $0x16b8] sm:$0xff] }
 0x4ed   :  { %v11880_v12 = vcombine.high %v7483_v60, %v7487_v3  ;;  %v11879_v44 = vcombine.low %v7483_v60, %v7487_v3  ;;  %v7444_v60 = vld [vmem:[#allocation10 + $0x1618] sm:$0xff] }
 0x4ee   :  { %v7448_v3 = vld [vmem:[#allocation10 + $0x1638] sm:$0xff] }
 0x4ef   :  { %7848 = vmatpush1.bf16.msra.mxu1 %v11867_v15  ;;  %7889 = vmatpush1.bf16.msra.mxu0 %v11869_v53  ;;  %v11887_v53 = vcombine.low %v7491_v18, %v7495_v47  ;;  %v7452_v18 = vld [vmem:[#allocation10 + $0x1658] sm:$0xff] }
 0x4f0   :  { %7849 = vmatprep.subr.bf16.mxu1 %v11860_v58  ;;  %7890 = vmatprep.subr.bf16.mxu0 %v11862_v8  ;;  %v11889_v8 = vcombine.low %v7492_v43, %v7496_v22  ;;  %v7456_v47 = vld [vmem:[#allocation10 + $0x1678] sm:$0xff]  ;;  %v11857_v22 = vcombine.low %v7460_v14, %v7464_v61 }
 0x4f1   :  { %v11849_v10 = vcombine.low %v7452_v18, %v7456_v47 }
 0x4f3   :  { %7850 = vmatpush1.bf16.msra.mxu1 %v11859_v50  ;;  %7891 = vmatpush1.bf16.msra.mxu0 %v11861_v13  ;;  %v7475_v50 = vld [vmem:[#allocation10 + $0x1710] sm:$0xff] }
 0x4f4   :  { %7851 = vmatprep.subr.bf16.mxu1 %v11852_v48  ;;  %7892 = vmatprep.subr.bf16.mxu0 %v11854_v57  ;;  %v7476_v57 = vld [vmem:[#allocation10 + $0x1718] sm:$0xff] }
 0x4f7   :  { %7852 = vmatpush1.bf16.msra.mxu1 %v11851_v6  ;;  %7893 = vmatpush1.bf16.msra.mxu0 %v11853_v29 }
 0x4f8   :  { %7853 = vmatprep.subr.bf16.mxu1 %v11844_v26  ;;  %7894 = vmatprep.subr.bf16.mxu0 %v11846_v5  ;;  %v7467_v26 = vld [vmem:[#allocation10 + $0x16d0] sm:$0xff] }
 0x4f9   :  { %v7471_v5 = vld [vmem:[#allocation10 + $0x16f0] sm:$0xff] }
 0x4fa   :  { %v11863_v45 = vcombine.low %v7467_v26, %v7471_v5 }
 0x4fb   :  { %7854 = vmatpush1.bf16.msra.mxu1 %v11843_v55  ;;  %7895 = vmatpush1.bf16.msra.mxu0 %v11845_v23  ;;  %v11864_v55 = vcombine.high %v7467_v26, %v7471_v5  ;;  %v11866_v23 = vcombine.high %v7468_v34, %v7472_v4  ;;  %v8054_v26 = vld [vmem:[#allocation10 + $0x1948] sm:$0xff] }
 0x4fc   :  { %7855 = vmatprep.subr.bf16.mxu1 %v11836_v2  ;;  %7896 = vmatprep.subr.bf16.mxu0 %v11838_v16  ;;  %v7459_v2 = vld [vmem:[#allocation10 + $0x1690] sm:$0xff]  ;;  %v8058_v5 = vld [vmem:[#allocation10 + $0x1968] sm:$0xff] }
 0x4fd   :  { %v7463_v16 = vld [vmem:[#allocation10 + $0x16b0] sm:$0xff] }
 0x4fe   :  { %v11855_v43 = vcombine.low %v7459_v2, %v7463_v16 }
 0x4ff   :  { %7856 = vmatpush1.bf16.msra.mxu1 %v11835_v52  ;;  %7897 = vmatpush1.bf16.msra.mxu0 %v11837_v51  ;;  %v11856_v52 = vcombine.high %v7459_v2, %v7463_v16  ;;  %v11858_v51 = vcombine.high %v7460_v14, %v7464_v61  ;;  %v11942_v61 = vcombine.high %v8054_v26, %v8058_v5 }
 0x500   :  { %7923 = vmatprep.subr.bf16.mxu1 %v11896_v35  ;;  %7964 = vmatprep.subr.bf16.mxu0 %v11898_v17  ;;  %v7451_v35 = vld [vmem:[#allocation10 + $0x1650] sm:$0xff] }
 0x501   :  { %v7455_v17 = vld [vmem:[#allocation10 + $0x1670] sm:$0xff] }
 0x502   :  { %v6159_v36 = vpop.f32.mrf.mxu1  ;;  %v6200_v15 = vpop.f32.mrf.mxu0  ;;  %7874 = vmatmul.mubr.bf16.vlgmr.msra.gmra.mxu1 %v13614_v27  ;;  %7915 = vmatmul.mubr.bf16.vlgmr.msra.gmra.mxu0 %v13614_v27  ;;  %v11847_v40 = vcombine.low %v7451_v35, %v7455_v17 }
 0x503   :  { %v13619_v58 = vadd.f32 %v6159_v36, %v13583_v21  ;;  %v13622_v63 = vadd.f32 %v6200_v15, %v13586_v24  ;;  %7924 = vmatpush1.bf16.msra.mxu1 %v11895_v41  ;;  %7965 = vmatpush1.bf16.msra.mxu0 %v11897_v54  ;;  %v7479_v21 = vld [vmem:[#allocation10 + $0x1730] sm:$0xff]  ;;  %v7480_v24 = vld [vmem:[#allocation10 + $0x1738] sm:$0xff]  ;;  %v11848_v41 = vcombine.high %v7451_v35, %v7455_v17 }
 0x504   :  { %v6161_v19 = vpop.f32.mrf.mxu1  ;;  %v6202_v25 = vpop.f32.mrf.mxu0  ;;  %7925 = vmatprep.subr.bf16.mxu1 %v11888_v62  ;;  %7966 = vmatprep.subr.bf16.mxu0 %v11890_v31  ;;  %v11871_v38 = vcombine.low %v7475_v50, %v7479_v21  ;;  %v11873_v39 = vcombine.low %v7476_v57, %v7480_v24  ;;  %v11850_v54 = vcombine.high %v7452_v18, %v7456_v47  ;;  %v7443_v62 = vld [vmem:[#allocation10 + $0x1610] sm:$0xff] }
 0x505   :  { %v13625_v13 = vadd.f32 %v6161_v19, %v13589_v20  ;;  %v13628_v48 = vadd.f32 %v6202_v25, %v13592_v59  ;;  %7955 = vmatprep.mubr.bf16.mxu1 %v12650_v42  ;;  %7996 = vmatprep.mubr.bf16.mxu0 %v12650_v42  ;;  %v11872_v20 = vcombine.high %v7475_v50, %v7479_v21  ;;  %v7447_v31 = vld [vmem:[#allocation10 + $0x1630] sm:$0xff]  ;;  %v8070_v19 = vld [vmem:[#allocation10 + $0x19c8] sm:$0xff] }
 0x506   :  { %v6163_v9 = vpop.f32.mrf.mxu1  ;;  %v6204_v32 = vpop.f32.mrf.mxu0  ;;  %v11874_v59 = vcombine.high %v7476_v57, %v7480_v24  ;;  %v11840_v36 = vcombine.high %v7443_v62, %v7447_v31  ;;  %v11842_v15 = vcombine.high %v7444_v60, %v7448_v3  ;;  %v8074_v25 = vld [vmem:[#allocation10 + $0x19e8] sm:$0xff]  ;;  %v8061_v57 = vld [vmem:[#allocation10 + $0x1980] sm:$0xff]  ;;  %v11941_v18 = vcombine.low %v8054_v26, %v8058_v5 }
 0x507   :  { %7926 = vmatpush1.bf16.msra.mxu1 %v11887_v53  ;;  %7967 = vmatpush1.bf16.msra.mxu0 %v11889_v8  ;;  %v8069_v53 = vld [vmem:[#allocation10 + $0x19c0] sm:$0xff]  ;;  %v11958_v21 = vcombine.high %v8070_v19, %v8074_v25  ;;  %v8062_v9 = vld [vmem:[#allocation10 + $0x1988] sm:$0xff] }
 0x508   :  { %v6164_v6 = vpop.f32.mrf.mxu1  ;;  %v6205_v29 = vpop.f32.mrf.mxu0  ;;  %7927 = vmatprep.subr.bf16.mxu1 %v11880_v12  ;;  %7968 = vmatprep.subr.bf16.mxu0 %v11882_v49  ;;  %v8073_v8 = vld [vmem:[#allocation10 + $0x19e0] sm:$0xff]  ;;  %v11839_v12 = vcombine.low %v7443_v62, %v7447_v31  ;;  %v11841_v49 = vcombine.low %v7444_v60, %v7448_v3  ;;  %v8066_v32 = vld [vmem:[#allocation10 + $0x19a8] sm:$0xff] }
 0x509   :  { %v11956_v50 = vcombine.high %v8069_v53, %v8073_v8  ;;  %v8065_v24 = vld [vmem:[#allocation10 + $0x19a0] sm:$0xff]  ;;  %v11950_v29 = vcombine.high %v8062_v9, %v8066_v32  ;;  %v8042_v62 = vld [vmem:[#allocation10 + $0x18e8] sm:$0xff] }
 0x50a   :  { %v11948_v6 = vcombine.high %v8061_v57, %v8065_v24 }
 0x50b   :  { %7928 = vmatpush1.bf16.msra.mxu1 %v11879_v44  ;;  %7969 = vmatpush1.bf16.msra.mxu0 %v11881_v46  ;;  %v11955_v44 = vcombine.low %v8069_v53, %v8073_v8  ;;  %v11957_v46 = vcombine.low %v8070_v19, %v8074_v25  ;;  %v8034_v53 = vld [vmem:[#allocation10 + $0x18a8] sm:$0xff] }
 0x50c   :  { %7929 = vmatprep.subr.bf16.mxu1 %v11872_v20  ;;  %7970 = vmatprep.subr.bf16.mxu0 %v11874_v59  ;;  %v8053_v20 = vld [vmem:[#allocation10 + $0x1940] sm:$0xff] }
 0x50d   :  { %v8057_v59 = vld [vmem:[#allocation10 + $0x1960] sm:$0xff] }
 0x50e   :  { %v11940_v14 = vcombine.high %v8053_v20, %v8057_v59  ;;  %v11939_v17 = vcombine.low %v8053_v20, %v8057_v59  ;;  %v8018_v20 = vld [vmem:[#allocation10 + $0x1828] sm:$0xff] }
 0x50f   :  { %7930 = vmatpush1.bf16.msra.mxu1 %v11871_v38  ;;  %7971 = vmatpush1.bf16.msra.mxu0 %v11873_v39  ;;  %v11947_v38 = vcombine.low %v8061_v57, %v8065_v24  ;;  %v8026_v57 = vld [vmem:[#allocation10 + $0x1868] sm:$0xff] }
 0x510   :  { %7931 = vmatprep.subr.bf16.mxu1 %v11864_v55  ;;  %7972 = vmatprep.subr.bf16.mxu0 %v11866_v23  ;;  %v11949_v23 = vcombine.low %v8062_v9, %v8066_v32 }
 0x513   :  { %7932 = vmatpush1.bf16.msra.mxu1 %v11863_v45  ;;  %7973 = vmatpush1.bf16.msra.mxu0 %v11865_v37  ;;  %v8045_v45 = vld [vmem:[#allocation10 + $0x1900] sm:$0xff] }
 0x514   :  { %7933 = vmatprep.subr.bf16.mxu1 %v11856_v52  ;;  %7974 = vmatprep.subr.bf16.mxu0 %v11858_v51  ;;  %v8046_v52 = vld [vmem:[#allocation10 + $0x1908] sm:$0xff] }
 0x517   :  { %7934 = vmatpush1.bf16.msra.mxu1 %v11855_v43  ;;  %7975 = vmatpush1.bf16.msra.mxu0 %v11857_v22  ;;  %v8037_v22 = vld [vmem:[#allocation10 + $0x18c0] sm:$0xff] }
 0x518   :  { %7935 = vmatprep.subr.bf16.mxu1 %v11848_v41  ;;  %7976 = vmatprep.subr.bf16.mxu0 %v11850_v54  ;;  %v8041_v41 = vld [vmem:[#allocation10 + $0x18e0] sm:$0xff]  ;;  %v8038_v54 = vld [vmem:[#allocation10 + $0x18c8] sm:$0xff] }
 0x519   :  { %v11924_v3 = vcombine.high %v8037_v22, %v8041_v41  ;;  %v11923_v8 = vcombine.low %v8037_v22, %v8041_v41  ;;  %v11925_v19 = vcombine.low %v8038_v54, %v8042_v62  ;;  %v8056_v22 = vld [vmem:[#allocation10 + $0x1958] sm:$0xff] }
 0x51a   :  { %v8060_v41 = vld [vmem:[#allocation10 + $0x1978] sm:$0xff] }
 0x51b   :  { %7936 = vmatpush1.bf16.msra.mxu1 %v11847_v40  ;;  %7977 = vmatpush1.bf16.msra.mxu0 %v11849_v10  ;;  %v11926_v40 = vcombine.high %v8038_v54, %v8042_v62  ;;  %v8029_v10 = vld [vmem:[#allocation10 + $0x1880] sm:$0xff] }
 0x51c   :  { %7937 = vmatprep.subr.bf16.mxu1 %v11840_v36  ;;  %7978 = vmatprep.subr.bf16.mxu0 %v11842_v15  ;;  %v8033_v36 = vld [vmem:[#allocation10 + $0x18a0] sm:$0xff]  ;;  %v8030_v15 = vld [vmem:[#allocation10 + $0x1888] sm:$0xff] }
 0x51d   :  { %v11916_v25 = vcombine.high %v8029_v10, %v8033_v36  ;;  %v11915_v24 = vcombine.low %v8029_v10, %v8033_v36  ;;  %v11917_v9 = vcombine.low %v8030_v15, %v8034_v53 }
 0x51f   :  { %7938 = vmatpush1.bf16.msra.mxu1 %v11839_v12  ;;  %7979 = vmatpush1.bf16.msra.mxu0 %v11841_v49  ;;  %v11918_v12 = vcombine.high %v8030_v15, %v8034_v53  ;;  %v8021_v49 = vld [vmem:[#allocation10 + $0x1840] sm:$0xff]  ;;  %v11946_v15 = vcombine.high %v8056_v22, %v8060_v41  ;;  %v8047_v53 = vld [vmem:[#allocation10 + $0x1910] sm:$0xff] }
 0x520   :  { %8413 = vmatprep.subr.bf16.mxu1 %v11956_v50  ;;  %8454 = vmatprep.subr.bf16.mxu0 %v11958_v21  ;;  %v8025_v50 = vld [vmem:[#allocation10 + $0x1860] sm:$0xff]  ;;  %v8022_v21 = vld [vmem:[#allocation10 + $0x1848] sm:$0xff] }
 0x521   :  { %v11908_v32 = vcombine.high %v8021_v49, %v8025_v50  ;;  %v11907_v59 = vcombine.low %v8021_v49, %v8025_v50  ;;  %v11909_v26 = vcombine.low %v8022_v21, %v8026_v57 }
 0x522   :  { %v6241_v34 = vpop.f32.mrf.mxu1  ;;  %v6282_v4 = vpop.f32.mrf.mxu0  ;;  %7956 = vmatmul.mubr.bf16.vlgmr.msra.gmra.mxu1 %v13614_v27  ;;  %7997 = vmatmul.mubr.bf16.vlgmr.msra.gmra.mxu0 %v13614_v27 }
 0x523   :  { %v13635_v39 = vadd.f32 %v6241_v34, %v13599_v11  ;;  %v13638_v55 = vadd.f32 %v6282_v4, %v13602_v33  ;;  %8414 = vmatpush1.bf16.msra.mxu1 %v11955_v44  ;;  %8455 = vmatpush1.bf16.msra.mxu0 %v11957_v46  ;;  %v8049_v11 = vld [vmem:[#allocation10 + $0x1920] sm:$0xff]  ;;  %v8050_v33 = vld [vmem:[#allocation10 + $0x1928] sm:$0xff]  ;;  %v11910_v44 = vcombine.high %v8022_v21, %v8026_v57  ;;  %v8071_v4 = vld [vmem:[#allocation10 + $0x19d0] sm:$0xff] }
 0x524   :  { %v6243_v2 = vpop.f32.mrf.mxu1  ;;  %v6284_v16 = vpop.f32.mrf.mxu0  ;;  %8415 = vmatprep.subr.bf16.mxu1 %v11948_v6  ;;  %8456 = vmatprep.subr.bf16.mxu0 %v11950_v29  ;;  %v11931_v31 = vcombine.low %v8045_v45, %v8049_v11  ;;  %v11933_v60 = vcombine.low %v8046_v52, %v8050_v33  ;;  %v8013_v46 = vld [vmem:[#allocation10 + $0x1800] sm:$0xff]  ;;  %v8014_v29 = vld [vmem:[#allocation10 + $0x1808] sm:$0xff]  ;;  %v11945_v21 = vcombine.low %v8056_v22, %v8060_v41 }
 0x525   :  { %v13641_v37 = vadd.f32 %v6243_v2, %v13605_v1  ;;  %v13644_v27 = vadd.f32 %v6284_v16, %v13608_v28  ;;  %8445 = vmatprep.mubr.bf16.mxu1 %v12650_v42  ;;  %8486 = vmatprep.mubr.bf16.mxu0 %v12650_v42  ;;  %v11932_v1 = vcombine.high %v8045_v45, %v8049_v11  ;;  %v8017_v6 = vld [vmem:[#allocation10 + $0x1820] sm:$0xff]  ;;  %v8076_v2 = vld [vmem:[#allocation10 + $0x19f8] sm:$0xff]  ;;  %v8063_v11 = vld [vmem:[#allocation10 + $0x1990] sm:$0xff] }
 0x526   :  { %v6245_v51 = vpop.f32.mrf.mxu1  ;;  %v6286_v35 = vpop.f32.mrf.mxu0  ;;  %v11934_v28 = vcombine.high %v8046_v52, %v8050_v33  ;;  %v11900_v5 = vcombine.high %v8013_v46, %v8017_v6  ;;  %v11902_v34 = vcombine.high %v8014_v29, %v8018_v20  ;;  %v11899_v16 = vcombine.low %v8013_v46, %v8017_v6  ;;  %v8067_v52 = vld [vmem:[#allocation10 + $0x19b0] sm:$0xff]  ;;  %v8064_v33 = vld [vmem:[#allocation10 + $0x1998] sm:$0xff] }
 0x527   :  { %8416 = vmatpush1.bf16.msra.mxu1 %v11947_v38  ;;  %8457 = vmatpush1.bf16.msra.mxu0 %v11949_v23  ;;  %v8075_v38 = vld [vmem:[#allocation10 + $0x19f0] sm:$0xff]  ;;  %v8072_v23 = vld [vmem:[#allocation10 + $0x19d8] sm:$0xff] }
 0x528   :  { %v6246_v47 = vpop.f32.mrf.mxu1  ;;  %v6287_v43 = vpop.f32.mrf.mxu0  ;;  %8417 = vmatprep.subr.bf16.mxu1 %v11940_v14  ;;  %8458 = vmatprep.subr.bf16.mxu0 %v11942_v61  ;;  %v11901_v14 = vcombine.low %v8014_v29, %v8018_v20  ;;  %v11960_v61 = vcombine.high %v8071_v4, %v8075_v38  ;;  %v11962_v45 = vcombine.high %v8072_v23, %v8076_v2  ;;  %v8068_v51 = vld [vmem:[#allocation10 + $0x19b8] sm:$0xff] }
 0x529   :  { %v11959_v35 = vcombine.low %v8071_v4, %v8075_v38  ;;  %v11952_v47 = vcombine.high %v8063_v11, %v8067_v52  ;;  %v11954_v43 = vcombine.high %v8064_v33, %v8068_v51  ;;  %v8044_v46 = vld [vmem:[#allocation10 + $0x18f8] sm:$0xff] }
 0x52a   :  { %v8036_v4 = vld [vmem:[#allocation10 + $0x18b8] sm:$0xff] }
 0x52b   :  { %8418 = vmatpush1.bf16.msra.mxu1 %v11939_v17  ;;  %8459 = vmatpush1.bf16.msra.mxu0 %v11941_v18  ;;  %v11961_v17 = vcombine.low %v8072_v23, %v8076_v2  ;;  %v13650_v18 = vpack.c.b16 %v13254_v0, %v13254_v0 }
 0x52c   :  { %8419 = vmatprep.subr.bf16.mxu1 %v11932_v1  ;;  %8460 = vmatprep.subr.bf16.mxu0 %v11934_v28  ;;  %v8055_v1 = vld [vmem:[#allocation10 + $0x1950] sm:$0xff] }
 0x52d   :  { %v8059_v28 = vld [vmem:[#allocation10 + $0x1970] sm:$0xff] }
 0x52e   :  { %v11944_v36 = vcombine.high %v8055_v1, %v8059_v28  ;;  %v11943_v50 = vcombine.low %v8055_v1, %v8059_v28  ;;  %v8020_v1 = vld [vmem:[#allocation10 + $0x1838] sm:$0xff] }
 0x52f   :  { %8420 = vmatpush1.bf16.msra.mxu1 %v11931_v31  ;;  %8461 = vmatpush1.bf16.msra.mxu0 %v11933_v60  ;;  %v11951_v31 = vcombine.low %v8063_v11, %v8067_v52  ;;  %v8028_v11 = vld [vmem:[#allocation10 + $0x1878] sm:$0xff] }
 0x530   :  { %8421 = vmatprep.subr.bf16.mxu1 %v11924_v3  ;;  %8462 = vmatprep.subr.bf16.mxu0 %v11926_v40  ;;  %v11953_v3 = vcombine.low %v8064_v33, %v8068_v51 }
 0x533   :  { %8422 = vmatpush1.bf16.msra.mxu1 %v11923_v8  ;;  %8463 = vmatpush1.bf16.msra.mxu0 %v11925_v19 }
 0x534   :  { %8423 = vmatprep.subr.bf16.mxu1 %v11916_v25  ;;  %8464 = vmatprep.subr.bf16.mxu0 %v11918_v12  ;;  %v8048_v25 = vld [vmem:[#allocation10 + $0x1918] sm:$0xff] }
 0x537   :  { %8424 = vmatpush1.bf16.msra.mxu1 %v11915_v24  ;;  %8465 = vmatpush1.bf16.msra.mxu0 %v11917_v9  ;;  %v8039_v9 = vld [vmem:[#allocation10 + $0x18d0] sm:$0xff] }
 0x538   :  { %8425 = vmatprep.subr.bf16.mxu1 %v11908_v32  ;;  %8466 = vmatprep.subr.bf16.mxu0 %v11910_v44  ;;  %v8043_v32 = vld [vmem:[#allocation10 + $0x18f0] sm:$0xff]  ;;  %v8040_v44 = vld [vmem:[#allocation10 + $0x18d8] sm:$0xff] }
 0x539   :  { %v11928_v20 = vcombine.high %v8039_v9, %v8043_v32  ;;  %v11927_v38 = vcombine.low %v8039_v9, %v8043_v32  ;;  %v11929_v23 = vcombine.low %v8040_v44, %v8044_v46  ;;  %v8630_v9 = vld [vmem:[#allocation10 + $0x1b68] sm:$0xff] }
 0x53b   :  { %8426 = vmatpush1.bf16.msra.mxu1 %v11907_v59  ;;  %8467 = vmatpush1.bf16.msra.mxu0 %v11909_v26  ;;  %v11930_v59 = vcombine.high %v8040_v44, %v8044_v46  ;;  %v8031_v26 = vld [vmem:[#allocation10 + $0x1890] sm:$0xff] }
 0x53c   :  { %8427 = vmatprep.subr.bf16.mxu1 %v11900_v5  ;;  %8468 = vmatprep.subr.bf16.mxu0 %v11902_v34  ;;  %v8035_v5 = vld [vmem:[#allocation10 + $0x18b0] sm:$0xff]  ;;  %v8032_v34 = vld [vmem:[#allocation10 + $0x1898] sm:$0xff] }
 0x53d   :  { %v11920_v2 = vcombine.high %v8031_v26, %v8035_v5  ;;  %v11919_v52 = vcombine.low %v8031_v26, %v8035_v5  ;;  %v11921_v33 = vcombine.low %v8032_v34, %v8036_v4 }
 0x53f   :  { %8428 = vmatpush1.bf16.msra.mxu1 %v11899_v16  ;;  %8469 = vmatpush1.bf16.msra.mxu0 %v11901_v14  ;;  %v11922_v16 = vcombine.high %v8032_v34, %v8036_v4  ;;  %v8023_v14 = vld [vmem:[#allocation10 + $0x1850] sm:$0xff]  ;;  %v8617_v4 = vld [vmem:[#allocation10 + $0x1b00] sm:$0xff] }
 0x540   :  { %8495 = vmatprep.subr.bf16.mxu1 %v11960_v61  ;;  %8536 = vmatprep.subr.bf16.mxu0 %v11962_v45  ;;  %v8027_v61 = vld [vmem:[#allocation10 + $0x1870] sm:$0xff]  ;;  %v8024_v45 = vld [vmem:[#allocation10 + $0x1858] sm:$0xff] }
 0x541   :  { %v11912_v51 = vcombine.high %v8023_v14, %v8027_v61  ;;  %v11911_v28 = vcombine.low %v8023_v14, %v8027_v61  ;;  %v11913_v22 = vcombine.low %v8024_v45, %v8028_v11 }
 0x542   :  { %v6731_v54 = vpop.f32.mrf.mxu1  ;;  %v6772_v62 = vpop.f32.mrf.mxu0  ;;  %8446 = vmatmul.mubr.bf16.vlgmr.msra.gmra.mxu1 %v13650_v18  ;;  %8487 = vmatmul.mubr.bf16.vlgmr.msra.gmra.mxu0 %v13650_v18 }
 0x543   :  { %v13655_v60 = vadd.f32 %v6731_v54, %v13619_v58  ;;  %v13658_v0 = vadd.f32 %v6772_v62, %v13622_v63  ;;  %8496 = vmatpush1.bf16.msra.mxu1 %v11959_v35  ;;  %8537 = vmatpush1.bf16.msra.mxu0 %v11961_v17  ;;  %v8051_v58 = vld [vmem:[#allocation10 + $0x1930] sm:$0xff]  ;;  %v8052_v63 = vld [vmem:[#allocation10 + $0x1938] sm:$0xff]  ;;  %v11914_v35 = vcombine.high %v8024_v45, %v8028_v11  ;;  %v8641_v62 = vld [vmem:[#allocation10 + $0x1bc0] sm:$0xff] }
 0x544   :  { %v6733_v40 = vpop.f32.mrf.mxu1  ;;  %v6774_v10 = vpop.f32.mrf.mxu0  ;;  %8497 = vmatprep.subr.bf16.mxu1 %v11952_v47  ;;  %8538 = vmatprep.subr.bf16.mxu0 %v11954_v43  ;;  %v11935_v6 = vcombine.low %v8047_v53, %v8051_v58  ;;  %v11937_v29 = vcombine.low %v8048_v25, %v8052_v63  ;;  %v8015_v17 = vld [vmem:[#allocation10 + $0x1810] sm:$0xff]  ;;  %v8016_v43 = vld [vmem:[#allocation10 + $0x1818] sm:$0xff] }
 0x545   :  { %v13661_v8 = vadd.f32 %v6733_v40, %v13625_v13  ;;  %v13664_v19 = vadd.f32 %v6774_v10, %v13628_v48  ;;  %8527 = vmatprep.mubr.bf16.mxu1 %v12650_v42  ;;  %8568 = vmatprep.mubr.bf16.mxu0 %v12650_v42  ;;  %v11936_v13 = vcombine.high %v8047_v53, %v8051_v58  ;;  %v8019_v47 = vld [vmem:[#allocation10 + $0x1830] sm:$0xff]  ;;  %v8646_v40 = vld [vmem:[#allocation10 + $0x1be8] sm:$0xff]  ;;  %v8633_v58 = vld [vmem:[#allocation10 + $0x1b80] sm:$0xff] }
 0x546   :  { %v6735_v12 = vpop.f32.mrf.mxu1  ;;  %v6776_v49 = vpop.f32.mrf.mxu0  ;;  %v11938_v48 = vcombine.high %v8048_v25, %v8052_v63  ;;  %v11904_v41 = vcombine.high %v8015_v17, %v8019_v47  ;;  %v11906_v54 = vcombine.high %v8016_v43, %v8020_v1  ;;  %v11903_v10 = vcombine.low %v8015_v17, %v8019_v47  ;;  %v8637_v25 = vld [vmem:[#allocation10 + $0x1ba0] sm:$0xff]  ;;  %v8634_v63 = vld [vmem:[#allocation10 + $0x1b88] sm:$0xff] }
 0x547   :  { %8498 = vmatpush1.bf16.msra.mxu1 %v11951_v31  ;;  %8539 = vmatpush1.bf16.msra.mxu0 %v11953_v3  ;;  %v8645_v31 = vld [vmem:[#allocation10 + $0x1be0] sm:$0xff]  ;;  %v8642_v3 = vld [vmem:[#allocation10 + $0x1bc8] sm:$0xff]  ;;  %v12011_v46 = vcombine.low %v8633_v58, %v8637_v25 }
 0x548   :  { %v6736_v57 = vpop.f32.mrf.mxu1  ;;  %v6777_v24 = vpop.f32.mrf.mxu0  ;;  %8499 = vmatprep.subr.bf16.mxu1 %v11944_v36  ;;  %8540 = vmatprep.subr.bf16.mxu0 %v11946_v15  ;;  %v11905_v36 = vcombine.low %v8016_v43, %v8020_v1  ;;  %v12020_v15 = vcombine.high %v8641_v62, %v8645_v31  ;;  %v12022_v53 = vcombine.high %v8642_v3, %v8646_v40  ;;  %v8638_v12 = vld [vmem:[#allocation10 + $0x1ba8] sm:$0xff] }
 0x549   :  { %v12019_v49 = vcombine.low %v8641_v62, %v8645_v31  ;;  %v12014_v57 = vcombine.high %v8634_v63, %v8638_v12  ;;  %v8625_v24 = vld [vmem:[#allocation10 + $0x1b40] sm:$0xff] }
 0x54b   :  { %8500 = vmatpush1.bf16.msra.mxu1 %v11943_v50  ;;  %8541 = vmatpush1.bf16.msra.mxu0 %v11945_v21  ;;  %v12021_v50 = vcombine.low %v8642_v3, %v8646_v40  ;;  %v12012_v21 = vcombine.high %v8633_v58, %v8637_v25 }
 0x54c   :  { %8501 = vmatprep.subr.bf16.mxu1 %v11936_v13  ;;  %8542 = vmatprep.subr.bf16.mxu0 %v11938_v48  ;;  %v8629_v13 = vld [vmem:[#allocation10 + $0x1b60] sm:$0xff]  ;;  %v8626_v48 = vld [vmem:[#allocation10 + $0x1b48] sm:$0xff] }
 0x54d   :  { %v12004_v5 = vcombine.high %v8625_v24, %v8629_v13  ;;  %v12006_v34 = vcombine.high %v8626_v48, %v8630_v9  ;;  %v12003_v14 = vcombine.low %v8625_v24, %v8629_v13  ;;  %v12005_v61 = vcombine.low %v8626_v48, %v8630_v9 }
 0x54f   :  { %8502 = vmatpush1.bf16.msra.mxu1 %v11935_v6  ;;  %8543 = vmatpush1.bf16.msra.mxu0 %v11937_v29 }
 0x550   :  { %8503 = vmatprep.subr.bf16.mxu1 %v11928_v20  ;;  %8544 = vmatprep.subr.bf16.mxu0 %v11930_v59  ;;  %v12013_v20 = vcombine.low %v8634_v63, %v8638_v12 }
 0x553   :  { %8504 = vmatpush1.bf16.msra.mxu1 %v11927_v38  ;;  %8545 = vmatpush1.bf16.msra.mxu0 %v11929_v23  ;;  %v8618_v23 = vld [vmem:[#allocation10 + $0x1b08] sm:$0xff] }
 0x554   :  { %8505 = vmatprep.subr.bf16.mxu1 %v11920_v2  ;;  %8546 = vmatprep.subr.bf16.mxu0 %v11922_v16 }
 0x557   :  { %8506 = vmatpush1.bf16.msra.mxu1 %v11919_v52  ;;  %8547 = vmatpush1.bf16.msra.mxu0 %v11921_v33  ;;  %v8609_v52 = vld [vmem:[#allocation10 + $0x1ac0] sm:$0xff] }
 0x558   :  { %8507 = vmatprep.subr.bf16.mxu1 %v11912_v51  ;;  %8548 = vmatprep.subr.bf16.mxu0 %v11914_v35  ;;  %v8613_v33 = vld [vmem:[#allocation10 + $0x1ae0] sm:$0xff]  ;;  %v8610_v51 = vld [vmem:[#allocation10 + $0x1ac8] sm:$0xff] }
 0x559   :  { %v8614_v35 = vld [vmem:[#allocation10 + $0x1ae8] sm:$0xff]  ;;  %v11988_v43 = vcombine.high %v8609_v52, %v8613_v33  ;;  %v11987_v62 = vcombine.low %v8609_v52, %v8613_v33  ;;  %v8632_v52 = vld [vmem:[#allocation10 + $0x1b78] sm:$0xff] }
 0x55a   :  { %v11990_v1 = vcombine.high %v8610_v51, %v8614_v35  ;;  %v11989_v31 = vcombine.low %v8610_v51, %v8614_v35 }
 0x55b   :  { %8508 = vmatpush1.bf16.msra.mxu1 %v11911_v28  ;;  %8549 = vmatpush1.bf16.msra.mxu0 %v11913_v22  ;;  %v8601_v28 = vld [vmem:[#allocation10 + $0x1a80] sm:$0xff] }
 0x55c   :  { %8509 = vmatprep.subr.bf16.mxu1 %v11904_v41  ;;  %8550 = vmatprep.subr.bf16.mxu0 %v11906_v54  ;;  %v8605_v22 = vld [vmem:[#allocation10 + $0x1aa0] sm:$0xff]  ;;  %v8602_v41 = vld [vmem:[#allocation10 + $0x1a88] sm:$0xff] }
 0x55d   :  { %v8606_v54 = vld [vmem:[#allocation10 + $0x1aa8] sm:$0xff]  ;;  %v11980_v3 = vcombine.high %v8601_v28, %v8605_v22  ;;  %v11979_v58 = vcombine.low %v8601_v28, %v8605_v22 }
 0x55e   :  { %v11982_v40 = vcombine.high %v8602_v41, %v8606_v54  ;;  %v11981_v25 = vcombine.low %v8602_v41, %v8606_v54  ;;  %v8619_v41 = vld [vmem:[#allocation10 + $0x1b10] sm:$0xff] }
 0x55f   :  { %8510 = vmatpush1.bf16.msra.mxu1 %v11903_v10  ;;  %8551 = vmatpush1.bf16.msra.mxu0 %v11905_v36  ;;  %v8593_v10 = vld [vmem:[#allocation10 + $0x1a40] sm:$0xff] }
 0x560   :  { %8985 = vmatprep.subr.bf16.mxu1 %v12020_v15  ;;  %9026 = vmatprep.subr.bf16.mxu0 %v12022_v53  ;;  %v8597_v36 = vld [vmem:[#allocation10 + $0x1a60] sm:$0xff]  ;;  %v8594_v15 = vld [vmem:[#allocation10 + $0x1a48] sm:$0xff] }
 0x561   :  { %v8598_v53 = vld [vmem:[#allocation10 + $0x1a68] sm:$0xff]  ;;  %v11972_v63 = vcombine.high %v8593_v10, %v8597_v36  ;;  %v11971_v24 = vcombine.low %v8593_v10, %v8597_v36 }
 0x562   :  { %v6813_v32 = vpop.f32.mrf.mxu1  ;;  %v6854_v44 = vpop.f32.mrf.mxu0  ;;  %8528 = vmatmul.mubr.bf16.vlgmr.msra.gmra.mxu1 %v13650_v18  ;;  %8569 = vmatmul.mubr.bf16.vlgmr.msra.gmra.mxu0 %v13650_v18  ;;  %v11974_v12 = vcombine.high %v8594_v15, %v8598_v53  ;;  %v11973_v13 = vcombine.low %v8594_v15, %v8598_v53 }
 0x563   :  { %v13671_v6 = vadd.f32 %v6813_v32, %v13635_v39  ;;  %v13674_v29 = vadd.f32 %v6854_v44, %v13638_v55  ;;  %8986 = vmatpush1.bf16.msra.mxu1 %v12019_v49  ;;  %9027 = vmatpush1.bf16.msra.mxu0 %v12021_v50  ;;  %v8621_v39 = vld [vmem:[#allocation10 + $0x1b20] sm:$0xff]  ;;  %v8622_v55 = vld [vmem:[#allocation10 + $0x1b28] sm:$0xff]  ;;  %v8643_v32 = vld [vmem:[#allocation10 + $0x1bd0] sm:$0xff] }
 0x564   :  { %v6815_v59 = vpop.f32.mrf.mxu1  ;;  %v6856_v26 = vpop.f32.mrf.mxu0  ;;  %8987 = vmatprep.subr.bf16.mxu1 %v12012_v21  ;;  %9028 = vmatprep.subr.bf16.mxu0 %v12014_v57  ;;  %v11995_v17 = vcombine.low %v8617_v4, %v8621_v39  ;;  %v11997_v47 = vcombine.low %v8618_v23, %v8622_v55  ;;  %v8585_v49 = vld [vmem:[#allocation10 + $0x1a00] sm:$0xff]  ;;  %v8586_v21 = vld [vmem:[#allocation10 + $0x1a08] sm:$0xff]  ;;  %v8647_v44 = vld [vmem:[#allocation10 + $0x1bf0] sm:$0xff] }
 0x565   :  { %v13677_v38 = vadd.f32 %v6815_v59, %v13641_v37  ;;  %v13680_v18 = vadd.f32 %v6856_v26, %v13644_v27  ;;  %9017 = vmatprep.mubr.bf16.mxu1 %v12650_v42  ;;  %9058 = vmatprep.mubr.bf16.mxu0 %v12650_v42  ;;  %v11996_v37 = vcombine.high %v8617_v4, %v8621_v39  ;;  %v8589_v50 = vld [vmem:[#allocation10 + $0x1a20] sm:$0xff]  ;;  %v8590_v57 = vld [vmem:[#allocation10 + $0x1a28] sm:$0xff]  ;;  %v8635_v4 = vld [vmem:[#allocation10 + $0x1b90] sm:$0xff] }
 0x566   :  { %v6817_v2 = vpop.f32.mrf.mxu1  ;;  %v6858_v16 = vpop.f32.mrf.mxu0  ;;  %v11998_v27 = vcombine.high %v8618_v23, %v8622_v55  ;;  %v11964_v48 = vcombine.high %v8585_v49, %v8589_v50  ;;  %v11966_v9 = vcombine.high %v8586_v21, %v8590_v57  ;;  %v11963_v59 = vcombine.low %v8585_v49, %v8589_v50  ;;  %v8639_v39 = vld [vmem:[#allocation10 + $0x1bb0] sm:$0xff]  ;;  %v8636_v23 = vld [vmem:[#allocation10 + $0x1b98] sm:$0xff] }
 0x567   :  { %8988 = vmatpush1.bf16.msra.mxu1 %v12011_v46  ;;  %9029 = vmatpush1.bf16.msra.mxu0 %v12013_v20  ;;  %v8644_v46 = vld [vmem:[#allocation10 + $0x1bd8] sm:$0xff]  ;;  %v11965_v26 = vcombine.low %v8586_v21, %v8590_v57  ;;  %v12023_v2 = vcombine.low %v8643_v32, %v8647_v44  ;;  %v12015_v35 = vcombine.low %v8635_v4, %v8639_v39 }
 0x568   :  { %v6818_v45 = vpop.f32.mrf.mxu1  ;;  %v6859_v11 = vpop.f32.mrf.mxu0  ;;  %8989 = vmatprep.subr.bf16.mxu1 %v12004_v5  ;;  %9030 = vmatprep.subr.bf16.mxu0 %v12006_v34  ;;  %v8648_v20 = vld [vmem:[#allocation10 + $0x1bf8] sm:$0xff]  ;;  %v12024_v5 = vcombine.high %v8643_v32, %v8647_v44 }
 0x569   :  { %v12026_v34 = vcombine.high %v8644_v46, %v8648_v20  ;;  %v8640_v55 = vld [vmem:[#allocation10 + $0x1bb8] sm:$0xff]  ;;  %v12025_v16 = vcombine.low %v8644_v46, %v8648_v20  ;;  %v8627_v11 = vld [vmem:[#allocation10 + $0x1b50] sm:$0xff] }
 0x56a   :  { %v12018_v45 = vcombine.high %v8636_v23, %v8640_v55 }
 0x56b   :  { %8990 = vmatpush1.bf16.msra.mxu1 %v12003_v14  ;;  %9031 = vmatpush1.bf16.msra.mxu0 %v12005_v61  ;;  %v13686_v14 = vpack.c.b16 %v13276_v56, %v13276_v56  ;;  %v12016_v61 = vcombine.high %v8635_v4, %v8639_v39 }
 0x56c   :  { %8991 = vmatprep.subr.bf16.mxu1 %v11996_v37  ;;  %9032 = vmatprep.subr.bf16.mxu0 %v11998_v27  ;;  %v8631_v37 = vld [vmem:[#allocation10 + $0x1b70] sm:$0xff]  ;;  %v8628_v27 = vld [vmem:[#allocation10 + $0x1b58] sm:$0xff] }
 0x56d   :  { %v12008_v28 = vcombine.high %v8627_v11, %v8631_v37  ;;  %v12010_v22 = vcombine.high %v8628_v27, %v8632_v52  ;;  %v12007_v10 = vcombine.low %v8627_v11, %v8631_v37  ;;  %v12009_v36 = vcombine.low %v8628_v27, %v8632_v52 }
 0x56f   :  { %8992 = vmatpush1.bf16.msra.mxu1 %v11995_v17  ;;  %9033 = vmatpush1.bf16.msra.mxu0 %v11997_v47  ;;  %v12017_v47 = vcombine.low %v8636_v23, %v8640_v55 }
 0x570   :  { %8993 = vmatprep.subr.bf16.mxu1 %v11988_v43  ;;  %9034 = vmatprep.subr.bf16.mxu0 %v11990_v1 }
 0x573   :  { %8994 = vmatpush1.bf16.msra.mxu1 %v11987_v62  ;;  %9035 = vmatpush1.bf16.msra.mxu0 %v11989_v31  ;;  %v8620_v31 = vld [vmem:[#allocation10 + $0x1b18] sm:$0xff] }
 0x574   :  { %8995 = vmatprep.subr.bf16.mxu1 %v11980_v3  ;;  %9036 = vmatprep.subr.bf16.mxu0 %v11982_v40 }
 0x577   :  { %8996 = vmatpush1.bf16.msra.mxu1 %v11979_v58  ;;  %9037 = vmatpush1.bf16.msra.mxu0 %v11981_v25  ;;  %v8611_v58 = vld [vmem:[#allocation10 + $0x1ad0] sm:$0xff] }
 0x578   :  { %8997 = vmatprep.subr.bf16.mxu1 %v11972_v63  ;;  %9038 = vmatprep.subr.bf16.mxu0 %v11974_v12  ;;  %v8615_v25 = vld [vmem:[#allocation10 + $0x1af0] sm:$0xff]  ;;  %v8612_v63 = vld [vmem:[#allocation10 + $0x1ad8] sm:$0xff] }
 0x579   :  { %v8616_v12 = vld [vmem:[#allocation10 + $0x1af8] sm:$0xff]  ;;  %v11992_v21 = vcombine.high %v8611_v58, %v8615_v25  ;;  %v11991_v32 = vcombine.low %v8611_v58, %v8615_v25 }
 0x57a   :  { %v11994_v57 = vcombine.high %v8612_v63, %v8616_v12  ;;  %v11993_v44 = vcombine.low %v8612_v63, %v8616_v12 }
 0x57b   :  { %8998 = vmatpush1.bf16.msra.mxu1 %v11971_v24  ;;  %9039 = vmatpush1.bf16.msra.mxu0 %v11973_v13  ;;  %v8603_v24 = vld [vmem:[#allocation10 + $0x1a90] sm:$0xff] }
 0x57c   :  { %8999 = vmatprep.subr.bf16.mxu1 %v11964_v48  ;;  %9040 = vmatprep.subr.bf16.mxu0 %v11966_v9  ;;  %v8607_v13 = vld [vmem:[#allocation10 + $0x1ab0] sm:$0xff]  ;;  %v8604_v48 = vld [vmem:[#allocation10 + $0x1a98] sm:$0xff] }
 0x57d   :  { %v8608_v9 = vld [vmem:[#allocation10 + $0x1ab8] sm:$0xff]  ;;  %v11984_v46 = vcombine.high %v8603_v24, %v8607_v13  ;;  %v11983_v4 = vcombine.low %v8603_v24, %v8607_v13 }
 0x57e   :  { %v11986_v20 = vcombine.high %v8604_v48, %v8608_v9  ;;  %v11985_v39 = vcombine.low %v8604_v48, %v8608_v9  ;;  %v9189_v48 = vld [vmem:[#allocation10 + $0x1d00] sm:$0xff] }
 0x57f   :  { %9000 = vmatpush1.bf16.msra.mxu1 %v11963_v59  ;;  %9041 = vmatpush1.bf16.msra.mxu0 %v11965_v26  ;;  %v8595_v59 = vld [vmem:[#allocation10 + $0x1a50] sm:$0xff] }
 0x580   :  { %9067 = vmatprep.subr.bf16.mxu1 %v12024_v5  ;;  %9108 = vmatprep.subr.bf16.mxu0 %v12026_v34  ;;  %v8599_v26 = vld [vmem:[#allocation10 + $0x1a70] sm:$0xff]  ;;  %v8596_v5 = vld [vmem:[#allocation10 + $0x1a58] sm:$0xff] }
 0x581   :  { %v8600_v34 = vld [vmem:[#allocation10 + $0x1a78] sm:$0xff]  ;;  %v11976_v23 = vcombine.high %v8595_v59, %v8599_v26  ;;  %v11975_v11 = vcombine.low %v8595_v59, %v8599_v26 }
 0x582   :  { %v7303_v33 = vpop.f32.mrf.mxu1  ;;  %v7344_v51 = vpop.f32.mrf.mxu0  ;;  %9018 = vmatmul.mubr.bf16.vlgmr.msra.gmra.mxu1 %v13686_v14  ;;  %9059 = vmatmul.mubr.bf16.vlgmr.msra.gmra.mxu0 %v13686_v14  ;;  %v11978_v55 = vcombine.high %v8596_v5, %v8600_v34  ;;  %v11977_v37 = vcombine.low %v8596_v5, %v8600_v34  ;;  %v9181_v34 = vld [vmem:[#allocation10 + $0x1cc0] sm:$0xff] }
 0x583   :  { %v13691_v17 = vadd.f32 %v7303_v33, %v13655_v60  ;;  %v13694_v56 = vadd.f32 %v7344_v51, %v13658_v0  ;;  %9068 = vmatpush1.bf16.msra.mxu1 %v12023_v2  ;;  %9109 = vmatpush1.bf16.msra.mxu0 %v12025_v16  ;;  %v8623_v60 = vld [vmem:[#allocation10 + $0x1b30] sm:$0xff]  ;;  %v8624_v0 = vld [vmem:[#allocation10 + $0x1b38] sm:$0xff]  ;;  %v9213_v33 = vld [vmem:[#allocation10 + $0x1dc0] sm:$0xff] }
 0x584   :  { %v7305_v43 = vpop.f32.mrf.mxu1  ;;  %v7346_v1 = vpop.f32.mrf.mxu0  ;;  %9069 = vmatprep.subr.bf16.mxu1 %v12016_v61  ;;  %9110 = vmatprep.subr.bf16.mxu0 %v12018_v45  ;;  %v11999_v49 = vcombine.low %v8619_v41, %v8623_v60  ;;  %v12001_v50 = vcombine.low %v8620_v31, %v8624_v0  ;;  %v8587_v2 = vld [vmem:[#allocation10 + $0x1a10] sm:$0xff]  ;;  %v8588_v61 = vld [vmem:[#allocation10 + $0x1a18] sm:$0xff]  ;;  %v9217_v51 = vld [vmem:[#allocation10 + $0x1de0] sm:$0xff] }
 0x585   :  { %v13697_v54 = vadd.f32 %v7305_v43, %v13661_v8  ;;  %v13700_v62 = vadd.f32 %v7346_v1, %v13664_v19  ;;  %9099 = vmatprep.mubr.bf16.mxu1 %v12650_v42  ;;  %9140 = vmatprep.mubr.bf16.mxu0 %v12650_v42  ;;  %v12000_v8 = vcombine.high %v8619_v41, %v8623_v60  ;;  %v8591_v16 = vld [vmem:[#allocation10 + $0x1a30] sm:$0xff]  ;;  %v8592_v45 = vld [vmem:[#allocation10 + $0x1a38] sm:$0xff]  ;;  %v9205_v41 = vld [vmem:[#allocation10 + $0x1d80] sm:$0xff] }
 0x586   :  { %v7307_v3 = vpop.f32.mrf.mxu1  ;;  %v7348_v40 = vpop.f32.mrf.mxu0  ;;  %v12002_v19 = vcombine.high %v8620_v31, %v8624_v0  ;;  %v11968_v27 = vcombine.high %v8587_v2, %v8591_v16  ;;  %v11970_v52 = vcombine.high %v8588_v61, %v8592_v45  ;;  %v11967_v43 = vcombine.low %v8587_v2, %v8591_v16  ;;  %v9209_v60 = vld [vmem:[#allocation10 + $0x1da0] sm:$0xff]  ;;  %v9206_v31 = vld [vmem:[#allocation10 + $0x1d88] sm:$0xff] }
 0x587   :  { %9070 = vmatpush1.bf16.msra.mxu1 %v12015_v35  ;;  %9111 = vmatpush1.bf16.msra.mxu0 %v12017_v47  ;;  %v9214_v35 = vld [vmem:[#allocation10 + $0x1dc8] sm:$0xff]  ;;  %v11969_v1 = vcombine.low %v8588_v61, %v8592_v45  ;;  %v12083_v3 = vcombine.low %v9213_v33, %v9217_v51  ;;  %v12075_v63 = vcombine.low %v9205_v41, %v9209_v60  ;;  %v9173_v45 = vld [vmem:[#allocation10 + $0x1c80] sm:$0xff] }
 0x588   :  { %v7308_v15 = vpop.f32.mrf.mxu1  ;;  %v7349_v53 = vpop.f32.mrf.mxu0  ;;  %9071 = vmatprep.subr.bf16.mxu1 %v12008_v28  ;;  %9112 = vmatprep.subr.bf16.mxu0 %v12010_v22  ;;  %v9218_v47 = vld [vmem:[#allocation10 + $0x1de8] sm:$0xff]  ;;  %v12084_v28 = vcombine.high %v9213_v33, %v9217_v51 }
 0x589   :  { %v12086_v22 = vcombine.high %v9214_v35, %v9218_v47  ;;  %v9210_v0 = vld [vmem:[#allocation10 + $0x1da8] sm:$0xff]  ;;  %v12085_v40 = vcombine.low %v9214_v35, %v9218_v47  ;;  %v9197_v15 = vld [vmem:[#allocation10 + $0x1d40] sm:$0xff] }
 0x58a   :  { %v9201_v53 = vld [vmem:[#allocation10 + $0x1d60] sm:$0xff] }
 0x58b   :  { %9072 = vmatpush1.bf16.msra.mxu1 %v12007_v10  ;;  %9113 = vmatpush1.bf16.msra.mxu0 %v12009_v36  ;;  %v12076_v10 = vcombine.high %v9205_v41, %v9209_v60  ;;  %v12078_v36 = vcombine.high %v9206_v31, %v9210_v0  ;;  %v12068_v24 = vcombine.high %v9197_v15, %v9201_v53  ;;  %v9165_v47 = vld [vmem:[#allocation10 + $0x1c40] sm:$0xff] }
 0x58c   :  { %9073 = vmatprep.subr.bf16.mxu1 %v12000_v8  ;;  %9114 = vmatprep.subr.bf16.mxu0 %v12002_v19  ;;  %v9198_v8 = vld [vmem:[#allocation10 + $0x1d48] sm:$0xff] }
 0x58d   :  { %v9202_v19 = vld [vmem:[#allocation10 + $0x1d68] sm:$0xff] }
 0x58e   :  { %v12070_v13 = vcombine.high %v9198_v8, %v9202_v19  ;;  %v12069_v59 = vcombine.low %v9198_v8, %v9202_v19  ;;  %v9215_v19 = vld [vmem:[#allocation10 + $0x1dd0] sm:$0xff] }
 0x58f   :  { %9074 = vmatpush1.bf16.msra.mxu1 %v11999_v49  ;;  %9115 = vmatpush1.bf16.msra.mxu0 %v12001_v50  ;;  %v12077_v50 = vcombine.low %v9206_v31, %v9210_v0  ;;  %v9157_v0 = vld [vmem:[#allocation10 + $0x1c00] sm:$0xff] }
 0x590   :  { %9075 = vmatprep.subr.bf16.mxu1 %v11992_v21  ;;  %9116 = vmatprep.subr.bf16.mxu0 %v11994_v57 }
 0x593   :  { %9076 = vmatpush1.bf16.msra.mxu1 %v11991_v32  ;;  %9117 = vmatpush1.bf16.msra.mxu0 %v11993_v44  ;;  %v9190_v32 = vld [vmem:[#allocation10 + $0x1d08] sm:$0xff] }
 0x594   :  { %9077 = vmatprep.subr.bf16.mxu1 %v11984_v46  ;;  %9118 = vmatprep.subr.bf16.mxu0 %v11986_v20  ;;  %v12067_v20 = vcombine.low %v9197_v15, %v9201_v53 }
 0x597   :  { %9078 = vmatpush1.bf16.msra.mxu1 %v11983_v4  ;;  %9119 = vmatpush1.bf16.msra.mxu0 %v11985_v39  ;;  %v9185_v4 = vld [vmem:[#allocation10 + $0x1ce0] sm:$0xff]  ;;  %v9182_v39 = vld [vmem:[#allocation10 + $0x1cc8] sm:$0xff] }
 0x598   :  { %9079 = vmatprep.subr.bf16.mxu1 %v11976_v23  ;;  %9120 = vmatprep.subr.bf16.mxu0 %v11978_v55  ;;  %v9186_v23 = vld [vmem:[#allocation10 + $0x1ce8] sm:$0xff]  ;;  %v12052_v16 = vcombine.high %v9181_v34, %v9185_v4 }
 0x599   :  { %v12054_v61 = vcombine.high %v9182_v39, %v9186_v23  ;;  %v12053_v33 = vcombine.low %v9182_v39, %v9186_v23 }
 0x59b   :  { %9080 = vmatpush1.bf16.msra.mxu1 %v11975_v11  ;;  %9121 = vmatpush1.bf16.msra.mxu0 %v11977_v37  ;;  %v9177_v11 = vld [vmem:[#allocation10 + $0x1ca0] sm:$0xff]  ;;  %v9174_v37 = vld [vmem:[#allocation10 + $0x1c88] sm:$0xff] }
 0x59c   :  { %9081 = vmatprep.subr.bf16.mxu1 %v11968_v27  ;;  %9122 = vmatprep.subr.bf16.mxu0 %v11970_v52  ;;  %v9178_v27 = vld [vmem:[#allocation10 + $0x1ca8] sm:$0xff]  ;;  %v12051_v52 = vcombine.low %v9181_v34, %v9185_v4  ;;  %v12044_v51 = vcombine.high %v9173_v45, %v9177_v11 }
 0x59d   :  { %v12046_v35 = vcombine.high %v9174_v37, %v9178_v27  ;;  %v12045_v41 = vcombine.low %v9174_v37, %v9178_v27 }
 0x59f   :  { %9082 = vmatpush1.bf16.msra.mxu1 %v11967_v43  ;;  %9123 = vmatpush1.bf16.msra.mxu0 %v11969_v1  ;;  %v9169_v43 = vld [vmem:[#allocation10 + $0x1c60] sm:$0xff]  ;;  %v9166_v1 = vld [vmem:[#allocation10 + $0x1c48] sm:$0xff] }
 0x5a0   :  { %9557 = vmatprep.subr.bf16.mxu1 %v12084_v28  ;;  %9598 = vmatprep.subr.bf16.mxu0 %v12086_v22  ;;  %v9170_v28 = vld [vmem:[#allocation10 + $0x1c68] sm:$0xff]  ;;  %v12043_v22 = vcombine.low %v9173_v45, %v9177_v11  ;;  %v12036_v60 = vcombine.high %v9165_v47, %v9169_v43  ;;  %v9191_v11 = vld [vmem:[#allocation10 + $0x1d10] sm:$0xff] }
 0x5a1   :  { %v12038_v31 = vcombine.high %v9166_v1, %v9170_v28  ;;  %v12037_v15 = vcombine.low %v9166_v1, %v9170_v28  ;;  %v9183_v28 = vld [vmem:[#allocation10 + $0x1cd0] sm:$0xff] }
 0x5a2   :  { %v7385_v58 = vpop.f32.mrf.mxu1  ;;  %v7426_v25 = vpop.f32.mrf.mxu0  ;;  %9100 = vmatmul.mubr.bf16.vlgmr.msra.gmra.mxu1 %v13686_v14  ;;  %9141 = vmatmul.mubr.bf16.vlgmr.msra.gmra.mxu0 %v13686_v14 }
 0x5a3   :  { %v13707_v12 = vadd.f32 %v7385_v58, %v13671_v6  ;;  %v13710_v49 = vadd.f32 %v7426_v25, %v13674_v29  ;;  %9558 = vmatpush1.bf16.msra.mxu1 %v12083_v3  ;;  %9599 = vmatpush1.bf16.msra.mxu0 %v12085_v40  ;;  %v9193_v6 = vld [vmem:[#allocation10 + $0x1d20] sm:$0xff]  ;;  %v9194_v29 = vld [vmem:[#allocation10 + $0x1d28] sm:$0xff]  ;;  %v9219_v58 = vld [vmem:[#allocation10 + $0x1df0] sm:$0xff] }
 0x5a4   :  { %v7387_v21 = vpop.f32.mrf.mxu1  ;;  %v7428_v57 = vpop.f32.mrf.mxu0  ;;  %9559 = vmatprep.subr.bf16.mxu1 %v12076_v10  ;;  %9600 = vmatprep.subr.bf16.mxu0 %v12078_v36  ;;  %v12059_v55 = vcombine.low %v9189_v48, %v9193_v6  ;;  %v12061_v2 = vcombine.low %v9190_v32, %v9194_v29  ;;  %v9161_v3 = vld [vmem:[#allocation10 + $0x1c20] sm:$0xff]  ;;  %v9158_v40 = vld [vmem:[#allocation10 + $0x1c08] sm:$0xff]  ;;  %v12035_v36 = vcombine.low %v9165_v47, %v9169_v43  ;;  %v9216_v25 = vld [vmem:[#allocation10 + $0x1dd8] sm:$0xff] }
 0x5a5   :  { %v13713_v9 = vadd.f32 %v7387_v21, %v13677_v38  ;;  %v13716_v14 = vadd.f32 %v7428_v57, %v13680_v18  ;;  %9589 = vmatprep.mubr.bf16.mxu1 %v12650_v42  ;;  %9630 = vmatprep.mubr.bf16.mxu0 %v12650_v42  ;;  %v12060_v38 = vcombine.high %v9189_v48, %v9193_v6  ;;  %v9162_v10 = vld [vmem:[#allocation10 + $0x1c28] sm:$0xff]  ;;  %v9211_v48 = vld [vmem:[#allocation10 + $0x1db0] sm:$0xff]  ;;  %v9208_v6 = vld [vmem:[#allocation10 + $0x1d98] sm:$0xff] }
 0x5a6   :  { %v7389_v44 = vpop.f32.mrf.mxu1  ;;  %v7430_v46 = vpop.f32.mrf.mxu0  ;;  %v12062_v18 = vcombine.high %v9190_v32, %v9194_v29  ;;  %v12028_v53 = vcombine.high %v9157_v0, %v9161_v3  ;;  %v12030_v8 = vcombine.high %v9158_v40, %v9162_v10  ;;  %v12029_v21 = vcombine.low %v9158_v40, %v9162_v10  ;;  %v9212_v32 = vld [vmem:[#allocation10 + $0x1db8] sm:$0xff]  ;;  %v9175_v10 = vld [vmem:[#allocation10 + $0x1c90] sm:$0xff] }
 0x5a7   :  { %9560 = vmatpush1.bf16.msra.mxu1 %v12075_v63  ;;  %9601 = vmatpush1.bf16.msra.mxu0 %v12077_v50  ;;  %v9220_v63 = vld [vmem:[#allocation10 + $0x1df8] sm:$0xff]  ;;  %v12027_v50 = vcombine.low %v9157_v0, %v9161_v3  ;;  %v12088_v57 = vcombine.high %v9215_v19, %v9219_v58  ;;  %v12087_v29 = vcombine.low %v9215_v19, %v9219_v58 }
 0x5a8   :  { %v7390_v26 = vpop.f32.mrf.mxu1  ;;  %v7431_v5 = vpop.f32.mrf.mxu0  ;;  %9561 = vmatprep.subr.bf16.mxu1 %v12068_v24  ;;  %9602 = vmatprep.subr.bf16.mxu0 %v12070_v13  ;;  %v12090_v24 = vcombine.high %v9216_v25, %v9220_v63  ;;  %v9207_v13 = vld [vmem:[#allocation10 + $0x1d90] sm:$0xff]  ;;  %v12089_v44 = vcombine.low %v9216_v25, %v9220_v63  ;;  %v13722_v46 = vpack.c.b16 %v13293_v30, %v13293_v30 }
 0x5a9   :  { %v9199_v26 = vld [vmem:[#allocation10 + $0x1d50] sm:$0xff]  ;;  %v12079_v39 = vcombine.low %v9207_v13, %v9211_v48 }
 0x5aa   :  { %v9203_v5 = vld [vmem:[#allocation10 + $0x1d70] sm:$0xff] }
 0x5ab   :  { %9562 = vmatpush1.bf16.msra.mxu1 %v12067_v20  ;;  %9603 = vmatpush1.bf16.msra.mxu0 %v12069_v59  ;;  %v12080_v20 = vcombine.high %v9207_v13, %v9211_v48  ;;  %v12082_v59 = vcombine.high %v9208_v6, %v9212_v32  ;;  %v9167_v63 = vld [vmem:[#allocation10 + $0x1c50] sm:$0xff] }
 0x5ac   :  { %9563 = vmatprep.subr.bf16.mxu1 %v12060_v38  ;;  %9604 = vmatprep.subr.bf16.mxu0 %v12062_v18  ;;  %v9200_v38 = vld [vmem:[#allocation10 + $0x1d58] sm:$0xff] }
 0x5ad   :  { %v9204_v18 = vld [vmem:[#allocation10 + $0x1d78] sm:$0xff] }
 0x5ae   :  { %v12074_v45 = vcombine.high %v9200_v38, %v9204_v18  ;;  %v12073_v47 = vcombine.low %v9200_v38, %v9204_v18  ;;  %v9785_v18 = vld [vmem:[#allocation10 + $0x1fc0] sm:$0xff] }
 0x5af   :  { %9564 = vmatpush1.bf16.msra.mxu1 %v12059_v55  ;;  %9605 = vmatpush1.bf16.msra.mxu0 %v12061_v2  ;;  %v12081_v55 = vcombine.low %v9208_v6, %v9212_v32  ;;  %v9159_v32 = vld [vmem:[#allocation10 + $0x1c10] sm:$0xff] }
 0x5b0   :  { %9565 = vmatprep.subr.bf16.mxu1 %v12052_v16  ;;  %9606 = vmatprep.subr.bf16.mxu0 %v12054_v61  ;;  %v12072_v61 = vcombine.high %v9199_v26, %v9203_v5 }
 0x5b3   :  { %9566 = vmatpush1.bf16.msra.mxu1 %v12051_v52  ;;  %9607 = vmatpush1.bf16.msra.mxu0 %v12053_v33  ;;  %v9192_v52 = vld [vmem:[#allocation10 + $0x1d18] sm:$0xff] }
 0x5b4   :  { %9567 = vmatprep.subr.bf16.mxu1 %v12044_v51  ;;  %9608 = vmatprep.subr.bf16.mxu0 %v12046_v35  ;;  %v12071_v35 = vcombine.low %v9199_v26, %v9203_v5 }
 0x5b7   :  { %9568 = vmatpush1.bf16.msra.mxu1 %v12043_v22  ;;  %9609 = vmatpush1.bf16.msra.mxu0 %v12045_v41  ;;  %v9187_v22 = vld [vmem:[#allocation10 + $0x1cf0] sm:$0xff]  ;;  %v9184_v41 = vld [vmem:[#allocation10 + $0x1cd8] sm:$0xff] }
 0x5b8   :  { %9569 = vmatprep.subr.bf16.mxu1 %v12036_v60  ;;  %9610 = vmatprep.subr.bf16.mxu0 %v12038_v31  ;;  %v9188_v60 = vld [vmem:[#allocation10 + $0x1cf8] sm:$0xff]  ;;  %v12056_v3 = vcombine.high %v9183_v28, %v9187_v22 }
 0x5b9   :  { %v12058_v40 = vcombine.high %v9184_v41, %v9188_v60  ;;  %v12057_v19 = vcombine.low %v9184_v41, %v9188_v60 }
 0x5bb   :  { %9570 = vmatpush1.bf16.msra.mxu1 %v12035_v36  ;;  %9611 = vmatpush1.bf16.msra.mxu0 %v12037_v15  ;;  %v9179_v36 = vld [vmem:[#allocation10 + $0x1cb0] sm:$0xff]  ;;  %v9176_v15 = vld [vmem:[#allocation10 + $0x1c98] sm:$0xff] }
 0x5bc   :  { %9571 = vmatprep.subr.bf16.mxu1 %v12028_v53  ;;  %9612 = vmatprep.subr.bf16.mxu0 %v12030_v8  ;;  %v9180_v53 = vld [vmem:[#allocation10 + $0x1cb8] sm:$0xff]  ;;  %v12055_v8 = vcombine.low %v9183_v28, %v9187_v22  ;;  %v12048_v58 = vcombine.high %v9175_v10, %v9179_v36 }
 0x5bd   :  { %v12050_v25 = vcombine.high %v9176_v15, %v9180_v53  ;;  %v12049_v13 = vcombine.low %v9176_v15, %v9180_v53  ;;  %v9762_v53 = vld [vmem:[#allocation10 + $0x1f08] sm:$0xff] }
 0x5bf   :  { %9572 = vmatpush1.bf16.msra.mxu1 %v12027_v50  ;;  %9613 = vmatpush1.bf16.msra.mxu0 %v12029_v21  ;;  %v9171_v50 = vld [vmem:[#allocation10 + $0x1c70] sm:$0xff]  ;;  %v9168_v21 = vld [vmem:[#allocation10 + $0x1c58] sm:$0xff] }
 0x5c0   :  { %9639 = vmatprep.subr.bf16.mxu1 %v12088_v57  ;;  %9680 = vmatprep.subr.bf16.mxu0 %v12090_v24  ;;  %v9172_v57 = vld [vmem:[#allocation10 + $0x1c78] sm:$0xff]  ;;  %v12047_v24 = vcombine.low %v9175_v10, %v9179_v36  ;;  %v12040_v48 = vcombine.high %v9167_v63, %v9171_v50  ;;  %v9761_v36 = vld [vmem:[#allocation10 + $0x1f00] sm:$0xff] }
 0x5c1   :  { %v12042_v6 = vcombine.high %v9168_v21, %v9172_v57  ;;  %v12041_v26 = vcombine.low %v9168_v21, %v9172_v57  ;;  %v9753_v21 = vld [vmem:[#allocation10 + $0x1ec0] sm:$0xff] }
 0x5c2   :  { %v7875_v34 = vpop.f32.mrf.mxu1  ;;  %v7916_v4 = vpop.f32.mrf.mxu0  ;;  %9590 = vmatmul.mubr.bf16.vlgmr.msra.gmra.mxu1 %v13722_v46  ;;  %9631 = vmatmul.mubr.bf16.vlgmr.msra.gmra.mxu0 %v13722_v46  ;;  %v9757_v57 = vld [vmem:[#allocation10 + $0x1ee0] sm:$0xff] }
 0x5c3   :  { %v13727_v23 = vadd.f32 %v7875_v34, %v13691_v17  ;;  %v13730_v30 = vadd.f32 %v7916_v4, %v13694_v56  ;;  %9640 = vmatpush1.bf16.msra.mxu1 %v12087_v29  ;;  %9681 = vmatpush1.bf16.msra.mxu0 %v12089_v44  ;;  %v9195_v17 = vld [vmem:[#allocation10 + $0x1d30] sm:$0xff]  ;;  %v9196_v56 = vld [vmem:[#allocation10 + $0x1d38] sm:$0xff]  ;;  %v9789_v34 = vld [vmem:[#allocation10 + $0x1fe0] sm:$0xff] }
 0x5c4   :  { %v7877_v2 = vpop.f32.mrf.mxu1  ;;  %v7918_v16 = vpop.f32.mrf.mxu0  ;;  %9641 = vmatprep.subr.bf16.mxu1 %v12080_v20  ;;  %9682 = vmatprep.subr.bf16.mxu0 %v12082_v59  ;;  %v12063_v31 = vcombine.low %v9191_v11, %v9195_v17  ;;  %v12065_v0 = vcombine.low %v9192_v52, %v9196_v56  ;;  %v9163_v29 = vld [vmem:[#allocation10 + $0x1c30] sm:$0xff]  ;;  %v9160_v44 = vld [vmem:[#allocation10 + $0x1c18] sm:$0xff]  ;;  %v12039_v59 = vcombine.low %v9167_v63, %v9171_v50  ;;  %v9786_v4 = vld [vmem:[#allocation10 + $0x1fc8] sm:$0xff] }
 0x5c5   :  { %v13733_v37 = vadd.f32 %v7877_v2, %v13697_v54  ;;  %v13736_v27 = vadd.f32 %v7918_v16, %v13700_v62  ;;  %9671 = vmatprep.mubr.bf16.mxu1 %v12650_v42  ;;  %9712 = vmatprep.mubr.bf16.mxu0 %v12650_v42  ;;  %v12064_v54 = vcombine.high %v9191_v11, %v9195_v17  ;;  %v9164_v20 = vld [vmem:[#allocation10 + $0x1c38] sm:$0xff]  ;;  %v9781_v11 = vld [vmem:[#allocation10 + $0x1fa0] sm:$0xff]  ;;  %v9778_v17 = vld [vmem:[#allocation10 + $0x1f88] sm:$0xff] }
 0x5c6   :  { %v7879_v33 = vpop.f32.mrf.mxu1  ;;  %v7920_v51 = vpop.f32.mrf.mxu0  ;;  %v12066_v62 = vcombine.high %v9192_v52, %v9196_v56  ;;  %v12032_v5 = vcombine.high %v9159_v32, %v9163_v29  ;;  %v12034_v38 = vcombine.high %v9160_v44, %v9164_v20  ;;  %v12033_v2 = vcombine.low %v9160_v44, %v9164_v20  ;;  %v9782_v52 = vld [vmem:[#allocation10 + $0x1fa8] sm:$0xff]  ;;  %v9745_v44 = vld [vmem:[#allocation10 + $0x1e80] sm:$0xff] }
 0x5c7   :  { %9642 = vmatpush1.bf16.msra.mxu1 %v12079_v39  ;;  %9683 = vmatpush1.bf16.msra.mxu0 %v12081_v55  ;;  %v9790_v39 = vld [vmem:[#allocation10 + $0x1fe8] sm:$0xff]  ;;  %v12031_v55 = vcombine.low %v9159_v32, %v9163_v29  ;;  %v12148_v16 = vcombine.high %v9785_v18, %v9789_v34  ;;  %v12147_v56 = vcombine.low %v9785_v18, %v9789_v34  ;;  %v9749_v20 = vld [vmem:[#allocation10 + $0x1ea0] sm:$0xff] }
 0x5c8   :  { %v7880_v43 = vpop.f32.mrf.mxu1  ;;  %v7921_v1 = vpop.f32.mrf.mxu0  ;;  %9643 = vmatprep.subr.bf16.mxu1 %v12072_v61  ;;  %9684 = vmatprep.subr.bf16.mxu0 %v12074_v45  ;;  %v12150_v61 = vcombine.high %v9786_v4, %v9790_v39  ;;  %v9777_v45 = vld [vmem:[#allocation10 + $0x1f80] sm:$0xff]  ;;  %v12149_v33 = vcombine.low %v9786_v4, %v9790_v39  ;;  %v12116_v32 = vcombine.high %v9753_v21, %v9757_v57 }
 0x5c9   :  { %v12140_v51 = vcombine.high %v9777_v45, %v9781_v11  ;;  %v9773_v43 = vld [vmem:[#allocation10 + $0x1f60] sm:$0xff]  ;;  %v9770_v1 = vld [vmem:[#allocation10 + $0x1f48] sm:$0xff]  ;;  %v12139_v22 = vcombine.low %v9777_v45, %v9781_v11  ;;  %v12108_v18 = vcombine.high %v9745_v44, %v9749_v20 }
 0x5ca   :  { %v9737_v4 = vld [vmem:[#allocation10 + $0x1e40] sm:$0xff] }
 0x5cb   :  { %9644 = vmatpush1.bf16.msra.mxu1 %v12071_v35  ;;  %9685 = vmatpush1.bf16.msra.mxu0 %v12073_v47  ;;  %v12142_v35 = vcombine.high %v9778_v17, %v9782_v52  ;;  %v9769_v47 = vld [vmem:[#allocation10 + $0x1f40] sm:$0xff] }
 0x5cc   :  { %9645 = vmatprep.subr.bf16.mxu1 %v12064_v54  ;;  %9686 = vmatprep.subr.bf16.mxu0 %v12066_v62  ;;  %v9774_v54 = vld [vmem:[#allocation10 + $0x1f68] sm:$0xff]  ;;  %v9741_v39 = vld [vmem:[#allocation10 + $0x1e60] sm:$0xff] }
 0x5cd   :  { %v12134_v10 = vcombine.high %v9770_v1, %v9774_v54  ;;  %v12100_v45 = vcombine.high %v9737_v4, %v9741_v39 }
 0x5cf   :  { %9646 = vmatpush1.bf16.msra.mxu1 %v12063_v31  ;;  %9687 = vmatpush1.bf16.msra.mxu0 %v12065_v0  ;;  %v12141_v31 = vcombine.low %v9778_v17, %v9782_v52  ;;  %v9729_v17 = vld [vmem:[#allocation10 + $0x1e00] sm:$0xff] }
 0x5d0   :  { %9647 = vmatprep.subr.bf16.mxu1 %v12056_v3  ;;  %9688 = vmatprep.subr.bf16.mxu0 %v12058_v40  ;;  %v12132_v40 = vcombine.high %v9769_v47, %v9773_v43  ;;  %v9733_v52 = vld [vmem:[#allocation10 + $0x1e20] sm:$0xff] }
 0x5d3   :  { %9648 = vmatpush1.bf16.msra.mxu1 %v12055_v8  ;;  %9689 = vmatpush1.bf16.msra.mxu0 %v12057_v19 }
 0x5d4   :  { %9649 = vmatprep.subr.bf16.mxu1 %v12048_v58  ;;  %9690 = vmatprep.subr.bf16.mxu0 %v12050_v25  ;;  %v12131_v58 = vcombine.low %v9769_v47, %v9773_v43  ;;  %v12133_v25 = vcombine.low %v9770_v1, %v9774_v54  ;;  %v12092_v47 = vcombine.high %v9729_v17, %v9733_v52  ;;  %v9787_v1 = vld [vmem:[#allocation10 + $0x1fd0] sm:$0xff] }
 0x5d5   :  { %v9791_v54 = vld [vmem:[#allocation10 + $0x1ff0] sm:$0xff] }
 0x5d7   :  { %9650 = vmatpush1.bf16.msra.mxu1 %v12047_v24  ;;  %9691 = vmatpush1.bf16.msra.mxu0 %v12049_v13  ;;  %v9754_v24 = vld [vmem:[#allocation10 + $0x1ec8] sm:$0xff] }
 0x5d8   :  { %9651 = vmatprep.subr.bf16.mxu1 %v12040_v48  ;;  %9692 = vmatprep.subr.bf16.mxu0 %v12042_v6  ;;  %v9758_v13 = vld [vmem:[#allocation10 + $0x1ee8] sm:$0xff] }
 0x5d9   :  { %v12118_v29 = vcombine.high %v9754_v24, %v9758_v13 }
 0x5db   :  { %9652 = vmatpush1.bf16.msra.mxu1 %v12039_v59  ;;  %9693 = vmatpush1.bf16.msra.mxu0 %v12041_v26  ;;  %v9746_v59 = vld [vmem:[#allocation10 + $0x1e88] sm:$0xff] }
 0x5dc   :  { %9653 = vmatprep.subr.bf16.mxu1 %v12032_v5  ;;  %9694 = vmatprep.subr.bf16.mxu0 %v12034_v38  ;;  %v9750_v26 = vld [vmem:[#allocation10 + $0x1ea8] sm:$0xff]  ;;  %v12115_v5 = vcombine.low %v9753_v21, %v9757_v57  ;;  %v12117_v38 = vcombine.low %v9754_v24, %v9758_v13 }
 0x5dd   :  { %v12110_v34 = vcombine.high %v9746_v59, %v9750_v26 }
 0x5df   :  { %9654 = vmatpush1.bf16.msra.mxu1 %v12031_v55  ;;  %9695 = vmatpush1.bf16.msra.mxu0 %v12033_v2  ;;  %v9738_v55 = vld [vmem:[#allocation10 + $0x1e48] sm:$0xff] }
 0x5e0   :  { %10129 = vmatprep.subr.bf16.mxu1 %v12148_v16  ;;  %10170 = vmatprep.subr.bf16.mxu0 %v12150_v61  ;;  %v9742_v2 = vld [vmem:[#allocation10 + $0x1e68] sm:$0xff]  ;;  %v12107_v16 = vcombine.low %v9745_v44, %v9749_v20  ;;  %v12109_v61 = vcombine.low %v9746_v59, %v9750_v26  ;;  %v9763_v44 = vld [vmem:[#allocation10 + $0x1f10] sm:$0xff]  ;;  %v9764_v26 = vld [vmem:[#allocation10 + $0x1f18] sm:$0xff] }
 0x5e1   :  { %v12102_v11 = vcombine.high %v9738_v55, %v9742_v2 }
 0x5e2   :  { %v7957_v62 = vpop.f32.mrf.mxu1  ;;  %v7998_v28 = vpop.f32.mrf.mxu0  ;;  %9672 = vmatmul.mubr.bf16.vlgmr.msra.gmra.mxu1 %v13722_v46  ;;  %9713 = vmatmul.mubr.bf16.vlgmr.msra.gmra.mxu0 %v13722_v46 }
 0x5e3   :  { %v13743_v41 = vadd.f32 %v7957_v62, %v13707_v12  ;;  %v13746_v60 = vadd.f32 %v7998_v28, %v13710_v49  ;;  %10130 = vmatpush1.bf16.msra.mxu1 %v12147_v56  ;;  %10171 = vmatpush1.bf16.msra.mxu0 %v12149_v33  ;;  %v9765_v12 = vld [vmem:[#allocation10 + $0x1f20] sm:$0xff]  ;;  %v9766_v49 = vld [vmem:[#allocation10 + $0x1f28] sm:$0xff]  ;;  %v9788_v62 = vld [vmem:[#allocation10 + $0x1fd8] sm:$0xff] }
 0x5e4   :  { %v7959_v0 = vpop.f32.mrf.mxu1  ;;  %v8000_v3 = vpop.f32.mrf.mxu0  ;;  %10131 = vmatprep.subr.bf16.mxu1 %v12140_v51  ;;  %10172 = vmatprep.subr.bf16.mxu0 %v12142_v35  ;;  %v12123_v48 = vcombine.low %v9761_v36, %v9765_v12  ;;  %v12125_v6 = vcombine.low %v9762_v53, %v9766_v49  ;;  %v9730_v56 = vld [vmem:[#allocation10 + $0x1e08] sm:$0xff]  ;;  %v12099_v51 = vcombine.low %v9737_v4, %v9741_v39  ;;  %v9792_v28 = vld [vmem:[#allocation10 + $0x1ff8] sm:$0xff] }
 0x5e5   :  { %v13749_v15 = vadd.f32 %v7959_v0, %v13713_v9  ;;  %v13752_v46 = vadd.f32 %v8000_v3, %v13716_v14  ;;  %10161 = vmatprep.mubr.bf16.mxu1 %v12650_v42  ;;  %10202 = vmatprep.mubr.bf16.mxu0 %v12650_v42  ;;  %v12124_v9 = vcombine.high %v9761_v36, %v9765_v12  ;;  %v9734_v33 = vld [vmem:[#allocation10 + $0x1e28] sm:$0xff]  ;;  %v9780_v36 = vld [vmem:[#allocation10 + $0x1f98] sm:$0xff] }
 0x5e6   :  { %v7961_v8 = vpop.f32.mrf.mxu1  ;;  %v8002_v19 = vpop.f32.mrf.mxu0  ;;  %v12126_v14 = vcombine.high %v9762_v53, %v9766_v49  ;;  %v12101_v35 = vcombine.low %v9738_v55, %v9742_v2  ;;  %v12094_v43 = vcombine.high %v9730_v56, %v9734_v33  ;;  %v12152_v0 = vcombine.high %v9787_v1, %v9791_v54  ;;  %v9784_v12 = vld [vmem:[#allocation10 + $0x1fb8] sm:$0xff]  ;;  %v9755_v55 = vld [vmem:[#allocation10 + $0x1ed0] sm:$0xff] }
 0x5e7   :  { %10132 = vmatpush1.bf16.msra.mxu1 %v12139_v22  ;;  %10173 = vmatpush1.bf16.msra.mxu0 %v12141_v31  ;;  %v12091_v22 = vcombine.low %v9729_v17, %v9733_v52  ;;  %v12093_v31 = vcombine.low %v9730_v56, %v9734_v33  ;;  %v12154_v3 = vcombine.high %v9788_v62, %v9792_v28  ;;  %v9759_v2 = vld [vmem:[#allocation10 + $0x1ef0] sm:$0xff]  ;;  %v9748_v33 = vld [vmem:[#allocation10 + $0x1e98] sm:$0xff] }
 0x5e8   :  { %v7962_v63 = vpop.f32.mrf.mxu1  ;;  %v8003_v50 = vpop.f32.mrf.mxu0  ;;  %10133 = vmatprep.subr.bf16.mxu1 %v12132_v40  ;;  %10174 = vmatprep.subr.bf16.mxu0 %v12134_v10  ;;  %v9779_v40 = vld [vmem:[#allocation10 + $0x1f90] sm:$0xff]  ;;  %v12151_v53 = vcombine.low %v9787_v1, %v9791_v54  ;;  %v12153_v49 = vcombine.low %v9788_v62, %v9792_v28  ;;  %v13758_v8 = vpack.c.b16 %v13306_v7, %v13306_v7  ;;  %v9740_v28 = vld [vmem:[#allocation10 + $0x1e58] sm:$0xff] }
 0x5e9   :  { %v9783_v10 = vld [vmem:[#allocation10 + $0x1fb0] sm:$0xff]  ;;  %v9772_v50 = vld [vmem:[#allocation10 + $0x1f58] sm:$0xff]  ;;  %v12145_v13 = vcombine.low %v9780_v36, %v9784_v12 }
 0x5ea   :  { %v12144_v19 = vcombine.high %v9779_v40, %v9783_v10  ;;  %v9775_v63 = vld [vmem:[#allocation10 + $0x1f70] sm:$0xff]  ;;  %v12143_v57 = vcombine.low %v9779_v40, %v9783_v10 }
 0x5eb   :  { %10134 = vmatpush1.bf16.msra.mxu1 %v12131_v58  ;;  %10175 = vmatpush1.bf16.msra.mxu0 %v12133_v25  ;;  %v12146_v58 = vcombine.high %v9780_v36, %v9784_v12  ;;  %v9771_v25 = vld [vmem:[#allocation10 + $0x1f50] sm:$0xff]  ;;  %v9732_v12 = vld [vmem:[#allocation10 + $0x1e18] sm:$0xff] }
 0x5ec   :  { %10135 = vmatprep.subr.bf16.mxu1 %v12124_v9  ;;  %10176 = vmatprep.subr.bf16.mxu0 %v12126_v14  ;;  %v9776_v9 = vld [vmem:[#allocation10 + $0x1f78] sm:$0xff]  ;;  %v9747_v52 = vld [vmem:[#allocation10 + $0x1e90] sm:$0xff] }
 0x5ed   :  { %v9751_v56 = vld [vmem:[#allocation10 + $0x1eb0] sm:$0xff] }
 0x5ee   :  { %v9739_v54 = vld [vmem:[#allocation10 + $0x1e50] sm:$0xff] }
 0x5ef   :  { %10136 = vmatpush1.bf16.msra.mxu1 %v12123_v48  ;;  %10177 = vmatpush1.bf16.msra.mxu0 %v12125_v6  ;;  %v9743_v62 = vld [vmem:[#allocation10 + $0x1e70] sm:$0xff] }
 0x5f0   :  { %10137 = vmatprep.subr.bf16.mxu1 %v12116_v32  ;;  %10178 = vmatprep.subr.bf16.mxu0 %v12118_v29  ;;  %v12136_v32 = vcombine.high %v9771_v25, %v9775_v63  ;;  %v12138_v29 = vcombine.high %v9772_v50, %v9776_v9  ;;  %v9731_v10 = vld [vmem:[#allocation10 + $0x1e10] sm:$0xff] }
 0x5f1   :  { %v9735_v36 = vld [vmem:[#allocation10 + $0x1e30] sm:$0xff] }
 0x5f3   :  { %10138 = vmatpush1.bf16.msra.mxu1 %v12115_v5  ;;  %10179 = vmatpush1.bf16.msra.mxu0 %v12117_v38 }
 0x5f4   :  { %10139 = vmatprep.subr.bf16.mxu1 %v12108_v18  ;;  %10180 = vmatprep.subr.bf16.mxu0 %v12110_v34  ;;  %v12135_v18 = vcombine.low %v9771_v25, %v9775_v63  ;;  %v12137_v34 = vcombine.low %v9772_v50, %v9776_v9  ;;  %v12095_v63 = vcombine.low %v9731_v10, %v9735_v36 }
 0x5f7   :  { %10140 = vmatpush1.bf16.msra.mxu1 %v12107_v16  ;;  %10181 = vmatpush1.bf16.msra.mxu0 %v12109_v61  ;;  %v9756_v16 = vld [vmem:[#allocation10 + $0x1ed8] sm:$0xff] }
 0x5f8   :  { %10141 = vmatprep.subr.bf16.mxu1 %v12100_v45  ;;  %10182 = vmatprep.subr.bf16.mxu0 %v12102_v11  ;;  %v9760_v61 = vld [vmem:[#allocation10 + $0x1ef8] sm:$0xff]  ;;  %v12120_v11 = vcombine.high %v9755_v55, %v9759_v2 }
 0x5f9   :  { %v12122_v17 = vcombine.high %v9756_v16, %v9760_v61 }
 0x5fb   :  { %10142 = vmatpush1.bf16.msra.mxu1 %v12099_v51  ;;  %10183 = vmatpush1.bf16.msra.mxu0 %v12101_v35  ;;  %v9752_v51 = vld [vmem:[#allocation10 + $0x1eb8] sm:$0xff]  ;;  %v12119_v35 = vcombine.low %v9755_v55, %v9759_v2  ;;  %v12392_v55 = vld [vmem:[#allocation13 + $0x20] sm:$0xff]  }
 0x5fc   :  { %10143 = vmatprep.subr.bf16.mxu1 %v12092_v47  ;;  %10184 = vmatprep.subr.bf16.mxu0 %v12094_v43  ;;  %v12121_v47 = vcombine.low %v9756_v16, %v9760_v61  ;;  %v12112_v43 = vcombine.high %v9747_v52, %v9751_v56  ;;  %v12114_v1 = vcombine.high %v9748_v33, %v9752_v51  ;;  %v12393_v2 = vld [vmem:[#allocation13 + $0xa0] sm:$0xff]   ;;  %v12394_v16 = vld [vmem:[#allocation13 + $0x58] sm:$0xff]  }
 0x5fd   :  { %v12395_v61 = vld [vmem:[#allocation13 + $0xd8] sm:$0xff]  }
 0x5ff   :  { %10144 = vmatpush1.bf16.msra.mxu1 %v12091_v22  ;;  %10185 = vmatpush1.bf16.msra.mxu0 %v12093_v31  ;;  %v9744_v22 = vld [vmem:[#allocation10 + $0x1e78] sm:$0xff]  ;;  %v12111_v31 = vcombine.low %v9747_v52, %v9751_v56 }
 0x600   :  { %10211 = vmatprep.subr.bf16.mxu1 %v12152_v0  ;;  %10252 = vmatprep.subr.bf16.mxu0 %v12154_v3  ;;  %v12113_v0 = vcombine.low %v9748_v33, %v9752_v51  ;;  %v12104_v3 = vcombine.high %v9739_v54, %v9743_v62  ;;  %v12106_v40 = vcombine.high %v9740_v28, %v9744_v22 }
 0x602   :  { %v8447_v14 = vpop.f32.mrf.mxu1  ;;  %v8488_v21 = vpop.f32.mrf.mxu0  ;;  %10162 = vmatmul.mubr.bf16.vlgmr.msra.gmra.mxu1 %v13758_v8  ;;  %10203 = vmatmul.mubr.bf16.vlgmr.msra.gmra.mxu0 %v13758_v8 }
 0x603   :  { %v13763_v24 = vadd.f32 %v8447_v14, %v13727_v23  ;;  %v13766_v7 = vadd.f32 %v8488_v21, %v13730_v30  ;;  %10212 = vmatpush1.bf16.msra.mxu1 %v12151_v53  ;;  %10253 = vmatpush1.bf16.msra.mxu0 %v12153_v49  ;;  %v9767_v23 = vld [vmem:[#allocation10 + $0x1f30] sm:$0xff]  ;;  %v9768_v30 = vld [vmem:[#allocation10 + $0x1f38] sm:$0xff]  ;;  %v12103_v49 = vcombine.low %v9739_v54, %v9743_v62 }
 0x604   :  { %v8449_v48 = vpop.f32.mrf.mxu1  ;;  %v8490_v6 = vpop.f32.mrf.mxu0  ;;  %10213 = vmatprep.subr.bf16.mxu1 %v12144_v19  ;;  %10254 = vmatprep.subr.bf16.mxu0 %v12146_v58  ;;  %v12127_v45 = vcombine.low %v9763_v44, %v9767_v23  ;;  %v9736_v53 = vld [vmem:[#allocation10 + $0x1e38] sm:$0xff]  ;;  %v12105_v19 = vcombine.low %v9740_v28, %v9744_v22  ;;  %v12096_v58 = vcombine.high %v9731_v10, %v9735_v36  ;;  %v12408_v10 = vld [vmem:[#allocation13] sm:$0xff]  }
 0x605   :  { %v13769_v20 = vadd.f32 %v8449_v48, %v13733_v37  ;;  %v13772_v59 = vadd.f32 %v8490_v6, %v13736_v27  ;;  %10243 = vmatprep.mubr.bf16.mxu1 %v12650_v42  ;;  %10284 = vmatprep.mubr.bf16.mxu0 %v12650_v42  ;;  %v12128_v37 = vcombine.high %v9763_v44, %v9767_v23  ;;  %v12398_v28 = vld [vmem:[#allocation13 + $0x50] sm:$0xff]   ;;  %v12409_v36 = vld [vmem:[#allocation13 + $0x80] sm:$0xff]  }
 0x606   :  { %v8451_v5 = vpop.f32.mrf.mxu1  ;;  %v8492_v38 = vpop.f32.mrf.mxu0  ;;  %v12130_v27 = vcombine.high %v9764_v26, %v9768_v30  ;;  %v12129_v42 = vcombine.low %v9764_v26, %v9768_v30  ;;  %v12098_v25 = vcombine.high %v9732_v12, %v9736_v53  ;;  %v12097_v50 = vcombine.low %v9732_v12, %v9736_v53  ;;  %v12378_v30 = vld [vmem:[#allocation13 + $0x78] sm:$0xff]   ;;  %v12399_v22 = vld [vmem:[#allocation13 + $0xd0] sm:$0xff]  }
 0x607   :  { %10214 = vmatpush1.bf16.msra.mxu1 %v12143_v57  ;;  %10255 = vmatpush1.bf16.msra.mxu0 %v12145_v13  ;;  %v12380_v5 = vld [vmem:[#allocation13 + $0x38] sm:$0xff]   ;;  %v12382_v38 = vld [vmem:[#allocation13 + $0x70] sm:$0xff]  }
 0x608   :  { %v8452_v4 = vpop.f32.mrf.mxu1  ;;  %v8493_v39 = vpop.f32.mrf.mxu0  ;;  %10215 = vmatprep.subr.bf16.mxu1 %v12136_v32  ;;  %10256 = vmatprep.subr.bf16.mxu0 %v12138_v29  ;;  %v12410_v12 = vld [vmem:[#allocation13 + $0x178] sm:$0xff]  }
 0x609   :  { %v12388_v4 = vld [vmem:[#allocation13 + $0x28] sm:$0xff]   ;;  %v12411_v53 = vld [vmem:[#allocation13 + $0x1f8] sm:$0xff]  }
 0x60a   :  { %v12389_v39 = vld [vmem:[#allocation13 + $0xa8] sm:$0xff]  }
 0x60b   :  { %10216 = vmatpush1.bf16.msra.mxu1 %v12135_v18  ;;  %10257 = vmatpush1.bf16.msra.mxu0 %v12137_v34  ;;  %v12383_v18 = vld [vmem:[#allocation13 + $0xf0] sm:$0xff]   ;;  %v12387_v34 = vld [vmem:[#allocation13 + $0xe8] sm:$0xff]  }
 0x60c   :  { %10217 = vmatprep.subr.bf16.mxu1 %v12128_v37  ;;  %10258 = vmatprep.subr.bf16.mxu0 %v12130_v27  ;;  %v12390_v37 = vld [vmem:[#allocation13 + $0x60] sm:$0xff]  }
 0x60d   :  { %v12391_v27 = vld [vmem:[#allocation13 + $0xe0] sm:$0xff]  }
 0x60f   :  { %10218 = vmatpush1.bf16.msra.mxu1 %v12127_v45  ;;  %10259 = vmatpush1.bf16.msra.mxu0 %v12129_v42  ;;  %v12396_v45 = vld [vmem:[#allocation13 + $0x18] sm:$0xff]  }
 0x610   :  { %10219 = vmatprep.subr.bf16.mxu1 %v12120_v11  ;;  %10260 = vmatprep.subr.bf16.mxu0 %v12122_v17  ;;  %v12397_v42 = vld [vmem:[#allocation13 + $0x98] sm:$0xff]  }
 0x613   :  { %10220 = vmatpush1.bf16.msra.mxu1 %v12119_v35  ;;  %10261 = vmatpush1.bf16.msra.mxu0 %v12121_v47 }
 0x614   :  { %10221 = vmatprep.subr.bf16.mxu1 %v12112_v43  ;;  %10262 = vmatprep.subr.bf16.mxu0 %v12114_v1 }
 0x617   :  { %10222 = vmatpush1.bf16.msra.mxu1 %v12111_v31  ;;  %10263 = vmatpush1.bf16.msra.mxu0 %v12113_v0  ;;  %v12400_v31 = vld [vmem:[#allocation13 + $0x10] sm:$0xff]  }
 0x618   :  { %10223 = vmatprep.subr.bf16.mxu1 %v12104_v3  ;;  %10264 = vmatprep.subr.bf16.mxu0 %v12106_v40  ;;  %v12401_v0 = vld [vmem:[#allocation13 + $0x90] sm:$0xff]   ;;  %v12404_v3 = vld [vmem:[#allocation13 + $0x8] sm:$0xff]   ;;  %v12407_v40 = vld [vmem:[#allocation13 + $0xc0] sm:$0xff]  }
 0x61b   :  { %10224 = vmatpush1.bf16.msra.mxu1 %v12103_v49  ;;  %10265 = vmatpush1.bf16.msra.mxu0 %v12105_v19 }
 0x61c   :  { %10225 = vmatprep.subr.bf16.mxu1 %v12096_v58  ;;  %10266 = vmatprep.subr.bf16.mxu0 %v12098_v25 }
 0x61f   :  { %10226 = vmatpush1.bf16.msra.mxu1 %v12095_v63  ;;  %10267 = vmatpush1.bf16.msra.mxu0 %v12097_v50 }
 0x620   :  { %12240 = vmatprep.subr.bf16.mxu1 %v12378_v30 }
 0x622   :  { %v8529_v9 = vpop.f32.mrf.mxu1  ;;  %v8570_v14 = vpop.f32.mrf.mxu0  ;;  %10244 = vmatmul.mubr.bf16.vlgmr.msra.gmra.mxu1 %v13758_v8  ;;  %10285 = vmatmul.mubr.bf16.vlgmr.msra.gmra.mxu0 %v13758_v8  ;;  %v12379_v8 = vld [vmem:[#allocation13 + $0xf8] sm:$0xff]  }
 0x623   :  { %v13779_v21 = vadd.f32 %v8529_v9, %v13743_v41  ;;  %v13782_v57 = vadd.f32 %v8570_v14, %v13746_v60  ;;  %v12381_v41 = vld [vmem:[#allocation13 + $0xb8] sm:$0xff]   ;;  %12262 = vmatprep.subr.bf16.mxu0 %v12379_v8  ;;  %12241 = vmatpush3.bf16.msra.mxu1 %v12380_v5  ;;  %v12384_v60 = vld [vmem:[#allocation13 + $0x30] sm:$0xff]  }
 0x624   :  { %v8531_v13 = vpop.f32.mrf.mxu1  ;;  %v8572_v48 = vpop.f32.mrf.mxu0  ;;  %12263 = vmatpush3.bf16.msra.mxu0 %v12381_v41  ;;  %12242 = vmatprep.subr.bf16.mxu1 %v12382_v38 }
 0x625   :  { %v13785_v6 = vadd.f32 %v8531_v13, %v13749_v15  ;;  %v13788_v32 = vadd.f32 %v8572_v48, %v13752_v46  ;;  %v12385_v15 = vld [vmem:[#allocation13 + $0xb0] sm:$0xff]   ;;  %12264 = vmatprep.subr.bf16.mxu0 %v12383_v18  ;;  %v12386_v46 = vld [vmem:[#allocation13 + $0x68] sm:$0xff]  }
 0x626   :  { %v8533_v29 = vpop.f32.mrf.mxu1  ;;  %v8574_v44 = vpop.f32.mrf.mxu0 }
 0x627   :  { %12243 = vmatpush3.bf16.msra.mxu1 %v12384_v60 }
 0x628   :  { %v8534_v23 = vpop.f32.mrf.mxu1  ;;  %v8575_v26 = vpop.f32.mrf.mxu0  ;;  %12265 = vmatpush3.bf16.msra.mxu0 %v12385_v15  ;;  %12244 = vmatprep.subr.bf16.mxu1 %v12386_v46 }
 0x629   :  { %12266 = vmatprep.subr.bf16.mxu0 %v12387_v34 }
 0x62b   :  { %12245 = vmatpush3.bf16.msra.mxu1 %v12388_v4 }
 0x62c   :  { %12267 = vmatpush3.bf16.msra.mxu0 %v12389_v39  ;;  %12246 = vmatprep.subr.bf16.mxu1 %v12390_v37 }
 0x62d   :  { %12268 = vmatprep.subr.bf16.mxu0 %v12391_v27 }
 0x62f   :  { %12247 = vmatpush3.bf16.msra.mxu1 %v12392_v55  ;;  %v10303_v55 = vlaneseq }
 0x630   :  { %12269 = vmatpush3.bf16.msra.mxu0 %v12393_v2  ;;  %12248 = vmatprep.subr.bf16.mxu1 %v12394_v16 }
 0x631   :  { %12270 = vmatprep.subr.bf16.mxu0 %v12395_v61  ;;  %v13814_v2 = vshrl.u32 %v10303_v55, 7 }
 0x633   :  { %12249 = vmatpush3.bf16.msra.mxu1 %v12396_v45  ;;  %v10305_v16 = vsub.s32 0, %v13814_v2  ;;  %v10313_v61 = vsub.s32 2, %v13814_v2  ;;  %v13818_v45 = vld [vmem:[#allocation11] sm:$0xff]  ;;  %v10329_v55 = vsub.s32 6, %v13814_v2 }
 0x634   :  { %12271 = vmatpush3.bf16.msra.mxu0 %v12397_v42  ;;  %12250 = vmatprep.subr.bf16.mxu1 %v12398_v28  ;;  %v10309_v42 = vsub.s32 1, %v13814_v2 }
 0x635   :  { %12272 = vmatprep.subr.bf16.mxu0 %v12399_v22 }
 0x637   :  { %12251 = vmatpush3.bf16.msra.mxu1 %v12400_v31 }
 0x638   :  { %12273 = vmatpush3.bf16.msra.mxu0 %v12401_v0 }
 0x642   :  { %v9019_v11 = vpop.f32.mrf.mxu1  ;;  %v9060_v17 = vpop.f32.mrf.mxu0 }
 0x643   :  { %v9149_v52 = vadd.f32 %v9019_v11, %v13763_v24  ;;  %v9151_v56 = vadd.f32 %v9060_v17, %v13766_v7  ;;  %v12402_v24 = vld [vmem:[#allocation13 + $0x48] sm:$0xff]   ;;  %v10317_v11 = vsub.s32 3, %v13814_v2  ;;  %v10306_v17 = vrot.slane %v13818_v45, %v10305_v16 }
 0x644   :  { %v9021_v33 = vpop.f32.mrf.mxu1  ;;  %v9062_v51 = vpop.f32.mrf.mxu0  ;;  %v12403_v7 = vld [vmem:[#allocation13 + $0xc8] sm:$0xff]   ;;  %12252 = vmatprep.subr.bf16.mxu1 %v12402_v24  ;;  %v10325_v16 = vsub.s32 5, %v13814_v2 }
 0x645   :  { %v13793_v35 = vadd.f32 %v9021_v33, %v13769_v20  ;;  %v13796_v47 = vadd.f32 %v9062_v51, %v13772_v59  ;;  %v12405_v20 = vld [vmem:[#allocation13 + $0x88] sm:$0xff]   ;;  %12274 = vmatprep.subr.bf16.mxu0 %v12403_v7  ;;  %v12406_v59 = vld [vmem:[#allocation13 + $0x40] sm:$0xff]   ;;  %12253 = vmatpush3.bf16.msra.mxu1 %v12404_v3  ;;  %v10310_v51 = vrot.slane %v13818_v45, %v10309_v42  ;;  %v12432_v42 = vld [vmem:[#allocation13 + $0x110] sm:$0xff]  }
 0x646   :  { %v9023_v43 = vpop.f32.mrf.mxu1  ;;  %v9064_v1 = vpop.f32.mrf.mxu0  ;;  %12275 = vmatpush3.bf16.msra.mxu0 %v12405_v20  ;;  %12254 = vmatprep.subr.bf16.mxu1 %v12406_v59 }
 0x647   :  { %12276 = vmatprep.subr.bf16.mxu0 %v12407_v40  ;;  %v10318_v43 = vrot.slane %v13818_v45, %v10317_v11  ;;  %v12433_v11 = vld [vmem:[#allocation13 + $0x190] sm:$0xff]  }
 0x648   :  { %v9024_v54 = vpop.f32.mrf.mxu1  ;;  %v9065_v62 = vpop.f32.mrf.mxu0 }
 0x649   :  { %12255 = vmatpush3.bf16.msra.mxu1 %v12408_v10 }
 0x64a   :  { %12277 = vmatpush3.bf16.msra.mxu0 %v12409_v36  ;;  %12284 = vmatprep.subr.bf16.mxu1 %v12410_v12 }
 0x64b   :  { %12306 = vmatprep.subr.bf16.mxu0 %v12411_v53 }
 0x662   :  { %v9101_v49 = vpop.f32.mrf.mxu1  ;;  %v9142_v19 = vpop.f32.mrf.mxu0 }
 0x663   :  { %v9153_v58 = vadd.f32 %v9101_v49, %v13779_v21  ;;  %v9155_v25 = vadd.f32 %v9142_v19, %v13782_v57 }
 0x664   :  { %v9103_v63 = vpop.f32.mrf.mxu1  ;;  %v9144_v50 = vpop.f32.mrf.mxu0 }
 0x665   :  { %v13801_v9 = vadd.f32 %v9103_v63, %v13785_v6  ;;  %v13804_v14 = vadd.f32 %v9144_v50, %v13788_v32  ;;  %v12413_v63 = vld [vmem:[#allocation13 + $0x1b8] sm:$0xff]  }
 0x666   :  { %v9105_v13 = vpop.f32.mrf.mxu1  ;;  %v9146_v48 = vpop.f32.mrf.mxu0 }
 0x667   :  { %v12414_v48 = vld [vmem:[#allocation13 + $0x170] sm:$0xff]  }
 0x668   :  { %v9106_v29 = vpop.f32.mrf.mxu1  ;;  %v9147_v44 = vpop.f32.mrf.mxu0 }
 0x669   :  { %v12415_v29 = vld [vmem:[#allocation13 + $0x1f0] sm:$0xff]  }
 0x66a   :  { %v12416_v44 = vld [vmem:[#allocation13 + $0x130] sm:$0xff]  }
 0x682   :  { %v9591_v23 = vpop.f32.mrf.mxu1  ;;  %v9632_v26 = vpop.f32.mrf.mxu0 }
 0x683   :  { %v9721_v30 = vadd.f32 %v9591_v23, %v9149_v52  ;;  %v9723_v8 = vadd.f32 %v9632_v26, %v9151_v56  ;;  %v10314_v52 = vrot.slane %v13818_v45, %v10313_v61  ;;  %v12417_v23 = vld [vmem:[#allocation13 + $0x1b0] sm:$0xff]   ;;  %v12418_v26 = vld [vmem:[#allocation13 + $0x168] sm:$0xff]   ;;  %v10333_v61 = vsub.s32 7, %v13814_v2 }
 0x684   :  { %v9593_v5 = vpop.f32.mrf.mxu1  ;;  %v9634_v21 = vpop.f32.mrf.mxu0 }
 0x685   :  { %v9722_v1 = vadd.f32 %v9593_v5, %v13793_v35  ;;  %v9724_v54 = vadd.f32 %v9634_v21, %v13796_v47  ;;  %v12421_v5 = vld [vmem:[#allocation13 + $0x1a8] sm:$0xff]   ;;  %v12422_v21 = vld [vmem:[#allocation13 + $0x160] sm:$0xff]  }
 0x686   :  { %v9595_v41 = vpop.f32.mrf.mxu1  ;;  %v9636_v57 = vpop.f32.mrf.mxu0 }
 0x687   :  { %v12423_v41 = vld [vmem:[#allocation13 + $0x1e0] sm:$0xff]  }
 0x688   :  { %v9596_v38 = vpop.f32.mrf.mxu1  ;;  %v9637_v18 = vpop.f32.mrf.mxu0  ;;  %v12424_v57 = vld [vmem:[#allocation13 + $0x120] sm:$0xff]  }
 0x689   :  { %v12425_v38 = vld [vmem:[#allocation13 + $0x1a0] sm:$0xff]   ;;  %v12426_v18 = vld [vmem:[#allocation13 + $0x158] sm:$0xff]  }
 0x6a2   :  { %v9673_v60 = vpop.f32.mrf.mxu1  ;;  %v9714_v6 = vpop.f32.mrf.mxu0 }
 0x6a3   :  { %v13806_v15 = vadd.f32 %v9673_v60, %v9153_v58  ;;  %v13808_v32 = vadd.f32 %v9714_v6, %v9155_v25  ;;  %v12412_v25 = vld [vmem:[#allocation13 + $0x138] sm:$0xff]  }
 0x6a4   :  { %v13810_v46 = vpop.f32.mrf.mxu1  ;;  %v13812_v34 = vpop.f32.mrf.mxu0  ;;  %v12427_v60 = vld [vmem:[#allocation13 + $0x1d8] sm:$0xff]  }
 0x6a5   :  { %v12428_v6 = vld [vmem:[#allocation13 + $0x118] sm:$0xff]  }
 0x6a6   :  { %v9677_v4 = vpop.f32.mrf.mxu1  ;;  %v9718_v39 = vpop.f32.mrf.mxu0 }
 0x6a7   :  { %v12429_v4 = vld [vmem:[#allocation13 + $0x198] sm:$0xff]   ;;  %v12430_v39 = vld [vmem:[#allocation13 + $0x150] sm:$0xff]  }
 0x6a8   :  { %v9678_v37 = vpop.f32.mrf.mxu1  ;;  %v9719_v27 = vpop.f32.mrf.mxu0 }
 0x6a9   :  { %v12431_v37 = vld [vmem:[#allocation13 + $0x1d0] sm:$0xff]   ;;  %v10321_v27 = vsub.s32 4, %v13814_v2  ;;  %v10334_v2 = vrot.slane %v13818_v45, %v10333_v61 }
 0x6c2   :  { %v10163_v56 = vpop.f32.mrf.mxu1  ;;  %v10204_v33 = vpop.f32.mrf.mxu0 }
 0x6c3   :  { %v10293_v62 = vadd.f32 %v10163_v56, %v9721_v30  ;;  %v10295_v28 = vadd.f32 %v10204_v33, %v9723_v8  ;;  %v12419_v30 = vld [vmem:[#allocation13 + $0x1e8] sm:$0xff]   ;;  %v10322_v56 = vrot.slane %v13818_v45, %v10321_v27  ;;  %v10330_v33 = vrot.slane %v13818_v45, %v10329_v55 }
 0x6c4   :  { %v10165_v22 = vpop.f32.mrf.mxu1  ;;  %v10206_v31 = vpop.f32.mrf.mxu0  ;;  %v12420_v8 = vld [vmem:[#allocation13 + $0x128] sm:$0xff]  }
 0x6c5   :  { %v10343_v0 = vadd.f32 %v10306_v17, %v10293_v62  ;;  %v10345_v24 = vadd.f32 %v10314_v52, %v10295_v28  ;;  %v10294_v7 = vadd.f32 %v10165_v22, %v9722_v1  ;;  %v10296_v3 = vadd.f32 %v10206_v31, %v9724_v54  ;;  %v12434_v17 = vld [vmem:[#allocation13 + $0x148] sm:$0xff]  }
 0x6c6   :  { %v10167_v20 = vpop.f32.mrf.mxu1  ;;  %v10208_v59 = vpop.f32.mrf.mxu0  ;;  %v12435_v52 = vld [vmem:[#allocation13 + $0x1c8] sm:$0xff]   ;;  %v10326_v54 = vrot.slane %v13818_v45, %v10325_v16  ;;  %v9728_v62 = vadd.f32 %v13812_v34, %v13804_v14 }
 0x6c7   :  { %v10344_v40 = vadd.f32 %v10310_v51, %v10294_v7  ;;  %v10346_v10 = vadd.f32 %v10318_v43, %v10296_v3  ;;  %v10351_v36 = vmax.f32 %v10343_v0, 0.0  ;;  %v10353_v12 = vmax.f32 %v10345_v24, 0.0  ;;  %v12436_v31 = vld [vmem:[#allocation13 + $0x108] sm:$0xff]  }
 0x6c8   :  { %v10168_v53 = vpop.f32.mrf.mxu1  ;;  %v10209_v49 = vpop.f32.mrf.mxu0  ;;  %v9726_v51 = vadd.f32 %v13810_v46, %v13801_v9  ;;  %v12437_v0 = vld [vmem:[#allocation13 + $0x188] sm:$0xff]   ;;  %v12438_v9 = vld [vmem:[#allocation13 + $0x140] sm:$0xff]  }
 0x6c9   :  { %v10352_v19 = vmax.f32 %v10344_v40, 0.0  ;;  %v10354_v35 = vmax.f32 %v10346_v10, 0.0  ;;  %v10359_v50 = vpack.c.bf16 %v10351_v36, %v10351_v36  ;;  %v10361_v13 = vpack.c.bf16 %v10353_v12, %v10353_v12  ;;  %v12439_v46 = vld [vmem:[#allocation13 + $0x1c0] sm:$0xff]  }
 0x6ca   :  { %v12441_v10 = vld [vmem:[#allocation13 + $0x180] sm:$0xff]  }
 0x6cb   :  { %v10360_v58 = vpack.c.bf16 %v10352_v19, %v10352_v19  ;;  %v10362_v47 = vpack.c.bf16 %v10354_v35, %v10354_v35 }
 0x6cd   :  { %10918 = vmatprep.mubr.bf16.mxu1 %v10360_v58  ;;  %10958 = vmatprep.mubr.bf16.mxu0 %v10362_v47 }
 0x6ce   :  { %10919 = vmatmul.mubr.bf16.vlgmr.msra.gmra.mxu1 %v10359_v50  ;;  %10959 = vmatmul.mubr.bf16.vlgmr.msra.gmra.mxu0 %v10361_v13 }
 0x6cf   :  { %12285 = vmatpush3.bf16.msra.mxu1 %v12412_v25  ;;  %12307 = vmatpush3.bf16.msra.mxu0 %v12413_v63 }
 0x6d0   :  { %12286 = vmatprep.subr.bf16.mxu1 %v12414_v48  ;;  %12308 = vmatprep.subr.bf16.mxu0 %v12415_v29 }
 0x6d3   :  { %12287 = vmatpush3.bf16.msra.mxu1 %v12416_v44  ;;  %12309 = vmatpush3.bf16.msra.mxu0 %v12417_v23 }
 0x6d4   :  { %12288 = vmatprep.subr.bf16.mxu1 %v12418_v26  ;;  %12310 = vmatprep.subr.bf16.mxu0 %v12419_v30 }
 0x6d7   :  { %12289 = vmatpush3.bf16.msra.mxu1 %v12420_v8  ;;  %12311 = vmatpush3.bf16.msra.mxu0 %v12421_v5  ;;  %v12155_v5 = vld [vmem:[#allocation14] ss:$0 sm:$0xff] }
 0x6d8   :  { %12290 = vmatprep.subr.bf16.mxu1 %v12422_v21  ;;  %12312 = vmatprep.subr.bf16.mxu0 %v12423_v41 }
 0x6db   :  { %12291 = vmatpush3.bf16.msra.mxu1 %v12424_v57  ;;  %12313 = vmatpush3.bf16.msra.mxu0 %v12425_v38 }
 0x6dc   :  { %12292 = vmatprep.subr.bf16.mxu1 %v12426_v18  ;;  %12314 = vmatprep.subr.bf16.mxu0 %v12427_v60 }
 0x6df   :  { %12293 = vmatpush3.bf16.msra.mxu1 %v12428_v6  ;;  %12315 = vmatpush3.bf16.msra.mxu0 %v12429_v4 }
 0x6e0   :  { %12294 = vmatprep.subr.bf16.mxu1 %v12430_v39  ;;  %12316 = vmatprep.subr.bf16.mxu0 %v12431_v37 }
 0x6e2   :  { %v10245_v43 = vpop.f32.mrf.mxu1  ;;  %v10286_v1 = vpop.f32.mrf.mxu0 }
 0x6e3   :  { %v10297_v28 = vadd.f32 %v10245_v43, %v13806_v15  ;;  %v10299_v22 = vadd.f32 %v10286_v1, %v13808_v32  ;;  %12295 = vmatpush3.bf16.msra.mxu1 %v12432_v42  ;;  %12317 = vmatpush3.bf16.msra.mxu0 %v12433_v11  ;;  %v12440_v32 = vld [vmem:[#allocation13 + $0x100] sm:$0xff]  }
 0x6e4   :  { %v10247_v24 = vpop.f32.mrf.mxu1  ;;  %v10288_v7 = vpop.f32.mrf.mxu0  ;;  %12296 = vmatprep.subr.bf16.mxu1 %v12434_v17  ;;  %12318 = vmatprep.subr.bf16.mxu0 %v12435_v52 }
 0x6e5   :  { %v10347_v3 = vadd.f32 %v10322_v56, %v10297_v28  ;;  %v10349_v20 = vadd.f32 %v10330_v33, %v10299_v22  ;;  %v10298_v45 = vadd.f32 %v10247_v24, %v9726_v51  ;;  %v10300_v59 = vadd.f32 %v10288_v7, %v9728_v62 }
 0x6e6   :  { %v10249_v40 = vpop.f32.mrf.mxu1  ;;  %v10290_v14 = vpop.f32.mrf.mxu0 }
 0x6e7   :  { %v10348_v34 = vadd.f32 %v10326_v54, %v10298_v45  ;;  %v10350_v15 = vadd.f32 %v10334_v2, %v10300_v59  ;;  %12297 = vmatpush3.bf16.msra.mxu1 %v12436_v31  ;;  %12319 = vmatpush3.bf16.msra.mxu0 %v12437_v0  ;;  %v10355_v36 = vmax.f32 %v10347_v3, 0.0  ;;  %v10357_v12 = vmax.f32 %v10349_v20, 0.0 }
 0x6e8   :  { %v10250_v53 = vpop.f32.mrf.mxu1  ;;  %v10291_v49 = vpop.f32.mrf.mxu0  ;;  %12298 = vmatprep.subr.bf16.mxu1 %v12438_v9  ;;  %12320 = vmatprep.subr.bf16.mxu0 %v12439_v46 }
 0x6e9   :  { %v10356_v19 = vmax.f32 %v10348_v34, 0.0  ;;  %v10358_v35 = vmax.f32 %v10350_v15, 0.0  ;;  %v10363_v25 = vpack.c.bf16 %v10355_v36, %v10355_v36  ;;  %v10365_v63 = vpack.c.bf16 %v10357_v12, %v10357_v12 }
 0x6eb   :  { %v10364_v58 = vpack.c.bf16 %v10356_v19, %v10356_v19  ;;  %v10366_v47 = vpack.c.bf16 %v10358_v35, %v10358_v35  ;;  %12299 = vmatpush3.bf16.msra.mxu1 %v12440_v32  ;;  %12321 = vmatpush3.bf16.msra.mxu0 %v12441_v10 }
 0x6ed   :  { %10998 = vmatprep.mubr.bf16.mxu1 %v10364_v58  ;;  %11038 = vmatprep.mubr.bf16.mxu0 %v10366_v47 }
 0x6ee   :  { %10999 = vmatmul.mubr.bf16.vlgmr.msra.gmra.mxu1 %v10363_v25  ;;  %11039 = vmatmul.mubr.bf16.vlgmr.msra.gmra.mxu0 %v10365_v63 }
 0x78e   :  { %v12256_v50 = vpop.f32.mrf.mxu1  ;;  %v12278_v13 = vpop.f32.mrf.mxu0 }
 0x790   :  { %v12257_v48 = vpop.f32.mrf.mxu1  ;;  %v12279_v29 = vpop.f32.mrf.mxu0 }
 0x791   :  { %v12258_v8 = vadd.f32 %v12257_v48, %v12256_v50  ;;  %v12280_v38 = vadd.f32 %v12279_v29, %v12278_v13 }
 0x792   :  { %v12259_v44 = vpop.f32.mrf.mxu1  ;;  %v12281_v23 = vpop.f32.mrf.mxu0 }
 0x793   :  { %v10921_v21 = vadd.f32 %v12258_v8, %v12155_v5 }
 0x794   :  { %v12260_v26 = vpop.f32.mrf.mxu1  ;;  %v12282_v30 = vpop.f32.mrf.mxu0 }
 0x795   :  { %v10961_v6 = vadd.f32 %v12280_v38, %v10921_v21 }
 0x7ae   :  { %v12300_v41 = vpop.f32.mrf.mxu1  ;;  %v12322_v57 = vpop.f32.mrf.mxu0 }
 0x7b0   :  { %v12301_v18 = vpop.f32.mrf.mxu1  ;;  %v12323_v60 = vpop.f32.mrf.mxu0 }
 0x7b1   :  { %v12302_v4 = vadd.f32 %v12301_v18, %v12300_v41  ;;  %v12324_v55 = vadd.f32 %v12323_v60, %v12322_v57 }
 0x7b2   :  { %v12303_v39 = vpop.f32.mrf.mxu1  ;;  %v12325_v37 = vpop.f32.mrf.mxu0 }
 0x7b3   :  { %v11001_v27 = vadd.f32 %v12302_v4, %v10961_v6 }
 0x7b4   :  { %v12304_v16 = vpop.f32.mrf.mxu1  ;;  %v12326_v61 = vpop.f32.mrf.mxu0 }
 0x7b5   :  { %v11041_v42 = vadd.f32 %v12324_v55, %v11001_v27 }
 0x7b7   :  { %11046 = vst [vmem:[#allocation16] sm:$0xff] %v11041_v42 }
 0x7b8   :  { %12613 = shalt.err (!%p12610_p2)
}
 0x7b9   :  { %11056 = dma.vmem_to_hbm [thread:$0]  %s11054_s7, 128, %s13853_s8, [#allocation4]  }
 0x7ba   :  { %12632 = dma.done.wait [#allocation4], 128  }
 0x7bb   :  { %12633 = vsyncadd [#allocation4], 4294967168 }
 0x7bc   :  { %11060 = vsyncpa [#allocation3], 1 }
 0x7bd   :  { %11061 = vsyncpa [#allocation6], 1 }
 0x7be   :  { %11062 = vsyncpa [#allocation9], 1 }
 0x7bf   :  { %11063 = vsyncpa [#allocation12], 1 }
 0x7c0   :  { %11064 = vsyncpa [#allocation15], 1 }
 0x7c1   :  { %11065 = vsyncpa [#allocation4], 1 }

</bundles_post_ra>
